<compile_context>
chip_gen: v6e
topology: v6e:2x2x1
jax: 0.10.0
libtpu: 0.0.40
codegen_flags: <defaults>
</compile_context>

<pallas_src>
import functools

import jax
import jax.numpy as jnp
from jax.experimental import pallas as pl
from jax.experimental.pallas import tpu as pltpu


def _graph_directed_kernel(e1_ref, nv2_ref, w1_ref, b1_ref, o_ref, *, alpha, k):
    f32 = jnp.float32

    # nodevec1 for this row tile: (tm,dim)@(dim,dim) on the MXU with f32
    # accumulation, bias add on the VPU, tanh on the EUP.
    h1 = jnp.tanh(alpha * (jnp.dot(e1_ref[...], w1_ref[...],
                                   preferred_element_type=f32) + b1_ref[...]))

    # a[i, j] = <h1_i, nv2_j>: contract the feature dim; rows of this tile on
    # sublanes, all n_pad nodes on the lane axis (lane-dense output tile).
    a = jax.lax.dot_general(h1, nv2_ref[...], (((1,), (1,)), ((), ())),
                            preferred_element_type=f32)
    adj = jnp.maximum(jnp.tanh(alpha * a), 0.0)          # relu(tanh(alpha*a)) >= 0

    # Row-wise top-k: k argmax-and-exclude passes (ties -> lowest column index).
    # Selected entries are exactly those driven to -inf in `work`; no extra mask.
    n_pad = adj.shape[1]
    col = jax.lax.broadcasted_iota(jnp.int32, adj.shape, 1)
    neg_inf = jnp.float32(-jnp.inf)

    def body(_, work):
        cur = jnp.max(work, axis=1, keepdims=True)                      # XLU reduce
        sel = jnp.min(jnp.where(work == cur, col, n_pad),
                      axis=1, keepdims=True)                            # XLU reduce
        return jnp.where(col == sel, neg_inf, work)

    work = jax.lax.fori_loop(0, k, body, adj, unroll=True)
    o_ref[...] = jnp.where(jnp.isneginf(work), adj, 0.0)


def graph_directed(idx, emb1, emb2, w1, b1, w2, b2, *, k, alpha=3.0, tm=None):
    """Pallas forward of MTGNN GraphDirected (static_feat=None path).

    idx         : (n,)   int node ids
    emb1, emb2  : (nnodes, dim) embedding tables
    w1, w2      : (dim, dim)   torch nn.Linear weights (out, in)
    b1, b2      : (dim,)       biases
    Returns the (n, n) top-k-sparsified adjacency.
    """
    n = int(idx.shape[0])
    dim = int(emb1.shape[1])
    alpha = float(alpha)
    k = int(k)

    # Embedding gathers stay at the XLA level (per-row DMAs inside the kernel
    # would be descriptor-bound); keep this whole wrapper under one jit.
    e1 = jnp.take(jnp.asarray(emb1, jnp.float32), idx, axis=0)
    e2 = jnp.take(jnp.asarray(emb2, jnp.float32), idx, axis=0)

    # nn.Linear computes x @ W.T + b -> pre-transpose once in the wrapper.
    w1t = jnp.asarray(w1, jnp.float32).T
    b1r = jnp.asarray(b1, jnp.float32).reshape(1, dim)

    # nv2 hoisted: computed exactly once here, resident in VMEM across grid steps.
    hp = jax.lax.Precision.HIGHEST
    nv2 = jnp.tanh(alpha * (jnp.dot(e2, jnp.asarray(w2, jnp.float32).T, precision=hp)
                            + jnp.asarray(b2, jnp.float32)))

    # Pad n to a multiple of 128 for lane-dense (unmasked) output stores.
    # Padded nv2 rows are zero -> padded adjacency columns are exactly 0 and can
    # never displace a real positive entry from the top-k.
    n_pad = max(128, ((n + 127) // 128) * 128)
    if n_pad != n:
        nv2 = jnp.pad(nv2, ((0, n_pad - n), (0, 0)))
        e1 = jnp.pad(e1, ((0, n_pad - n), (0, 0)))

    # Tile selection: small-n fast path (single grid step); otherwise tm=128 keeps
    # the live set (double-buffered out tile + ~5 (tm,n_pad) f32 temporaries in the
    # top-k loop) well under v7x's 64 MiB VMEM even at production node counts.
    if tm is None:
        tm = n_pad if n_pad <= 256 else 128
    tm = min(int(tm), n_pad)
    if tm % 8 != 0 or n_pad % tm != 0:
        raise ValueError(f"row tile {tm} incompatible with padded n={n_pad}")

    # Explicit VMEM budget (inputs double-buffered + top-k temporaries), capped
    # below the v7x physical limit.
    vmem_bytes = 4 * (2 * tm * dim + 2 * n_pad * dim + 2 * dim * dim + 2 * dim
                      + 2 * tm * n_pad          # double-buffered out tile
                      + 6 * tm * n_pad)         # adj/work/col/temporaries
    vmem_limit = int(min(max(2 * vmem_bytes, 16 << 20), 60 << 20))

    kernel = functools.partial(_graph_directed_kernel, alpha=alpha, k=k)

    # nv2 is computed outside the kernel now, so only h1 + the outer matmul count.
    cost = pl.CostEstimate(
        flops=int(2 * n_pad * dim * dim + 2 * n_pad * n_pad * dim),
        transcendentals=int(n_pad * dim + n_pad * n_pad),
        bytes_accessed=int(4 * (2 * n_pad * dim + dim * dim + dim
                                + n_pad * n_pad)),
    )

    out = pl.pallas_call(
        kernel,
        out_shape=jax.ShapeDtypeStruct((n_pad, n_pad), jnp.float32),
        grid_spec=pltpu.PrefetchScalarGridSpec(
            num_scalar_prefetch=0,
            grid=(n_pad // tm,),
            in_specs=[
                pl.BlockSpec((tm, dim), lambda i: (i, 0)),     # e1: row tile
                pl.BlockSpec((n_pad, dim), lambda i: (0, 0)),  # nv2: resident
                pl.BlockSpec((dim, dim), lambda i: (0, 0)),    # W1^T: resident
                pl.BlockSpec((1, dim), lambda i: (0, 0)),      # b1: resident
            ],
            out_specs=pl.BlockSpec((tm, n_pad), lambda i: (i, 0)),
        ),
        compiler_params=pltpu.CompilerParams(
            dimension_semantics=("parallel",),
            vmem_limit_bytes=vmem_limit),
        cost_estimate=cost,
    )(e1, nv2, w1t, b1r)

    return out[:n, :n]


if __name__ == "__main__":
    key = jax.random.PRNGKey(0)
    nnodes, n_id, dim, k, alpha = 160, 128, 32, 16, 3.0

    ks = jax.random.split(key, 7)
    emb1 = 0.5 * jax.random.normal(ks[0], (nnodes, dim), jnp.float32)
    emb2 = 0.5 * jax.random.normal(ks[1], (nnodes, dim), jnp.float32)
    w1 = 0.1 * jax.random.normal(ks[2], (dim, dim), jnp.float32)
    w2 = 0.1 * jax.random.normal(ks[3], (dim, dim), jnp.float32)
    b1 = 0.1 * jax.random.normal(ks[4], (dim,), jnp.float32)
    b2 = 0.1 * jax.random.normal(ks[5], (dim,), jnp.float32)
    idx = jax.random.permutation(ks[6], nnodes)[:n_id].astype(jnp.int32)

    fwd = jax.jit(functools.partial(graph_directed, k=k, alpha=alpha))
    out = jax.block_until_ready(fwd(idx, emb1, emb2, w1, b1, w2, b2))

    # ---- pure-JAX reference with torch semantics ----
    hp = jax.lax.Precision.HIGHEST
    e1 = emb1[idx]
    e2 = emb2[idx]
    nv1 = jnp.tanh(alpha * (jnp.dot(e1, w1.T, precision=hp) + b1))
    nv2 = jnp.tanh(alpha * (jnp.dot(e2, w2.T, precision=hp) + b2))
    adj = jax.nn.relu(jnp.tanh(alpha * jnp.dot(nv1, nv2.T, precision=hp)))
    s1, t1 = jax.lax.top_k(adj, k)
    mask = jnp.zeros_like(adj).at[jnp.arange(n_id)[:, None], t1].set(1.0)
    ref = adj * mask

    assert out.shape == ref.shape == (n_id, n_id), (out.shape, ref.shape)

    # Tie/rounding-robust comparison: entries clearly above (below) each row's
    # k-th largest value must equal adj (be zero); a narrow band around the
    # threshold may legitimately flip between 0 and adj because the two
    # adjacency computations differ by f32 rounding.
    tol, band = 2e-3, 5e-3
    thr = s1[:, -1:]
    kept = adj > thr + band
    dropped = adj < thr - band
    amb = ~(kept | dropped)
    assert bool(jnp.all(jnp.where(kept, jnp.abs(out - adj) <= tol, True)))
    assert bool(jnp.all(jnp.where(dropped, jnp.abs(out) <= tol, True)))
    assert bool(jnp.all(jnp.where(
        amb, (jnp.abs(out - adj) <= tol) | (jnp.abs(out) <= tol), True)))
    # each row keeps at most k clearly-nonzero entries, and something is kept
    assert bool(jnp.all(jnp.sum(out > tol, axis=1) <= k))
    assert bool(jnp.sum(out > tol) > 0)
    print("KERNEL_OK")
</pallas_src>

<mosaic_0001>
module attributes {stable_mosaic.version = 11 : i64} {
  func.func @_graph_directed_kernel(%arg0: i32, %arg1: memref<128x32xf32, #tpu.memory_space<vmem>>, %arg2: memref<128x32xf32, #tpu.memory_space<vmem>>, %arg3: memref<32x32xf32, #tpu.memory_space<vmem>>, %arg4: memref<1x32xf32, #tpu.memory_space<vmem>>, %arg5: memref<128x128xf32, #tpu.memory_space<vmem>>) attributes {dimension_semantics = [#tpu.dimension_semantics<parallel>], iteration_bounds = array<i64: 1>, scalar_prefetch = 0 : i64, scratch_operands = 0 : i64, tpu.core_type = #tpu.core_type<tc>, window_params = [{transform_indices = @transform_0, window_bounds = array<i64: 128, 32>}, {pipeline_mode = #tpu.pipeline_mode<synchronous>, transform_indices = @transform_1, window_bounds = array<i64: 128, 32>}, {pipeline_mode = #tpu.pipeline_mode<synchronous>, transform_indices = @transform_2, window_bounds = array<i64: 32, 32>}, {pipeline_mode = #tpu.pipeline_mode<synchronous>, transform_indices = @transform_3, window_bounds = array<i64: 1, 32>}, {transform_indices = @transform_4, window_bounds = array<i64: 128, 128>}]} {
    %c0 = arith.constant 0 : index
    %c0_0 = arith.constant 0 : index
    %0 = vector.load %arg1[%c0, %c0_0] : memref<128x32xf32, #tpu.memory_space<vmem>>, vector<128x32xf32>
    %c0_1 = arith.constant 0 : index
    %c0_2 = arith.constant 0 : index
    %1 = vector.load %arg3[%c0_1, %c0_2] : memref<32x32xf32, #tpu.memory_space<vmem>>, vector<32x32xf32>
    %cst = arith.constant dense<0.000000e+00> : vector<128x32xf32>
    %2 = tpu.matmul %0, %1, %cst {dimension_numbers = #tpu.dot_dimension_numbers<[1], [0], [0], [1], [0, 0, 1, 1], [], []>} : vector<128x32xf32>, vector<32x32xf32>, vector<128x32xf32> -> vector<128x32xf32>
    %c0_3 = arith.constant 0 : index
    %c0_4 = arith.constant 0 : index
    %3 = vector.load %arg4[%c0_3, %c0_4] : memref<1x32xf32, #tpu.memory_space<vmem>>, vector<1x32xf32>
    %4 = vector.broadcast %3 : vector<1x32xf32> to vector<128x32xf32>
    %5 = arith.addf %2, %4 : vector<128x32xf32>
    %cst_5 = arith.constant 3.000000e+00 : f32
    %6 = vector.broadcast %cst_5 : f32 to vector<128x32xf32>
    %7 = arith.mulf %6, %5 : vector<128x32xf32>
    %8 = math.tanh %7 : vector<128x32xf32>
    %c0_6 = arith.constant 0 : index
    %c0_7 = arith.constant 0 : index
    %9 = vector.load %arg2[%c0_6, %c0_7] : memref<128x32xf32, #tpu.memory_space<vmem>>, vector<128x32xf32>
    %cst_8 = arith.constant dense<0.000000e+00> : vector<128x128xf32>
    %10 = tpu.matmul %8, %9, %cst_8 {dimension_numbers = #tpu.dot_dimension_numbers<[1], [1], [0], [0], [0, 0, 1, 0], [], []>} : vector<128x32xf32>, vector<128x32xf32>, vector<128x128xf32> -> vector<128x128xf32>
    %cst_9 = arith.constant 3.000000e+00 : f32
    %11 = vector.broadcast %cst_9 : f32 to vector<128x128xf32>
    %12 = arith.mulf %11, %10 : vector<128x128xf32>
    %13 = math.tanh %12 : vector<128x128xf32>
    %cst_10 = arith.constant 0.000000e+00 : f32
    %14 = vector.broadcast %cst_10 : f32 to vector<128x128xf32>
    %15 = arith.maximumf %13, %14 : vector<128x128xf32>
    %16 = tpu.iota {dimensions = array<i32: 1>} : vector<128x128xi32>
    %cst_11 = arith.constant 0xFF800000 : f32
    %c0_i32 = arith.constant 0 : i32
    %cst_12 = arith.constant dense<0xFF800000> : vector<128xf32>
    %17 = vector.multi_reduction <maximumf>, %15, %cst_12 [1] : vector<128x128xf32> to vector<128xf32>
    %18 = vector.shape_cast %17 : vector<128xf32> to vector<128x1xf32>
    %19 = vector.broadcast %18 : vector<128x1xf32> to vector<128x128xf32>
    %20 = arith.cmpf oeq, %15, %19 : vector<128x128xf32>
    %c128_i32 = arith.constant 128 : i32
    %21 = vector.broadcast %c128_i32 : i32 to vector<128x128xi32>
    %22 = arith.select %20, %16, %21 : vector<128x128xi1>, vector<128x128xi32>
    %cst_13 = arith.constant dense<2147483647> : vector<128xi32>
    %23 = vector.multi_reduction <minsi>, %22, %cst_13 [1] : vector<128x128xi32> to vector<128xi32>
    %24 = vector.shape_cast %23 : vector<128xi32> to vector<128x1xi32>
    %25 = vector.broadcast %24 : vector<128x1xi32> to vector<128x128xi32>
    %26 = arith.cmpi eq, %16, %25 : vector<128x128xi32>
    %27 = vector.broadcast %cst_11 : f32 to vector<128x128xf32>
    %28 = arith.select %26, %27, %15 : vector<128x128xi1>, vector<128x128xf32>
    %c1_i32 = arith.constant 1 : i32
    %cst_14 = arith.constant dense<0xFF800000> : vector<128xf32>
    %29 = vector.multi_reduction <maximumf>, %28, %cst_14 [1] : vector<128x128xf32> to vector<128xf32>
    %30 = vector.shape_cast %29 : vector<128xf32> to vector<128x1xf32>
    %31 = vector.broadcast %30 : vector<128x1xf32> to vector<128x128xf32>
    %32 = arith.cmpf oeq, %28, %31 : vector<128x128xf32>
    %c128_i32_15 = arith.constant 128 : i32
    %33 = vector.broadcast %c128_i32_15 : i32 to vector<128x128xi32>
    %34 = arith.select %32, %16, %33 : vector<128x128xi1>, vector<128x128xi32>
    %cst_16 = arith.constant dense<2147483647> : vector<128xi32>
    %35 = vector.multi_reduction <minsi>, %34, %cst_16 [1] : vector<128x128xi32> to vector<128xi32>
    %36 = vector.shape_cast %35 : vector<128xi32> to vector<128x1xi32>
    %37 = vector.broadcast %36 : vector<128x1xi32> to vector<128x128xi32>
    %38 = arith.cmpi eq, %16, %37 : vector<128x128xi32>
    %39 = vector.broadcast %cst_11 : f32 to vector<128x128xf32>
    %40 = arith.select %38, %39, %28 : vector<128x128xi1>, vector<128x128xf32>
    %c2_i32 = arith.constant 2 : i32
    %cst_17 = arith.constant dense<0xFF800000> : vector<128xf32>
    %41 = vector.multi_reduction <maximumf>, %40, %cst_17 [1] : vector<128x128xf32> to vector<128xf32>
    %42 = vector.shape_cast %41 : vector<128xf32> to vector<128x1xf32>
    %43 = vector.broadcast %42 : vector<128x1xf32> to vector<128x128xf32>
    %44 = arith.cmpf oeq, %40, %43 : vector<128x128xf32>
    %c128_i32_18 = arith.constant 128 : i32
    %45 = vector.broadcast %c128_i32_18 : i32 to vector<128x128xi32>
    %46 = arith.select %44, %16, %45 : vector<128x128xi1>, vector<128x128xi32>
    %cst_19 = arith.constant dense<2147483647> : vector<128xi32>
    %47 = vector.multi_reduction <minsi>, %46, %cst_19 [1] : vector<128x128xi32> to vector<128xi32>
    %48 = vector.shape_cast %47 : vector<128xi32> to vector<128x1xi32>
    %49 = vector.broadcast %48 : vector<128x1xi32> to vector<128x128xi32>
    %50 = arith.cmpi eq, %16, %49 : vector<128x128xi32>
    %51 = vector.broadcast %cst_11 : f32 to vector<128x128xf32>
    %52 = arith.select %50, %51, %40 : vector<128x128xi1>, vector<128x128xf32>
    %c3_i32 = arith.constant 3 : i32
    %cst_20 = arith.constant dense<0xFF800000> : vector<128xf32>
    %53 = vector.multi_reduction <maximumf>, %52, %cst_20 [1] : vector<128x128xf32> to vector<128xf32>
    %54 = vector.shape_cast %53 : vector<128xf32> to vector<128x1xf32>
    %55 = vector.broadcast %54 : vector<128x1xf32> to vector<128x128xf32>
    %56 = arith.cmpf oeq, %52, %55 : vector<128x128xf32>
    %c128_i32_21 = arith.constant 128 : i32
    %57 = vector.broadcast %c128_i32_21 : i32 to vector<128x128xi32>
    %58 = arith.select %56, %16, %57 : vector<128x128xi1>, vector<128x128xi32>
    %cst_22 = arith.constant dense<2147483647> : vector<128xi32>
    %59 = vector.multi_reduction <minsi>, %58, %cst_22 [1] : vector<128x128xi32> to vector<128xi32>
    %60 = vector.shape_cast %59 : vector<128xi32> to vector<128x1xi32>
    %61 = vector.broadcast %60 : vector<128x1xi32> to vector<128x128xi32>
    %62 = arith.cmpi eq, %16, %61 : vector<128x128xi32>
    %63 = vector.broadcast %cst_11 : f32 to vector<128x128xf32>
    %64 = arith.select %62, %63, %52 : vector<128x128xi1>, vector<128x128xf32>
    %c4_i32 = arith.constant 4 : i32
    %cst_23 = arith.constant dense<0xFF800000> : vector<128xf32>
    %65 = vector.multi_reduction <maximumf>, %64, %cst_23 [1] : vector<128x128xf32> to vector<128xf32>
    %66 = vector.shape_cast %65 : vector<128xf32> to vector<128x1xf32>
    %67 = vector.broadcast %66 : vector<128x1xf32> to vector<128x128xf32>
    %68 = arith.cmpf oeq, %64, %67 : vector<128x128xf32>
    %c128_i32_24 = arith.constant 128 : i32
    %69 = vector.broadcast %c128_i32_24 : i32 to vector<128x128xi32>
    %70 = arith.select %68, %16, %69 : vector<128x128xi1>, vector<128x128xi32>
    %cst_25 = arith.constant dense<2147483647> : vector<128xi32>
    %71 = vector.multi_reduction <minsi>, %70, %cst_25 [1] : vector<128x128xi32> to vector<128xi32>
    %72 = vector.shape_cast %71 : vector<128xi32> to vector<128x1xi32>
    %73 = vector.broadcast %72 : vector<128x1xi32> to vector<128x128xi32>
    %74 = arith.cmpi eq, %16, %73 : vector<128x128xi32>
    %75 = vector.broadcast %cst_11 : f32 to vector<128x128xf32>
    %76 = arith.select %74, %75, %64 : vector<128x128xi1>, vector<128x128xf32>
    %c5_i32 = arith.constant 5 : i32
    %cst_26 = arith.constant dense<0xFF800000> : vector<128xf32>
    %77 = vector.multi_reduction <maximumf>, %76, %cst_26 [1] : vector<128x128xf32> to vector<128xf32>
    %78 = vector.shape_cast %77 : vector<128xf32> to vector<128x1xf32>
    %79 = vector.broadcast %78 : vector<128x1xf32> to vector<128x128xf32>
    %80 = arith.cmpf oeq, %76, %79 : vector<128x128xf32>
    %c128_i32_27 = arith.constant 128 : i32
    %81 = vector.broadcast %c128_i32_27 : i32 to vector<128x128xi32>
    %82 = arith.select %80, %16, %81 : vector<128x128xi1>, vector<128x128xi32>
    %cst_28 = arith.constant dense<2147483647> : vector<128xi32>
    %83 = vector.multi_reduction <minsi>, %82, %cst_28 [1] : vector<128x128xi32> to vector<128xi32>
    %84 = vector.shape_cast %83 : vector<128xi32> to vector<128x1xi32>
    %85 = vector.broadcast %84 : vector<128x1xi32> to vector<128x128xi32>
    %86 = arith.cmpi eq, %16, %85 : vector<128x128xi32>
    %87 = vector.broadcast %cst_11 : f32 to vector<128x128xf32>
    %88 = arith.select %86, %87, %76 : vector<128x128xi1>, vector<128x128xf32>
    %c6_i32 = arith.constant 6 : i32
    %cst_29 = arith.constant dense<0xFF800000> : vector<128xf32>
    %89 = vector.multi_reduction <maximumf>, %88, %cst_29 [1] : vector<128x128xf32> to vector<128xf32>
    %90 = vector.shape_cast %89 : vector<128xf32> to vector<128x1xf32>
    %91 = vector.broadcast %90 : vector<128x1xf32> to vector<128x128xf32>
    %92 = arith.cmpf oeq, %88, %91 : vector<128x128xf32>
    %c128_i32_30 = arith.constant 128 : i32
    %93 = vector.broadcast %c128_i32_30 : i32 to vector<128x128xi32>
    %94 = arith.select %92, %16, %93 : vector<128x128xi1>, vector<128x128xi32>
    %cst_31 = arith.constant dense<2147483647> : vector<128xi32>
    %95 = vector.multi_reduction <minsi>, %94, %cst_31 [1] : vector<128x128xi32> to vector<128xi32>
    %96 = vector.shape_cast %95 : vector<128xi32> to vector<128x1xi32>
    %97 = vector.broadcast %96 : vector<128x1xi32> to vector<128x128xi32>
    %98 = arith.cmpi eq, %16, %97 : vector<128x128xi32>
    %99 = vector.broadcast %cst_11 : f32 to vector<128x128xf32>
    %100 = arith.select %98, %99, %88 : vector<128x128xi1>, vector<128x128xf32>
    %c7_i32 = arith.constant 7 : i32
    %cst_32 = arith.constant dense<0xFF800000> : vector<128xf32>
    %101 = vector.multi_reduction <maximumf>, %100, %cst_32 [1] : vector<128x128xf32> to vector<128xf32>
    %102 = vector.shape_cast %101 : vector<128xf32> to vector<128x1xf32>
    %103 = vector.broadcast %102 : vector<128x1xf32> to vector<128x128xf32>
    %104 = arith.cmpf oeq, %100, %103 : vector<128x128xf32>
    %c128_i32_33 = arith.constant 128 : i32
    %105 = vector.broadcast %c128_i32_33 : i32 to vector<128x128xi32>
    %106 = arith.select %104, %16, %105 : vector<128x128xi1>, vector<128x128xi32>
    %cst_34 = arith.constant dense<2147483647> : vector<128xi32>
    %107 = vector.multi_reduction <minsi>, %106, %cst_34 [1] : vector<128x128xi32> to vector<128xi32>
    %108 = vector.shape_cast %107 : vector<128xi32> to vector<128x1xi32>
    %109 = vector.broadcast %108 : vector<128x1xi32> to vector<128x128xi32>
    %110 = arith.cmpi eq, %16, %109 : vector<128x128xi32>
    %111 = vector.broadcast %cst_11 : f32 to vector<128x128xf32>
    %112 = arith.select %110, %111, %100 : vector<128x128xi1>, vector<128x128xf32>
    %c8_i32 = arith.constant 8 : i32
    %cst_35 = arith.constant dense<0xFF800000> : vector<128xf32>
    %113 = vector.multi_reduction <maximumf>, %112, %cst_35 [1] : vector<128x128xf32> to vector<128xf32>
    %114 = vector.shape_cast %113 : vector<128xf32> to vector<128x1xf32>
    %115 = vector.broadcast %114 : vector<128x1xf32> to vector<128x128xf32>
    %116 = arith.cmpf oeq, %112, %115 : vector<128x128xf32>
    %c128_i32_36 = arith.constant 128 : i32
    %117 = vector.broadcast %c128_i32_36 : i32 to vector<128x128xi32>
    %118 = arith.select %116, %16, %117 : vector<128x128xi1>, vector<128x128xi32>
    %cst_37 = arith.constant dense<2147483647> : vector<128xi32>
    %119 = vector.multi_reduction <minsi>, %118, %cst_37 [1] : vector<128x128xi32> to vector<128xi32>
    %120 = vector.shape_cast %119 : vector<128xi32> to vector<128x1xi32>
    %121 = vector.broadcast %120 : vector<128x1xi32> to vector<128x128xi32>
    %122 = arith.cmpi eq, %16, %121 : vector<128x128xi32>
    %123 = vector.broadcast %cst_11 : f32 to vector<128x128xf32>
    %124 = arith.select %122, %123, %112 : vector<128x128xi1>, vector<128x128xf32>
    %c9_i32 = arith.constant 9 : i32
    %cst_38 = arith.constant dense<0xFF800000> : vector<128xf32>
    %125 = vector.multi_reduction <maximumf>, %124, %cst_38 [1] : vector<128x128xf32> to vector<128xf32>
    %126 = vector.shape_cast %125 : vector<128xf32> to vector<128x1xf32>
    %127 = vector.broadcast %126 : vector<128x1xf32> to vector<128x128xf32>
    %128 = arith.cmpf oeq, %124, %127 : vector<128x128xf32>
    %c128_i32_39 = arith.constant 128 : i32
    %129 = vector.broadcast %c128_i32_39 : i32 to vector<128x128xi32>
    %130 = arith.select %128, %16, %129 : vector<128x128xi1>, vector<128x128xi32>
    %cst_40 = arith.constant dense<2147483647> : vector<128xi32>
    %131 = vector.multi_reduction <minsi>, %130, %cst_40 [1] : vector<128x128xi32> to vector<128xi32>
    %132 = vector.shape_cast %131 : vector<128xi32> to vector<128x1xi32>
    %133 = vector.broadcast %132 : vector<128x1xi32> to vector<128x128xi32>
    %134 = arith.cmpi eq, %16, %133 : vector<128x128xi32>
    %135 = vector.broadcast %cst_11 : f32 to vector<128x128xf32>
    %136 = arith.select %134, %135, %124 : vector<128x128xi1>, vector<128x128xf32>
    %c10_i32 = arith.constant 10 : i32
    %cst_41 = arith.constant dense<0xFF800000> : vector<128xf32>
    %137 = vector.multi_reduction <maximumf>, %136, %cst_41 [1] : vector<128x128xf32> to vector<128xf32>
    %138 = vector.shape_cast %137 : vector<128xf32> to vector<128x1xf32>
    %139 = vector.broadcast %138 : vector<128x1xf32> to vector<128x128xf32>
    %140 = arith.cmpf oeq, %136, %139 : vector<128x128xf32>
    %c128_i32_42 = arith.constant 128 : i32
    %141 = vector.broadcast %c128_i32_42 : i32 to vector<128x128xi32>
    %142 = arith.select %140, %16, %141 : vector<128x128xi1>, vector<128x128xi32>
    %cst_43 = arith.constant dense<2147483647> : vector<128xi32>
    %143 = vector.multi_reduction <minsi>, %142, %cst_43 [1] : vector<128x128xi32> to vector<128xi32>
    %144 = vector.shape_cast %143 : vector<128xi32> to vector<128x1xi32>
    %145 = vector.broadcast %144 : vector<128x1xi32> to vector<128x128xi32>
    %146 = arith.cmpi eq, %16, %145 : vector<128x128xi32>
    %147 = vector.broadcast %cst_11 : f32 to vector<128x128xf32>
    %148 = arith.select %146, %147, %136 : vector<128x128xi1>, vector<128x128xf32>
    %c11_i32 = arith.constant 11 : i32
    %cst_44 = arith.constant dense<0xFF800000> : vector<128xf32>
    %149 = vector.multi_reduction <maximumf>, %148, %cst_44 [1] : vector<128x128xf32> to vector<128xf32>
    %150 = vector.shape_cast %149 : vector<128xf32> to vector<128x1xf32>
    %151 = vector.broadcast %150 : vector<128x1xf32> to vector<128x128xf32>
    %152 = arith.cmpf oeq, %148, %151 : vector<128x128xf32>
    %c128_i32_45 = arith.constant 128 : i32
    %153 = vector.broadcast %c128_i32_45 : i32 to vector<128x128xi32>
    %154 = arith.select %152, %16, %153 : vector<128x128xi1>, vector<128x128xi32>
    %cst_46 = arith.constant dense<2147483647> : vector<128xi32>
    %155 = vector.multi_reduction <minsi>, %154, %cst_46 [1] : vector<128x128xi32> to vector<128xi32>
    %156 = vector.shape_cast %155 : vector<128xi32> to vector<128x1xi32>
    %157 = vector.broadcast %156 : vector<128x1xi32> to vector<128x128xi32>
    %158 = arith.cmpi eq, %16, %157 : vector<128x128xi32>
    %159 = vector.broadcast %cst_11 : f32 to vector<128x128xf32>
    %160 = arith.select %158, %159, %148 : vector<128x128xi1>, vector<128x128xf32>
    %c12_i32 = arith.constant 12 : i32
    %cst_47 = arith.constant dense<0xFF800000> : vector<128xf32>
    %161 = vector.multi_reduction <maximumf>, %160, %cst_47 [1] : vector<128x128xf32> to vector<128xf32>
    %162 = vector.shape_cast %161 : vector<128xf32> to vector<128x1xf32>
    %163 = vector.broadcast %162 : vector<128x1xf32> to vector<128x128xf32>
    %164 = arith.cmpf oeq, %160, %163 : vector<128x128xf32>
    %c128_i32_48 = arith.constant 128 : i32
    %165 = vector.broadcast %c128_i32_48 : i32 to vector<128x128xi32>
    %166 = arith.select %164, %16, %165 : vector<128x128xi1>, vector<128x128xi32>
    %cst_49 = arith.constant dense<2147483647> : vector<128xi32>
    %167 = vector.multi_reduction <minsi>, %166, %cst_49 [1] : vector<128x128xi32> to vector<128xi32>
    %168 = vector.shape_cast %167 : vector<128xi32> to vector<128x1xi32>
    %169 = vector.broadcast %168 : vector<128x1xi32> to vector<128x128xi32>
    %170 = arith.cmpi eq, %16, %169 : vector<128x128xi32>
    %171 = vector.broadcast %cst_11 : f32 to vector<128x128xf32>
    %172 = arith.select %170, %171, %160 : vector<128x128xi1>, vector<128x128xf32>
    %c13_i32 = arith.constant 13 : i32
    %cst_50 = arith.constant dense<0xFF800000> : vector<128xf32>
    %173 = vector.multi_reduction <maximumf>, %172, %cst_50 [1] : vector<128x128xf32> to vector<128xf32>
    %174 = vector.shape_cast %173 : vector<128xf32> to vector<128x1xf32>
    %175 = vector.broadcast %174 : vector<128x1xf32> to vector<128x128xf32>
    %176 = arith.cmpf oeq, %172, %175 : vector<128x128xf32>
    %c128_i32_51 = arith.constant 128 : i32
    %177 = vector.broadcast %c128_i32_51 : i32 to vector<128x128xi32>
    %178 = arith.select %176, %16, %177 : vector<128x128xi1>, vector<128x128xi32>
    %cst_52 = arith.constant dense<2147483647> : vector<128xi32>
    %179 = vector.multi_reduction <minsi>, %178, %cst_52 [1] : vector<128x128xi32> to vector<128xi32>
    %180 = vector.shape_cast %179 : vector<128xi32> to vector<128x1xi32>
    %181 = vector.broadcast %180 : vector<128x1xi32> to vector<128x128xi32>
    %182 = arith.cmpi eq, %16, %181 : vector<128x128xi32>
    %183 = vector.broadcast %cst_11 : f32 to vector<128x128xf32>
    %184 = arith.select %182, %183, %172 : vector<128x128xi1>, vector<128x128xf32>
    %c14_i32 = arith.constant 14 : i32
    %cst_53 = arith.constant dense<0xFF800000> : vector<128xf32>
    %185 = vector.multi_reduction <maximumf>, %184, %cst_53 [1] : vector<128x128xf32> to vector<128xf32>
    %186 = vector.shape_cast %185 : vector<128xf32> to vector<128x1xf32>
    %187 = vector.broadcast %186 : vector<128x1xf32> to vector<128x128xf32>
    %188 = arith.cmpf oeq, %184, %187 : vector<128x128xf32>
    %c128_i32_54 = arith.constant 128 : i32
    %189 = vector.broadcast %c128_i32_54 : i32 to vector<128x128xi32>
    %190 = arith.select %188, %16, %189 : vector<128x128xi1>, vector<128x128xi32>
    %cst_55 = arith.constant dense<2147483647> : vector<128xi32>
    %191 = vector.multi_reduction <minsi>, %190, %cst_55 [1] : vector<128x128xi32> to vector<128xi32>
    %192 = vector.shape_cast %191 : vector<128xi32> to vector<128x1xi32>
    %193 = vector.broadcast %192 : vector<128x1xi32> to vector<128x128xi32>
    %194 = arith.cmpi eq, %16, %193 : vector<128x128xi32>
    %195 = vector.broadcast %cst_11 : f32 to vector<128x128xf32>
    %196 = arith.select %194, %195, %184 : vector<128x128xi1>, vector<128x128xf32>
    %c15_i32 = arith.constant 15 : i32
    %cst_56 = arith.constant dense<0xFF800000> : vector<128xf32>
    %197 = vector.multi_reduction <maximumf>, %196, %cst_56 [1] : vector<128x128xf32> to vector<128xf32>
    %198 = vector.shape_cast %197 : vector<128xf32> to vector<128x1xf32>
    %199 = vector.broadcast %198 : vector<128x1xf32> to vector<128x128xf32>
    %200 = arith.cmpf oeq, %196, %199 : vector<128x128xf32>
    %c128_i32_57 = arith.constant 128 : i32
    %201 = vector.broadcast %c128_i32_57 : i32 to vector<128x128xi32>
    %202 = arith.select %200, %16, %201 : vector<128x128xi1>, vector<128x128xi32>
    %cst_58 = arith.constant dense<2147483647> : vector<128xi32>
    %203 = vector.multi_reduction <minsi>, %202, %cst_58 [1] : vector<128x128xi32> to vector<128xi32>
    %204 = vector.shape_cast %203 : vector<128xi32> to vector<128x1xi32>
    %205 = vector.broadcast %204 : vector<128x1xi32> to vector<128x128xi32>
    %206 = arith.cmpi eq, %16, %205 : vector<128x128xi32>
    %207 = vector.broadcast %cst_11 : f32 to vector<128x128xf32>
    %208 = arith.select %206, %207, %196 : vector<128x128xi1>, vector<128x128xf32>
    %cst_59 = arith.constant 0xFF800000 : f32
    %209 = vector.broadcast %cst_59 : f32 to vector<128x128xf32>
    %210 = arith.cmpf oeq, %208, %209 : vector<128x128xf32>
    %cst_60 = arith.constant 0.000000e+00 : f32
    %211 = vector.broadcast %cst_60 : f32 to vector<128x128xf32>
    %212 = arith.select %210, %15, %211 : vector<128x128xi1>, vector<128x128xf32>
    %c0_61 = arith.constant 0 : index
    %c0_62 = arith.constant 0 : index
    %213 = vector.load %arg5[%c0_61, %c0_62] : memref<128x128xf32, #tpu.memory_space<vmem>>, vector<128x128xf32>
    tpu.vector_store %arg5[%c0_61, %c0_62], %212 {strides = array<i32>} : memref<128x128xf32, #tpu.memory_space<vmem>>, vector<128x128xf32>,
    return
  }
  func.func @transform_0(%arg0: i32) -> (i32, i32) {
    %c0_i32 = arith.constant 0 : i32
    %c0_i32_0 = arith.constant 0 : i32
    return %arg0, %c0_i32 : i32, i32
  }
  func.func @transform_1(%arg0: i32) -> (i32, i32) {
    %c0_i32 = arith.constant 0 : i32
    %c0_i32_0 = arith.constant 0 : i32
    %c0_i32_1 = arith.constant 0 : i32
    return %c0_i32, %c0_i32_0 : i32, i32
  }
  func.func @transform_2(%arg0: i32) -> (i32, i32) {
    %c0_i32 = arith.constant 0 : i32
    %c0_i32_0 = arith.constant 0 : i32
    %c0_i32_1 = arith.constant 0 : i32
    return %c0_i32, %c0_i32_0 : i32, i32
  }
  func.func @transform_3(%arg0: i32) -> (i32, i32) {
    %c0_i32 = arith.constant 0 : i32
    %c0_i32_0 = arith.constant 0 : i32
    %c0_i32_1 = arith.constant 0 : i32
    return %c0_i32, %c0_i32_0 : i32, i32
  }
  func.func @transform_4(%arg0: i32) -> (i32, i32) {
    %c0_i32 = arith.constant 0 : i32
    %c0_i32_0 = arith.constant 0 : i32
    return %arg0, %c0_i32 : i32, i32
  }
}

</mosaic_0001>

<bundles_post_ra>
// kernel: graph_directed.1
= control target key start
LH: loop header
LB: loop body
LE: loop exit
PB: predicated region body
PF: predicated region fallthrough
CT: control target
= control target key end

     0   :  { %vm45_vm0 = vcmask 261120   ;;  %s11210_s0 = inlined_call_operand.vmem [shape: f32[128,32], index: 0, kind: input, shape index: {}]   ;;  %s11211_s1 = inlined_call_operand.vmem [shape: f32[128,32], index: 1, kind: input, shape index: {}]   ;;  %s11212_s2 = inlined_call_operand.vmem [shape: f32[32,32], index: 2, kind: input, shape index: {}]   ;;  %s11213_s3 = inlined_call_operand.vmem [shape: f32[1,32], index: 3, kind: input, shape index: {}]   ;;  %s11214_s4 = inlined_call_operand.hbm [shape: f32[128,128], index: 4, kind: output, shape index: {}]  }
   0x1   :  { %v37_v0 = vld [vmem:[%s11212_s2 + $0x18] sm:$0xff]  ;;  %v36_v1 = vld [vmem:[%s11212_s2 + $0x10] sm:$0xff]  ;;  %v18_v2 = vld [vmem:[%s11210_s0] sm:$0xff] }
   0x2   :  { %5863 = vmatprep.subr.mxu0 %v37_v0  ;;  %v35_v3 = vld [vmem:[%s11212_s2 + $0x8] sm:$0xff]  ;;  %5871 = vmatprep.mubr.msk.f32.mxu0 %vm45_vm0, %v18_v2  ;;  %v34_v4 = vld [vmem:[%s11212_s2] sm:$0xff]  ;;  %v286_v6 = vld [vmem:[%s11211_s1 + $0x78] sm:$0xff] }
   0x3   :  { %5864 = vmatpush3.msra.mxu0 %v37_v0  ;;  %v19_v5 = vld [vmem:[%s11210_s0 + $0x8] sm:$0xff]  ;;  %v20_v7 = vld [vmem:[%s11210_s0 + $0x10] sm:$0xff]  ;;  %5951 = vmatprep.subr.msk.mxu1 %vm45_vm0, %v286_v6  ;;  %v21_v9 = vld [vmem:[%s11210_s0 + $0x18] sm:$0xff] }
   0x4   :  { %5865 = vmatprep.subr.mxu0 %v36_v1  ;;  %v285_v8 = vld [vmem:[%s11211_s1 + $0x70] sm:$0xff]  ;;  %5967 = vmatpush3.xpose.msk.msra.mxu1 %vm45_vm0, %v286_v6 }
   0x5   :  { %5866 = vmatpush3.msra.mxu0 %v36_v1 }
   0x6   :  { %5867 = vmatprep.subr.mxu0 %v35_v3 }
   0x7   :  { %5868 = vmatpush3.msra.mxu0 %v35_v3 }
   0x8   :  { %5869 = vmatprep.subr.mxu0 %v34_v4 }
   0x9   :  { %5870 = vmatpush3.msra.mxu0 %v34_v4 }
   0xa   :  { %5872 = vmatmul.mubr.msk.f32.vlgmr.msra.gmra.mxu0 %vm45_vm0, %v19_v5  ;;  %5895 = vmatprep.subr.msk.mxu0 %vm45_vm0, %v286_v6 }
   0xb   :  { %5874 = vmatprep.mubr.msk.f32.mxu0 %vm45_vm0, %v20_v7  ;;  %5896 = vmatpush3.xpose.msk.msra.mxu0 %vm45_vm0, %v286_v6 }
   0xc   :  { %9 = vsyncpa [#allocation3], 0  ;;  %v22_v10 = vld [vmem:[%s11210_s0 + $0x20] sm:$0xff]  ;;  %5897 = vmatprep.subr.msk.mxu0 %vm45_vm0, %v285_v8  ;;  %5952 = vmatprep.subr.msk.mxu1 %vm45_vm0, %v285_v8  ;;  %v284_v11 = vld [vmem:[%s11211_s1 + $0x68] sm:$0xff] }
   0xd   :  { %5968 = vmatpush3.xpose.msk.msra.mxu1 %vm45_vm0, %v285_v8  ;;  %v23_v12 = vld [vmem:[%s11210_s0 + $0x28] sm:$0xff]  ;;  %v24_v13 = vld [vmem:[%s11210_s0 + $0x30] sm:$0xff]  ;;  %v283_v14 = vld [vmem:[%s11211_s1 + $0x60] sm:$0xff] }
   0xe   :  { %5875 = vmatmul.mubr.msk.f32.gmra.mxu0 %vm45_vm0, %v21_v9  ;;  %5953 = vmatprep.subr.msk.mxu1 %vm45_vm0, %v284_v11  ;;  %v25_v15 = vld [vmem:[%s11210_s0 + $0x38] sm:$0xff]  ;;  %v26_v16 = vld [vmem:[%s11210_s0 + $0x40] sm:$0xff]  ;;  %v27_v18 = vld [vmem:[%s11210_s0 + $0x48] sm:$0xff] }
   0xf   :  { %5877 = vmatprep.mubr.msk.f32.mxu0 %vm45_vm0, %v22_v10  ;;  %5898 = vmatpush3.xpose.msk.msra.mxu0 %vm45_vm0, %v285_v8  ;;  %v282_v17 = vld [vmem:[%s11211_s1 + $0x58] sm:$0xff]  ;;  %v28_v19 = vld [vmem:[%s11210_s0 + $0x50] sm:$0xff]  ;;  %v30_v22 = vld [vmem:[%s11210_s0 + $0x60] sm:$0xff] }
  0x10   :  { %5899 = vmatprep.subr.msk.mxu0 %vm45_vm0, %v284_v11  ;;  %v281_v20 = vld [vmem:[%s11211_s1 + $0x50] sm:$0xff]  ;;  %v29_v21 = vld [vmem:[%s11210_s0 + $0x58] sm:$0xff]  ;;  %v280_v23 = vld [vmem:[%s11211_s1 + $0x48] sm:$0xff] }
  0x11   :  { %5969 = vmatpush3.xpose.msk.msra.mxu1 %vm45_vm0, %v284_v11  ;;  %v31_v24 = vld [vmem:[%s11210_s0 + $0x68] sm:$0xff]  ;;  %v32_v25 = vld [vmem:[%s11210_s0 + $0x70] sm:$0xff]  ;;  %v279_v26 = vld [vmem:[%s11211_s1 + $0x40] sm:$0xff] }
  0x12   :  { %5878 = vmatmul.mubr.msk.f32.gmra.mxu0 %vm45_vm0, %v23_v12  ;;  %5954 = vmatprep.subr.msk.mxu1 %vm45_vm0, %v283_v14  ;;  %v33_v27 = vld [vmem:[%s11210_s0 + $0x78] sm:$0xff]  ;;  %v277_v29 = vld [vmem:[%s11211_s1 + $0x30] sm:$0xff]  ;;  %v276_v30 = vld [vmem:[%s11211_s1 + $0x28] sm:$0xff] }
  0x13   :  { %5880 = vmatprep.mubr.msk.f32.mxu0 %vm45_vm0, %v24_v13  ;;  %5900 = vmatpush3.xpose.msk.msra.mxu0 %vm45_vm0, %v284_v11  ;;  %v278_v28 = vld [vmem:[%s11211_s1 + $0x38] sm:$0xff]  ;;  %v275_v31 = vld [vmem:[%s11211_s1 + $0x20] sm:$0xff]  ;;  %v273_v33 = vld [vmem:[%s11211_s1 + $0x10] sm:$0xff] }
  0x14   :  { %5901 = vmatprep.subr.msk.mxu0 %vm45_vm0, %v283_v14  ;;  %v274_v32 = vld [vmem:[%s11211_s1 + $0x18] sm:$0xff]  ;;  %v272_v34 = vld [vmem:[%s11211_s1 + $0x8] sm:$0xff]  ;;  %v271_v35 = vld [vmem:[%s11211_s1] sm:$0xff]  ;;  %s6072_s1 = smov [#allocation2]  }
  0x15   :  { %5970 = vmatpush3.xpose.msk.msra.mxu1 %vm45_vm0, %v283_v14  ;;  %v6291_v36 = vld [vmem:[%s11213_s3] ss:$0 sm:$0xff]  ;;  %s5751_s3 = sshll.u32 %s6072_s1, 4  ;;  %s5752_s3 = int_to_ptr.vmem [resolvable:$true] %s5751_s3 }
  0x16   :  { %5881 = vmatmul.mubr.msk.f32.gmra.mxu0 %vm45_vm0, %v25_v15  ;;  %5955 = vmatprep.subr.msk.mxu1 %vm45_vm0, %v282_v17  ;;  %s6050_s7 = scalar_lea.vmem %s5752_s3, 2048  ;;  %p6055_p1 = scmp.lt.s32.totalorder %s5752_s3, %s5752_s3 }
  0x17   :  { %5883 = vmatprep.mubr.msk.f32.mxu0 %vm45_vm0, %v26_v16  ;;  %5902 = vmatpush3.xpose.msk.msra.mxu0 %vm45_vm0, %v283_v14  ;;  %p6051_p0 = scmp.ne.s32.totalorder %s5752_s3, %s6050_s7  ;;  %p6056_p2 = scmp.lt.s32.totalorder %s6050_s7, %s6050_s7 }
  0x18   :  { %5903 = vmatprep.subr.msk.mxu0 %vm45_vm0, %v282_v17 }
  0x19   :  { %5971 = vmatpush3.xpose.msk.msra.mxu1 %vm45_vm0, %v282_v17  ;;  %p6057_p3 = por %p6056_p2, %p6055_p1 }
  0x1a   :  { %5884 = vmatmul.mubr.msk.f32.gmra.mxu0 %vm45_vm0, %v27_v18  ;;  %5956 = vmatprep.subr.msk.mxu1 %vm45_vm0, %v281_v20 }
  0x1b   :  { %5886 = vmatprep.mubr.msk.f32.mxu0 %vm45_vm0, %v28_v19  ;;  %5904 = vmatpush3.xpose.msk.msra.mxu0 %vm45_vm0, %v282_v17  ;;  %p6058_p4 = pnand %p6057_p3, %p6051_p0 }
  0x1c   :  { %5905 = vmatprep.subr.msk.mxu0 %vm45_vm0, %v281_v20 }
  0x1d   :  { %5972 = vmatpush3.xpose.msk.msra.mxu1 %vm45_vm0, %v281_v20 }
  0x1e   :  { %5887 = vmatmul.mubr.msk.f32.gmra.mxu0 %vm45_vm0, %v29_v21  ;;  %5957 = vmatprep.subr.msk.mxu1 %vm45_vm0, %v280_v23 }
  0x1f   :  { %5889 = vmatprep.mubr.msk.f32.mxu0 %vm45_vm0, %v30_v22  ;;  %5906 = vmatpush3.xpose.msk.msra.mxu0 %vm45_vm0, %v281_v20 }
  0x20   :  { %5907 = vmatprep.subr.msk.mxu0 %vm45_vm0, %v280_v23 }
  0x21   :  { %5973 = vmatpush3.xpose.msk.msra.mxu1 %vm45_vm0, %v280_v23 }
  0x22   :  { %5890 = vmatmul.mubr.msk.f32.gmra.mxu0 %vm45_vm0, %v31_v24  ;;  %5958 = vmatprep.subr.msk.mxu1 %vm45_vm0, %v279_v26 }
  0x23   :  { %5892 = vmatprep.mubr.msk.f32.mxu0 %vm45_vm0, %v32_v25  ;;  %5908 = vmatpush3.xpose.msk.msra.mxu0 %vm45_vm0, %v280_v23 }
  0x24   :  { %5909 = vmatprep.subr.msk.mxu0 %vm45_vm0, %v279_v26 }
  0x25   :  { %5974 = vmatpush3.xpose.msk.msra.mxu1 %vm45_vm0, %v279_v26 }
  0x26   :  { %5893 = vmatmul.mubr.msk.f32.gmra.mxu0 %vm45_vm0, %v33_v27  ;;  %5959 = vmatprep.subr.msk.mxu1 %vm45_vm0, %v278_v28 }
  0x27   :  { %5910 = vmatpush3.xpose.msk.msra.mxu0 %vm45_vm0, %v279_v26 }
  0x28   :  { %5911 = vmatprep.subr.msk.mxu0 %vm45_vm0, %v278_v28 }
  0x29   :  { %5975 = vmatpush3.xpose.msk.msra.mxu1 %vm45_vm0, %v278_v28 }
  0x2a   :  { %5960 = vmatprep.subr.msk.mxu1 %vm45_vm0, %v277_v29 }
  0x2b   :  { %5912 = vmatpush3.xpose.msk.msra.mxu0 %vm45_vm0, %v278_v28 }
  0x2c   :  { %5913 = vmatprep.subr.msk.mxu0 %vm45_vm0, %v277_v29 }
  0x2d   :  { %5976 = vmatpush3.xpose.msk.msra.mxu1 %vm45_vm0, %v277_v29 }
  0x2e   :  { %5961 = vmatprep.subr.msk.mxu1 %vm45_vm0, %v276_v30 }
  0x2f   :  { %5914 = vmatpush3.xpose.msk.msra.mxu0 %vm45_vm0, %v277_v29 }
  0x30   :  { %5915 = vmatprep.subr.msk.mxu0 %vm45_vm0, %v276_v30 }
  0x31   :  { %5977 = vmatpush3.xpose.msk.msra.mxu1 %vm45_vm0, %v276_v30 }
  0x32   :  { %5962 = vmatprep.subr.msk.mxu1 %vm45_vm0, %v275_v31 }
  0x33   :  { %5916 = vmatpush3.xpose.msk.msra.mxu0 %vm45_vm0, %v276_v30 }
  0x34   :  { %5917 = vmatprep.subr.msk.mxu0 %vm45_vm0, %v275_v31 }
  0x35   :  { %5978 = vmatpush3.xpose.msk.msra.mxu1 %vm45_vm0, %v275_v31 }
  0x36   :  { %5963 = vmatprep.subr.msk.mxu1 %vm45_vm0, %v274_v32 }
  0x37   :  { %5918 = vmatpush3.xpose.msk.msra.mxu0 %vm45_vm0, %v275_v31 }
  0x38   :  { %5919 = vmatprep.subr.msk.mxu0 %vm45_vm0, %v274_v32 }
  0x39   :  { %5979 = vmatpush3.xpose.msk.msra.mxu1 %vm45_vm0, %v274_v32 }
  0x3a   :  { %5964 = vmatprep.subr.msk.mxu1 %vm45_vm0, %v273_v33 }
  0x3b   :  { %5920 = vmatpush3.xpose.msk.msra.mxu0 %vm45_vm0, %v274_v32 }
  0x3c   :  { %5921 = vmatprep.subr.msk.mxu0 %vm45_vm0, %v273_v33 }
  0x3d   :  { %5980 = vmatpush3.xpose.msk.msra.mxu1 %vm45_vm0, %v273_v33 }
  0x3e   :  { %5965 = vmatprep.subr.msk.mxu1 %vm45_vm0, %v272_v34 }
  0x3f   :  { %5922 = vmatpush3.xpose.msk.msra.mxu0 %vm45_vm0, %v273_v33 }
  0x40   :  { %5923 = vmatprep.subr.msk.mxu0 %vm45_vm0, %v272_v34 }
  0x41   :  { %5981 = vmatpush3.xpose.msk.msra.mxu1 %vm45_vm0, %v272_v34 }
  0x42   :  { %5966 = vmatprep.subr.msk.mxu1 %vm45_vm0, %v271_v35 }
  0x43   :  { %5924 = vmatpush3.xpose.msk.msra.mxu0 %vm45_vm0, %v272_v34 }
  0x44   :  { %5925 = vmatprep.subr.msk.mxu0 %vm45_vm0, %v271_v35 }
  0x45   :  { %5982 = vmatpush3.xpose.msk.msra.mxu1 %vm45_vm0, %v271_v35 }
  0x47   :  { %5926 = vmatpush3.xpose.msk.msra.mxu0 %vm45_vm0, %v271_v35 }
  0xca   :  { %v5873_v37 = vpop.f32.mrf.mxu0 }
  0xcb   :  { %v166_v38 = vadd.f32 %v5873_v37, %v6291_v36 }
  0xcc   :  { %v160_v39 = vpop.f32.mrf.mxu0 }
  0xcd   :  { %v161_v40 = vadd.f32 %v6291_v36, %v160_v39  ;;  %v240_v41 = vmul.f32 3.0, %v166_v38 }
  0xce   :  { %v5876_v42 = vpop.f32.mrf.mxu0 }
  0xcf   :  { %v239_v43 = vmul.f32 3.0, %v161_v40  ;;  %v176_v44 = vadd.f32 %v5876_v42, %v6291_v36 }
  0xd0   :  { %v170_v45 = vpop.f32.mrf.mxu0 }
  0xd1   :  { %5986 = vtanh.f32 %v239_v43  ;;  %v171_v46 = vadd.f32 %v6291_v36, %v170_v45  ;;  %v242_v47 = vmul.f32 3.0, %v176_v44 }
  0xd2   :  { %5988 = vtanh.f32 %v240_v41  ;;  %v5879_v48 = vpop.f32.mrf.mxu0 }
  0xd3   :  { %v241_v49 = vmul.f32 3.0, %v171_v46  ;;  %v186_v50 = vadd.f32 %v5879_v48, %v6291_v36 }
  0xd4   :  { %v180_v51 = vpop.f32.mrf.mxu0 }
  0xd5   :  { %5990 = vtanh.f32 %v241_v49  ;;  %v244_v52 = vmul.f32 3.0, %v186_v50  ;;  %v181_v53 = vadd.f32 %v6291_v36, %v180_v51 }
  0xd6   :  { %5992 = vtanh.f32 %v242_v47  ;;  %v5882_v54 = vpop.f32.mrf.mxu0 }
  0xd7   :  { %v243_v55 = vmul.f32 3.0, %v181_v53  ;;  %v196_v56 = vadd.f32 %v5882_v54, %v6291_v36  ;;  %5994 = vtanh.f32 %v244_v52 }
  0xd8   :  { %v190_v57 = vpop.f32.mrf.mxu0 }
  0xd9   :  { %5996 = vtanh.f32 %v243_v55  ;;  %v246_v58 = vmul.f32 3.0, %v196_v56  ;;  %v191_v59 = vadd.f32 %v6291_v36, %v190_v57 }
  0xda   :  { %v5885_v60 = vpop.f32.mrf.mxu0 }
  0xdb   :  { %v245_v61 = vmul.f32 3.0, %v191_v59  ;;  %v206_v62 = vadd.f32 %v5885_v60, %v6291_v36  ;;  %5998 = vtanh.f32 %v246_v58 }
  0xdc   :  { %v200_v63 = vpop.f32.mrf.mxu0 }
  0xdd   :  { %6000 = vtanh.f32 %v245_v61  ;;  %v248_v0 = vmul.f32 3.0, %v206_v62  ;;  %v201_v1 = vadd.f32 %v6291_v36, %v200_v63 }
  0xde   :  { %v5987_v2 = vpop.eup %5986  ;;  %v5888_v3 = vpop.f32.mrf.mxu0 }
  0xdf   :  { %v5989_v4 = vpop.eup %5988  ;;  %v247_v5 = vmul.f32 3.0, %v201_v1  ;;  %v216_v6 = vadd.f32 %v5888_v3, %v6291_v36  ;;  %5927 = vmatprep.mubr.msk.f32.mxu0 %vm45_vm0, %v5987_v2  ;;  %6002 = vtanh.f32 %v248_v0 }
  0xe0   :  { %v210_v7 = vpop.f32.mrf.mxu0  ;;  %5928 = vmatmul.mubr.msk.f32.vlgmr.msra.gmra.mxu0 %vm45_vm0, %v5989_v4 }
  0xe1   :  { %6004 = vtanh.f32 %v247_v5  ;;  %v250_v8 = vmul.f32 3.0, %v216_v6  ;;  %v211_v9 = vadd.f32 %v6291_v36, %v210_v7 }
  0xe2   :  { %v5991_v10 = vpop.eup %5990  ;;  %v5891_v11 = vpop.f32.mrf.mxu0 }
  0xe3   :  { %v5993_v12 = vpop.eup %5992  ;;  %v249_v13 = vmul.f32 3.0, %v211_v9  ;;  %v226_v14 = vadd.f32 %v5891_v11, %v6291_v36  ;;  %5930 = vmatprep.mubr.msk.f32.mxu0 %vm45_vm0, %v5991_v10  ;;  %6006 = vtanh.f32 %v250_v8 }
  0xe4   :  { %v220_v15 = vpop.f32.mrf.mxu0  ;;  %5931 = vmatmul.mubr.msk.f32.gmra.mxu0 %vm45_vm0, %v5993_v12  ;;  %v5995_v16 = vpop.eup %5994 }
  0xe5   :  { %6008 = vtanh.f32 %v249_v13  ;;  %v252_v17 = vmul.f32 3.0, %v226_v14  ;;  %v221_v18 = vadd.f32 %v6291_v36, %v220_v15 }
  0xe6   :  { %v5997_v19 = vpop.eup %5996  ;;  %v5894_v20 = vpop.f32.mrf.mxu0 }
  0xe7   :  { %v251_v21 = vmul.f32 3.0, %v221_v18  ;;  %v236_v22 = vadd.f32 %v5894_v20, %v6291_v36  ;;  %5933 = vmatprep.mubr.msk.f32.mxu0 %vm45_vm0, %v5997_v19  ;;  %6010 = vtanh.f32 %v252_v17 }
  0xe8   :  { %v230_v23 = vpop.f32.mrf.mxu0  ;;  %5934 = vmatmul.mubr.msk.f32.gmra.mxu0 %vm45_vm0, %v5995_v16  ;;  %v5999_v24 = vpop.eup %5998 }
  0xe9   :  { %6012 = vtanh.f32 %v251_v21  ;;  %v254_v25 = vmul.f32 3.0, %v236_v22  ;;  %v231_v26 = vadd.f32 %v6291_v36, %v230_v23 }
  0xea   :  { %v6001_v27 = vpop.eup %6000 }
  0xeb   :  { %v253_v28 = vmul.f32 3.0, %v231_v26  ;;  %5936 = vmatprep.mubr.msk.f32.mxu1 %vm45_vm0, %v6001_v27  ;;  %6014 = vtanh.f32 %v254_v25 }
  0xec   :  { %5937 = vmatmul.mubr.msk.f32.vlgmr.msra.gmra.mxu1 %vm45_vm0, %v5999_v24  ;;  %v6003_v29 = vpop.eup %6002 }
  0xed   :  { %6016 = vtanh.f32 %v253_v28 }
  0xee   :  { %v6005_v30 = vpop.eup %6004 }
  0xef   :  { %5939 = vmatprep.mubr.msk.f32.mxu1 %vm45_vm0, %v6005_v30 }
  0xf0   :  { %5940 = vmatmul.mubr.msk.f32.gmra.mxu1 %vm45_vm0, %v6003_v29  ;;  %v6007_v31 = vpop.eup %6006 }
  0xf2   :  { %v6009_v32 = vpop.eup %6008 }
  0xf3   :  { %5942 = vmatprep.mubr.msk.f32.mxu1 %vm45_vm0, %v6009_v32 }
  0xf4   :  { %5943 = vmatmul.mubr.msk.f32.gmra.mxu1 %vm45_vm0, %v6007_v31  ;;  %v6011_v33 = vpop.eup %6010 }
  0xf6   :  { %v6013_v34 = vpop.eup %6012 }
  0xf7   :  { %5945 = vmatprep.mubr.msk.f32.mxu1 %vm45_vm0, %v6013_v34 }
  0xf8   :  { %5946 = vmatmul.mubr.msk.f32.gmra.mxu1 %vm45_vm0, %v6011_v33  ;;  %v6015_v35 = vpop.eup %6014 }
  0xfa   :  { %v6017_v36 = vpop.eup %6016 }
  0xfb   :  { %5948 = vmatprep.mubr.msk.f32.mxu1 %vm45_vm0, %v6017_v36 }
  0xfc   :  { %5949 = vmatmul.mubr.msk.f32.gmra.mxu1 %vm45_vm0, %v6015_v35 }
 0x1a0   :  { %v5929_v37 = vpop.f32.mrf.mxu0 }
 0x1a1   :  { %v529_v38 = vmul.f32 3.0, %v5929_v37  ;;  %v576_v37 = vlaneseq }
 0x1a2   :  { %v449_v39 = vpop.f32.mrf.mxu0 }
 0x1a3   :  { %6018 = vtanh.f32 %v529_v38  ;;  %v528_v40 = vmul.f32 3.0, %v449_v39  ;;  %v6373_v38 = vand.u32 127, %v576_v37 }
 0x1a4   :  { %v5932_v41 = vpop.f32.mrf.mxu0 }
 0x1a5   :  { %6020 = vtanh.f32 %v528_v40  ;;  %v531_v42 = vmul.f32 3.0, %v5932_v41 }
 0x1a6   :  { %v459_v43 = vpop.f32.mrf.mxu0 }
 0x1a7   :  { %6022 = vtanh.f32 %v531_v42  ;;  %v530_v44 = vmul.f32 3.0, %v459_v43 }
 0x1a8   :  { %v5935_v45 = vpop.f32.mrf.mxu0 }
 0x1a9   :  { %6024 = vtanh.f32 %v530_v44  ;;  %v533_v46 = vmul.f32 3.0, %v5935_v45 }
 0x1aa   :  { %v469_v47 = vpop.f32.mrf.mxu0 }
 0x1ab   :  { %v532_v48 = vmul.f32 3.0, %v469_v47  ;;  %6026 = vtanh.f32 %v533_v46 }
 0x1ac   :  { %v5938_v49 = vpop.f32.mrf.mxu1 }
 0x1ad   :  { %6028 = vtanh.f32 %v532_v48  ;;  %v535_v50 = vmul.f32 3.0, %v5938_v49 }
 0x1ae   :  { %v479_v51 = vpop.f32.mrf.mxu1 }
 0x1af   :  { %v534_v52 = vmul.f32 3.0, %v479_v51  ;;  %6030 = vtanh.f32 %v535_v50 }
 0x1b0   :  { %v6019_v53 = vpop.eup %6018  ;;  %v5941_v54 = vpop.f32.mrf.mxu1 }
 0x1b1   :  { %v6325_v55 = vmax.f32 %v6019_v53, 0.0  ;;  %6032 = vtanh.f32 %v534_v52  ;;  %v537_v56 = vmul.f32 3.0, %v5941_v54 }
 0x1b2   :  { %v6021_v57 = vpop.eup %6020  ;;  %v489_v58 = vpop.f32.mrf.mxu1 }
 0x1b3   :  { %v536_v59 = vmul.f32 3.0, %v489_v58  ;;  %580 = vmax.xlane.f32.xlu0 %v6325_v55  ;;  %6034 = vtanh.f32 %v537_v56  ;;  %v6328_v62 = vmax.f32 %v6021_v57, 0.0 }
 0x1b4   :  { %v6023_v60 = vpop.eup %6022  ;;  %v5944_v61 = vpop.f32.mrf.mxu1 }
 0x1b5   :  { %v6330_v63 = vmax.f32 %v6023_v60, 0.0  ;;  %6036 = vtanh.f32 %v536_v59  ;;  %v539_v0 = vmul.f32 3.0, %v5944_v61 }
 0x1b6   :  { %v6025_v1 = vpop.eup %6024  ;;  %v499_v2 = vpop.f32.mrf.mxu1 }
 0x1b7   :  { %v538_v3 = vmul.f32 3.0, %v499_v2  ;;  %578 = vmax.xlane.f32.xlu0 %v6328_v62  ;;  %584 = vmax.xlane.f32.xlu1 %v6330_v63  ;;  %6038 = vtanh.f32 %v539_v0  ;;  %v6334_v6 = vmax.f32 %v6025_v1, 0.0 }
 0x1b8   :  { %v5947_v4 = vpop.f32.mrf.mxu1  ;;  %v6027_v5 = vpop.eup %6026 }
 0x1b9   :  { %6040 = vtanh.f32 %v538_v3  ;;  %v541_v7 = vmul.f32 3.0, %v5947_v4  ;;  %v6339_v14 = vmax.f32 %v6027_v5, 0.0 }
 0x1ba   :  { %v6029_v8 = vpop.eup %6028  ;;  %v509_v9 = vpop.f32.mrf.mxu1 }
 0x1bb   :  { %v6336_v10 = vmax.f32 %v6029_v8, 0.0  ;;  %v540_v11 = vmul.f32 3.0, %v509_v9  ;;  %582 = vmax.xlane.f32.xlu1 %v6334_v6  ;;  %6042 = vtanh.f32 %v541_v7 }
 0x1bc   :  { %v5950_v12 = vpop.f32.mrf.mxu1  ;;  %v6031_v13 = vpop.eup %6030 }
 0x1bd   :  { %11226 = vst [vmem:[#allocation5_spill] sm:$0xff] %v6336_v10  ;;  %6044 = vtanh.f32 %v540_v11  ;;  %v543_v15 = vmul.f32 3.0, %v5950_v12  ;;  %586 = vmax.xlane.f32.xlu0 %v6336_v10  ;;  %v6345_v21 = vmax.f32 %v6031_v13, 0.0 }
 0x1be   :  { %v6033_v16 = vpop.eup %6032  ;;  %v519_v17 = vpop.f32.mrf.mxu1 }
 0x1bf   :  { %v6342_v18 = vmax.f32 %v6033_v16, 0.0  ;;  %v542_v19 = vmul.f32 3.0, %v519_v17  ;;  %588 = vmax.xlane.f32.xlu1 %v6339_v14  ;;  %6046 = vtanh.f32 %v543_v15  ;;  %11228 = vst [vmem:[#allocation7_spill] sm:$0xff] %v6345_v21 }
 0x1c0   :  { %v6035_v20 = vpop.eup %6034 }
 0x1c1   :  { %11227 = vst [vmem:[#allocation6_spill] sm:$0xff] %v6342_v18  ;;  %6048 = vtanh.f32 %v542_v19  ;;  %590 = vmax.xlane.f32.xlu0 %v6342_v18  ;;  %v6351_v25 = vmax.f32 %v6035_v20, 0.0 }
 0x1c2   :  { %v6037_v22 = vpop.eup %6036 }
 0x1c3   :  { %v6348_v23 = vmax.f32 %v6037_v22, 0.0  ;;  %592 = vmax.xlane.f32.xlu1 %v6345_v21  ;;  %11230 = vst [vmem:[#allocation9_spill] sm:$0xff] %v6351_v25 }
 0x1c4   :  { %v6039_v24 = vpop.eup %6038 }
 0x1c5   :  { %11229 = vst [vmem:[#allocation8_spill] sm:$0xff] %v6348_v23  ;;  %594 = vmax.xlane.f32.xlu0 %v6348_v23  ;;  %v6357_v29 = vmax.f32 %v6039_v24, 0.0 }
 0x1c6   :  { %v6041_v26 = vpop.eup %6040 }
 0x1c7   :  { %v6354_v27 = vmax.f32 %v6041_v26, 0.0  ;;  %596 = vmax.xlane.f32.xlu1 %v6351_v25  ;;  %11232 = vst [vmem:[#allocation11_spill] sm:$0xff] %v6357_v29 }
 0x1c8   :  { %v6043_v28 = vpop.eup %6042 }
 0x1c9   :  { %11231 = vst [vmem:[#allocation10_spill] sm:$0xff] %v6354_v27  ;;  %598 = vmax.xlane.f32.xlu0 %v6354_v27  ;;  %v6363_v33 = vmax.f32 %v6043_v28, 0.0 }
 0x1ca   :  { %v6045_v30 = vpop.eup %6044 }
 0x1cb   :  { %v6360_v31 = vmax.f32 %v6045_v30, 0.0  ;;  %600 = vmax.xlane.f32.xlu1 %v6357_v29  ;;  %11234 = vst [vmem:[#allocation13_spill] sm:$0xff] %v6363_v33 }
 0x1cc   :  { %v6047_v32 = vpop.eup %6046 }
 0x1cd   :  { %11233 = vst [vmem:[#allocation12_spill] sm:$0xff] %v6360_v31  ;;  %602 = vmax.xlane.f32.xlu0 %v6360_v31  ;;  %v6369_v36 = vmax.f32 %v6047_v32, 0.0 }
 0x1ce   :  { %v6049_v34 = vpop.eup %6048 }
 0x1cf   :  { %v6366_v35 = vmax.f32 %v6049_v34, 0.0  ;;  %604 = vmax.xlane.f32.xlu1 %v6363_v33  ;;  %11236 = vst [vmem:[#allocation15_spill] sm:$0xff] %v6369_v36 }
 0x1d1   :  { %11235 = vst [vmem:[#allocation14_spill] sm:$0xff] %v6366_v35  ;;  %606 = vmax.xlane.f32.xlu0 %v6366_v35 }
 0x1d3   :  { %608 = vmax.xlane.f32.xlu1 %v6369_v36 }
 0x23c   :  { %v581_v39 = vpop.xlane.xlu0 %580 }
 0x23d   :  { %vm611_vm1 = vcmp.eq.f32.partialorder %v6325_v55, %v581_v39 }
 0x23e   :  { %v6377_v40 = vsel %vm611_vm1, %v6373_v38, 128 }
 0x23f   :  { %v657_v41 = vshra.s32 %v6377_v40, 16 }
 0x240   :  { %v579_v42 = vpop.xlane.xlu0 %578  ;;  %v585_v43 = vpop.xlane.xlu1 %584 }
 0x241   :  { %vm610_vm2 = vcmp.eq.f32.partialorder %v6328_v62, %v579_v42  ;;  %vm613_vm3 = vcmp.eq.f32.partialorder %v6330_v63, %v585_v43  ;;  %v6382_v44 = vcvt.s32.f32 %v657_v41 }
 0x242   :  { %v6385_v45 = vsel %vm610_vm2, %v6373_v38, 128  ;;  %v6388_v46 = vsel %vm613_vm3, %v6373_v38, 128 }
 0x243   :  { %660 = vmin.xlane.f32.xlu1 %v6382_v44  ;;  %v685_v47 = vshra.s32 %v6388_v46, 16  ;;  %v643_v48 = vshra.s32 %v6385_v45, 16 }
 0x244   :  { %v583_v49 = vpop.xlane.xlu1 %582 }
 0x245   :  { %vm612_vm4 = vcmp.eq.f32.partialorder %v6334_v6, %v583_v49  ;;  %v6394_v50 = vcvt.s32.f32 %v685_v47  ;;  %v6396_v51 = vcvt.s32.f32 %v643_v48 }
 0x246   :  { %v6399_v52 = vsel %vm612_vm4, %v6373_v38, 128  ;;  %v587_v53 = vpop.xlane.xlu0 %586 }
 0x247   :  { %vm614_vm5 = vcmp.eq.f32.partialorder %v6336_v10, %v587_v53  ;;  %688 = vmin.xlane.f32.xlu1 %v6394_v50  ;;  %646 = vmin.xlane.f32.xlu0 %v6396_v51  ;;  %v671_v54 = vshra.s32 %v6399_v52, 16 }
 0x248   :  { %v6406_v56 = vsel %vm614_vm5, %v6373_v38, 128  ;;  %v589_v57 = vpop.xlane.xlu1 %588 }
 0x249   :  { %vm615_vm6 = vcmp.eq.f32.partialorder %v6339_v14, %v589_v57  ;;  %v6409_v58 = vcvt.s32.f32 %v671_v54  ;;  %v699_v59 = vshra.s32 %v6406_v56, 16 }
 0x24a   :  { %v6413_v60 = vsel %vm615_vm6, %v6373_v38, 128  ;;  %v591_v61 = vpop.xlane.xlu0 %590 }
 0x24b   :  { %vm616_vm7 = vcmp.eq.f32.partialorder %v6342_v18, %v591_v61  ;;  %674 = vmin.xlane.f32.xlu0 %v6409_v58  ;;  %v713_v0 = vshra.s32 %v6413_v60, 16  ;;  %v6424_v4 = vcvt.s32.f32 %v699_v59 }
 0x24c   :  { %v6419_v1 = vsel %vm616_vm7, %v6373_v38, 128  ;;  %v593_v2 = vpop.xlane.xlu1 %592 }
 0x24d   :  { %vm617_vm8 = vcmp.eq.f32.partialorder %v6345_v21, %v593_v2  ;;  %v6422_v3 = vcvt.s32.f32 %v713_v0  ;;  %v727_v5 = vshra.s32 %v6419_v1, 16 }
 0x24e   :  { %v6428_v7 = vsel %vm617_vm8, %v6373_v38, 128  ;;  %v595_v8 = vpop.xlane.xlu0 %594 }
 0x24f   :  { %vm618_vm9 = vcmp.eq.f32.partialorder %v6348_v23, %v595_v8  ;;  %716 = vmin.xlane.f32.xlu1 %v6422_v3  ;;  %702 = vmin.xlane.f32.xlu0 %v6424_v4  ;;  %v741_v9 = vshra.s32 %v6428_v7, 16  ;;  %v6440_v15 = vcvt.s32.f32 %v727_v5 }
 0x250   :  { %v6435_v11 = vsel %vm618_vm9, %v6373_v38, 128  ;;  %v597_v12 = vpop.xlane.xlu1 %596 }
 0x251   :  { %vm619_vm10 = vcmp.eq.f32.partialorder %v6351_v25, %v597_v12  ;;  %v6438_v13 = vcvt.s32.f32 %v741_v9  ;;  %v755_v16 = vshra.s32 %v6435_v11, 16  ;;  %v656_v12 = vand.u32 65535, %v6377_v40 }
 0x252   :  { %v6444_v17 = vsel %vm619_vm10, %v6373_v38, 128  ;;  %v599_v19 = vpop.xlane.xlu0 %598  ;;  %v670_v40 = vand.u32 65535, %v6399_v52 }
 0x253   :  { %vm620_vm11 = vcmp.eq.f32.partialorder %v6354_v27, %v599_v19  ;;  %744 = vmin.xlane.f32.xlu1 %v6438_v13  ;;  %730 = vmin.xlane.f32.xlu0 %v6440_v15  ;;  %v769_v20 = vshra.s32 %v6444_v17, 16  ;;  %v6456_v28 = vcvt.s32.f32 %v755_v16  ;;  %v658_v19 = vcvt.s32.f32 %v656_v12 }
 0x254   :  { %v6451_v22 = vsel %vm620_vm11, %v6373_v38, 128  ;;  %v601_v24 = vpop.xlane.xlu1 %600  ;;  %v740_v12 = vand.u32 65535, %v6428_v7  ;;  %v768_v7 = vand.u32 65535, %v6444_v17 }
 0x255   :  { %vm621_vm12 = vcmp.eq.f32.partialorder %v6357_v29, %v601_v24  ;;  %v6454_v26 = vcvt.s32.f32 %v769_v20  ;;  %v783_v30 = vshra.s32 %v6451_v22, 16  ;;  %v684_v20 = vand.u32 65535, %v6388_v46 }
 0x256   :  { %v6460_v32 = vsel %vm621_vm12, %v6373_v38, 128  ;;  %v603_v34 = vpop.xlane.xlu0 %602  ;;  %v642_v24 = vand.u32 65535, %v6385_v45 }
 0x257   :  { %vm622_vm13 = vcmp.eq.f32.partialorder %v6360_v31, %v603_v34  ;;  %772 = vmin.xlane.f32.xlu1 %v6454_v26  ;;  %758 = vmin.xlane.f32.xlu0 %v6456_v28  ;;  %v797_v37 = vshra.s32 %v6460_v32, 16  ;;  %v6472_v43 = vcvt.s32.f32 %v783_v30  ;;  %v796_v17 = vand.u32 65535, %v6460_v32 }
 0x258   :  { %v6467_v39 = vsel %vm622_vm13, %v6373_v38, 128  ;;  %v605_v41 = vpop.xlane.xlu1 %604 }
 0x259   :  { %vm623_vm14 = vcmp.eq.f32.partialorder %v6363_v33, %v605_v41  ;;  %v6470_v42 = vcvt.s32.f32 %v797_v37  ;;  %v811_v47 = vshra.s32 %v6467_v39, 16  ;;  %v686_v41 = vcvt.s32.f32 %v684_v20 }
 0x25a   :  { %v6476_v48 = vsel %vm623_vm14, %v6373_v38, 128  ;;  %v607_v49 = vpop.xlane.xlu0 %606 }
 0x25b   :  { %vm624_vm15 = vcmp.eq.f32.partialorder %v6366_v35, %v607_v49  ;;  %800 = vmin.xlane.f32.xlu1 %v6470_v42  ;;  %786 = vmin.xlane.f32.xlu0 %v6472_v43  ;;  %v825_v53 = vshra.s32 %v6476_v48, 16  ;;  %v6488_v61 = vcvt.s32.f32 %v811_v47  ;;  %v644_v47 = vcvt.s32.f32 %v642_v24 }
 0x25c   :  { %v6483_v54 = vsel %vm624_vm15, %v6373_v38, 128  ;;  %v609_v57 = vpop.xlane.xlu1 %608  ;;  %v672_v49 = vcvt.s32.f32 %v670_v40  ;;  %v742_v24 = vcvt.s32.f32 %v740_v12  ;;  %v770_v40 = vcvt.s32.f32 %v768_v7 }
 0x25d   :  { %vm625_vm0 = vcmp.eq.f32.partialorder %v6369_v36, %v609_v57  ;;  %v6486_v59 = vcvt.s32.f32 %v825_v53  ;;  %v839_v0 = vshra.s32 %v6483_v54, 16  ;;  %v712_v53 = vand.u32 65535, %v6413_v60 }
 0x25e   :  { %v6492_v2 = vsel %vm625_vm0, %v6373_v38, 128  ;;  %v698_v57 = vand.u32 65535, %v6406_v56  ;;  %v824_v32 = vand.u32 65535, %v6476_v48 }
 0x25f   :  { %828 = vmin.xlane.f32.xlu1 %v6486_v59  ;;  %814 = vmin.xlane.f32.xlu0 %v6488_v61  ;;  %v853_v5 = vshra.s32 %v6492_v2, 16  ;;  %v6499_v9 = vcvt.s32.f32 %v839_v0  ;;  %v852_v48 = vand.u32 65535, %v6492_v2 }
 0x261   :  { %v6497_v8 = vcvt.s32.f32 %v853_v5  ;;  %v700_v5 = vcvt.s32.f32 %v698_v57 }
 0x263   :  { %856 = vmin.xlane.f32.xlu1 %v6497_v8  ;;  %842 = vmin.xlane.f32.xlu0 %v6499_v9 }
 0x2cc   :  { %v6504_v16 = vpop.xlane.xlu1 %660 }
 0x2cd   :  { %vm662_vm1 = vcmp.eq.f32.partialorder %v6382_v44, %v6504_v16 }
 0x2ce   :  { %v663_v30 = vsel %vm662_vm1, %v658_v19, inf  ;;  %v726_v19 = vand.u32 65535, %v6419_v1  ;;  %v754_v1 = vand.u32 65535, %v6435_v11  ;;  %v782_v11 = vand.u32 65535, %v6451_v22 }
 0x2cf   :  { %664 = vmin.xlane.f32.xlu1 %v663_v30  ;;  %v810_v22 = vand.u32 65535, %v6467_v39  ;;  %v838_v39 = vand.u32 65535, %v6483_v54 }
 0x2d0   :  { %v6510_v34 = vpop.xlane.xlu1 %688  ;;  %v6512_v37 = vpop.xlane.xlu0 %646  ;;  %v728_v30 = vcvt.s32.f32 %v726_v19  ;;  %v784_v57 = vcvt.s32.f32 %v782_v11 }
 0x2d1   :  { %vm690_vm2 = vcmp.eq.f32.partialorder %v6394_v50, %v6510_v34  ;;  %vm648_vm3 = vcmp.eq.f32.partialorder %v6396_v51, %v6512_v37  ;;  %v714_v51 = vcvt.s32.f32 %v712_v53  ;;  %v798_v53 = vcvt.s32.f32 %v796_v17 }
 0x2d2   :  { %v691_v45 = vsel %vm690_vm2, %v686_v41, inf  ;;  %v649_v46 = vsel %vm648_vm3, %v644_v47, inf  ;;  %v812_v12 = vcvt.s32.f32 %v810_v22  ;;  %v695_v2 = vcvt.f32.s32 %v6510_v34 }
 0x2d3   :  { %692 = vmin.xlane.f32.xlu1 %v691_v45  ;;  %650 = vmin.xlane.f32.xlu0 %v649_v46  ;;  %v756_v45 = vcvt.s32.f32 %v754_v1  ;;  %v653_v1 = vcvt.f32.s32 %v6512_v37 }
 0x2d4   :  { %v6519_v44 = vpop.xlane.xlu0 %674 }
 0x2d5   :  { %vm676_vm4 = vcmp.eq.f32.partialorder %v6409_v58, %v6519_v44 }
 0x2d6   :  { %v677_v52 = vsel %vm676_vm4, %v672_v49, inf }
 0x2d7   :  { %678 = vmin.xlane.f32.xlu0 %v677_v52 }
 0x2d8   :  { %v6525_v50 = vpop.xlane.xlu1 %716  ;;  %v6527_v0 = vpop.xlane.xlu0 %702 }
 0x2d9   :  { %vm718_vm5 = vcmp.eq.f32.partialorder %v6422_v3, %v6525_v50  ;;  %vm704_vm6 = vcmp.eq.f32.partialorder %v6424_v4, %v6527_v0 }
 0x2da   :  { %v719_v56 = vsel %vm718_vm5, %v714_v51, inf  ;;  %v705_v58 = vsel %vm704_vm6, %v700_v5, inf  ;;  %v826_v5 = vcvt.s32.f32 %v824_v32 }
 0x2db   :  { %720 = vmin.xlane.f32.xlu1 %v719_v56  ;;  %706 = vmin.xlane.f32.xlu0 %v705_v58  ;;  %v854_v58 = vcvt.s32.f32 %v852_v48 }
 0x2dc   :  { %v6535_v60 = vpop.xlane.xlu1 %744  ;;  %v6537_v20 = vpop.xlane.xlu0 %730 }
 0x2dd   :  { %vm746_vm7 = vcmp.eq.f32.partialorder %v6438_v13, %v6535_v60  ;;  %vm732_vm8 = vcmp.eq.f32.partialorder %v6440_v15, %v6537_v20 }
 0x2de   :  { %v747_v3 = vsel %vm746_vm7, %v742_v24, inf  ;;  %v733_v4 = vsel %vm732_vm8, %v728_v30, inf  ;;  %v840_v24 = vcvt.s32.f32 %v838_v39 }
 0x2df   :  { %748 = vmin.xlane.f32.xlu1 %v747_v3  ;;  %734 = vmin.xlane.f32.xlu0 %v733_v4 }
 0x2e0   :  { %v6545_v41 = vpop.xlane.xlu1 %772  ;;  %v6547_v47 = vpop.xlane.xlu0 %758 }
 0x2e1   :  { %vm774_vm9 = vcmp.eq.f32.partialorder %v6454_v26, %v6545_v41  ;;  %vm760_vm10 = vcmp.eq.f32.partialorder %v6456_v28, %v6547_v47 }
 0x2e2   :  { %v775_v13 = vsel %vm774_vm9, %v770_v40, inf  ;;  %v761_v15 = vsel %vm760_vm10, %v756_v45, inf  ;;  %v696_v40 = vshll.u32 %v695_v2, 16 }
 0x2e3   :  { %776 = vmin.xlane.f32.xlu1 %v775_v13  ;;  %762 = vmin.xlane.f32.xlu0 %v761_v15 }
 0x2e4   :  { %v6555_v46 = vpop.xlane.xlu1 %800  ;;  %v6557_v49 = vpop.xlane.xlu0 %786 }
 0x2e5   :  { %vm802_vm11 = vcmp.eq.f32.partialorder %v6470_v42, %v6555_v46  ;;  %vm788_vm12 = vcmp.eq.f32.partialorder %v6472_v43, %v6557_v49 }
 0x2e6   :  { %v803_v26 = vsel %vm802_vm11, %v798_v53, inf  ;;  %v789_v28 = vsel %vm788_vm12, %v784_v57, inf  ;;  %v723_v53 = vcvt.f32.s32 %v6525_v50 }
 0x2e7   :  { %804 = vmin.xlane.f32.xlu1 %v803_v26  ;;  %790 = vmin.xlane.f32.xlu0 %v789_v28 }
 0x2e8   :  { %v6565_v52 = vpop.xlane.xlu1 %828  ;;  %v6567_v51 = vpop.xlane.xlu0 %814  ;;  %v724_v50 = vshll.u32 %v723_v53, 16 }
 0x2e9   :  { %vm830_vm13 = vcmp.eq.f32.partialorder %v6486_v59, %v6565_v52  ;;  %vm816_vm14 = vcmp.eq.f32.partialorder %v6488_v61, %v6567_v51  ;;  %v667_v61 = vcvt.f32.s32 %v6504_v16 }
 0x2ea   :  { %v831_v42 = vsel %vm830_vm13, %v826_v5, inf  ;;  %v817_v43 = vsel %vm816_vm14, %v812_v12, inf  ;;  %v751_v5 = vcvt.f32.s32 %v6535_v60  ;;  %v779_v60 = vcvt.f32.s32 %v6545_v41 }
 0x2eb   :  { %832 = vmin.xlane.f32.xlu1 %v831_v42  ;;  %818 = vmin.xlane.f32.xlu0 %v817_v43  ;;  %v668_v7 = vshll.u32 %v667_v61, 16 }
 0x2ec   :  { %v6575_v19 = vpop.xlane.xlu1 %856  ;;  %v6577_v56 = vpop.xlane.xlu0 %842  ;;  %v780_v41 = vshll.u32 %v779_v60, 16 }
 0x2ed   :  { %vm858_vm15 = vcmp.eq.f32.partialorder %v6497_v8, %v6575_v19  ;;  %vm844_vm0 = vcmp.eq.f32.partialorder %v6499_v9, %v6577_v56  ;;  %v681_v8 = vcvt.f32.s32 %v6519_v44  ;;  %v654_v9 = vshll.u32 %v653_v1, 16 }
 0x2ee   :  { %v859_v54 = vsel %vm858_vm15, %v854_v58, inf  ;;  %v845_v59 = vsel %vm844_vm0, %v840_v24, inf  ;;  %v709_v44 = vcvt.f32.s32 %v6527_v0  ;;  %v737_v0 = vcvt.f32.s32 %v6537_v20 }
 0x2ef   :  { %860 = vmin.xlane.f32.xlu1 %v859_v54  ;;  %846 = vmin.xlane.f32.xlu0 %v845_v59  ;;  %v682_v37 = vshll.u32 %v681_v8, 16  ;;  %v752_v59 = vshll.u32 %v751_v5, 16  ;;  %v765_v20 = vcvt.f32.s32 %v6547_v47 }
 0x2f0   :  { %v710_v39 = vshll.u32 %v709_v44, 16  ;;  %v738_v61 = vshll.u32 %v737_v0, 16  ;;  %v835_v44 = vcvt.f32.s32 %v6565_v52 }
 0x2f1   :  { %v766_v47 = vshll.u32 %v765_v20, 16 }
 0x2f2   :  { %v836_v52 = vshll.u32 %v835_v44, 16 }
 0x358   :  { %v665_v30 = vpop.xlane.xlu1 %664 }
 0x359   :  { %v666_v3 = vcvt.f32.s32 %v665_v30 }
 0x35b   :  { %v669_v4 = vadd.s32 %v668_v7, %v666_v3 }
 0x35c   :  { %v693_v45 = vpop.xlane.xlu1 %692  ;;  %v651_v17 = vpop.xlane.xlu0 %650 }
 0x35d   :  { %v694_v11 = vcvt.f32.s32 %v693_v45  ;;  %v652_v13 = vcvt.f32.s32 %v651_v17  ;;  %vm867_vm1 = vcmp.eq.s32.totalorder %v6373_v38, %v669_v4  ;;  %v807_v45 = vcvt.f32.s32 %v6555_v46 }
 0x35e   :  { %v6589_v16 = vsel %vm867_vm1, -inf, %v6325_v55  ;;  %v793_v17 = vcvt.f32.s32 %v6557_v49 }
 0x35f   :  { %v697_v34 = vadd.s32 %v696_v40, %v694_v11  ;;  %v655_v15 = vadd.s32 %v654_v9, %v652_v13  ;;  %900 = vmax.xlane.f32.xlu1 %v6589_v16  ;;  %v808_v46 = vshll.u32 %v807_v45, 16 }
 0x360   :  { %v679_v57 = vpop.xlane.xlu0 %678  ;;  %v794_v49 = vshll.u32 %v793_v17, 16 }
 0x361   :  { %v680_v32 = vcvt.f32.s32 %v679_v57  ;;  %vm869_vm2 = vcmp.eq.s32.totalorder %v6373_v38, %v697_v34  ;;  %vm866_vm3 = vcmp.eq.s32.totalorder %v6373_v38, %v655_v15 }
 0x362   :  { %v6597_v22 = vsel %vm869_vm2, -inf, %v6330_v63  ;;  %v6600_v26 = vsel %vm866_vm3, -inf, %v6328_v62 }
 0x363   :  { %v683_v28 = vadd.s32 %v682_v37, %v680_v32  ;;  %904 = vmax.xlane.f32.xlu1 %v6597_v22  ;;  %898 = vmax.xlane.f32.xlu0 %v6600_v26  ;;  %v821_v32 = vcvt.f32.s32 %v6567_v51 }
 0x364   :  { %v721_v12 = vpop.xlane.xlu1 %720  ;;  %v707_v48 = vpop.xlane.xlu0 %706 }
 0x365   :  { %v722_v42 = vcvt.f32.s32 %v721_v12  ;;  %v708_v43 = vcvt.f32.s32 %v707_v48  ;;  %vm868_vm4 = vcmp.eq.s32.totalorder %v6373_v38, %v683_v28  ;;  %v822_v51 = vshll.u32 %v821_v32, 16 }
 0x366   :  { %v6608_v58 = vsel %vm868_vm4, -inf, %v6334_v6 }
 0x367   :  { %v725_v24 = vadd.s32 %v724_v50, %v722_v42  ;;  %v711_v54 = vadd.s32 %v710_v39, %v708_v43  ;;  %902 = vmax.xlane.f32.xlu0 %v6608_v58  ;;  %v863_v43 = vcvt.f32.s32 %v6575_v19 }
 0x368   :  { %v749_v2 = vpop.xlane.xlu1 %748  ;;  %v735_v30 = vpop.xlane.xlu0 %734 }
 0x369   :  { %v750_v7 = vcvt.f32.s32 %v749_v2  ;;  %v736_v1 = vcvt.f32.s32 %v735_v30  ;;  %vm871_vm5 = vcmp.eq.s32.totalorder %v6373_v38, %v725_v24  ;;  %vm870_vm6 = vcmp.eq.s32.totalorder %v6373_v38, %v711_v54 }
 0x36a   :  { %v6616_v3 = vsel %vm871_vm5, -inf, %v6339_v14  ;;  %v6619_v4 = vsel %vm870_vm6, -inf, %v6336_v10  ;;  %v849_v24 = vcvt.f32.s32 %v6577_v56  ;;  %v864_v19 = vshll.u32 %v863_v43, 16 }
 0x36b   :  { %v753_v40 = vadd.s32 %v752_v59, %v750_v7  ;;  %v739_v8 = vadd.s32 %v738_v61, %v736_v1  ;;  %908 = vmax.xlane.f32.xlu1 %v6616_v3  ;;  %906 = vmax.xlane.f32.xlu0 %v6619_v4 }
 0x36c   :  { %v777_v9 = vpop.xlane.xlu1 %776  ;;  %v763_v11 = vpop.xlane.xlu0 %762  ;;  %v850_v56 = vshll.u32 %v849_v24, 16 }
 0x36d   :  { %v778_v13 = vcvt.f32.s32 %v777_v9  ;;  %v764_v34 = vcvt.f32.s32 %v763_v11  ;;  %vm873_vm7 = vcmp.eq.s32.totalorder %v6373_v38, %v753_v40  ;;  %vm872_vm8 = vcmp.eq.s32.totalorder %v6373_v38, %v739_v8 }
 0x36e   :  { %v6628_v15 = vsel %vm873_vm7, -inf, %v6345_v21  ;;  %v6631_v37 = vsel %vm872_vm8, -inf, %v6342_v18 }
 0x36f   :  { %v781_v53 = vadd.s32 %v780_v41, %v778_v13  ;;  %v767_v57 = vadd.s32 %v766_v47, %v764_v34  ;;  %912 = vmax.xlane.f32.xlu1 %v6628_v15  ;;  %910 = vmax.xlane.f32.xlu0 %v6631_v37 }
 0x370   :  { %v805_v28 = vpop.xlane.xlu1 %804  ;;  %v791_v50 = vpop.xlane.xlu0 %790 }
 0x371   :  { %v806_v5 = vcvt.f32.s32 %v805_v28  ;;  %v792_v0 = vcvt.f32.s32 %v791_v50  ;;  %vm875_vm9 = vcmp.eq.s32.totalorder %v6373_v38, %v781_v53  ;;  %vm874_vm10 = vcmp.eq.s32.totalorder %v6373_v38, %v767_v57 }
 0x372   :  { %v6640_v12 = vsel %vm875_vm9, -inf, %v6351_v25  ;;  %v6643_v48 = vsel %vm874_vm10, -inf, %v6348_v23 }
 0x373   :  { %v809_v39 = vadd.s32 %v808_v46, %v806_v5  ;;  %v795_v42 = vadd.s32 %v794_v49, %v792_v0  ;;  %916 = vmax.xlane.f32.xlu1 %v6640_v12  ;;  %914 = vmax.xlane.f32.xlu0 %v6643_v48 }
 0x374   :  { %v833_v54 = vpop.xlane.xlu1 %832  ;;  %v819_v59 = vpop.xlane.xlu0 %818 }
 0x375   :  { %v834_v61 = vcvt.f32.s32 %v833_v54  ;;  %v820_v60 = vcvt.f32.s32 %v819_v59  ;;  %vm877_vm11 = vcmp.eq.s32.totalorder %v6373_v38, %v809_v39  ;;  %vm876_vm12 = vcmp.eq.s32.totalorder %v6373_v38, %v795_v42 }
 0x376   :  { %v6652_v20 = vsel %vm877_vm11, -inf, %v6357_v29  ;;  %v6655_v2 = vsel %vm876_vm12, -inf, %v6354_v27 }
 0x377   :  { %v837_v30 = vadd.s32 %v836_v52, %v834_v61  ;;  %v823_v7 = vadd.s32 %v822_v51, %v820_v60  ;;  %920 = vmax.xlane.f32.xlu1 %v6652_v20  ;;  %918 = vmax.xlane.f32.xlu0 %v6655_v2 }
 0x378   :  { %v861_v1 = vpop.xlane.xlu1 %860  ;;  %v847_v40 = vpop.xlane.xlu0 %846 }
 0x379   :  { %v862_v8 = vcvt.f32.s32 %v861_v1  ;;  %v848_v41 = vcvt.f32.s32 %v847_v40  ;;  %vm879_vm13 = vcmp.eq.s32.totalorder %v6373_v38, %v837_v30  ;;  %vm878_vm14 = vcmp.eq.s32.totalorder %v6373_v38, %v823_v7 }
 0x37a   :  { %v6662_v47 = vsel %vm879_vm13, -inf, %v6363_v33  ;;  %v6665_v45 = vsel %vm878_vm14, -inf, %v6360_v31 }
 0x37b   :  { %v865_v17 = vadd.s32 %v864_v19, %v862_v8  ;;  %v851_v9 = vadd.s32 %v850_v56, %v848_v41  ;;  %924 = vmax.xlane.f32.xlu1 %v6662_v47  ;;  %922 = vmax.xlane.f32.xlu0 %v6665_v45 }
 0x37d   :  { %vm881_vm15 = vcmp.eq.s32.totalorder %v6373_v38, %v865_v17  ;;  %vm880_vm0 = vcmp.eq.s32.totalorder %v6373_v38, %v851_v9 }
 0x37e   :  { %v6672_v11 = vsel %vm881_vm15, -inf, %v6369_v36  ;;  %v6675_v13 = vsel %vm880_vm0, -inf, %v6366_v35 }
 0x37f   :  { %928 = vmax.xlane.f32.xlu1 %v6672_v11  ;;  %926 = vmax.xlane.f32.xlu0 %v6675_v13 }
 0x3e8   :  { %v901_v34 = vpop.xlane.xlu1 %900 }
 0x3e9   :  { %vm931_vm1 = vcmp.eq.f32.partialorder %v6589_v16, %v901_v34 }
 0x3ea   :  { %v6681_v53 = vsel %vm931_vm1, %v6373_v38, 128 }
 0x3eb   :  { %v977_v57 = vshra.s32 %v6681_v53, 16 }
 0x3ec   :  { %v905_v46 = vpop.xlane.xlu1 %904  ;;  %v899_v49 = vpop.xlane.xlu0 %898 }
 0x3ed   :  { %vm933_vm2 = vcmp.eq.f32.partialorder %v6597_v22, %v905_v46  ;;  %vm930_vm3 = vcmp.eq.f32.partialorder %v6600_v26, %v899_v49  ;;  %v6686_v44 = vcvt.s32.f32 %v977_v57 }
 0x3ee   :  { %v6689_v32 = vsel %vm933_vm2, %v6373_v38, 128  ;;  %v6692_v28 = vsel %vm930_vm3, %v6373_v38, 128 }
 0x3ef   :  { %980 = vmin.xlane.f32.xlu1 %v6686_v44  ;;  %v1005_v50 = vshra.s32 %v6689_v32, 16  ;;  %v963_v5 = vshra.s32 %v6692_v28, 16  ;;  %v1004_v23 = vand.u32 65535, %v6689_v32  ;;  %v962_v25 = vand.u32 65535, %v6692_v28 }
 0x3f0   :  { %v903_v0 = vpop.xlane.xlu0 %902 }
 0x3f1   :  { %vm932_vm4 = vcmp.eq.f32.partialorder %v6608_v58, %v903_v0  ;;  %v6698_v39 = vcvt.s32.f32 %v1005_v50  ;;  %v6700_v42 = vcvt.s32.f32 %v963_v5  ;;  %v1006_v21 = vcvt.s32.f32 %v1004_v23 }
 0x3f2   :  { %v6703_v52 = vsel %vm932_vm4, %v6373_v38, 128  ;;  %v964_v10 = vcvt.s32.f32 %v962_v25 }
 0x3f3   :  { %1008 = vmin.xlane.f32.xlu1 %v6698_v39  ;;  %966 = vmin.xlane.f32.xlu0 %v6700_v42  ;;  %v991_v51 = vshra.s32 %v6703_v52, 16 }
 0x3f4   :  { %v909_v43 = vpop.xlane.xlu1 %908  ;;  %v907_v24 = vpop.xlane.xlu0 %906 }
 0x3f5   :  { %vm935_vm5 = vcmp.eq.f32.partialorder %v6616_v3, %v909_v43  ;;  %vm934_vm6 = vcmp.eq.f32.partialorder %v6619_v4, %v907_v24  ;;  %v6710_v54 = vcvt.s32.f32 %v991_v51 }
 0x3f6   :  { %v6713_v59 = vsel %vm935_vm5, %v6373_v38, 128  ;;  %v6716_v61 = vsel %vm934_vm6, %v6373_v38, 128 }
 0x3f7   :  { %994 = vmin.xlane.f32.xlu0 %v6710_v54  ;;  %v1033_v60 = vshra.s32 %v6713_v59, 16  ;;  %v1019_v30 = vshra.s32 %v6716_v61, 16  ;;  %v1018_v23 = vand.u32 65535, %v6716_v61 }
 0x3f8   :  { %v913_v7 = vpop.xlane.xlu1 %912  ;;  %v911_v19 = vpop.xlane.xlu0 %910 }
 0x3f9   :  { %vm937_vm7 = vcmp.eq.f32.partialorder %v6628_v15, %v913_v7  ;;  %vm936_vm8 = vcmp.eq.f32.partialorder %v6631_v37, %v911_v19  ;;  %v6723_v56 = vcvt.s32.f32 %v1033_v60  ;;  %v6725_v1 = vcvt.s32.f32 %v1019_v30 }
 0x3fa   :  { %v6728_v40 = vsel %vm937_vm7, %v6373_v38, 128  ;;  %v6731_v8 = vsel %vm936_vm8, %v6373_v38, 128 }
 0x3fb   :  { %1036 = vmin.xlane.f32.xlu1 %v6723_v56  ;;  %1022 = vmin.xlane.f32.xlu0 %v6725_v1  ;;  %v1061_v41 = vshra.s32 %v6728_v40, 16  ;;  %v1047_v17 = vshra.s32 %v6731_v8, 16 }
 0x3fc   :  { %v917_v9 = vpop.xlane.xlu1 %916  ;;  %v915_v34 = vpop.xlane.xlu0 %914 }
 0x3fd   :  { %vm939_vm9 = vcmp.eq.f32.partialorder %v6640_v12, %v917_v9  ;;  %vm938_vm10 = vcmp.eq.f32.partialorder %v6643_v48, %v915_v34  ;;  %v6739_v57 = vcvt.s32.f32 %v1061_v41  ;;  %v6741_v46 = vcvt.s32.f32 %v1047_v17 }
 0x3fe   :  { %v6744_v49 = vsel %vm939_vm9, %v6373_v38, 128  ;;  %v6747_v50 = vsel %vm938_vm10, %v6373_v38, 128 }
 0x3ff   :  { %1064 = vmin.xlane.f32.xlu1 %v6739_v57  ;;  %1050 = vmin.xlane.f32.xlu0 %v6741_v46  ;;  %v1089_v5 = vshra.s32 %v6744_v49, 16  ;;  %v1075_v0 = vshra.s32 %v6747_v50, 16 }
 0x400   :  { %v921_v51 = vpop.xlane.xlu1 %920  ;;  %v919_v43 = vpop.xlane.xlu0 %918 }
 0x401   :  { %vm941_vm11 = vcmp.eq.f32.partialorder %v6652_v20, %v921_v51  ;;  %vm940_vm12 = vcmp.eq.f32.partialorder %v6655_v2, %v919_v43  ;;  %v6755_v24 = vcvt.s32.f32 %v1089_v5  ;;  %v6757_v60 = vcvt.s32.f32 %v1075_v0 }
 0x402   :  { %v6760_v30 = vsel %vm941_vm11, %v6373_v38, 128  ;;  %v6763_v7 = vsel %vm940_vm12, %v6373_v38, 128 }
 0x403   :  { %1092 = vmin.xlane.f32.xlu1 %v6755_v24  ;;  %1078 = vmin.xlane.f32.xlu0 %v6757_v60  ;;  %v1117_v19 = vshra.s32 %v6760_v30, 16  ;;  %v1103_v41 = vshra.s32 %v6763_v7, 16 }
 0x404   :  { %v925_v17 = vpop.xlane.xlu1 %924  ;;  %v923_v9 = vpop.xlane.xlu0 %922 }
 0x405   :  { %vm943_vm13 = vcmp.eq.f32.partialorder %v6662_v47, %v925_v17  ;;  %vm942_vm14 = vcmp.eq.f32.partialorder %v6665_v45, %v923_v9  ;;  %v6771_v34 = vcvt.s32.f32 %v1117_v19  ;;  %v6773_v5 = vcvt.s32.f32 %v1103_v41 }
 0x406   :  { %v6776_v0 = vsel %vm943_vm13, %v6373_v38, 128  ;;  %v6779_v51 = vsel %vm942_vm14, %v6373_v38, 128 }
 0x407   :  { %1120 = vmin.xlane.f32.xlu1 %v6771_v34  ;;  %1106 = vmin.xlane.f32.xlu0 %v6773_v5  ;;  %v1145_v43 = vshra.s32 %v6776_v0, 16  ;;  %v1131_v17 = vshra.s32 %v6779_v51, 16 }
 0x408   :  { %v929_v35 = vpop.xlane.xlu1 %928  ;;  %v927_v9 = vpop.xlane.xlu0 %926 }
 0x409   :  { %vm945_vm15 = vcmp.eq.f32.partialorder %v6672_v11, %v929_v35  ;;  %vm944_vm0 = vcmp.eq.f32.partialorder %v6675_v13, %v927_v9  ;;  %v6787_v19 = vcvt.s32.f32 %v1145_v43  ;;  %v6789_v41 = vcvt.s32.f32 %v1131_v17 }
 0x40a   :  { %v6792_v36 = vsel %vm945_vm15, %v6373_v38, 128  ;;  %v6795_v31 = vsel %vm944_vm0, %v6373_v38, 128  ;;  %v976_v17 = vand.u32 65535, %v6681_v53  ;;  %v990_v53 = vand.u32 65535, %v6703_v52 }
 0x40b   :  { %1148 = vmin.xlane.f32.xlu1 %v6787_v19  ;;  %1134 = vmin.xlane.f32.xlu0 %v6789_v41  ;;  %v1173_v33 = vshra.s32 %v6792_v36, 16  ;;  %v1159_v35 = vshra.s32 %v6795_v31, 16 }
 0x40c   :  { %v978_v29 = vcvt.s32.f32 %v976_v17  ;;  %v1032_v17 = vand.u32 65535, %v6713_v59 }
 0x40d   :  { %v6801_v27 = vcvt.s32.f32 %v1173_v33  ;;  %v6803_v43 = vcvt.s32.f32 %v1159_v35 }
 0x40f   :  { %1176 = vmin.xlane.f32.xlu1 %v6801_v27  ;;  %1162 = vmin.xlane.f32.xlu0 %v6803_v43 }
 0x478   :  { %v6808_v9 = vpop.xlane.xlu1 %980 }
 0x479   :  { %vm982_vm1 = vcmp.eq.f32.partialorder %v6686_v44, %v6808_v9  ;;  %v992_v44 = vcvt.s32.f32 %v990_v53 }
 0x47a   :  { %v983_v33 = vsel %vm982_vm1, %v978_v29, inf }
 0x47b   :  { %984 = vmin.xlane.f32.xlu1 %v983_v33  ;;  %v1046_v33 = vand.u32 65535, %v6731_v8  ;;  %v1074_v8 = vand.u32 65535, %v6747_v50  ;;  %v1102_v50 = vand.u32 65535, %v6763_v7  ;;  %v1130_v7 = vand.u32 65535, %v6779_v51 }
 0x47c   :  { %v6814_v35 = vpop.xlane.xlu1 %1008  ;;  %v6816_v18 = vpop.xlane.xlu0 %966  ;;  %v1158_v51 = vand.u32 65535, %v6795_v31 }
 0x47d   :  { %vm1010_vm2 = vcmp.eq.f32.partialorder %v6698_v39, %v6814_v35  ;;  %vm968_vm3 = vcmp.eq.f32.partialorder %v6700_v42, %v6816_v18  ;;  %v1060_v42 = vand.u32 65535, %v6728_v40  ;;  %v1088_v40 = vand.u32 65535, %v6744_v49 }
 0x47e   :  { %v1011_v32 = vsel %vm1010_vm2, %v1006_v21, inf  ;;  %v969_v28 = vsel %vm968_vm3, %v964_v10, inf  ;;  %v1034_v21 = vcvt.s32.f32 %v1032_v17  ;;  %v1020_v10 = vcvt.s32.f32 %v1018_v23 }
 0x47f   :  { %1012 = vmin.xlane.f32.xlu1 %v1011_v32  ;;  %970 = vmin.xlane.f32.xlu0 %v969_v28  ;;  %v1062_v32 = vcvt.s32.f32 %v1060_v42  ;;  %v1048_v28 = vcvt.s32.f32 %v1046_v33  ;;  %v1090_v23 = vcvt.s32.f32 %v1088_v40  ;;  %v1116_v49 = vand.u32 65535, %v6760_v30 }
 0x480   :  { %v6823_v29 = vpop.xlane.xlu0 %994  ;;  %v1104_v33 = vcvt.s32.f32 %v1102_v50  ;;  %v1144_v30 = vand.u32 65535, %v6776_v0  ;;  %v1172_v0 = vand.u32 65535, %v6792_v36 }
 0x481   :  { %vm996_vm4 = vcmp.eq.f32.partialorder %v6710_v54, %v6823_v29  ;;  %v1118_v42 = vcvt.s32.f32 %v1116_v49  ;;  %v973_v49 = vcvt.f32.s32 %v6816_v18 }
 0x482   :  { %v997_v25 = vsel %vm996_vm4, %v992_v44, inf }
 0x483   :  { %998 = vmin.xlane.f32.xlu0 %v997_v25  ;;  %v1076_v25 = vcvt.s32.f32 %v1074_v8 }
 0x484   :  { %v6829_v39 = vpop.xlane.xlu1 %1036  ;;  %v6831_v52 = vpop.xlane.xlu0 %1022 }
 0x485   :  { %vm1038_vm5 = vcmp.eq.f32.partialorder %v6723_v56, %v6829_v39  ;;  %vm1024_vm6 = vcmp.eq.f32.partialorder %v6725_v1, %v6831_v52 }
 0x486   :  { %v1039_v59 = vsel %vm1038_vm5, %v1034_v21, inf  ;;  %v1025_v54 = vsel %vm1024_vm6, %v1020_v10, inf }
 0x487   :  { %1040 = vmin.xlane.f32.xlu1 %v1039_v59  ;;  %1026 = vmin.xlane.f32.xlu0 %v1025_v54 }
 0x488   :  { %v6839_v61 = vpop.xlane.xlu1 %1064  ;;  %v6841_v53 = vpop.xlane.xlu0 %1050 }
 0x489   :  { %vm1066_vm7 = vcmp.eq.f32.partialorder %v6739_v57, %v6839_v61  ;;  %vm1052_vm8 = vcmp.eq.f32.partialorder %v6741_v46, %v6841_v53 }
 0x48a   :  { %v1067_v56 = vsel %vm1066_vm7, %v1062_v32, inf  ;;  %v1053_v1 = vsel %vm1052_vm8, %v1048_v28, inf  ;;  %v1146_v32 = vcvt.s32.f32 %v1144_v30  ;;  %v1132_v28 = vcvt.s32.f32 %v1130_v7 }
 0x48b   :  { %1068 = vmin.xlane.f32.xlu1 %v1067_v56  ;;  %1054 = vmin.xlane.f32.xlu0 %v1053_v1  ;;  %v1174_v56 = vcvt.s32.f32 %v1172_v0  ;;  %v1160_v1 = vcvt.s32.f32 %v1158_v51 }
 0x48c   :  { %v6849_v44 = vpop.xlane.xlu1 %1092  ;;  %v6851_v17 = vpop.xlane.xlu0 %1078 }
 0x48d   :  { %vm1094_vm9 = vcmp.eq.f32.partialorder %v6755_v24, %v6849_v44  ;;  %vm1080_vm10 = vcmp.eq.f32.partialorder %v6757_v60, %v6851_v17 }
 0x48e   :  { %v1095_v57 = vsel %vm1094_vm9, %v1090_v23, inf  ;;  %v1081_v46 = vsel %vm1080_vm10, %v1076_v25, inf }
 0x48f   :  { %1096 = vmin.xlane.f32.xlu1 %v1095_v57  ;;  %1082 = vmin.xlane.f32.xlu0 %v1081_v46 }
 0x490   :  { %v6859_v21 = vpop.xlane.xlu1 %1120  ;;  %v6861_v10 = vpop.xlane.xlu0 %1106 }
 0x491   :  { %vm1122_vm11 = vcmp.eq.f32.partialorder %v6771_v34, %v6859_v21  ;;  %vm1108_vm12 = vcmp.eq.f32.partialorder %v6773_v5, %v6861_v10 }
 0x492   :  { %v1123_v24 = vsel %vm1122_vm11, %v1118_v42, inf  ;;  %v1109_v60 = vsel %vm1108_vm12, %v1104_v33, inf }
 0x493   :  { %1124 = vmin.xlane.f32.xlu1 %v1123_v24  ;;  %1110 = vmin.xlane.f32.xlu0 %v1109_v60  ;;  %v1043_v60 = vcvt.f32.s32 %v6829_v39 }
 0x494   :  { %v6869_v59 = vpop.xlane.xlu1 %1148  ;;  %v6871_v54 = vpop.xlane.xlu0 %1134 }
 0x495   :  { %vm1150_vm13 = vcmp.eq.f32.partialorder %v6787_v19, %v6869_v59  ;;  %vm1136_vm14 = vcmp.eq.f32.partialorder %v6789_v41, %v6871_v54  ;;  %v987_v19 = vcvt.f32.s32 %v6808_v9  ;;  %v1015_v41 = vcvt.f32.s32 %v6814_v35 }
 0x496   :  { %v1151_v34 = vsel %vm1150_vm13, %v1146_v32, inf  ;;  %v1137_v5 = vsel %vm1136_vm14, %v1132_v28, inf  ;;  %v1044_v39 = vshll.u32 %v1043_v60, 16 }
 0x497   :  { %1152 = vmin.xlane.f32.xlu1 %v1151_v34  ;;  %1138 = vmin.xlane.f32.xlu0 %v1137_v5  ;;  %v988_v25 = vshll.u32 %v987_v19, 16  ;;  %v1016_v46 = vshll.u32 %v1015_v41, 16  ;;  %v1071_v34 = vcvt.f32.s32 %v6839_v61  ;;  %v1099_v61 = vcvt.f32.s32 %v6849_v44 }
 0x498   :  { %v6879_v40 = vpop.xlane.xlu1 %1176  ;;  %v6881_v8 = vpop.xlane.xlu0 %1162 }
 0x499   :  { %vm1178_vm15 = vcmp.eq.f32.partialorder %v6801_v27, %v6879_v40  ;;  %vm1164_vm0 = vcmp.eq.f32.partialorder %v6803_v43, %v6881_v8  ;;  %v1001_v27 = vcvt.f32.s32 %v6823_v29  ;;  %v974_v43 = vshll.u32 %v973_v49, 16 }
 0x49a   :  { %v1179_v31 = vsel %vm1178_vm15, %v1174_v56, inf  ;;  %v1165_v36 = vsel %vm1164_vm0, %v1160_v1, inf  ;;  %v1029_v29 = vcvt.f32.s32 %v6831_v52  ;;  %v1057_v52 = vcvt.f32.s32 %v6841_v53 }
 0x49b   :  { %1180 = vmin.xlane.f32.xlu1 %v1179_v31  ;;  %1166 = vmin.xlane.f32.xlu0 %v1165_v36  ;;  %v1002_v18 = vshll.u32 %v1001_v27, 16  ;;  %v1072_v41 = vshll.u32 %v1071_v34, 16  ;;  %v1085_v53 = vcvt.f32.s32 %v6851_v17  ;;  %v1100_v44 = vshll.u32 %v1099_v61, 16 }
 0x49c   :  { %v1030_v1 = vshll.u32 %v1029_v29, 16  ;;  %v1141_v29 = vcvt.f32.s32 %v6871_v54 }
 0x49d   :  { %v1086_v17 = vshll.u32 %v1085_v53, 16 }
 0x49e   :  { %v1142_v54 = vshll.u32 %v1141_v29, 16 }
 0x504   :  { %v985_v23 = vpop.xlane.xlu1 %984 }
 0x505   :  { %v986_v50 = vcvt.f32.s32 %v985_v23  ;;  %v1058_v23 = vshll.u32 %v1057_v52, 16 }
 0x507   :  { %v989_v57 = vadd.s32 %v988_v25, %v986_v50 }
 0x508   :  { %v1013_v42 = vpop.xlane.xlu1 %1012  ;;  %v971_v33 = vpop.xlane.xlu0 %970 }
 0x509   :  { %v1014_v30 = vcvt.f32.s32 %v1013_v42  ;;  %v972_v7 = vcvt.f32.s32 %v971_v33  ;;  %vm1187_vm1 = vcmp.eq.s32.totalorder %v6373_v38, %v989_v57  ;;  %v1127_v33 = vcvt.f32.s32 %v6859_v21 }
 0x50a   :  { %v6893_v9 = vsel %vm1187_vm1, -inf, %v6589_v16 }
 0x50b   :  { %v1017_v35 = vadd.s32 %v1016_v46, %v1014_v30  ;;  %v975_v24 = vadd.s32 %v974_v43, %v972_v7  ;;  %1220 = vmax.xlane.f32.xlu1 %v6893_v9  ;;  %v1113_v43 = vcvt.f32.s32 %v6861_v10  ;;  %v1128_v21 = vshll.u32 %v1127_v33, 16 }
 0x50c   :  { %v999_v32 = vpop.xlane.xlu0 %998 }
 0x50d   :  { %v1000_v28 = vcvt.f32.s32 %v999_v32  ;;  %vm1189_vm2 = vcmp.eq.s32.totalorder %v6373_v38, %v1017_v35  ;;  %vm1186_vm3 = vcmp.eq.s32.totalorder %v6373_v38, %v975_v24  ;;  %v1114_v10 = vshll.u32 %v1113_v43, 16 }
 0x50e   :  { %v6901_v0 = vsel %vm1189_vm2, -inf, %v6597_v22  ;;  %v6904_v16 = vsel %vm1186_vm3, -inf, %v6600_v26  ;;  %v1155_v32 = vcvt.f32.s32 %v6869_v59 }
 0x50f   :  { %v1003_v51 = vadd.s32 %v1002_v18, %v1000_v28  ;;  %1224 = vmax.xlane.f32.xlu1 %v6901_v0  ;;  %1218 = vmax.xlane.f32.xlu0 %v6904_v16 }
 0x510   :  { %v1041_v5 = vpop.xlane.xlu1 %1040  ;;  %v1027_v56 = vpop.xlane.xlu0 %1026  ;;  %v1156_v59 = vshll.u32 %v1155_v32, 16 }
 0x511   :  { %v1042_v31 = vcvt.f32.s32 %v1041_v5  ;;  %v1028_v36 = vcvt.f32.s32 %v1027_v56  ;;  %vm1188_vm4 = vcmp.eq.s32.totalorder %v6373_v38, %v1003_v51  ;;  %v1183_v56 = vcvt.f32.s32 %v6879_v40 }
 0x512   :  { %v6912_v22 = vsel %vm1188_vm4, -inf, %v6608_v58 }
 0x513   :  { %v1045_v26 = vadd.s32 %v1044_v39, %v1042_v31  ;;  %v1031_v19 = vadd.s32 %v1030_v1, %v1028_v36  ;;  %1222 = vmax.xlane.f32.xlu0 %v6912_v22  ;;  %v1169_v1 = vcvt.f32.s32 %v6881_v8  ;;  %v1184_v40 = vshll.u32 %v1183_v56, 16 }
 0x514   :  { %v1069_v25 = vpop.xlane.xlu1 %1068  ;;  %v1055_v49 = vpop.xlane.xlu0 %1054 }
 0x515   :  { %v1070_v50 = vcvt.f32.s32 %v1069_v25  ;;  %v1056_v57 = vcvt.f32.s32 %v1055_v49  ;;  %vm1191_vm5 = vcmp.eq.s32.totalorder %v6373_v38, %v1045_v26  ;;  %vm1190_vm6 = vcmp.eq.s32.totalorder %v6373_v38, %v1031_v19 }
 0x516   :  { %v6920_v58 = vsel %vm1191_vm5, -inf, %v6616_v3  ;;  %v6923_v46 = vsel %vm1190_vm6, -inf, %v6619_v4  ;;  %v1170_v8 = vshll.u32 %v1169_v1, 16 }
 0x517   :  { %v1073_v27 = vadd.s32 %v1072_v41, %v1070_v50  ;;  %v1059_v42 = vadd.s32 %v1058_v23, %v1056_v57  ;;  %1228 = vmax.xlane.f32.xlu1 %v6920_v58  ;;  %1226 = vmax.xlane.f32.xlu0 %v6923_v46 }
 0x518   :  { %v1097_v30 = vpop.xlane.xlu1 %1096  ;;  %v1083_v7 = vpop.xlane.xlu0 %1082 }
 0x519   :  { %v1098_v35 = vcvt.f32.s32 %v1097_v30  ;;  %v1084_v3 = vcvt.f32.s32 %v1083_v7  ;;  %vm1193_vm7 = vcmp.eq.s32.totalorder %v6373_v38, %v1073_v27  ;;  %vm1192_vm8 = vcmp.eq.s32.totalorder %v6373_v38, %v1059_v42 }
 0x51a   :  { %v6932_v4 = vsel %vm1193_vm7, -inf, %v6628_v15  ;;  %v6935_v24 = vsel %vm1192_vm8, -inf, %v6631_v37 }
 0x51b   :  { %v1101_v18 = vadd.s32 %v1100_v44, %v1098_v35  ;;  %v1087_v60 = vadd.s32 %v1086_v17, %v1084_v3  ;;  %1232 = vmax.xlane.f32.xlu1 %v6932_v4  ;;  %1230 = vmax.xlane.f32.xlu0 %v6935_v24 }
 0x51c   :  { %v1125_v28 = vpop.xlane.xlu1 %1124  ;;  %v1111_v51 = vpop.xlane.xlu0 %1110 }
 0x51d   :  { %v1126_v39 = vcvt.f32.s32 %v1125_v28  ;;  %v1112_v15 = vcvt.f32.s32 %v1111_v51  ;;  %vm1195_vm9 = vcmp.eq.s32.totalorder %v6373_v38, %v1101_v18  ;;  %vm1194_vm10 = vcmp.eq.s32.totalorder %v6373_v38, %v1087_v60 }
 0x51e   :  { %v6944_v37 = vsel %vm1195_vm9, -inf, %v6640_v12  ;;  %v6947_v34 = vsel %vm1194_vm10, -inf, %v6643_v48 }
 0x51f   :  { %v1129_v52 = vadd.s32 %v1128_v21, %v1126_v39  ;;  %v1115_v5 = vadd.s32 %v1114_v10, %v1112_v15  ;;  %1236 = vmax.xlane.f32.xlu1 %v6944_v37  ;;  %1234 = vmax.xlane.f32.xlu0 %v6947_v34 }
 0x520   :  { %v1153_v31 = vpop.xlane.xlu1 %1152  ;;  %v1139_v36 = vpop.xlane.xlu0 %1138 }
 0x521   :  { %v1154_v26 = vcvt.f32.s32 %v1153_v31  ;;  %v1140_v12 = vcvt.f32.s32 %v1139_v36  ;;  %vm1197_vm11 = vcmp.eq.s32.totalorder %v6373_v38, %v1129_v52  ;;  %vm1196_vm12 = vcmp.eq.s32.totalorder %v6373_v38, %v1115_v5 }
 0x522   :  { %v6956_v48 = vsel %vm1197_vm11, -inf, %v6652_v20  ;;  %v6959_v19 = vsel %vm1196_vm12, -inf, %v6655_v2 }
 0x523   :  { %v1157_v41 = vadd.s32 %v1156_v59, %v1154_v26  ;;  %v1143_v23 = vadd.s32 %v1142_v54, %v1140_v12  ;;  %1240 = vmax.xlane.f32.xlu1 %v6956_v48  ;;  %1238 = vmax.xlane.f32.xlu0 %v6959_v19 }
 0x524   :  { %v1181_v61 = vpop.xlane.xlu1 %1180  ;;  %v1167_v53 = vpop.xlane.xlu0 %1166 }
 0x525   :  { %v1182_v25 = vcvt.f32.s32 %v1181_v61  ;;  %v1168_v49 = vcvt.f32.s32 %v1167_v53  ;;  %vm1199_vm13 = vcmp.eq.s32.totalorder %v6373_v38, %v1157_v41  ;;  %vm1198_vm14 = vcmp.eq.s32.totalorder %v6373_v38, %v1143_v23 }
 0x526   :  { %v6966_v20 = vsel %vm1199_vm13, -inf, %v6662_v47  ;;  %v6969_v2 = vsel %vm1198_vm14, -inf, %v6665_v45 }
 0x527   :  { %v1185_v50 = vadd.s32 %v1184_v40, %v1182_v25  ;;  %v1171_v57 = vadd.s32 %v1170_v8, %v1168_v49  ;;  %1244 = vmax.xlane.f32.xlu1 %v6966_v20  ;;  %1242 = vmax.xlane.f32.xlu0 %v6969_v2 }
 0x529   :  { %vm1201_vm15 = vcmp.eq.s32.totalorder %v6373_v38, %v1185_v50  ;;  %vm1200_vm0 = vcmp.eq.s32.totalorder %v6373_v38, %v1171_v57 }
 0x52a   :  { %v6976_v27 = vsel %vm1201_vm15, -inf, %v6672_v11  ;;  %v6979_v42 = vsel %vm1200_vm0, -inf, %v6675_v13 }
 0x52b   :  { %1248 = vmax.xlane.f32.xlu1 %v6976_v27  ;;  %1246 = vmax.xlane.f32.xlu0 %v6979_v42 }
 0x594   :  { %v1221_v47 = vpop.xlane.xlu1 %1220 }
 0x595   :  { %vm1251_vm1 = vcmp.eq.f32.partialorder %v6893_v9, %v1221_v47 }
 0x596   :  { %v6985_v45 = vsel %vm1251_vm1, %v6373_v38, 128 }
 0x597   :  { %v1297_v44 = vshra.s32 %v6985_v45, 16 }
 0x598   :  { %v1225_v17 = vpop.xlane.xlu1 %1224  ;;  %v1219_v33 = vpop.xlane.xlu0 %1218 }
 0x599   :  { %vm1253_vm2 = vcmp.eq.f32.partialorder %v6901_v0, %v1225_v17  ;;  %vm1250_vm3 = vcmp.eq.f32.partialorder %v6904_v16, %v1219_v33  ;;  %v6990_v11 = vcvt.s32.f32 %v1297_v44 }
 0x59a   :  { %v6993_v13 = vsel %vm1253_vm2, %v6373_v38, 128  ;;  %v6996_v43 = vsel %vm1250_vm3, %v6373_v38, 128 }
 0x59b   :  { %v1325_v30 = vshra.s32 %v6993_v13, 16  ;;  %v1283_v7 = vshra.s32 %v6996_v43, 16  ;;  %1300 = vmin.xlane.f32.xlu1 %v6990_v11 }
 0x59c   :  { %v1223_v35 = vpop.xlane.xlu0 %1222 }
 0x59d   :  { %vm1252_vm4 = vcmp.eq.f32.partialorder %v6912_v22, %v1223_v35  ;;  %v7002_v3 = vcvt.s32.f32 %v1325_v30  ;;  %v7004_v18 = vcvt.s32.f32 %v1283_v7 }
 0x59e   :  { %v7007_v60 = vsel %vm1252_vm4, %v6373_v38, 128 }
 0x59f   :  { %v1311_v21 = vshra.s32 %v7007_v60, 16  ;;  %1328 = vmin.xlane.f32.xlu1 %v7002_v3  ;;  %1286 = vmin.xlane.f32.xlu0 %v7004_v18 }
 0x5a0   :  { %v1229_v10 = vpop.xlane.xlu1 %1228  ;;  %v1227_v32 = vpop.xlane.xlu0 %1226 }
 0x5a1   :  { %vm1255_vm5 = vcmp.eq.f32.partialorder %v6920_v58, %v1229_v10  ;;  %vm1254_vm6 = vcmp.eq.f32.partialorder %v6923_v46, %v1227_v32  ;;  %v7014_v29 = vcvt.s32.f32 %v1311_v21 }
 0x5a2   :  { %v7017_v28 = vsel %vm1255_vm5, %v6373_v38, 128  ;;  %v7020_v51 = vsel %vm1254_vm6, %v6373_v38, 128 }
 0x5a3   :  { %v1353_v39 = vshra.s32 %v7017_v28, 16  ;;  %v1339_v15 = vshra.s32 %v7020_v51, 16  ;;  %1314 = vmin.xlane.f32.xlu0 %v7014_v29 }
 0x5a4   :  { %v1233_v52 = vpop.xlane.xlu1 %1232  ;;  %v1231_v5 = vpop.xlane.xlu0 %1230 }
 0x5a5   :  { %vm1257_vm7 = vcmp.eq.f32.partialorder %v6932_v4, %v1233_v52  ;;  %vm1256_vm8 = vcmp.eq.f32.partialorder %v6935_v24, %v1231_v5  ;;  %v7027_v59 = vcvt.s32.f32 %v1353_v39  ;;  %v7029_v54 = vcvt.s32.f32 %v1339_v15 }
 0x5a6   :  { %v7032_v56 = vsel %vm1257_vm7, %v6373_v38, 128  ;;  %v7035_v1 = vsel %vm1256_vm8, %v6373_v38, 128 }
 0x5a7   :  { %v1381_v31 = vshra.s32 %v7032_v56, 16  ;;  %v1367_v36 = vshra.s32 %v7035_v1, 16  ;;  %1356 = vmin.xlane.f32.xlu1 %v7027_v59  ;;  %1342 = vmin.xlane.f32.xlu0 %v7029_v54 }
 0x5a8   :  { %v1237_v26 = vpop.xlane.xlu1 %1236  ;;  %v1235_v12 = vpop.xlane.xlu0 %1234 }
 0x5a9   :  { %vm1259_vm9 = vcmp.eq.f32.partialorder %v6944_v37, %v1237_v26  ;;  %vm1258_vm10 = vcmp.eq.f32.partialorder %v6947_v34, %v1235_v12  ;;  %v7043_v41 = vcvt.s32.f32 %v1381_v31  ;;  %v7045_v23 = vcvt.s32.f32 %v1367_v36 }
 0x5aa   :  { %v7048_v40 = vsel %vm1259_vm9, %v6373_v38, 128  ;;  %v7051_v8 = vsel %vm1258_vm10, %v6373_v38, 128 }
 0x5ab   :  { %v1409_v61 = vshra.s32 %v7048_v40, 16  ;;  %v1395_v53 = vshra.s32 %v7051_v8, 16  ;;  %1384 = vmin.xlane.f32.xlu1 %v7043_v41  ;;  %1370 = vmin.xlane.f32.xlu0 %v7045_v23 }
 0x5ac   :  { %v1241_v25 = vpop.xlane.xlu1 %1240  ;;  %v1239_v49 = vpop.xlane.xlu0 %1238 }
 0x5ad   :  { %vm1261_vm11 = vcmp.eq.f32.partialorder %v6956_v48, %v1241_v25  ;;  %vm1260_vm12 = vcmp.eq.f32.partialorder %v6959_v19, %v1239_v49  ;;  %v7059_v50 = vcvt.s32.f32 %v1409_v61  ;;  %v7061_v57 = vcvt.s32.f32 %v1395_v53 }
 0x5ae   :  { %v7064_v47 = vsel %vm1261_vm11, %v6373_v38, 128  ;;  %v7067_v44 = vsel %vm1260_vm12, %v6373_v38, 128 }
 0x5af   :  { %v1437_v17 = vshra.s32 %v7064_v47, 16  ;;  %v1423_v33 = vshra.s32 %v7067_v44, 16  ;;  %1412 = vmin.xlane.f32.xlu1 %v7059_v50  ;;  %1398 = vmin.xlane.f32.xlu0 %v7061_v57 }
 0x5b0   :  { %v1245_v30 = vpop.xlane.xlu1 %1244  ;;  %v1243_v7 = vpop.xlane.xlu0 %1242 }
 0x5b1   :  { %vm1263_vm13 = vcmp.eq.f32.partialorder %v6966_v20, %v1245_v30  ;;  %vm1262_vm14 = vcmp.eq.f32.partialorder %v6969_v2, %v1243_v7  ;;  %v7075_v35 = vcvt.s32.f32 %v1437_v17  ;;  %v7077_v21 = vcvt.s32.f32 %v1423_v33 }
 0x5b2   :  { %v7080_v10 = vsel %vm1263_vm13, %v6373_v38, 128  ;;  %v7083_v32 = vsel %vm1262_vm14, %v6373_v38, 128  ;;  %v1296_v17 = vand.u32 65535, %v6985_v45  ;;  %v1324_v33 = vand.u32 65535, %v6993_v13 }
 0x5b3   :  { %v1465_v39 = vshra.s32 %v7080_v10, 16  ;;  %v1451_v15 = vshra.s32 %v7083_v32, 16  ;;  %1440 = vmin.xlane.f32.xlu1 %v7075_v35  ;;  %1426 = vmin.xlane.f32.xlu0 %v7077_v21  ;;  %v1282_v30 = vand.u32 65535, %v6996_v43 }
 0x5b4   :  { %v1249_v52 = vpop.xlane.xlu1 %1248  ;;  %v1247_v5 = vpop.xlane.xlu0 %1246 }
 0x5b5   :  { %vm1265_vm15 = vcmp.eq.f32.partialorder %v6976_v27, %v1249_v52  ;;  %vm1264_vm0 = vcmp.eq.f32.partialorder %v6979_v42, %v1247_v5  ;;  %v7091_v31 = vcvt.s32.f32 %v1465_v39  ;;  %v7093_v36 = vcvt.s32.f32 %v1451_v15 }
 0x5b6   :  { %v7096_v26 = vsel %vm1265_vm15, %v6373_v38, 128  ;;  %v7099_v12 = vsel %vm1264_vm0, %v6373_v38, 128  ;;  %v1298_v39 = vcvt.s32.f32 %v1296_v17  ;;  %v1310_v52 = vand.u32 65535, %v7007_v60 }
 0x5b7   :  { %v1493_v61 = vshra.s32 %v7096_v26, 16  ;;  %v1479_v53 = vshra.s32 %v7099_v12, 16  ;;  %1468 = vmin.xlane.f32.xlu1 %v7091_v31  ;;  %1454 = vmin.xlane.f32.xlu0 %v7093_v36  ;;  %v1284_v45 = vcvt.s32.f32 %v1282_v30  ;;  %v1338_v60 = vand.u32 65535, %v7020_v51 }
 0x5b9   :  { %v7105_v25 = vcvt.s32.f32 %v1493_v61  ;;  %v7107_v49 = vcvt.s32.f32 %v1479_v53  ;;  %v1326_v53 = vcvt.s32.f32 %v1324_v33 }
 0x5bb   :  { %1496 = vmin.xlane.f32.xlu1 %v7105_v25  ;;  %1482 = vmin.xlane.f32.xlu0 %v7107_v49 }
 0x624   :  { %v7114_v7 = vpop.xlane.xlu1 %1300 }
 0x625   :  { %vm1302_vm1 = vcmp.eq.f32.partialorder %v6990_v11, %v7114_v7  ;;  %v1352_v11 = vand.u32 65535, %v7017_v28  ;;  %v1340_v28 = vcvt.s32.f32 %v1338_v60 }
 0x626   :  { %v1303_v15 = vsel %vm1302_vm1, %v1298_v39, inf  ;;  %v1312_v39 = vcvt.s32.f32 %v1310_v52 }
 0x627   :  { %1304 = vmin.xlane.f32.xlu1 %v1303_v15 }
 0x628   :  { %v7119_v5 = vpop.xlane.xlu1 %1328  ;;  %v7121_v61 = vpop.xlane.xlu0 %1286 }
 0x629   :  { %vm1330_vm2 = vcmp.eq.f32.partialorder %v7002_v3, %v7119_v5  ;;  %vm1288_vm3 = vcmp.eq.f32.partialorder %v7004_v18, %v7121_v61  ;;  %v1380_v3 = vand.u32 65535, %v7032_v56  ;;  %v1366_v18 = vand.u32 65535, %v7035_v1 }
 0x62a   :  { %v1331_v13 = vsel %vm1330_vm2, %v1326_v53, inf  ;;  %v1289_v43 = vsel %vm1288_vm3, %v1284_v45, inf  ;;  %v1354_v53 = vcvt.s32.f32 %v1352_v11  ;;  %v1408_v56 = vand.u32 65535, %v7048_v40 }
 0x62b   :  { %1332 = vmin.xlane.f32.xlu1 %v1331_v13  ;;  %1290 = vmin.xlane.f32.xlu0 %v1289_v43  ;;  %v1394_v1 = vand.u32 65535, %v7051_v8  ;;  %v1382_v13 = vcvt.s32.f32 %v1380_v3  ;;  %v1368_v43 = vcvt.s32.f32 %v1366_v18  ;;  %v1436_v40 = vand.u32 65535, %v7064_v47 }
 0x62c   :  { %v7129_v17 = vpop.xlane.xlu0 %1314  ;;  %v1422_v8 = vand.u32 65535, %v7067_v44  ;;  %v1464_v47 = vand.u32 65535, %v7080_v10  ;;  %v1450_v44 = vand.u32 65535, %v7083_v32  ;;  %v1492_v10 = vand.u32 65535, %v7096_v26 }
 0x62d   :  { %vm1316_vm4 = vcmp.eq.f32.partialorder %v7014_v29, %v7129_v17  ;;  %v1478_v32 = vand.u32 65535, %v7099_v12 }
 0x62e   :  { %v1317_v33 = vsel %vm1316_vm4, %v1312_v39, inf  ;;  %v1410_v39 = vcvt.s32.f32 %v1408_v56  ;;  %v1466_v56 = vcvt.s32.f32 %v1464_v47  ;;  %v1494_v12 = vcvt.s32.f32 %v1492_v10 }
 0x62f   :  { %1318 = vmin.xlane.f32.xlu0 %v1317_v33  ;;  %v1396_v33 = vcvt.s32.f32 %v1394_v1  ;;  %v1452_v1 = vcvt.s32.f32 %v1450_v44 }
 0x630   :  { %v7135_v30 = vpop.xlane.xlu1 %1356  ;;  %v7137_v15 = vpop.xlane.xlu0 %1342 }
 0x631   :  { %vm1358_vm5 = vcmp.eq.f32.partialorder %v7027_v59, %v7135_v30  ;;  %vm1344_vm6 = vcmp.eq.f32.partialorder %v7029_v54, %v7137_v15 }
 0x632   :  { %v1359_v51 = vsel %vm1358_vm5, %v1354_v53, inf  ;;  %v1345_v29 = vsel %vm1344_vm6, %v1340_v28, inf  ;;  %v1438_v53 = vcvt.s32.f32 %v1436_v40  ;;  %v1424_v28 = vcvt.s32.f32 %v1422_v8 }
 0x633   :  { %1360 = vmin.xlane.f32.xlu1 %v1359_v51  ;;  %1346 = vmin.xlane.f32.xlu0 %v1345_v29 }
 0x634   :  { %v7145_v52 = vpop.xlane.xlu1 %1384  ;;  %v7147_v45 = vpop.xlane.xlu0 %1370 }
 0x635   :  { %vm1386_vm7 = vcmp.eq.f32.partialorder %v7043_v41, %v7145_v52  ;;  %vm1372_vm8 = vcmp.eq.f32.partialorder %v7045_v23, %v7147_v45 }
 0x636   :  { %v1387_v59 = vsel %vm1386_vm7, %v1382_v13, inf  ;;  %v1373_v54 = vsel %vm1372_vm8, %v1368_v43, inf  ;;  %v1480_v43 = vcvt.s32.f32 %v1478_v32 }
 0x637   :  { %1388 = vmin.xlane.f32.xlu1 %v1387_v59  ;;  %1374 = vmin.xlane.f32.xlu0 %v1373_v54  ;;  %v1335_v54 = vcvt.f32.s32 %v7119_v5 }
 0x638   :  { %v7155_v11 = vpop.xlane.xlu1 %1412  ;;  %v7157_v60 = vpop.xlane.xlu0 %1398 }
 0x639   :  { %vm1414_vm9 = vcmp.eq.f32.partialorder %v7059_v50, %v7155_v11  ;;  %vm1400_vm10 = vcmp.eq.f32.partialorder %v7061_v57, %v7157_v60 }
 0x63a   :  { %v1415_v41 = vsel %vm1414_vm9, %v1410_v39, inf  ;;  %v1401_v23 = vsel %vm1400_vm10, %v1396_v33, inf  ;;  %v1293_v39 = vcvt.f32.s32 %v7121_v61 }
 0x63b   :  { %1416 = vmin.xlane.f32.xlu1 %v1415_v41  ;;  %1402 = vmin.xlane.f32.xlu0 %v1401_v23  ;;  %v1336_v23 = vshll.u32 %v1335_v54, 16 }
 0x63c   :  { %v7165_v3 = vpop.xlane.xlu1 %1440  ;;  %v7167_v18 = vpop.xlane.xlu0 %1426 }
 0x63d   :  { %vm1442_vm11 = vcmp.eq.f32.partialorder %v7075_v35, %v7165_v3  ;;  %vm1428_vm12 = vcmp.eq.f32.partialorder %v7077_v21, %v7167_v18 }
 0x63e   :  { %v1443_v50 = vsel %vm1442_vm11, %v1438_v53, inf  ;;  %v1429_v57 = vsel %vm1428_vm12, %v1424_v28, inf }
 0x63f   :  { %1444 = vmin.xlane.f32.xlu1 %v1443_v50  ;;  %1430 = vmin.xlane.f32.xlu0 %v1429_v57  ;;  %v1363_v57 = vcvt.f32.s32 %v7135_v30 }
 0x640   :  { %v7175_v51 = vpop.xlane.xlu1 %1468  ;;  %v7177_v29 = vpop.xlane.xlu0 %1454 }
 0x641   :  { %vm1470_vm13 = vcmp.eq.f32.partialorder %v7091_v31, %v7175_v51  ;;  %vm1456_vm14 = vcmp.eq.f32.partialorder %v7093_v36, %v7177_v29  ;;  %v1307_v36 = vcvt.f32.s32 %v7114_v7  ;;  %v1364_v30 = vshll.u32 %v1363_v57, 16 }
 0x642   :  { %v1471_v35 = vsel %vm1470_vm13, %v1466_v56, inf  ;;  %v1457_v21 = vsel %vm1456_vm14, %v1452_v1, inf }
 0x643   :  { %1472 = vmin.xlane.f32.xlu1 %v1471_v35  ;;  %1458 = vmin.xlane.f32.xlu0 %v1457_v21  ;;  %v1308_v8 = vshll.u32 %v1307_v36, 16  ;;  %v1391_v35 = vcvt.f32.s32 %v7145_v52  ;;  %v1419_v52 = vcvt.f32.s32 %v7155_v11 }
 0x644   :  { %v7183_v13 = vpop.xlane.xlu1 %1496  ;;  %v7185_v26 = vpop.xlane.xlu0 %1482 }
 0x645   :  { %vm1498_vm15 = vcmp.eq.f32.partialorder %v7105_v25, %v7183_v13  ;;  %vm1484_vm0 = vcmp.eq.f32.partialorder %v7107_v49, %v7185_v26  ;;  %v1321_v25 = vcvt.f32.s32 %v7129_v17  ;;  %v1294_v49 = vshll.u32 %v1293_v39, 16 }
 0x646   :  { %v1499_v31 = vsel %vm1498_vm15, %v1494_v12, inf  ;;  %v1485_v59 = vsel %vm1484_vm0, %v1480_v43, inf  ;;  %v1349_v17 = vcvt.f32.s32 %v7137_v15  ;;  %v1377_v15 = vcvt.f32.s32 %v7147_v45 }
 0x647   :  { %1500 = vmin.xlane.f32.xlu1 %v1499_v31  ;;  %1486 = vmin.xlane.f32.xlu0 %v1485_v59  ;;  %v1322_v61 = vshll.u32 %v1321_v25, 16  ;;  %v1392_v54 = vshll.u32 %v1391_v35, 16  ;;  %v1405_v45 = vcvt.f32.s32 %v7157_v60  ;;  %v1420_v11 = vshll.u32 %v1419_v52, 16 }
 0x648   :  { %v1350_v43 = vshll.u32 %v1349_v17, 16  ;;  %v1461_v17 = vcvt.f32.s32 %v7177_v29 }
 0x649   :  { %v1406_v60 = vshll.u32 %v1405_v45, 16 }
 0x64a   :  { %v1462_v29 = vshll.u32 %v1461_v17, 16 }
 0x6b0   :  { %v1305_v40 = vpop.xlane.xlu1 %1304 }
 0x6b1   :  { %v1306_v33 = vcvt.f32.s32 %v1305_v40  ;;  %v1378_v40 = vshll.u32 %v1377_v15, 16 }
 0x6b3   :  { %v1309_v41 = vadd.s32 %v1308_v8, %v1306_v33 }
 0x6b4   :  { %v1333_v47 = vpop.xlane.xlu1 %1332  ;;  %v1291_v44 = vpop.xlane.xlu0 %1290 }
 0x6b5   :  { %v1334_v53 = vcvt.f32.s32 %v1333_v47  ;;  %v1292_v28 = vcvt.f32.s32 %v1291_v44  ;;  %vm1507_vm1 = vcmp.eq.s32.totalorder %v6373_v38, %v1309_v41  ;;  %v1447_v44 = vcvt.f32.s32 %v7165_v3 }
 0x6b6   :  { %v7197_v7 = vsel %vm1507_vm1, -inf, %v6893_v9 }
 0x6b7   :  { %v1337_v5 = vadd.s32 %v1336_v23, %v1334_v53  ;;  %v1295_v50 = vadd.s32 %v1294_v49, %v1292_v28  ;;  %1540 = vmax.xlane.f32.xlu1 %v7197_v7  ;;  %v1433_v49 = vcvt.f32.s32 %v7167_v18  ;;  %v1448_v3 = vshll.u32 %v1447_v44, 16 }
 0x6b8   :  { %v1319_v10 = vpop.xlane.xlu0 %1318 }
 0x6b9   :  { %v1320_v32 = vcvt.f32.s32 %v1319_v10  ;;  %vm1509_vm2 = vcmp.eq.s32.totalorder %v6373_v38, %v1337_v5  ;;  %vm1506_vm3 = vcmp.eq.s32.totalorder %v6373_v38, %v1295_v50  ;;  %v1434_v18 = vshll.u32 %v1433_v49, 16 }
 0x6ba   :  { %v7205_v56 = vsel %vm1509_vm2, -inf, %v6901_v0  ;;  %v7208_v9 = vsel %vm1506_vm3, -inf, %v6904_v16  ;;  %v1475_v10 = vcvt.f32.s32 %v7175_v51 }
 0x6bb   :  { %v1323_v1 = vadd.s32 %v1322_v61, %v1320_v32  ;;  %1544 = vmax.xlane.f32.xlu1 %v7205_v56  ;;  %1538 = vmax.xlane.f32.xlu0 %v7208_v9 }
 0x6bc   :  { %v1361_v21 = vpop.xlane.xlu1 %1360  ;;  %v1347_v12 = vpop.xlane.xlu0 %1346  ;;  %v1476_v51 = vshll.u32 %v1475_v10, 16 }
 0x6bd   :  { %v1362_v31 = vcvt.f32.s32 %v1361_v21  ;;  %v1348_v59 = vcvt.f32.s32 %v1347_v12  ;;  %vm1508_vm4 = vcmp.eq.s32.totalorder %v6373_v38, %v1323_v1  ;;  %v1503_v12 = vcvt.f32.s32 %v7183_v13 }
 0x6be   :  { %v7216_v0 = vsel %vm1508_vm4, -inf, %v6912_v22 }
 0x6bf   :  { %v1365_v16 = vadd.s32 %v1364_v30, %v1362_v31  ;;  %v1351_v36 = vadd.s32 %v1350_v43, %v1348_v59  ;;  %1542 = vmax.xlane.f32.xlu0 %v7216_v0  ;;  %v1489_v43 = vcvt.f32.s32 %v7185_v26  ;;  %v1504_v13 = vshll.u32 %v1503_v12, 16 }
 0x6c0   :  { %v1389_v8 = vpop.xlane.xlu1 %1388  ;;  %v1375_v39 = vpop.xlane.xlu0 %1374 }
 0x6c1   :  { %v1390_v33 = vcvt.f32.s32 %v1389_v8  ;;  %v1376_v41 = vcvt.f32.s32 %v1375_v39  ;;  %vm1511_vm5 = vcmp.eq.s32.totalorder %v6373_v38, %v1365_v16  ;;  %vm1510_vm6 = vcmp.eq.s32.totalorder %v6373_v38, %v1351_v36 }
 0x6c2   :  { %v7224_v22 = vsel %vm1511_vm5, -inf, %v6920_v58  ;;  %v7227_v23 = vsel %vm1510_vm6, -inf, %v6923_v46  ;;  %v1490_v26 = vshll.u32 %v1489_v43, 16 }
 0x6c3   :  { %v1393_v25 = vadd.s32 %v1392_v54, %v1390_v33  ;;  %v1379_v47 = vadd.s32 %v1378_v40, %v1376_v41  ;;  %1548 = vmax.xlane.f32.xlu1 %v7224_v22  ;;  %1546 = vmax.xlane.f32.xlu0 %v7227_v23 }
 0x6c4   :  { %v1417_v53 = vpop.xlane.xlu1 %1416  ;;  %v1403_v28 = vpop.xlane.xlu0 %1402 }
 0x6c5   :  { %v1418_v5 = vcvt.f32.s32 %v1417_v53  ;;  %v1404_v58 = vcvt.f32.s32 %v1403_v28  ;;  %vm1513_vm7 = vcmp.eq.s32.totalorder %v6373_v38, %v1393_v25  ;;  %vm1512_vm8 = vcmp.eq.s32.totalorder %v6373_v38, %v1379_v47 }
 0x6c6   :  { %v7236_v46 = vsel %vm1513_vm7, -inf, %v6932_v4  ;;  %v7239_v50 = vsel %vm1512_vm8, -inf, %v6935_v24 }
 0x6c7   :  { %v1421_v61 = vadd.s32 %v1420_v11, %v1418_v5  ;;  %v1407_v57 = vadd.s32 %v1406_v60, %v1404_v58  ;;  %1552 = vmax.xlane.f32.xlu1 %v7236_v46  ;;  %1550 = vmax.xlane.f32.xlu0 %v7239_v50 }
 0x6c8   :  { %v1445_v32 = vpop.xlane.xlu1 %1444  ;;  %v1431_v1 = vpop.xlane.xlu0 %1430 }
 0x6c9   :  { %v1446_v30 = vcvt.f32.s32 %v1445_v32  ;;  %v1432_v4 = vcvt.f32.s32 %v1431_v1  ;;  %vm1515_vm9 = vcmp.eq.s32.totalorder %v6373_v38, %v1421_v61  ;;  %vm1514_vm10 = vcmp.eq.s32.totalorder %v6373_v38, %v1407_v57 }
 0x6ca   :  { %v7248_v24 = vsel %vm1515_vm9, -inf, %v6944_v37  ;;  %v7251_v35 = vsel %vm1514_vm10, -inf, %v6947_v34 }
 0x6cb   :  { %v1449_v15 = vadd.s32 %v1448_v3, %v1446_v30  ;;  %v1435_v21 = vadd.s32 %v1434_v18, %v1432_v4  ;;  %1556 = vmax.xlane.f32.xlu1 %v7248_v24  ;;  %1554 = vmax.xlane.f32.xlu0 %v7251_v35 }
 0x6cc   :  { %v1473_v31 = vpop.xlane.xlu1 %1472  ;;  %v1459_v59 = vpop.xlane.xlu0 %1458 }
 0x6cd   :  { %v1474_v16 = vcvt.f32.s32 %v1473_v31  ;;  %v1460_v37 = vcvt.f32.s32 %v1459_v59  ;;  %vm1517_vm11 = vcmp.eq.s32.totalorder %v6373_v38, %v1449_v15  ;;  %vm1516_vm12 = vcmp.eq.s32.totalorder %v6373_v38, %v1435_v21 }
 0x6ce   :  { %v7260_v34 = vsel %vm1517_vm11, -inf, %v6956_v48  ;;  %v7263_v36 = vsel %vm1516_vm12, -inf, %v6959_v19 }
 0x6cf   :  { %v1477_v54 = vadd.s32 %v1476_v51, %v1474_v16  ;;  %v1463_v40 = vadd.s32 %v1462_v29, %v1460_v37  ;;  %1560 = vmax.xlane.f32.xlu1 %v7260_v34  ;;  %1558 = vmax.xlane.f32.xlu0 %v7263_v36 }
 0x6d0   :  { %v1501_v52 = vpop.xlane.xlu1 %1500  ;;  %v1487_v45 = vpop.xlane.xlu0 %1486 }
 0x6d1   :  { %v1502_v8 = vcvt.f32.s32 %v1501_v52  ;;  %v1488_v39 = vcvt.f32.s32 %v1487_v45  ;;  %vm1519_vm13 = vcmp.eq.s32.totalorder %v6373_v38, %v1477_v54  ;;  %vm1518_vm14 = vcmp.eq.s32.totalorder %v6373_v38, %v1463_v40 }
 0x6d2   :  { %v7270_v48 = vsel %vm1519_vm13, -inf, %v6966_v20  ;;  %v7273_v19 = vsel %vm1518_vm14, -inf, %v6969_v2 }
 0x6d3   :  { %v1505_v33 = vadd.s32 %v1504_v13, %v1502_v8  ;;  %v1491_v41 = vadd.s32 %v1490_v26, %v1488_v39  ;;  %1564 = vmax.xlane.f32.xlu1 %v7270_v48  ;;  %1562 = vmax.xlane.f32.xlu0 %v7273_v19 }
 0x6d5   :  { %vm1521_vm15 = vcmp.eq.s32.totalorder %v6373_v38, %v1505_v33  ;;  %vm1520_vm0 = vcmp.eq.s32.totalorder %v6373_v38, %v1491_v41 }
 0x6d6   :  { %v7280_v25 = vsel %vm1521_vm15, -inf, %v6976_v27  ;;  %v7283_v47 = vsel %vm1520_vm0, -inf, %v6979_v42 }
 0x6d7   :  { %1568 = vmax.xlane.f32.xlu1 %v7280_v25  ;;  %1566 = vmax.xlane.f32.xlu0 %v7283_v47 }
 0x740   :  { %v1541_v20 = vpop.xlane.xlu1 %1540 }
 0x741   :  { %vm1571_vm1 = vcmp.eq.f32.partialorder %v7197_v7, %v1541_v20 }
 0x742   :  { %v7289_v2 = vsel %vm1571_vm1, %v6373_v38, 128 }
 0x743   :  { %v1617_v11 = vshra.s32 %v7289_v2, 16 }
 0x744   :  { %v1545_v60 = vpop.xlane.xlu1 %1544  ;;  %v1539_v44 = vpop.xlane.xlu0 %1538 }
 0x745   :  { %vm1573_vm2 = vcmp.eq.f32.partialorder %v7205_v56, %v1545_v60  ;;  %vm1570_vm3 = vcmp.eq.f32.partialorder %v7208_v9, %v1539_v44  ;;  %v7294_v27 = vcvt.s32.f32 %v1617_v11 }
 0x746   :  { %v7297_v42 = vsel %vm1573_vm2, %v6373_v38, 128  ;;  %v7300_v49 = vsel %vm1570_vm3, %v6373_v38, 128 }
 0x747   :  { %v1645_v53 = vshra.s32 %v7297_v42, 16  ;;  %v1603_v28 = vshra.s32 %v7300_v49, 16  ;;  %1620 = vmin.xlane.f32.xlu1 %v7294_v27 }
 0x748   :  { %v1543_v5 = vpop.xlane.xlu0 %1542 }
 0x749   :  { %vm1572_vm4 = vcmp.eq.f32.partialorder %v7216_v0, %v1543_v5  ;;  %v7306_v58 = vcvt.s32.f32 %v1645_v53  ;;  %v7308_v61 = vcvt.s32.f32 %v1603_v28 }
 0x74a   :  { %v7311_v57 = vsel %vm1572_vm4, %v6373_v38, 128 }
 0x74b   :  { %v1631_v3 = vshra.s32 %v7311_v57, 16  ;;  %1648 = vmin.xlane.f32.xlu1 %v7306_v58  ;;  %1606 = vmin.xlane.f32.xlu0 %v7308_v61 }
 0x74c   :  { %v1549_v18 = vpop.xlane.xlu1 %1548  ;;  %v1547_v10 = vpop.xlane.xlu0 %1546 }
 0x74d   :  { %vm1575_vm5 = vcmp.eq.f32.partialorder %v7224_v22, %v1549_v18  ;;  %vm1574_vm6 = vcmp.eq.f32.partialorder %v7227_v23, %v1547_v10  ;;  %v7318_v17 = vcvt.s32.f32 %v1631_v3 }
 0x74e   :  { %v7321_v32 = vsel %vm1575_vm5, %v6373_v38, 128  ;;  %v7324_v1 = vsel %vm1574_vm6, %v6373_v38, 128 }
 0x74f   :  { %v1673_v30 = vshra.s32 %v7321_v32, 16  ;;  %v1659_v4 = vshra.s32 %v7324_v1, 16  ;;  %1634 = vmin.xlane.f32.xlu0 %v7318_v17 }
 0x750   :  { %v1553_v15 = vpop.xlane.xlu1 %1552  ;;  %v1551_v21 = vpop.xlane.xlu0 %1550 }
 0x751   :  { %vm1577_vm7 = vcmp.eq.f32.partialorder %v7236_v46, %v1553_v15  ;;  %vm1576_vm8 = vcmp.eq.f32.partialorder %v7239_v50, %v1551_v21  ;;  %v7331_v51 = vcvt.s32.f32 %v1673_v30  ;;  %v7333_v29 = vcvt.s32.f32 %v1659_v4 }
 0x752   :  { %v7336_v12 = vsel %vm1577_vm7, %v6373_v38, 128  ;;  %v7339_v43 = vsel %vm1576_vm8, %v6373_v38, 128 }
 0x753   :  { %v1701_v31 = vshra.s32 %v7336_v12, 16  ;;  %v1687_v59 = vshra.s32 %v7339_v43, 16  ;;  %1676 = vmin.xlane.f32.xlu1 %v7331_v51  ;;  %1662 = vmin.xlane.f32.xlu0 %v7333_v29 }
 0x754   :  { %v1557_v16 = vpop.xlane.xlu1 %1556  ;;  %v1555_v37 = vpop.xlane.xlu0 %1554 }
 0x755   :  { %vm1579_vm9 = vcmp.eq.f32.partialorder %v7248_v24, %v1557_v16  ;;  %vm1578_vm10 = vcmp.eq.f32.partialorder %v7251_v35, %v1555_v37  ;;  %v7347_v54 = vcvt.s32.f32 %v1701_v31  ;;  %v7349_v40 = vcvt.s32.f32 %v1687_v59 }
 0x756   :  { %v7352_v13 = vsel %vm1579_vm9, %v6373_v38, 128  ;;  %v7355_v26 = vsel %vm1578_vm10, %v6373_v38, 128 }
 0x757   :  { %v1729_v52 = vshra.s32 %v7352_v13, 16  ;;  %v1715_v45 = vshra.s32 %v7355_v26, 16  ;;  %1704 = vmin.xlane.f32.xlu1 %v7347_v54  ;;  %1690 = vmin.xlane.f32.xlu0 %v7349_v40 }
 0x758   :  { %v1561_v8 = vpop.xlane.xlu1 %1560  ;;  %v1559_v39 = vpop.xlane.xlu0 %1558 }
 0x759   :  { %vm1581_vm11 = vcmp.eq.f32.partialorder %v7260_v34, %v1561_v8  ;;  %vm1580_vm12 = vcmp.eq.f32.partialorder %v7263_v36, %v1559_v39  ;;  %v7363_v33 = vcvt.s32.f32 %v1729_v52  ;;  %v7365_v41 = vcvt.s32.f32 %v1715_v45 }
 0x75a   :  { %v7368_v20 = vsel %vm1581_vm11, %v6373_v38, 128  ;;  %v7371_v11 = vsel %vm1580_vm12, %v6373_v38, 128 }
 0x75b   :  { %v1757_v60 = vshra.s32 %v7368_v20, 16  ;;  %v1743_v44 = vshra.s32 %v7371_v11, 16  ;;  %1732 = vmin.xlane.f32.xlu1 %v7363_v33  ;;  %1718 = vmin.xlane.f32.xlu0 %v7365_v41 }
 0x75c   :  { %v1565_v53 = vpop.xlane.xlu1 %1564  ;;  %v1563_v28 = vpop.xlane.xlu0 %1562 }
 0x75d   :  { %vm1583_vm13 = vcmp.eq.f32.partialorder %v7270_v48, %v1565_v53  ;;  %vm1582_vm14 = vcmp.eq.f32.partialorder %v7273_v19, %v1563_v28  ;;  %v7379_v5 = vcvt.s32.f32 %v1757_v60  ;;  %v7381_v3 = vcvt.s32.f32 %v1743_v44 }
 0x75e   :  { %v7384_v18 = vsel %vm1583_vm13, %v6373_v38, 128  ;;  %v7387_v10 = vsel %vm1582_vm14, %v6373_v38, 128  ;;  %v1616_v60 = vand.u32 65535, %v7289_v2  ;;  %v1644_v44 = vand.u32 65535, %v7297_v42 }
 0x75f   :  { %v1785_v30 = vshra.s32 %v7384_v18, 16  ;;  %v1771_v4 = vshra.s32 %v7387_v10, 16  ;;  %1760 = vmin.xlane.f32.xlu1 %v7379_v5  ;;  %1746 = vmin.xlane.f32.xlu0 %v7381_v3  ;;  %v1602_v53 = vand.u32 65535, %v7300_v49 }
 0x760   :  { %v1569_v15 = vpop.xlane.xlu1 %1568  ;;  %v1567_v21 = vpop.xlane.xlu0 %1566 }
 0x761   :  { %vm1585_vm15 = vcmp.eq.f32.partialorder %v7280_v25, %v1569_v15  ;;  %vm1584_vm0 = vcmp.eq.f32.partialorder %v7283_v47, %v1567_v21  ;;  %v7395_v31 = vcvt.s32.f32 %v1785_v30  ;;  %v7397_v59 = vcvt.s32.f32 %v1771_v4 }
 0x762   :  { %v7400_v16 = vsel %vm1585_vm15, %v6373_v38, 128  ;;  %v7403_v37 = vsel %vm1584_vm0, %v6373_v38, 128  ;;  %v1618_v30 = vcvt.s32.f32 %v1616_v60  ;;  %v1630_v15 = vand.u32 65535, %v7311_v57 }
 0x763   :  { %v1813_v52 = vshra.s32 %v7400_v16, 16  ;;  %v1799_v45 = vshra.s32 %v7403_v37, 16  ;;  %1788 = vmin.xlane.f32.xlu1 %v7395_v31  ;;  %1774 = vmin.xlane.f32.xlu0 %v7397_v59  ;;  %v1604_v2 = vcvt.s32.f32 %v1602_v53  ;;  %v1658_v57 = vand.u32 65535, %v7324_v1 }
 0x765   :  { %v7409_v8 = vcvt.s32.f32 %v1813_v52  ;;  %v7411_v39 = vcvt.s32.f32 %v1799_v45  ;;  %v1646_v45 = vcvt.s32.f32 %v1644_v44 }
 0x767   :  { %1816 = vmin.xlane.f32.xlu1 %v7409_v8  ;;  %1802 = vmin.xlane.f32.xlu0 %v7411_v39 }
 0x7d0   :  { %v7418_v28 = vpop.xlane.xlu1 %1620 }
 0x7d1   :  { %vm1622_vm1 = vcmp.eq.f32.partialorder %v7294_v27, %v7418_v28  ;;  %v1672_v27 = vand.u32 65535, %v7321_v32  ;;  %v1660_v32 = vcvt.s32.f32 %v1658_v57 }
 0x7d2   :  { %v1623_v4 = vsel %vm1622_vm1, %v1618_v30, inf  ;;  %v1632_v30 = vcvt.s32.f32 %v1630_v15 }
 0x7d3   :  { %1624 = vmin.xlane.f32.xlu1 %v1623_v4 }
 0x7d4   :  { %v7423_v21 = vpop.xlane.xlu1 %1648  ;;  %v7425_v52 = vpop.xlane.xlu0 %1606 }
 0x7d5   :  { %vm1650_vm2 = vcmp.eq.f32.partialorder %v7306_v58, %v7423_v21  ;;  %vm1608_vm3 = vcmp.eq.f32.partialorder %v7308_v61, %v7425_v52  ;;  %v1700_v58 = vand.u32 65535, %v7336_v12  ;;  %v1686_v61 = vand.u32 65535, %v7339_v43 }
 0x7d6   :  { %v1651_v42 = vsel %vm1650_vm2, %v1646_v45, inf  ;;  %v1609_v49 = vsel %vm1608_vm3, %v1604_v2, inf  ;;  %v1674_v45 = vcvt.s32.f32 %v1672_v27  ;;  %v1728_v12 = vand.u32 65535, %v7352_v13 }
 0x7d7   :  { %1652 = vmin.xlane.f32.xlu1 %v1651_v42  ;;  %1610 = vmin.xlane.f32.xlu0 %v1609_v49  ;;  %v1714_v43 = vand.u32 65535, %v7355_v26  ;;  %v1702_v42 = vcvt.s32.f32 %v1700_v58  ;;  %v1688_v49 = vcvt.s32.f32 %v1686_v61  ;;  %v1756_v13 = vand.u32 65535, %v7368_v20 }
 0x7d8   :  { %v7433_v60 = vpop.xlane.xlu0 %1634  ;;  %v1742_v26 = vand.u32 65535, %v7371_v11  ;;  %v1784_v20 = vand.u32 65535, %v7384_v18  ;;  %v1770_v11 = vand.u32 65535, %v7387_v10  ;;  %v1812_v18 = vand.u32 65535, %v7400_v16 }
 0x7d9   :  { %vm1636_vm4 = vcmp.eq.f32.partialorder %v7318_v17, %v7433_v60  ;;  %v1798_v10 = vand.u32 65535, %v7403_v37 }
 0x7da   :  { %v1637_v44 = vsel %vm1636_vm4, %v1632_v30, inf  ;;  %v1730_v30 = vcvt.s32.f32 %v1728_v12  ;;  %v1786_v12 = vcvt.s32.f32 %v1784_v20  ;;  %v1814_v37 = vcvt.s32.f32 %v1812_v18 }
 0x7db   :  { %1638 = vmin.xlane.f32.xlu0 %v1637_v44  ;;  %v1716_v44 = vcvt.s32.f32 %v1714_v43  ;;  %v1772_v43 = vcvt.s32.f32 %v1770_v11 }
 0x7dc   :  { %v7439_v53 = vpop.xlane.xlu1 %1676  ;;  %v7441_v4 = vpop.xlane.xlu0 %1662 }
 0x7dd   :  { %vm1678_vm5 = vcmp.eq.f32.partialorder %v7331_v51, %v7439_v53  ;;  %vm1664_vm6 = vcmp.eq.f32.partialorder %v7333_v29, %v7441_v4 }
 0x7de   :  { %v1679_v1 = vsel %vm1678_vm5, %v1674_v45, inf  ;;  %v1665_v17 = vsel %vm1664_vm6, %v1660_v32, inf  ;;  %v1758_v45 = vcvt.s32.f32 %v1756_v13  ;;  %v1744_v32 = vcvt.s32.f32 %v1742_v26 }
 0x7df   :  { %1680 = vmin.xlane.f32.xlu1 %v1679_v1  ;;  %1666 = vmin.xlane.f32.xlu0 %v1665_v17 }
 0x7e0   :  { %v7449_v15 = vpop.xlane.xlu1 %1704  ;;  %v7451_v2 = vpop.xlane.xlu0 %1690 }
 0x7e1   :  { %vm1706_vm7 = vcmp.eq.f32.partialorder %v7347_v54, %v7449_v15  ;;  %vm1692_vm8 = vcmp.eq.f32.partialorder %v7349_v40, %v7451_v2 }
 0x7e2   :  { %v1707_v51 = vsel %vm1706_vm7, %v1702_v42, inf  ;;  %v1693_v29 = vsel %vm1692_vm8, %v1688_v49, inf  ;;  %v1800_v49 = vcvt.s32.f32 %v1798_v10 }
 0x7e3   :  { %1708 = vmin.xlane.f32.xlu1 %v1707_v51  ;;  %1694 = vmin.xlane.f32.xlu0 %v1693_v29  ;;  %v1655_v29 = vcvt.f32.s32 %v7423_v21 }
 0x7e4   :  { %v7459_v27 = vpop.xlane.xlu1 %1732  ;;  %v7461_v57 = vpop.xlane.xlu0 %1718 }
 0x7e5   :  { %vm1734_vm9 = vcmp.eq.f32.partialorder %v7363_v33, %v7459_v27  ;;  %vm1720_vm10 = vcmp.eq.f32.partialorder %v7365_v41, %v7461_v57 }
 0x7e6   :  { %v1735_v54 = vsel %vm1734_vm9, %v1730_v30, inf  ;;  %v1721_v40 = vsel %vm1720_vm10, %v1716_v44, inf  ;;  %v1613_v30 = vcvt.f32.s32 %v7425_v52 }
 0x7e7   :  { %1736 = vmin.xlane.f32.xlu1 %v1735_v54  ;;  %1722 = vmin.xlane.f32.xlu0 %v1721_v40  ;;  %v1656_v40 = vshll.u32 %v1655_v29, 16 }
 0x7e8   :  { %v7469_v58 = vpop.xlane.xlu1 %1760  ;;  %v7471_v61 = vpop.xlane.xlu0 %1746 }
 0x7e9   :  { %vm1762_vm11 = vcmp.eq.f32.partialorder %v7379_v5, %v7469_v58  ;;  %vm1748_vm12 = vcmp.eq.f32.partialorder %v7381_v3, %v7471_v61 }
 0x7ea   :  { %v1763_v33 = vsel %vm1762_vm11, %v1758_v45, inf  ;;  %v1749_v41 = vsel %vm1748_vm12, %v1744_v32, inf }
 0x7eb   :  { %1764 = vmin.xlane.f32.xlu1 %v1763_v33  ;;  %1750 = vmin.xlane.f32.xlu0 %v1749_v41  ;;  %v1683_v41 = vcvt.f32.s32 %v7439_v53 }
 0x7ec   :  { %v7479_v1 = vpop.xlane.xlu1 %1788  ;;  %v7481_v17 = vpop.xlane.xlu0 %1774 }
 0x7ed   :  { %vm1790_vm13 = vcmp.eq.f32.partialorder %v7395_v31, %v7479_v1  ;;  %vm1776_vm14 = vcmp.eq.f32.partialorder %v7397_v59, %v7481_v17  ;;  %v1627_v59 = vcvt.f32.s32 %v7418_v28  ;;  %v1684_v53 = vshll.u32 %v1683_v41, 16 }
 0x7ee   :  { %v1791_v5 = vsel %vm1790_vm13, %v1786_v12, inf  ;;  %v1777_v3 = vsel %vm1776_vm14, %v1772_v43, inf }
 0x7ef   :  { %1792 = vmin.xlane.f32.xlu1 %v1791_v5  ;;  %1778 = vmin.xlane.f32.xlu0 %v1777_v3  ;;  %v1628_v26 = vshll.u32 %v1627_v59, 16  ;;  %v1711_v5 = vcvt.f32.s32 %v7449_v15  ;;  %v1739_v15 = vcvt.f32.s32 %v7459_v27 }
 0x7f0   :  { %v7487_v42 = vpop.xlane.xlu1 %1816  ;;  %v7489_v16 = vpop.xlane.xlu0 %1802 }
 0x7f1   :  { %vm1818_vm15 = vcmp.eq.f32.partialorder %v7409_v8, %v7487_v42  ;;  %vm1804_vm0 = vcmp.eq.f32.partialorder %v7411_v39, %v7489_v16  ;;  %v1641_v8 = vcvt.f32.s32 %v7433_v60  ;;  %v1614_v39 = vshll.u32 %v1613_v30, 16 }
 0x7f2   :  { %v1819_v31 = vsel %vm1818_vm15, %v1814_v37, inf  ;;  %v1805_v51 = vsel %vm1804_vm0, %v1800_v49, inf  ;;  %v1669_v60 = vcvt.f32.s32 %v7441_v4  ;;  %v1697_v4 = vcvt.f32.s32 %v7451_v2 }
 0x7f3   :  { %1820 = vmin.xlane.f32.xlu1 %v1819_v31  ;;  %1806 = vmin.xlane.f32.xlu0 %v1805_v51  ;;  %v1642_v52 = vshll.u32 %v1641_v8, 16  ;;  %v1712_v29 = vshll.u32 %v1711_v5, 16  ;;  %v1725_v2 = vcvt.f32.s32 %v7461_v57  ;;  %v1740_v27 = vshll.u32 %v1739_v15, 16 }
 0x7f4   :  { %v1670_v49 = vshll.u32 %v1669_v60, 16  ;;  %v1781_v60 = vcvt.f32.s32 %v7481_v17 }
 0x7f5   :  { %v1726_v57 = vshll.u32 %v1725_v2, 16 }
 0x7f6   :  { %v1782_v17 = vshll.u32 %v1781_v60, 16 }
 0x85c   :  { %v1625_v13 = vpop.xlane.xlu1 %1624 }
 0x85d   :  { %v1626_v44 = vcvt.f32.s32 %v1625_v13  ;;  %v1698_v13 = vshll.u32 %v1697_v4, 16 }
 0x85f   :  { %v1629_v54 = vadd.s32 %v1628_v26, %v1626_v44 }
 0x860   :  { %v1653_v20 = vpop.xlane.xlu1 %1652  ;;  %v1611_v11 = vpop.xlane.xlu0 %1610 }
 0x861   :  { %v1654_v45 = vcvt.f32.s32 %v1653_v20  ;;  %v1612_v32 = vcvt.f32.s32 %v1611_v11  ;;  %vm1827_vm1 = vcmp.eq.s32.totalorder %v6373_v38, %v1629_v54  ;;  %v1767_v11 = vcvt.f32.s32 %v7469_v58 }
 0x862   :  { %v7501_v28 = vsel %vm1827_vm1, -inf, %v7197_v7 }
 0x863   :  { %v1657_v21 = vadd.s32 %v1656_v40, %v1654_v45  ;;  %v1615_v33 = vadd.s32 %v1614_v39, %v1612_v32  ;;  %1860 = vmax.xlane.f32.xlu1 %v7501_v28  ;;  %v1753_v39 = vcvt.f32.s32 %v7471_v61  ;;  %v1768_v58 = vshll.u32 %v1767_v11, 16 }
 0x864   :  { %v1639_v18 = vpop.xlane.xlu0 %1638 }
 0x865   :  { %v1640_v10 = vcvt.f32.s32 %v1639_v18  ;;  %vm1829_vm2 = vcmp.eq.s32.totalorder %v6373_v38, %v1657_v21  ;;  %vm1826_vm3 = vcmp.eq.s32.totalorder %v6373_v38, %v1615_v33  ;;  %v1754_v61 = vshll.u32 %v1753_v39, 16 }
 0x866   :  { %v7509_v12 = vsel %vm1829_vm2, -inf, %v7205_v56  ;;  %v7512_v7 = vsel %vm1826_vm3, -inf, %v7208_v9  ;;  %v1795_v18 = vcvt.f32.s32 %v7479_v1 }
 0x867   :  { %v1643_v43 = vadd.s32 %v1642_v52, %v1640_v10  ;;  %1864 = vmax.xlane.f32.xlu1 %v7509_v12  ;;  %1858 = vmax.xlane.f32.xlu0 %v7512_v7 }
 0x868   :  { %v1681_v3 = vpop.xlane.xlu1 %1680  ;;  %v1667_v37 = vpop.xlane.xlu0 %1666  ;;  %v1796_v1 = vshll.u32 %v1795_v18, 16 }
 0x869   :  { %v1682_v31 = vcvt.f32.s32 %v1681_v3  ;;  %v1668_v51 = vcvt.f32.s32 %v1667_v37  ;;  %vm1828_vm4 = vcmp.eq.s32.totalorder %v6373_v38, %v1643_v43  ;;  %v1823_v37 = vcvt.f32.s32 %v7487_v42 }
 0x86a   :  { %v7520_v56 = vsel %vm1828_vm4, -inf, %v7216_v0 }
 0x86b   :  { %v1685_v9 = vadd.s32 %v1684_v53, %v1682_v31  ;;  %v1671_v59 = vadd.s32 %v1670_v49, %v1668_v51  ;;  %1862 = vmax.xlane.f32.xlu0 %v7520_v56  ;;  %v1809_v49 = vcvt.f32.s32 %v7489_v16  ;;  %v1824_v42 = vshll.u32 %v1823_v37, 16 }
 0x86c   :  { %v1709_v26 = vpop.xlane.xlu1 %1708  ;;  %v1695_v30 = vpop.xlane.xlu0 %1694 }
 0x86d   :  { %v1710_v44 = vcvt.f32.s32 %v1709_v26  ;;  %v1696_v54 = vcvt.f32.s32 %v1695_v30  ;;  %vm1831_vm5 = vcmp.eq.s32.totalorder %v6373_v38, %v1685_v9  ;;  %vm1830_vm6 = vcmp.eq.s32.totalorder %v6373_v38, %v1671_v59 }
 0x86e   :  { %v7528_v0 = vsel %vm1831_vm5, -inf, %v7224_v22  ;;  %v7531_v40 = vsel %vm1830_vm6, -inf, %v7227_v23  ;;  %v1810_v16 = vshll.u32 %v1809_v49, 16 }
 0x86f   :  { %v1713_v8 = vadd.s32 %v1712_v29, %v1710_v44  ;;  %v1699_v20 = vadd.s32 %v1698_v13, %v1696_v54  ;;  %1868 = vmax.xlane.f32.xlu1 %v7528_v0  ;;  %1866 = vmax.xlane.f32.xlu0 %v7531_v40 }
 0x870   :  { %v1737_v45 = vpop.xlane.xlu1 %1736  ;;  %v1723_v32 = vpop.xlane.xlu0 %1722 }
 0x871   :  { %v1738_v21 = vcvt.f32.s32 %v1737_v45  ;;  %v1724_v22 = vcvt.f32.s32 %v1723_v32  ;;  %vm1833_vm7 = vcmp.eq.s32.totalorder %v6373_v38, %v1713_v8  ;;  %vm1832_vm8 = vcmp.eq.s32.totalorder %v6373_v38, %v1699_v20 }
 0x872   :  { %v7540_v23 = vsel %vm1833_vm7, -inf, %v7236_v46  ;;  %v7543_v33 = vsel %vm1832_vm8, -inf, %v7239_v50 }
 0x873   :  { %v1741_v52 = vadd.s32 %v1740_v27, %v1738_v21  ;;  %v1727_v41 = vadd.s32 %v1726_v57, %v1724_v22  ;;  %1872 = vmax.xlane.f32.xlu1 %v7540_v23  ;;  %1870 = vmax.xlane.f32.xlu0 %v7543_v33 }
 0x874   :  { %v1765_v10 = vpop.xlane.xlu1 %1764  ;;  %v1751_v43 = vpop.xlane.xlu0 %1750 }
 0x875   :  { %v1766_v53 = vcvt.f32.s32 %v1765_v10  ;;  %v1752_v46 = vcvt.f32.s32 %v1751_v43  ;;  %vm1835_vm9 = vcmp.eq.s32.totalorder %v6373_v38, %v1741_v52  ;;  %vm1834_vm10 = vcmp.eq.s32.totalorder %v6373_v38, %v1727_v41 }
 0x876   :  { %v7552_v50 = vsel %vm1835_vm9, -inf, %v7248_v24  ;;  %v7555_v5 = vsel %vm1834_vm10, -inf, %v7251_v35 }
 0x877   :  { %v1769_v4 = vadd.s32 %v1768_v58, %v1766_v53  ;;  %v1755_v3 = vadd.s32 %v1754_v61, %v1752_v46  ;;  %1876 = vmax.xlane.f32.xlu1 %v7552_v50  ;;  %1874 = vmax.xlane.f32.xlu0 %v7555_v5 }
 0x878   :  { %v1793_v31 = vpop.xlane.xlu1 %1792  ;;  %v1779_v51 = vpop.xlane.xlu0 %1778 }
 0x879   :  { %v1794_v9 = vcvt.f32.s32 %v1793_v31  ;;  %v1780_v24 = vcvt.f32.s32 %v1779_v51  ;;  %vm1837_vm11 = vcmp.eq.s32.totalorder %v6373_v38, %v1769_v4  ;;  %vm1836_vm12 = vcmp.eq.s32.totalorder %v6373_v38, %v1755_v3 }
 0x87a   :  { %v7564_v35 = vsel %vm1837_vm11, -inf, %v7260_v34  ;;  %v7567_v59 = vsel %vm1836_vm12, -inf, %v7263_v36 }
 0x87b   :  { %v1797_v29 = vadd.s32 %v1796_v1, %v1794_v9  ;;  %v1783_v13 = vadd.s32 %v1782_v17, %v1780_v24  ;;  %1880 = vmax.xlane.f32.xlu1 %v7564_v35  ;;  %1878 = vmax.xlane.f32.xlu0 %v7567_v59 }
 0x87c   :  { %v1821_v15 = vpop.xlane.xlu1 %1820  ;;  %v1807_v2 = vpop.xlane.xlu0 %1806 }
 0x87d   :  { %v1822_v26 = vcvt.f32.s32 %v1821_v15  ;;  %v1808_v30 = vcvt.f32.s32 %v1807_v2  ;;  %vm1839_vm13 = vcmp.eq.s32.totalorder %v6373_v38, %v1797_v29  ;;  %vm1838_vm14 = vcmp.eq.s32.totalorder %v6373_v38, %v1783_v13 }
 0x87e   :  { %v7574_v34 = vsel %vm1839_vm13, -inf, %v7270_v48  ;;  %v7577_v36 = vsel %vm1838_vm14, -inf, %v7273_v19 }
 0x87f   :  { %v1825_v44 = vadd.s32 %v1824_v42, %v1822_v26  ;;  %v1811_v54 = vadd.s32 %v1810_v16, %v1808_v30  ;;  %1884 = vmax.xlane.f32.xlu1 %v7574_v34  ;;  %1882 = vmax.xlane.f32.xlu0 %v7577_v36 }
 0x881   :  { %vm1841_vm15 = vcmp.eq.s32.totalorder %v6373_v38, %v1825_v44  ;;  %vm1840_vm0 = vcmp.eq.s32.totalorder %v6373_v38, %v1811_v54 }
 0x882   :  { %v7584_v8 = vsel %vm1841_vm15, -inf, %v7280_v25  ;;  %v7587_v20 = vsel %vm1840_vm0, -inf, %v7283_v47 }
 0x883   :  { %1888 = vmax.xlane.f32.xlu1 %v7584_v8  ;;  %1886 = vmax.xlane.f32.xlu0 %v7587_v20 }
 0x8ec   :  { %v1861_v48 = vpop.xlane.xlu1 %1860 }
 0x8ed   :  { %vm1891_vm1 = vcmp.eq.f32.partialorder %v7501_v28, %v1861_v48 }
 0x8ee   :  { %v7593_v19 = vsel %vm1891_vm1, %v6373_v38, 128 }
 0x8ef   :  { %v1937_v27 = vshra.s32 %v7593_v19, 16 }
 0x8f0   :  { %v1865_v57 = vpop.xlane.xlu1 %1864  ;;  %v1859_v11 = vpop.xlane.xlu0 %1858 }
 0x8f1   :  { %vm1893_vm2 = vcmp.eq.f32.partialorder %v7509_v12, %v1865_v57  ;;  %vm1890_vm3 = vcmp.eq.f32.partialorder %v7512_v7, %v1859_v11  ;;  %v7598_v25 = vcvt.s32.f32 %v1937_v27 }
 0x8f2   :  { %v7601_v47 = vsel %vm1893_vm2, %v6373_v38, 128  ;;  %v7604_v39 = vsel %vm1890_vm3, %v6373_v38, 128 }
 0x8f3   :  { %v1965_v45 = vshra.s32 %v7601_v47, 16  ;;  %v1923_v32 = vshra.s32 %v7604_v39, 16  ;;  %1940 = vmin.xlane.f32.xlu1 %v7598_v25 }
 0x8f4   :  { %v1863_v21 = vpop.xlane.xlu0 %1862 }
 0x8f5   :  { %vm1892_vm4 = vcmp.eq.f32.partialorder %v7520_v56, %v1863_v21  ;;  %v7610_v22 = vcvt.s32.f32 %v1965_v45  ;;  %v7612_v52 = vcvt.s32.f32 %v1923_v32 }
 0x8f6   :  { %v7615_v41 = vsel %vm1892_vm4, %v6373_v38, 128 }
 0x8f7   :  { %v1951_v58 = vshra.s32 %v7615_v41, 16  ;;  %1968 = vmin.xlane.f32.xlu1 %v7610_v22  ;;  %1926 = vmin.xlane.f32.xlu0 %v7612_v52 }
 0x8f8   :  { %v1869_v61 = vpop.xlane.xlu1 %1868  ;;  %v1867_v18 = vpop.xlane.xlu0 %1866 }
 0x8f9   :  { %vm1895_vm5 = vcmp.eq.f32.partialorder %v7528_v0, %v1869_v61  ;;  %vm1894_vm6 = vcmp.eq.f32.partialorder %v7531_v40, %v1867_v18  ;;  %v7622_v60 = vcvt.s32.f32 %v1951_v58 }
 0x8fa   :  { %v7625_v10 = vsel %vm1895_vm5, %v6373_v38, 128  ;;  %v7628_v43 = vsel %vm1894_vm6, %v6373_v38, 128 }
 0x8fb   :  { %v1993_v53 = vshra.s32 %v7625_v10, 16  ;;  %v1979_v46 = vshra.s32 %v7628_v43, 16  ;;  %1954 = vmin.xlane.f32.xlu0 %v7622_v60 }
 0x8fc   :  { %v1873_v4 = vpop.xlane.xlu1 %1872  ;;  %v1871_v3 = vpop.xlane.xlu0 %1870 }
 0x8fd   :  { %vm1897_vm7 = vcmp.eq.f32.partialorder %v7540_v23, %v1873_v4  ;;  %vm1896_vm8 = vcmp.eq.f32.partialorder %v7543_v33, %v1871_v3  ;;  %v7635_v1 = vcvt.s32.f32 %v1993_v53  ;;  %v7637_v17 = vcvt.s32.f32 %v1979_v46 }
 0x8fe   :  { %v7640_v37 = vsel %vm1897_vm7, %v6373_v38, 128  ;;  %v7643_v49 = vsel %vm1896_vm8, %v6373_v38, 128 }
 0x8ff   :  { %v2021_v31 = vshra.s32 %v7640_v37, 16  ;;  %v2007_v51 = vshra.s32 %v7643_v49, 16  ;;  %1996 = vmin.xlane.f32.xlu1 %v7635_v1  ;;  %1982 = vmin.xlane.f32.xlu0 %v7637_v17 }
 0x900   :  { %v1877_v9 = vpop.xlane.xlu1 %1876  ;;  %v1875_v24 = vpop.xlane.xlu0 %1874 }
 0x901   :  { %vm1899_vm9 = vcmp.eq.f32.partialorder %v7552_v50, %v1877_v9  ;;  %vm1898_vm10 = vcmp.eq.f32.partialorder %v7555_v5, %v1875_v24  ;;  %v7651_v29 = vcvt.s32.f32 %v2021_v31  ;;  %v7653_v13 = vcvt.s32.f32 %v2007_v51 }
 0x902   :  { %v7656_v42 = vsel %vm1899_vm9, %v6373_v38, 128  ;;  %v7659_v16 = vsel %vm1898_vm10, %v6373_v38, 128 }
 0x903   :  { %v2049_v15 = vshra.s32 %v7656_v42, 16  ;;  %v2035_v2 = vshra.s32 %v7659_v16, 16  ;;  %2024 = vmin.xlane.f32.xlu1 %v7651_v29  ;;  %2010 = vmin.xlane.f32.xlu0 %v7653_v13 }
 0x904   :  { %v1881_v26 = vpop.xlane.xlu1 %1880  ;;  %v1879_v30 = vpop.xlane.xlu0 %1878 }
 0x905   :  { %vm1901_vm11 = vcmp.eq.f32.partialorder %v7564_v35, %v1881_v26  ;;  %vm1900_vm12 = vcmp.eq.f32.partialorder %v7567_v59, %v1879_v30  ;;  %v7667_v44 = vcvt.s32.f32 %v2049_v15  ;;  %v7669_v54 = vcvt.s32.f32 %v2035_v2 }
 0x906   :  { %v7672_v48 = vsel %vm1901_vm11, %v6373_v38, 128  ;;  %v7675_v27 = vsel %vm1900_vm12, %v6373_v38, 128 }
 0x907   :  { %v2077_v57 = vshra.s32 %v7672_v48, 16  ;;  %v2063_v11 = vshra.s32 %v7675_v27, 16  ;;  %2052 = vmin.xlane.f32.xlu1 %v7667_v44  ;;  %2038 = vmin.xlane.f32.xlu0 %v7669_v54 }
 0x908   :  { %v1885_v45 = vpop.xlane.xlu1 %1884  ;;  %v1883_v32 = vpop.xlane.xlu0 %1882 }
 0x909   :  { %vm1903_vm13 = vcmp.eq.f32.partialorder %v7574_v34, %v1885_v45  ;;  %vm1902_vm14 = vcmp.eq.f32.partialorder %v7577_v36, %v1883_v32  ;;  %v7683_v21 = vcvt.s32.f32 %v2077_v57  ;;  %v7685_v58 = vcvt.s32.f32 %v2063_v11 }
 0x90a   :  { %v7688_v61 = vsel %vm1903_vm13, %v6373_v38, 128  ;;  %v7691_v18 = vsel %vm1902_vm14, %v6373_v38, 128  ;;  %v1936_v57 = vand.u32 65535, %v7593_v19  ;;  %v1964_v11 = vand.u32 65535, %v7601_v47 }
 0x90b   :  { %v2105_v53 = vshra.s32 %v7688_v61, 16  ;;  %v2091_v46 = vshra.s32 %v7691_v18, 16  ;;  %2080 = vmin.xlane.f32.xlu1 %v7683_v21  ;;  %2066 = vmin.xlane.f32.xlu0 %v7685_v58  ;;  %v1922_v45 = vand.u32 65535, %v7604_v39 }
 0x90c   :  { %v1889_v4 = vpop.xlane.xlu1 %1888  ;;  %v1887_v3 = vpop.xlane.xlu0 %1886 }
 0x90d   :  { %vm1905_vm15 = vcmp.eq.f32.partialorder %v7584_v8, %v1889_v4  ;;  %vm1904_vm0 = vcmp.eq.f32.partialorder %v7587_v20, %v1887_v3  ;;  %v7699_v31 = vcvt.s32.f32 %v2105_v53  ;;  %v7701_v51 = vcvt.s32.f32 %v2091_v46 }
 0x90e   :  { %v7704_v9 = vsel %vm1905_vm15, %v6373_v38, 128  ;;  %v7707_v24 = vsel %vm1904_vm0, %v6373_v38, 128  ;;  %v1938_v53 = vcvt.s32.f32 %v1936_v57  ;;  %v1950_v4 = vand.u32 65535, %v7615_v41 }
 0x90f   :  { %v2133_v15 = vshra.s32 %v7704_v9, 16  ;;  %v2119_v2 = vshra.s32 %v7707_v24, 16  ;;  %2108 = vmin.xlane.f32.xlu1 %v7699_v31  ;;  %2094 = vmin.xlane.f32.xlu0 %v7701_v51  ;;  %v1924_v19 = vcvt.s32.f32 %v1922_v45  ;;  %v1978_v41 = vand.u32 65535, %v7628_v43 }
 0x911   :  { %v7713_v26 = vcvt.s32.f32 %v2133_v15  ;;  %v7715_v30 = vcvt.s32.f32 %v2119_v2  ;;  %v1966_v2 = vcvt.s32.f32 %v1964_v11 }
 0x913   :  { %2136 = vmin.xlane.f32.xlu1 %v7713_v26  ;;  %2122 = vmin.xlane.f32.xlu0 %v7715_v30 }
 0x97c   :  { %v7722_v32 = vpop.xlane.xlu1 %1940 }
 0x97d   :  { %vm1942_vm1 = vcmp.eq.f32.partialorder %v7598_v25, %v7722_v32  ;;  %v1992_v25 = vand.u32 65535, %v7625_v10  ;;  %v1980_v10 = vcvt.s32.f32 %v1978_v41 }
 0x97e   :  { %v1943_v46 = vsel %vm1942_vm1, %v1938_v53, inf  ;;  %v1952_v53 = vcvt.s32.f32 %v1950_v4 }
 0x97f   :  { %1944 = vmin.xlane.f32.xlu1 %v1943_v46 }
 0x980   :  { %v7727_v3 = vpop.xlane.xlu1 %1968  ;;  %v7729_v15 = vpop.xlane.xlu0 %1926 }
 0x981   :  { %vm1970_vm2 = vcmp.eq.f32.partialorder %v7610_v22, %v7727_v3  ;;  %vm1928_vm3 = vcmp.eq.f32.partialorder %v7612_v52, %v7729_v15  ;;  %v2020_v22 = vand.u32 65535, %v7640_v37  ;;  %v2006_v52 = vand.u32 65535, %v7643_v49 }
 0x982   :  { %v1971_v47 = vsel %vm1970_vm2, %v1966_v2, inf  ;;  %v1929_v39 = vsel %vm1928_vm3, %v1924_v19, inf  ;;  %v1994_v2 = vcvt.s32.f32 %v1992_v25  ;;  %v2048_v37 = vand.u32 65535, %v7656_v42 }
 0x983   :  { %1972 = vmin.xlane.f32.xlu1 %v1971_v47  ;;  %1930 = vmin.xlane.f32.xlu0 %v1929_v39  ;;  %v2034_v49 = vand.u32 65535, %v7659_v16  ;;  %v2022_v47 = vcvt.s32.f32 %v2020_v22  ;;  %v2008_v39 = vcvt.s32.f32 %v2006_v52  ;;  %v2076_v42 = vand.u32 65535, %v7672_v48 }
 0x984   :  { %v7737_v57 = vpop.xlane.xlu0 %1954  ;;  %v2062_v16 = vand.u32 65535, %v7675_v27  ;;  %v2104_v48 = vand.u32 65535, %v7688_v61  ;;  %v2090_v27 = vand.u32 65535, %v7691_v18  ;;  %v2132_v61 = vand.u32 65535, %v7704_v9 }
 0x985   :  { %vm1956_vm4 = vcmp.eq.f32.partialorder %v7622_v60, %v7737_v57  ;;  %v2118_v18 = vand.u32 65535, %v7707_v24 }
 0x986   :  { %v1957_v11 = vsel %vm1956_vm4, %v1952_v53, inf  ;;  %v2050_v53 = vcvt.s32.f32 %v2048_v37  ;;  %v2106_v37 = vcvt.s32.f32 %v2104_v48  ;;  %v2134_v24 = vcvt.s32.f32 %v2132_v61 }
 0x987   :  { %1958 = vmin.xlane.f32.xlu0 %v1957_v11  ;;  %v2036_v11 = vcvt.s32.f32 %v2034_v49  ;;  %v2092_v49 = vcvt.s32.f32 %v2090_v27 }
 0x988   :  { %v7743_v45 = vpop.xlane.xlu1 %1996  ;;  %v7745_v46 = vpop.xlane.xlu0 %1982 }
 0x989   :  { %vm1998_vm5 = vcmp.eq.f32.partialorder %v7635_v1, %v7743_v45  ;;  %vm1984_vm6 = vcmp.eq.f32.partialorder %v7637_v17, %v7745_v46 }
 0x98a   :  { %v1999_v43 = vsel %vm1998_vm5, %v1994_v2, inf  ;;  %v1985_v60 = vsel %vm1984_vm6, %v1980_v10, inf  ;;  %v2078_v2 = vcvt.s32.f32 %v2076_v42  ;;  %v2064_v10 = vcvt.s32.f32 %v2062_v16 }
 0x98b   :  { %2000 = vmin.xlane.f32.xlu1 %v1999_v43  ;;  %1986 = vmin.xlane.f32.xlu0 %v1985_v60 }
 0x98c   :  { %v7753_v4 = vpop.xlane.xlu1 %2024  ;;  %v7755_v19 = vpop.xlane.xlu0 %2010 }
 0x98d   :  { %vm2026_vm7 = vcmp.eq.f32.partialorder %v7651_v29, %v7753_v4  ;;  %vm2012_vm8 = vcmp.eq.f32.partialorder %v7653_v13, %v7755_v19 }
 0x98e   :  { %v2027_v1 = vsel %vm2026_vm7, %v2022_v47, inf  ;;  %v2013_v17 = vsel %vm2012_vm8, %v2008_v39, inf  ;;  %v2120_v39 = vcvt.s32.f32 %v2118_v18 }
 0x98f   :  { %2028 = vmin.xlane.f32.xlu1 %v2027_v1  ;;  %2014 = vmin.xlane.f32.xlu0 %v2013_v17  ;;  %v1975_v17 = vcvt.f32.s32 %v7727_v3 }
 0x990   :  { %v7763_v25 = vpop.xlane.xlu1 %2052  ;;  %v7765_v41 = vpop.xlane.xlu0 %2038 }
 0x991   :  { %vm2054_vm9 = vcmp.eq.f32.partialorder %v7667_v44, %v7763_v25  ;;  %vm2040_vm10 = vcmp.eq.f32.partialorder %v7669_v54, %v7765_v41 }
 0x992   :  { %v2055_v29 = vsel %vm2054_vm9, %v2050_v53, inf  ;;  %v2041_v13 = vsel %vm2040_vm10, %v2036_v11, inf  ;;  %v1933_v53 = vcvt.f32.s32 %v7729_v15 }
 0x993   :  { %2056 = vmin.xlane.f32.xlu1 %v2055_v29  ;;  %2042 = vmin.xlane.f32.xlu0 %v2041_v13  ;;  %v1976_v13 = vshll.u32 %v1975_v17, 16 }
 0x994   :  { %v7773_v22 = vpop.xlane.xlu1 %2080  ;;  %v7775_v52 = vpop.xlane.xlu0 %2066 }
 0x995   :  { %vm2082_vm11 = vcmp.eq.f32.partialorder %v7683_v21, %v7773_v22  ;;  %vm2068_vm12 = vcmp.eq.f32.partialorder %v7685_v58, %v7775_v52 }
 0x996   :  { %v2083_v44 = vsel %vm2082_vm11, %v2078_v2, inf  ;;  %v2069_v54 = vsel %vm2068_vm12, %v2064_v10, inf }
 0x997   :  { %2084 = vmin.xlane.f32.xlu1 %v2083_v44  ;;  %2070 = vmin.xlane.f32.xlu0 %v2069_v54  ;;  %v2003_v54 = vcvt.f32.s32 %v7743_v45 }
 0x998   :  { %v7783_v43 = vpop.xlane.xlu1 %2108  ;;  %v7785_v60 = vpop.xlane.xlu0 %2094 }
 0x999   :  { %vm2110_vm13 = vcmp.eq.f32.partialorder %v7699_v31, %v7783_v43  ;;  %vm2096_vm14 = vcmp.eq.f32.partialorder %v7701_v51, %v7785_v60  ;;  %v1947_v51 = vcvt.f32.s32 %v7722_v32  ;;  %v2004_v45 = vshll.u32 %v2003_v54, 16 }
 0x99a   :  { %v2111_v21 = vsel %vm2110_vm13, %v2106_v37, inf  ;;  %v2097_v58 = vsel %vm2096_vm14, %v2092_v49, inf }
 0x99b   :  { %2112 = vmin.xlane.f32.xlu1 %v2111_v21  ;;  %2098 = vmin.xlane.f32.xlu0 %v2097_v58  ;;  %v1948_v16 = vshll.u32 %v1947_v51, 16  ;;  %v2031_v21 = vcvt.f32.s32 %v7753_v4  ;;  %v2059_v4 = vcvt.f32.s32 %v7763_v25 }
 0x99c   :  { %v7791_v47 = vpop.xlane.xlu1 %2136  ;;  %v7793_v9 = vpop.xlane.xlu0 %2122 }
 0x99d   :  { %vm2138_vm15 = vcmp.eq.f32.partialorder %v7713_v26, %v7791_v47  ;;  %vm2124_vm0 = vcmp.eq.f32.partialorder %v7715_v30, %v7793_v9  ;;  %v1961_v26 = vcvt.f32.s32 %v7737_v57  ;;  %v1934_v30 = vshll.u32 %v1933_v53, 16 }
 0x99e   :  { %v2139_v31 = vsel %vm2138_vm15, %v2134_v24, inf  ;;  %v2125_v1 = vsel %vm2124_vm0, %v2120_v39, inf  ;;  %v1989_v57 = vcvt.f32.s32 %v7745_v46  ;;  %v2017_v46 = vcvt.f32.s32 %v7755_v19 }
 0x99f   :  { %2140 = vmin.xlane.f32.xlu1 %v2139_v31  ;;  %2126 = vmin.xlane.f32.xlu0 %v2125_v1  ;;  %v1962_v15 = vshll.u32 %v1961_v26, 16  ;;  %v2032_v17 = vshll.u32 %v2031_v21, 16  ;;  %v2045_v19 = vcvt.f32.s32 %v7765_v41  ;;  %v2060_v25 = vshll.u32 %v2059_v4, 16 }
 0x9a0   :  { %v1990_v39 = vshll.u32 %v1989_v57, 16  ;;  %v2101_v57 = vcvt.f32.s32 %v7785_v60 }
 0x9a1   :  { %v2046_v41 = vshll.u32 %v2045_v19, 16 }
 0x9a2   :  { %v2102_v60 = vshll.u32 %v2101_v57, 16 }
 0xa08   :  { %v1945_v42 = vpop.xlane.xlu1 %1944 }
 0xa09   :  { %v1946_v11 = vcvt.f32.s32 %v1945_v42  ;;  %v2018_v42 = vshll.u32 %v2017_v46, 16 }
 0xa0b   :  { %v1949_v29 = vadd.s32 %v1948_v16, %v1946_v11 }
 0xa0c   :  { %v1973_v48 = vpop.xlane.xlu1 %1972  ;;  %v1931_v27 = vpop.xlane.xlu0 %1930 }
 0xa0d   :  { %v1974_v2 = vcvt.f32.s32 %v1973_v48  ;;  %v1932_v10 = vcvt.f32.s32 %v1931_v27  ;;  %vm2147_vm1 = vcmp.eq.s32.totalorder %v6373_v38, %v1949_v29  ;;  %v2087_v27 = vcvt.f32.s32 %v7773_v22 }
 0xa0e   :  { %v7805_v32 = vsel %vm2147_vm1, -inf, %v7501_v28 }
 0xa0f   :  { %v1977_v3 = vadd.s32 %v1976_v13, %v1974_v2  ;;  %v1935_v44 = vadd.s32 %v1934_v30, %v1932_v10  ;;  %2180 = vmax.xlane.f32.xlu1 %v7805_v32  ;;  %v2073_v30 = vcvt.f32.s32 %v7775_v52  ;;  %v2088_v22 = vshll.u32 %v2087_v27, 16 }
 0xa10   :  { %v1959_v61 = vpop.xlane.xlu0 %1958 }
 0xa11   :  { %v1960_v18 = vcvt.f32.s32 %v1959_v61  ;;  %vm2149_vm2 = vcmp.eq.s32.totalorder %v6373_v38, %v1977_v3  ;;  %vm2146_vm3 = vcmp.eq.s32.totalorder %v6373_v38, %v1935_v44  ;;  %v2074_v52 = vshll.u32 %v2073_v30, 16 }
 0xa12   :  { %v7813_v37 = vsel %vm2149_vm2, -inf, %v7509_v12  ;;  %v7816_v28 = vsel %vm2146_vm3, -inf, %v7512_v7  ;;  %v2115_v61 = vcvt.f32.s32 %v7783_v43 }
 0xa13   :  { %v1963_v49 = vadd.s32 %v1962_v15, %v1960_v18  ;;  %2184 = vmax.xlane.f32.xlu1 %v7813_v37  ;;  %2178 = vmax.xlane.f32.xlu0 %v7816_v28 }
 0xa14   :  { %v2001_v58 = vpop.xlane.xlu1 %2000  ;;  %v1987_v24 = vpop.xlane.xlu0 %1986  ;;  %v2116_v43 = vshll.u32 %v2115_v61, 16 }
 0xa15   :  { %v2002_v31 = vcvt.f32.s32 %v2001_v58  ;;  %v1988_v1 = vcvt.f32.s32 %v1987_v24  ;;  %vm2148_vm4 = vcmp.eq.s32.totalorder %v6373_v38, %v1963_v49  ;;  %v2143_v24 = vcvt.f32.s32 %v7791_v47 }
 0xa16   :  { %v7824_v12 = vsel %vm2148_vm4, -inf, %v7520_v56 }
 0xa17   :  { %v2005_v7 = vadd.s32 %v2004_v45, %v2002_v31  ;;  %v1991_v51 = vadd.s32 %v1990_v39, %v1988_v1  ;;  %2182 = vmax.xlane.f32.xlu0 %v7824_v12  ;;  %v2129_v39 = vcvt.f32.s32 %v7793_v9  ;;  %v2144_v47 = vshll.u32 %v2143_v24, 16 }
 0xa18   :  { %v2029_v16 = vpop.xlane.xlu1 %2028  ;;  %v2015_v53 = vpop.xlane.xlu0 %2014 }
 0xa19   :  { %v2030_v11 = vcvt.f32.s32 %v2029_v16  ;;  %v2016_v29 = vcvt.f32.s32 %v2015_v53  ;;  %vm2151_vm5 = vcmp.eq.s32.totalorder %v6373_v38, %v2005_v7  ;;  %vm2150_vm6 = vcmp.eq.s32.totalorder %v6373_v38, %v1991_v51 }
 0xa1a   :  { %v7832_v56 = vsel %vm2151_vm5, -inf, %v7528_v0  ;;  %v7835_v13 = vsel %vm2150_vm6, -inf, %v7531_v40  ;;  %v2130_v9 = vshll.u32 %v2129_v39, 16 }
 0xa1b   :  { %v2033_v26 = vadd.s32 %v2032_v17, %v2030_v11  ;;  %v2019_v48 = vadd.s32 %v2018_v42, %v2016_v29  ;;  %2188 = vmax.xlane.f32.xlu1 %v7832_v56  ;;  %2186 = vmax.xlane.f32.xlu0 %v7835_v13 }
 0xa1c   :  { %v2057_v2 = vpop.xlane.xlu1 %2056  ;;  %v2043_v10 = vpop.xlane.xlu0 %2042 }
 0xa1d   :  { %v2058_v3 = vcvt.f32.s32 %v2057_v2  ;;  %v2044_v0 = vcvt.f32.s32 %v2043_v10  ;;  %vm2153_vm7 = vcmp.eq.s32.totalorder %v6373_v38, %v2033_v26  ;;  %vm2152_vm8 = vcmp.eq.s32.totalorder %v6373_v38, %v2019_v48 }
 0xa1e   :  { %v7844_v40 = vsel %vm2153_vm7, -inf, %v7540_v23  ;;  %v7847_v44 = vsel %vm2152_vm8, -inf, %v7543_v33 }
 0xa1f   :  { %v2061_v15 = vadd.s32 %v2060_v25, %v2058_v3  ;;  %v2047_v54 = vadd.s32 %v2046_v41, %v2044_v0  ;;  %2192 = vmax.xlane.f32.xlu1 %v7844_v40  ;;  %2190 = vmax.xlane.f32.xlu0 %v7847_v44 }
 0xa20   :  { %v2085_v18 = vpop.xlane.xlu1 %2084  ;;  %v2071_v49 = vpop.xlane.xlu0 %2070 }
 0xa21   :  { %v2086_v45 = vcvt.f32.s32 %v2085_v18  ;;  %v2072_v23 = vcvt.f32.s32 %v2071_v49  ;;  %vm2155_vm9 = vcmp.eq.s32.totalorder %v6373_v38, %v2061_v15  ;;  %vm2154_vm10 = vcmp.eq.s32.totalorder %v6373_v38, %v2047_v54 }
 0xa22   :  { %v7856_v33 = vsel %vm2155_vm9, -inf, %v7552_v50  ;;  %v7859_v21 = vsel %vm2154_vm10, -inf, %v7555_v5 }
 0xa23   :  { %v2089_v46 = vadd.s32 %v2088_v22, %v2086_v45  ;;  %v2075_v58 = vadd.s32 %v2074_v52, %v2072_v23  ;;  %2196 = vmax.xlane.f32.xlu1 %v7856_v33  ;;  %2194 = vmax.xlane.f32.xlu0 %v7859_v21 }
 0xa24   :  { %v2113_v31 = vpop.xlane.xlu1 %2112  ;;  %v2099_v1 = vpop.xlane.xlu0 %2098 }
 0xa25   :  { %v2114_v7 = vcvt.f32.s32 %v2113_v31  ;;  %v2100_v50 = vcvt.f32.s32 %v2099_v1  ;;  %vm2157_vm11 = vcmp.eq.s32.totalorder %v6373_v38, %v2089_v46  ;;  %vm2156_vm12 = vcmp.eq.s32.totalorder %v6373_v38, %v2075_v58 }
 0xa26   :  { %v7868_v5 = vsel %vm2157_vm11, -inf, %v7564_v35  ;;  %v7871_v51 = vsel %vm2156_vm12, -inf, %v7567_v59 }
 0xa27   :  { %v2117_v17 = vadd.s32 %v2116_v43, %v2114_v7  ;;  %v2103_v42 = vadd.s32 %v2102_v60, %v2100_v50  ;;  %2200 = vmax.xlane.f32.xlu1 %v7868_v5  ;;  %2198 = vmax.xlane.f32.xlu0 %v7871_v51 }
 0xa28   :  { %v2141_v4 = vpop.xlane.xlu1 %2140  ;;  %v2127_v19 = vpop.xlane.xlu0 %2126 }
 0xa29   :  { %v2142_v16 = vcvt.f32.s32 %v2141_v4  ;;  %v2128_v53 = vcvt.f32.s32 %v2127_v19  ;;  %vm2159_vm13 = vcmp.eq.s32.totalorder %v6373_v38, %v2117_v17  ;;  %vm2158_vm14 = vcmp.eq.s32.totalorder %v6373_v38, %v2103_v42 }
 0xa2a   :  { %v7878_v35 = vsel %vm2159_vm13, -inf, %v7574_v34  ;;  %v7881_v59 = vsel %vm2158_vm14, -inf, %v7577_v36 }
 0xa2b   :  { %v2145_v11 = vadd.s32 %v2144_v47, %v2142_v16  ;;  %v2131_v29 = vadd.s32 %v2130_v9, %v2128_v53  ;;  %2204 = vmax.xlane.f32.xlu1 %v7878_v35  ;;  %2202 = vmax.xlane.f32.xlu0 %v7881_v59 }
 0xa2d   :  { %vm2161_vm15 = vcmp.eq.s32.totalorder %v6373_v38, %v2145_v11  ;;  %vm2160_vm0 = vcmp.eq.s32.totalorder %v6373_v38, %v2131_v29 }
 0xa2e   :  { %v7888_v26 = vsel %vm2161_vm15, -inf, %v7584_v8  ;;  %v7891_v48 = vsel %vm2160_vm0, -inf, %v7587_v20 }
 0xa2f   :  { %2208 = vmax.xlane.f32.xlu1 %v7888_v26  ;;  %2206 = vmax.xlane.f32.xlu0 %v7891_v48 }
 0xa98   :  { %v2181_v34 = vpop.xlane.xlu1 %2180 }
 0xa99   :  { %vm2211_vm1 = vcmp.eq.f32.partialorder %v7805_v32, %v2181_v34 }
 0xa9a   :  { %v7897_v36 = vsel %vm2211_vm1, %v6373_v38, 128 }
 0xa9b   :  { %v2257_v25 = vshra.s32 %v7897_v36, 16 }
 0xa9c   :  { %v2185_v41 = vpop.xlane.xlu1 %2184  ;;  %v2179_v27 = vpop.xlane.xlu0 %2178 }
 0xa9d   :  { %vm2213_vm2 = vcmp.eq.f32.partialorder %v7813_v37, %v2185_v41  ;;  %vm2210_vm3 = vcmp.eq.f32.partialorder %v7816_v28, %v2179_v27  ;;  %v7902_v8 = vcvt.s32.f32 %v2257_v25 }
 0xa9e   :  { %v7905_v20 = vsel %vm2213_vm2, %v6373_v38, 128  ;;  %v7908_v30 = vsel %vm2210_vm3, %v6373_v38, 128 }
 0xa9f   :  { %v2285_v2 = vshra.s32 %v7905_v20, 16  ;;  %v2243_v10 = vshra.s32 %v7908_v30, 16  ;;  %2260 = vmin.xlane.f32.xlu1 %v7902_v8 }
 0xaa0   :  { %v2183_v3 = vpop.xlane.xlu0 %2182 }
 0xaa1   :  { %vm2212_vm4 = vcmp.eq.f32.partialorder %v7824_v12, %v2183_v3  ;;  %v7914_v0 = vcvt.s32.f32 %v2285_v2  ;;  %v7916_v15 = vcvt.s32.f32 %v2243_v10 }
 0xaa2   :  { %v7919_v54 = vsel %vm2212_vm4, %v6373_v38, 128 }
 0xaa3   :  { %v2271_v22 = vshra.s32 %v7919_v54, 16  ;;  %2288 = vmin.xlane.f32.xlu1 %v7914_v0  ;;  %2246 = vmin.xlane.f32.xlu0 %v7916_v15 }
 0xaa4   :  { %v2189_v52 = vpop.xlane.xlu1 %2188  ;;  %v2187_v61 = vpop.xlane.xlu0 %2186 }
 0xaa5   :  { %vm2215_vm5 = vcmp.eq.f32.partialorder %v7832_v56, %v2189_v52  ;;  %vm2214_vm6 = vcmp.eq.f32.partialorder %v7835_v13, %v2187_v61  ;;  %v7926_v57 = vcvt.s32.f32 %v2271_v22 }
 0xaa6   :  { %v7929_v18 = vsel %vm2215_vm5, %v6373_v38, 128  ;;  %v7932_v49 = vsel %vm2214_vm6, %v6373_v38, 128 }
 0xaa7   :  { %v2313_v45 = vshra.s32 %v7929_v18, 16  ;;  %v2299_v23 = vshra.s32 %v7932_v49, 16  ;;  %2274 = vmin.xlane.f32.xlu0 %v7926_v57 }
 0xaa8   :  { %v2193_v46 = vpop.xlane.xlu1 %2192  ;;  %v2191_v58 = vpop.xlane.xlu0 %2190 }
 0xaa9   :  { %vm2217_vm7 = vcmp.eq.f32.partialorder %v7844_v40, %v2193_v46  ;;  %vm2216_vm8 = vcmp.eq.f32.partialorder %v7847_v44, %v2191_v58  ;;  %v7939_v43 = vcvt.s32.f32 %v2313_v45  ;;  %v7941_v60 = vcvt.s32.f32 %v2299_v23 }
 0xaaa   :  { %v7944_v24 = vsel %vm2217_vm7, %v6373_v38, 128  ;;  %v7947_v39 = vsel %vm2216_vm8, %v6373_v38, 128 }
 0xaab   :  { %v2341_v31 = vshra.s32 %v7944_v24, 16  ;;  %v2327_v1 = vshra.s32 %v7947_v39, 16  ;;  %2316 = vmin.xlane.f32.xlu1 %v7939_v43  ;;  %2302 = vmin.xlane.f32.xlu0 %v7941_v60 }
 0xaac   :  { %v2197_v7 = vpop.xlane.xlu1 %2196  ;;  %v2195_v50 = vpop.xlane.xlu0 %2194 }
 0xaad   :  { %vm2219_vm9 = vcmp.eq.f32.partialorder %v7856_v33, %v2197_v7  ;;  %vm2218_vm10 = vcmp.eq.f32.partialorder %v7859_v21, %v2195_v50  ;;  %v7955_v17 = vcvt.s32.f32 %v2341_v31  ;;  %v7957_v42 = vcvt.s32.f32 %v2327_v1 }
 0xaae   :  { %v7960_v47 = vsel %vm2219_vm9, %v6373_v38, 128  ;;  %v7963_v9 = vsel %vm2218_vm10, %v6373_v38, 128 }
 0xaaf   :  { %v2369_v4 = vshra.s32 %v7960_v47, 16  ;;  %v2355_v19 = vshra.s32 %v7963_v9, 16  ;;  %2344 = vmin.xlane.f32.xlu1 %v7955_v17  ;;  %2330 = vmin.xlane.f32.xlu0 %v7957_v42 }
 0xab0   :  { %v2201_v16 = vpop.xlane.xlu1 %2200  ;;  %v2199_v53 = vpop.xlane.xlu0 %2198 }
 0xab1   :  { %vm2221_vm11 = vcmp.eq.f32.partialorder %v7868_v5, %v2201_v16  ;;  %vm2220_vm12 = vcmp.eq.f32.partialorder %v7871_v51, %v2199_v53  ;;  %v7971_v11 = vcvt.s32.f32 %v2369_v4  ;;  %v7973_v29 = vcvt.s32.f32 %v2355_v19 }
 0xab2   :  { %v7976_v34 = vsel %vm2221_vm11, %v6373_v38, 128  ;;  %v7979_v25 = vsel %vm2220_vm12, %v6373_v38, 128 }
 0xab3   :  { %v2397_v41 = vshra.s32 %v7976_v34, 16  ;;  %v2383_v27 = vshra.s32 %v7979_v25, 16  ;;  %2372 = vmin.xlane.f32.xlu1 %v7971_v11  ;;  %2358 = vmin.xlane.f32.xlu0 %v7973_v29 }
 0xab4   :  { %v2205_v2 = vpop.xlane.xlu1 %2204  ;;  %v2203_v10 = vpop.xlane.xlu0 %2202 }
 0xab5   :  { %vm2223_vm13 = vcmp.eq.f32.partialorder %v7878_v35, %v2205_v2  ;;  %vm2222_vm14 = vcmp.eq.f32.partialorder %v7881_v59, %v2203_v10  ;;  %v7987_v3 = vcvt.s32.f32 %v2397_v41  ;;  %v7989_v22 = vcvt.s32.f32 %v2383_v27 }
 0xab6   :  { %v7992_v52 = vsel %vm2223_vm13, %v6373_v38, 128  ;;  %v7995_v61 = vsel %vm2222_vm14, %v6373_v38, 128  ;;  %v2256_v41 = vand.u32 65535, %v7897_v36  ;;  %v2284_v27 = vand.u32 65535, %v7905_v20 }
 0xab7   :  { %v2425_v45 = vshra.s32 %v7992_v52, 16  ;;  %v2411_v23 = vshra.s32 %v7995_v61, 16  ;;  %2400 = vmin.xlane.f32.xlu1 %v7987_v3  ;;  %2386 = vmin.xlane.f32.xlu0 %v7989_v22  ;;  %v2242_v2 = vand.u32 65535, %v7908_v30 }
 0xab8   :  { %v2209_v46 = vpop.xlane.xlu1 %2208  ;;  %v2207_v58 = vpop.xlane.xlu0 %2206 }
 0xab9   :  { %vm2225_vm15 = vcmp.eq.f32.partialorder %v7888_v26, %v2209_v46  ;;  %vm2224_vm0 = vcmp.eq.f32.partialorder %v7891_v48, %v2207_v58  ;;  %v8003_v31 = vcvt.s32.f32 %v2425_v45  ;;  %v8005_v1 = vcvt.s32.f32 %v2411_v23 }
 0xaba   :  { %v8008_v7 = vsel %vm2225_vm15, %v6373_v38, 128  ;;  %v8011_v50 = vsel %vm2224_vm0, %v6373_v38, 128  ;;  %v2258_v45 = vcvt.s32.f32 %v2256_v41  ;;  %v2270_v46 = vand.u32 65535, %v7919_v54 }
 0xabb   :  { %v2453_v4 = vshra.s32 %v8008_v7, 16  ;;  %v2439_v19 = vshra.s32 %v8011_v50, 16  ;;  %2428 = vmin.xlane.f32.xlu1 %v8003_v31  ;;  %2414 = vmin.xlane.f32.xlu0 %v8005_v1  ;;  %v2244_v36 = vcvt.s32.f32 %v2242_v2  ;;  %v2298_v54 = vand.u32 65535, %v7932_v49 }
 0xabd   :  { %v8017_v16 = vcvt.s32.f32 %v2453_v4  ;;  %v8019_v53 = vcvt.s32.f32 %v2439_v19  ;;  %v2286_v19 = vcvt.s32.f32 %v2284_v27 }
 0xabf   :  { %2456 = vmin.xlane.f32.xlu1 %v8017_v16  ;;  %2442 = vmin.xlane.f32.xlu0 %v8019_v53 }
 0xb28   :  { %v8026_v10 = vpop.xlane.xlu1 %2260 }
 0xb29   :  { %vm2262_vm1 = vcmp.eq.f32.partialorder %v7902_v8, %v8026_v10  ;;  %v2312_v8 = vand.u32 65535, %v7929_v18  ;;  %v2300_v18 = vcvt.s32.f32 %v2298_v54 }
 0xb2a   :  { %v2263_v23 = vsel %vm2262_vm1, %v2258_v45, inf  ;;  %v2272_v45 = vcvt.s32.f32 %v2270_v46 }
 0xb2b   :  { %2264 = vmin.xlane.f32.xlu1 %v2263_v23 }
 0xb2c   :  { %v8031_v58 = vpop.xlane.xlu1 %2288  ;;  %v8033_v4 = vpop.xlane.xlu0 %2246 }
 0xb2d   :  { %vm2290_vm2 = vcmp.eq.f32.partialorder %v7914_v0, %v8031_v58  ;;  %vm2248_vm3 = vcmp.eq.f32.partialorder %v7916_v15, %v8033_v4  ;;  %v2340_v0 = vand.u32 65535, %v7944_v24  ;;  %v2326_v15 = vand.u32 65535, %v7947_v39 }
 0xb2e   :  { %v2291_v20 = vsel %vm2290_vm2, %v2286_v19, inf  ;;  %v2249_v30 = vsel %vm2248_vm3, %v2244_v36, inf  ;;  %v2314_v19 = vcvt.s32.f32 %v2312_v8  ;;  %v2368_v24 = vand.u32 65535, %v7960_v47 }
 0xb2f   :  { %2292 = vmin.xlane.f32.xlu1 %v2291_v20  ;;  %2250 = vmin.xlane.f32.xlu0 %v2249_v30  ;;  %v2354_v39 = vand.u32 65535, %v7963_v9  ;;  %v2342_v20 = vcvt.s32.f32 %v2340_v0  ;;  %v2328_v30 = vcvt.s32.f32 %v2326_v15  ;;  %v2396_v47 = vand.u32 65535, %v7976_v34 }
 0xb30   :  { %v8041_v41 = vpop.xlane.xlu0 %2274  ;;  %v2382_v9 = vand.u32 65535, %v7979_v25  ;;  %v2424_v34 = vand.u32 65535, %v7992_v52  ;;  %v2410_v25 = vand.u32 65535, %v7995_v61  ;;  %v2452_v52 = vand.u32 65535, %v8008_v7 }
 0xb31   :  { %vm2276_vm4 = vcmp.eq.f32.partialorder %v7926_v57, %v8041_v41  ;;  %v2438_v61 = vand.u32 65535, %v8011_v50 }
 0xb32   :  { %v2277_v27 = vsel %vm2276_vm4, %v2272_v45, inf  ;;  %v2370_v45 = vcvt.s32.f32 %v2368_v24  ;;  %v2426_v24 = vcvt.s32.f32 %v2424_v34  ;;  %v2454_v50 = vcvt.s32.f32 %v2452_v52 }
 0xb33   :  { %2278 = vmin.xlane.f32.xlu0 %v2277_v27  ;;  %v2356_v27 = vcvt.s32.f32 %v2354_v39  ;;  %v2412_v39 = vcvt.s32.f32 %v2410_v25 }
 0xb34   :  { %v8047_v2 = vpop.xlane.xlu1 %2316  ;;  %v8049_v23 = vpop.xlane.xlu0 %2302 }
 0xb35   :  { %vm2318_vm5 = vcmp.eq.f32.partialorder %v7939_v43, %v8047_v2  ;;  %vm2304_vm6 = vcmp.eq.f32.partialorder %v7941_v60, %v8049_v23 }
 0xb36   :  { %v2319_v49 = vsel %vm2318_vm5, %v2314_v19, inf  ;;  %v2305_v57 = vsel %vm2304_vm6, %v2300_v18, inf  ;;  %v2398_v19 = vcvt.s32.f32 %v2396_v47  ;;  %v2384_v18 = vcvt.s32.f32 %v2382_v9 }
 0xb37   :  { %2320 = vmin.xlane.f32.xlu1 %v2319_v49  ;;  %2306 = vmin.xlane.f32.xlu0 %v2305_v57 }
 0xb38   :  { %v8057_v46 = vpop.xlane.xlu1 %2344  ;;  %v8059_v36 = vpop.xlane.xlu0 %2330 }
 0xb39   :  { %vm2346_vm7 = vcmp.eq.f32.partialorder %v7955_v17, %v8057_v46  ;;  %vm2332_vm8 = vcmp.eq.f32.partialorder %v7957_v42, %v8059_v36 }
 0xb3a   :  { %v2347_v43 = vsel %vm2346_vm7, %v2342_v20, inf  ;;  %v2333_v60 = vsel %vm2332_vm8, %v2328_v30, inf  ;;  %v2440_v30 = vcvt.s32.f32 %v2438_v61 }
 0xb3b   :  { %2348 = vmin.xlane.f32.xlu1 %v2347_v43  ;;  %2334 = vmin.xlane.f32.xlu0 %v2333_v60  ;;  %v2295_v60 = vcvt.f32.s32 %v8031_v58 }
 0xb3c   :  { %v8067_v8 = vpop.xlane.xlu1 %2372  ;;  %v8069_v54 = vpop.xlane.xlu0 %2358 }
 0xb3d   :  { %vm2374_vm9 = vcmp.eq.f32.partialorder %v7971_v11, %v8067_v8  ;;  %vm2360_vm10 = vcmp.eq.f32.partialorder %v7973_v29, %v8069_v54 }
 0xb3e   :  { %v2375_v17 = vsel %vm2374_vm9, %v2370_v45, inf  ;;  %v2361_v42 = vsel %vm2360_vm10, %v2356_v27, inf  ;;  %v2253_v45 = vcvt.f32.s32 %v8033_v4 }
 0xb3f   :  { %2376 = vmin.xlane.f32.xlu1 %v2375_v17  ;;  %2362 = vmin.xlane.f32.xlu0 %v2361_v42  ;;  %v2296_v42 = vshll.u32 %v2295_v60, 16 }
 0xb40   :  { %v8077_v0 = vpop.xlane.xlu1 %2400  ;;  %v8079_v15 = vpop.xlane.xlu0 %2386 }
 0xb41   :  { %vm2402_vm11 = vcmp.eq.f32.partialorder %v7987_v3, %v8077_v0  ;;  %vm2388_vm12 = vcmp.eq.f32.partialorder %v7989_v22, %v8079_v15 }
 0xb42   :  { %v2403_v11 = vsel %vm2402_vm11, %v2398_v19, inf  ;;  %v2389_v29 = vsel %vm2388_vm12, %v2384_v18, inf }
 0xb43   :  { %2404 = vmin.xlane.f32.xlu1 %v2403_v11  ;;  %2390 = vmin.xlane.f32.xlu0 %v2389_v29  ;;  %v2323_v29 = vcvt.f32.s32 %v8047_v2 }
 0xb44   :  { %v8087_v49 = vpop.xlane.xlu1 %2428  ;;  %v8089_v57 = vpop.xlane.xlu0 %2414 }
 0xb45   :  { %vm2430_vm13 = vcmp.eq.f32.partialorder %v8003_v31, %v8087_v49  ;;  %vm2416_vm14 = vcmp.eq.f32.partialorder %v8005_v1, %v8089_v57  ;;  %v2267_v1 = vcvt.f32.s32 %v8026_v10  ;;  %v2324_v2 = vshll.u32 %v2323_v29, 16 }
 0xb46   :  { %v2431_v3 = vsel %vm2430_vm13, %v2426_v24, inf  ;;  %v2417_v22 = vsel %vm2416_vm14, %v2412_v39, inf }
 0xb47   :  { %2432 = vmin.xlane.f32.xlu1 %v2431_v3  ;;  %2418 = vmin.xlane.f32.xlu0 %v2417_v22  ;;  %v2268_v9 = vshll.u32 %v2267_v1, 16  ;;  %v2351_v3 = vcvt.f32.s32 %v8057_v46  ;;  %v2379_v46 = vcvt.f32.s32 %v8067_v8 }
 0xb48   :  { %v8095_v20 = vpop.xlane.xlu1 %2456  ;;  %v8097_v7 = vpop.xlane.xlu0 %2442 }
 0xb49   :  { %vm2458_vm15 = vcmp.eq.f32.partialorder %v8017_v16, %v8095_v20  ;;  %vm2444_vm0 = vcmp.eq.f32.partialorder %v8019_v53, %v8097_v7  ;;  %v2281_v16 = vcvt.f32.s32 %v8041_v41  ;;  %v2254_v53 = vshll.u32 %v2253_v45, 16 }
 0xb4a   :  { %v2459_v31 = vsel %vm2458_vm15, %v2454_v50, inf  ;;  %v2445_v43 = vsel %vm2444_vm0, %v2440_v30, inf  ;;  %v2309_v41 = vcvt.f32.s32 %v8049_v23  ;;  %v2337_v23 = vcvt.f32.s32 %v8059_v36 }
 0xb4b   :  { %2460 = vmin.xlane.f32.xlu1 %v2459_v31  ;;  %2446 = vmin.xlane.f32.xlu0 %v2445_v43  ;;  %v2282_v4 = vshll.u32 %v2281_v16, 16  ;;  %v2352_v60 = vshll.u32 %v2351_v3, 16  ;;  %v2365_v36 = vcvt.f32.s32 %v8069_v54  ;;  %v2380_v8 = vshll.u32 %v2379_v46, 16 }
 0xb4c   :  { %v2310_v30 = vshll.u32 %v2309_v41, 16  ;;  %v2421_v41 = vcvt.f32.s32 %v8089_v57 }
 0xb4d   :  { %v2366_v54 = vshll.u32 %v2365_v36, 16 }
 0xb4e   :  { %v2422_v57 = vshll.u32 %v2421_v41, 16 }
 0xbb4   :  { %v2265_v47 = vpop.xlane.xlu1 %2264 }
 0xbb5   :  { %v2266_v27 = vcvt.f32.s32 %v2265_v47  ;;  %v2338_v47 = vshll.u32 %v2337_v23, 16 }
 0xbb7   :  { %v2269_v17 = vadd.s32 %v2268_v9, %v2266_v27 }
 0xbb8   :  { %v2293_v34 = vpop.xlane.xlu1 %2292  ;;  %v2251_v25 = vpop.xlane.xlu0 %2250 }
 0xbb9   :  { %v2294_v19 = vcvt.f32.s32 %v2293_v34  ;;  %v2252_v18 = vcvt.f32.s32 %v2251_v25  ;;  %vm2467_vm1 = vcmp.eq.s32.totalorder %v6373_v38, %v2269_v17  ;;  %v2407_v25 = vcvt.f32.s32 %v8077_v0 }
 0xbba   :  { %v8109_v10 = vsel %vm2467_vm1, -inf, %v7805_v32 }
 0xbbb   :  { %v2297_v58 = vadd.s32 %v2296_v42, %v2294_v19  ;;  %v2255_v11 = vadd.s32 %v2254_v53, %v2252_v18  ;;  %2500 = vmax.xlane.f32.xlu1 %v8109_v10  ;;  %v2393_v53 = vcvt.f32.s32 %v8079_v15  ;;  %v2408_v0 = vshll.u32 %v2407_v25, 16 }
 0xbbc   :  { %v2279_v52 = vpop.xlane.xlu0 %2278 }
 0xbbd   :  { %v2280_v61 = vcvt.f32.s32 %v2279_v52  ;;  %vm2469_vm2 = vcmp.eq.s32.totalorder %v6373_v38, %v2297_v58  ;;  %vm2466_vm3 = vcmp.eq.s32.totalorder %v6373_v38, %v2255_v11  ;;  %v2394_v15 = vshll.u32 %v2393_v53, 16 }
 0xbbe   :  { %v8117_v24 = vsel %vm2469_vm2, -inf, %v7813_v37  ;;  %v8120_v32 = vsel %vm2466_vm3, -inf, %v7816_v28  ;;  %v2435_v52 = vcvt.f32.s32 %v8087_v49 }
 0xbbf   :  { %v2283_v39 = vadd.s32 %v2282_v4, %v2280_v61  ;;  %2504 = vmax.xlane.f32.xlu1 %v8117_v24  ;;  %2498 = vmax.xlane.f32.xlu0 %v8120_v32 }
 0xbc0   :  { %v2321_v22 = vpop.xlane.xlu1 %2320  ;;  %v2307_v50 = vpop.xlane.xlu0 %2306  ;;  %v2436_v49 = vshll.u32 %v2435_v52, 16 }
 0xbc1   :  { %v2322_v31 = vcvt.f32.s32 %v2321_v22  ;;  %v2308_v43 = vcvt.f32.s32 %v2307_v50  ;;  %vm2468_vm4 = vcmp.eq.s32.totalorder %v6373_v38, %v2283_v39  ;;  %v2463_v50 = vcvt.f32.s32 %v8095_v20 }
 0xbc2   :  { %v8128_v37 = vsel %vm2468_vm4, -inf, %v7824_v12 }
 0xbc3   :  { %v2325_v28 = vadd.s32 %v2324_v2, %v2322_v31  ;;  %v2311_v1 = vadd.s32 %v2310_v30, %v2308_v43  ;;  %2502 = vmax.xlane.f32.xlu0 %v8128_v37  ;;  %v2449_v30 = vcvt.f32.s32 %v8097_v7  ;;  %v2464_v20 = vshll.u32 %v2463_v50, 16 }
 0xbc4   :  { %v2349_v9 = vpop.xlane.xlu1 %2348  ;;  %v2335_v45 = vpop.xlane.xlu0 %2334 }
 0xbc5   :  { %v2350_v27 = vcvt.f32.s32 %v2349_v9  ;;  %v2336_v17 = vcvt.f32.s32 %v2335_v45  ;;  %vm2471_vm5 = vcmp.eq.s32.totalorder %v6373_v38, %v2325_v28  ;;  %vm2470_vm6 = vcmp.eq.s32.totalorder %v6373_v38, %v2311_v1 }
 0xbc6   :  { %v8136_v12 = vsel %vm2471_vm5, -inf, %v7832_v56  ;;  %v8139_v42 = vsel %vm2470_vm6, -inf, %v7835_v13  ;;  %v2450_v7 = vshll.u32 %v2449_v30, 16 }
 0xbc7   :  { %v2353_v16 = vadd.s32 %v2352_v60, %v2350_v27  ;;  %v2339_v34 = vadd.s32 %v2338_v47, %v2336_v17  ;;  %2508 = vmax.xlane.f32.xlu1 %v8136_v12  ;;  %2506 = vmax.xlane.f32.xlu0 %v8139_v42 }
 0xbc8   :  { %v2377_v19 = vpop.xlane.xlu1 %2376  ;;  %v2363_v18 = vpop.xlane.xlu0 %2362 }
 0xbc9   :  { %v2378_v58 = vcvt.f32.s32 %v2377_v19  ;;  %v2364_v56 = vcvt.f32.s32 %v2363_v18  ;;  %vm2473_vm7 = vcmp.eq.s32.totalorder %v6373_v38, %v2353_v16  ;;  %vm2472_vm8 = vcmp.eq.s32.totalorder %v6373_v38, %v2339_v34 }
 0xbca   :  { %v8148_v13 = vsel %vm2473_vm7, -inf, %v7844_v40  ;;  %v8151_v11 = vsel %vm2472_vm8, -inf, %v7847_v44 }
 0xbcb   :  { %v2381_v4 = vadd.s32 %v2380_v8, %v2378_v58  ;;  %v2367_v29 = vadd.s32 %v2366_v54, %v2364_v56  ;;  %2512 = vmax.xlane.f32.xlu1 %v8148_v13  ;;  %2510 = vmax.xlane.f32.xlu0 %v8151_v11 }
 0xbcc   :  { %v2405_v61 = vpop.xlane.xlu1 %2404  ;;  %v2391_v39 = vpop.xlane.xlu0 %2390 }
 0xbcd   :  { %v2406_v2 = vcvt.f32.s32 %v2405_v61  ;;  %v2392_v40 = vcvt.f32.s32 %v2391_v39  ;;  %vm2475_vm9 = vcmp.eq.s32.totalorder %v6373_v38, %v2381_v4  ;;  %vm2474_vm10 = vcmp.eq.s32.totalorder %v6373_v38, %v2367_v29 }
 0xbce   :  { %v8160_v44 = vsel %vm2475_vm9, -inf, %v7856_v33  ;;  %v8163_v3 = vsel %vm2474_vm10, -inf, %v7859_v21 }
 0xbcf   :  { %v2409_v23 = vadd.s32 %v2408_v0, %v2406_v2  ;;  %v2395_v22 = vadd.s32 %v2394_v15, %v2392_v40  ;;  %2516 = vmax.xlane.f32.xlu1 %v8160_v44  ;;  %2514 = vmax.xlane.f32.xlu0 %v8163_v3 }
 0xbd0   :  { %v2433_v31 = vpop.xlane.xlu1 %2432  ;;  %v2419_v43 = vpop.xlane.xlu0 %2418 }
 0xbd1   :  { %v2434_v28 = vcvt.f32.s32 %v2433_v31  ;;  %v2420_v33 = vcvt.f32.s32 %v2419_v43  ;;  %vm2477_vm11 = vcmp.eq.s32.totalorder %v6373_v38, %v2409_v23  ;;  %vm2476_vm12 = vcmp.eq.s32.totalorder %v6373_v38, %v2395_v22 }
 0xbd2   :  { %v8172_v21 = vsel %vm2477_vm11, -inf, %v7868_v5  ;;  %v8175_v1 = vsel %vm2476_vm12, -inf, %v7871_v51 }
 0xbd3   :  { %v2437_v60 = vadd.s32 %v2436_v49, %v2434_v28  ;;  %v2423_v47 = vadd.s32 %v2422_v57, %v2420_v33  ;;  %2520 = vmax.xlane.f32.xlu1 %v8172_v21  ;;  %2518 = vmax.xlane.f32.xlu0 %v8175_v1 }
 0xbd4   :  { %v2461_v46 = vpop.xlane.xlu1 %2460  ;;  %v2447_v36 = vpop.xlane.xlu0 %2446 }
 0xbd5   :  { %v2462_v9 = vcvt.f32.s32 %v2461_v46  ;;  %v2448_v45 = vcvt.f32.s32 %v2447_v36  ;;  %vm2479_vm13 = vcmp.eq.s32.totalorder %v6373_v38, %v2437_v60  ;;  %vm2478_vm14 = vcmp.eq.s32.totalorder %v6373_v38, %v2423_v47 }
 0xbd6   :  { %v8182_v5 = vsel %vm2479_vm13, -inf, %v7878_v35  ;;  %v8185_v51 = vsel %vm2478_vm14, -inf, %v7881_v59 }
 0xbd7   :  { %v2465_v27 = vadd.s32 %v2464_v20, %v2462_v9  ;;  %v2451_v17 = vadd.s32 %v2450_v7, %v2448_v45  ;;  %2524 = vmax.xlane.f32.xlu1 %v8182_v5  ;;  %2522 = vmax.xlane.f32.xlu0 %v8185_v51 }
 0xbd9   :  { %vm2481_vm15 = vcmp.eq.s32.totalorder %v6373_v38, %v2465_v27  ;;  %vm2480_vm0 = vcmp.eq.s32.totalorder %v6373_v38, %v2451_v17 }
 0xbda   :  { %v8192_v16 = vsel %vm2481_vm15, -inf, %v7888_v26  ;;  %v8195_v34 = vsel %vm2480_vm0, -inf, %v7891_v48 }
 0xbdb   :  { %2528 = vmax.xlane.f32.xlu1 %v8192_v16  ;;  %2526 = vmax.xlane.f32.xlu0 %v8195_v34 }
 0xc44   :  { %v2501_v35 = vpop.xlane.xlu1 %2500 }
 0xc45   :  { %vm2531_vm1 = vcmp.eq.f32.partialorder %v8109_v10, %v2501_v35 }
 0xc46   :  { %v8201_v59 = vsel %vm2531_vm1, %v6373_v38, 128 }
 0xc47   :  { %v2577_v8 = vshra.s32 %v8201_v59, 16 }
 0xc48   :  { %v2505_v54 = vpop.xlane.xlu1 %2504  ;;  %v2499_v25 = vpop.xlane.xlu0 %2498 }
 0xc49   :  { %vm2533_vm2 = vcmp.eq.f32.partialorder %v8117_v24, %v2505_v54  ;;  %vm2530_vm3 = vcmp.eq.f32.partialorder %v8120_v32, %v2499_v25  ;;  %v8206_v26 = vcvt.s32.f32 %v2577_v8 }
 0xc4a   :  { %v8209_v48 = vsel %vm2533_vm2, %v6373_v38, 128  ;;  %v8212_v53 = vsel %vm2530_vm3, %v6373_v38, 128 }
 0xc4b   :  { %v2605_v19 = vshra.s32 %v8209_v48, 16  ;;  %v2563_v18 = vshra.s32 %v8212_v53, 16  ;;  %2580 = vmin.xlane.f32.xlu1 %v8206_v26 }
 0xc4c   :  { %v2503_v58 = vpop.xlane.xlu0 %2502 }
 0xc4d   :  { %vm2532_vm4 = vcmp.eq.f32.partialorder %v8128_v37, %v2503_v58  ;;  %v8218_v56 = vcvt.s32.f32 %v2605_v19  ;;  %v8220_v4 = vcvt.s32.f32 %v2563_v18 }
 0xc4e   :  { %v8223_v29 = vsel %vm2532_vm4, %v6373_v38, 128 }
 0xc4f   :  { %v2591_v0 = vshra.s32 %v8223_v29, 16  ;;  %2608 = vmin.xlane.f32.xlu1 %v8218_v56  ;;  %2566 = vmin.xlane.f32.xlu0 %v8220_v4 }
 0xc50   :  { %v2509_v15 = vpop.xlane.xlu1 %2508  ;;  %v2507_v52 = vpop.xlane.xlu0 %2506 }
 0xc51   :  { %vm2535_vm5 = vcmp.eq.f32.partialorder %v8136_v12, %v2509_v15  ;;  %vm2534_vm6 = vcmp.eq.f32.partialorder %v8139_v42, %v2507_v52  ;;  %v8230_v41 = vcvt.s32.f32 %v2591_v0 }
 0xc52   :  { %v8233_v61 = vsel %vm2535_vm5, %v6373_v38, 128  ;;  %v8236_v39 = vsel %vm2534_vm6, %v6373_v38, 128 }
 0xc53   :  { %v2633_v2 = vshra.s32 %v8233_v61, 16  ;;  %v2619_v40 = vshra.s32 %v8236_v39, 16  ;;  %2594 = vmin.xlane.f32.xlu0 %v8230_v41 }
 0xc54   :  { %v2513_v23 = vpop.xlane.xlu1 %2512  ;;  %v2511_v22 = vpop.xlane.xlu0 %2510 }
 0xc55   :  { %vm2537_vm7 = vcmp.eq.f32.partialorder %v8148_v13, %v2513_v23  ;;  %vm2536_vm8 = vcmp.eq.f32.partialorder %v8151_v11, %v2511_v22  ;;  %v8243_v49 = vcvt.s32.f32 %v2633_v2  ;;  %v8245_v57 = vcvt.s32.f32 %v2619_v40 }
 0xc56   :  { %v8248_v50 = vsel %vm2537_vm7, %v6373_v38, 128  ;;  %v8251_v30 = vsel %vm2536_vm8, %v6373_v38, 128 }
 0xc57   :  { %v2661_v31 = vshra.s32 %v8248_v50, 16  ;;  %v2647_v43 = vshra.s32 %v8251_v30, 16  ;;  %2636 = vmin.xlane.f32.xlu1 %v8243_v49  ;;  %2622 = vmin.xlane.f32.xlu0 %v8245_v57 }
 0xc58   :  { %v2517_v28 = vpop.xlane.xlu1 %2516  ;;  %v2515_v33 = vpop.xlane.xlu0 %2514 }
 0xc59   :  { %vm2539_vm9 = vcmp.eq.f32.partialorder %v8160_v44, %v2517_v28  ;;  %vm2538_vm10 = vcmp.eq.f32.partialorder %v8163_v3, %v2515_v33  ;;  %v8259_v60 = vcvt.s32.f32 %v2661_v31  ;;  %v8261_v47 = vcvt.s32.f32 %v2647_v43 }
 0xc5a   :  { %v8264_v20 = vsel %vm2539_vm9, %v6373_v38, 128  ;;  %v8267_v7 = vsel %vm2538_vm10, %v6373_v38, 128 }
 0xc5b   :  { %v2689_v46 = vshra.s32 %v8264_v20, 16  ;;  %v2675_v36 = vshra.s32 %v8267_v7, 16  ;;  %2664 = vmin.xlane.f32.xlu1 %v8259_v60  ;;  %2650 = vmin.xlane.f32.xlu0 %v8261_v47 }
 0xc5c   :  { %v2521_v9 = vpop.xlane.xlu1 %2520  ;;  %v2519_v45 = vpop.xlane.xlu0 %2518 }
 0xc5d   :  { %vm2541_vm11 = vcmp.eq.f32.partialorder %v8172_v21, %v2521_v9  ;;  %vm2540_vm12 = vcmp.eq.f32.partialorder %v8175_v1, %v2519_v45  ;;  %v8275_v27 = vcvt.s32.f32 %v2689_v46  ;;  %v8277_v17 = vcvt.s32.f32 %v2675_v36 }
 0xc5e   :  { %v8280_v35 = vsel %vm2541_vm11, %v6373_v38, 128  ;;  %v8283_v8 = vsel %vm2540_vm12, %v6373_v38, 128 }
 0xc5f   :  { %v2717_v54 = vshra.s32 %v8280_v35, 16  ;;  %v2703_v25 = vshra.s32 %v8283_v8, 16  ;;  %2692 = vmin.xlane.f32.xlu1 %v8275_v27  ;;  %2678 = vmin.xlane.f32.xlu0 %v8277_v17 }
 0xc60   :  { %v2525_v19 = vpop.xlane.xlu1 %2524  ;;  %v2523_v18 = vpop.xlane.xlu0 %2522 }
 0xc61   :  { %vm2543_vm13 = vcmp.eq.f32.partialorder %v8182_v5, %v2525_v19  ;;  %vm2542_vm14 = vcmp.eq.f32.partialorder %v8185_v51, %v2523_v18  ;;  %v8291_v58 = vcvt.s32.f32 %v2717_v54  ;;  %v8293_v0 = vcvt.s32.f32 %v2703_v25 }
 0xc62   :  { %v8296_v15 = vsel %vm2543_vm13, %v6373_v38, 128  ;;  %v8299_v52 = vsel %vm2542_vm14, %v6373_v38, 128  ;;  %v2576_v54 = vand.u32 65535, %v8201_v59  ;;  %v2604_v25 = vand.u32 65535, %v8209_v48 }
 0xc63   :  { %v2745_v2 = vshra.s32 %v8296_v15, 16  ;;  %v2731_v40 = vshra.s32 %v8299_v52, 16  ;;  %2720 = vmin.xlane.f32.xlu1 %v8291_v58  ;;  %2706 = vmin.xlane.f32.xlu0 %v8293_v0  ;;  %v2562_v19 = vand.u32 65535, %v8212_v53 }
 0xc64   :  { %v2529_v23 = vpop.xlane.xlu1 %2528  ;;  %v2527_v22 = vpop.xlane.xlu0 %2526 }
 0xc65   :  { %vm2545_vm15 = vcmp.eq.f32.partialorder %v8192_v16, %v2529_v23  ;;  %vm2544_vm0 = vcmp.eq.f32.partialorder %v8195_v34, %v2527_v22  ;;  %v8307_v31 = vcvt.s32.f32 %v2745_v2  ;;  %v8309_v43 = vcvt.s32.f32 %v2731_v40 }
 0xc66   :  { %v8312_v28 = vsel %vm2545_vm15, %v6373_v38, 128  ;;  %v8315_v33 = vsel %vm2544_vm0, %v6373_v38, 128  ;;  %v2578_v2 = vcvt.s32.f32 %v2576_v54  ;;  %v2590_v23 = vand.u32 65535, %v8223_v29 }
 0xc67   :  { %v2773_v46 = vshra.s32 %v8312_v28, 16  ;;  %v2759_v36 = vshra.s32 %v8315_v33, 16  ;;  %2748 = vmin.xlane.f32.xlu1 %v8307_v31  ;;  %2734 = vmin.xlane.f32.xlu0 %v8309_v43  ;;  %v2564_v59 = vcvt.s32.f32 %v2562_v19  ;;  %v2618_v29 = vand.u32 65535, %v8236_v39 }
 0xc69   :  { %v8321_v9 = vcvt.s32.f32 %v2773_v46  ;;  %v8323_v45 = vcvt.s32.f32 %v2759_v36  ;;  %v2606_v36 = vcvt.s32.f32 %v2604_v25 }
 0xc6b   :  { %2776 = vmin.xlane.f32.xlu1 %v8321_v9  ;;  %2762 = vmin.xlane.f32.xlu0 %v8323_v45 }
 0xcd4   :  { %v8330_v18 = vpop.xlane.xlu1 %2580 }
 0xcd5   :  { %vm2582_vm1 = vcmp.eq.f32.partialorder %v8206_v26, %v8330_v18  ;;  %v2632_v26 = vand.u32 65535, %v8233_v61  ;;  %v2620_v61 = vcvt.s32.f32 %v2618_v29 }
 0xcd6   :  { %v2583_v40 = vsel %vm2582_vm1, %v2578_v2, inf  ;;  %v2592_v2 = vcvt.s32.f32 %v2590_v23 }
 0xcd7   :  { %2584 = vmin.xlane.f32.xlu1 %v2583_v40 }
 0xcd8   :  { %v8335_v22 = vpop.xlane.xlu1 %2608  ;;  %v8337_v46 = vpop.xlane.xlu0 %2566 }
 0xcd9   :  { %vm2610_vm2 = vcmp.eq.f32.partialorder %v8218_v56, %v8335_v22  ;;  %vm2568_vm3 = vcmp.eq.f32.partialorder %v8220_v4, %v8337_v46  ;;  %v2660_v56 = vand.u32 65535, %v8248_v50  ;;  %v2646_v4 = vand.u32 65535, %v8251_v30 }
 0xcda   :  { %v2611_v48 = vsel %vm2610_vm2, %v2606_v36, inf  ;;  %v2569_v53 = vsel %vm2568_vm3, %v2564_v59, inf  ;;  %v2634_v36 = vcvt.s32.f32 %v2632_v26  ;;  %v2688_v50 = vand.u32 65535, %v8264_v20 }
 0xcdb   :  { %2612 = vmin.xlane.f32.xlu1 %v2611_v48  ;;  %2570 = vmin.xlane.f32.xlu0 %v2569_v53  ;;  %v2674_v30 = vand.u32 65535, %v8267_v7  ;;  %v2662_v48 = vcvt.s32.f32 %v2660_v56  ;;  %v2648_v53 = vcvt.s32.f32 %v2646_v4  ;;  %v2716_v20 = vand.u32 65535, %v8280_v35 }
 0xcdc   :  { %v8345_v54 = vpop.xlane.xlu0 %2594  ;;  %v2702_v7 = vand.u32 65535, %v8283_v8  ;;  %v2744_v35 = vand.u32 65535, %v8296_v15  ;;  %v2730_v8 = vand.u32 65535, %v8299_v52  ;;  %v2772_v15 = vand.u32 65535, %v8312_v28 }
 0xcdd   :  { %vm2596_vm4 = vcmp.eq.f32.partialorder %v8230_v41, %v8345_v54  ;;  %v2758_v52 = vand.u32 65535, %v8315_v33 }
 0xcde   :  { %v2597_v25 = vsel %vm2596_vm4, %v2592_v2, inf  ;;  %v2690_v2 = vcvt.s32.f32 %v2688_v50  ;;  %v2746_v50 = vcvt.s32.f32 %v2744_v35  ;;  %v2774_v33 = vcvt.s32.f32 %v2772_v15 }
 0xcdf   :  { %2598 = vmin.xlane.f32.xlu0 %v2597_v25  ;;  %v2676_v25 = vcvt.s32.f32 %v2674_v30  ;;  %v2732_v30 = vcvt.s32.f32 %v2730_v8 }
 0xce0   :  { %v8351_v19 = vpop.xlane.xlu1 %2636  ;;  %v8353_v40 = vpop.xlane.xlu0 %2622 }
 0xce1   :  { %vm2638_vm5 = vcmp.eq.f32.partialorder %v8243_v49, %v8351_v19  ;;  %vm2624_vm6 = vcmp.eq.f32.partialorder %v8245_v57, %v8353_v40 }
 0xce2   :  { %v2639_v39 = vsel %vm2638_vm5, %v2634_v36, inf  ;;  %v2625_v41 = vsel %vm2624_vm6, %v2620_v61, inf  ;;  %v2718_v36 = vcvt.s32.f32 %v2716_v20  ;;  %v2704_v61 = vcvt.s32.f32 %v2702_v7 }
 0xce3   :  { %2640 = vmin.xlane.f32.xlu1 %v2639_v39  ;;  %2626 = vmin.xlane.f32.xlu0 %v2625_v41 }
 0xce4   :  { %v8361_v23 = vpop.xlane.xlu1 %2664  ;;  %v8363_v59 = vpop.xlane.xlu0 %2650 }
 0xce5   :  { %vm2666_vm7 = vcmp.eq.f32.partialorder %v8259_v60, %v8361_v23  ;;  %vm2652_vm8 = vcmp.eq.f32.partialorder %v8261_v47, %v8363_v59 }
 0xce6   :  { %v2667_v49 = vsel %vm2666_vm7, %v2662_v48, inf  ;;  %v2653_v57 = vsel %vm2652_vm8, %v2648_v53, inf  ;;  %v2760_v53 = vcvt.s32.f32 %v2758_v52 }
 0xce7   :  { %2668 = vmin.xlane.f32.xlu1 %v2667_v49  ;;  %2654 = vmin.xlane.f32.xlu0 %v2653_v57  ;;  %v2615_v57 = vcvt.f32.s32 %v8335_v22 }
 0xce8   :  { %v8371_v26 = vpop.xlane.xlu1 %2692  ;;  %v8373_v29 = vpop.xlane.xlu0 %2678 }
 0xce9   :  { %vm2694_vm9 = vcmp.eq.f32.partialorder %v8275_v27, %v8371_v26  ;;  %vm2680_vm10 = vcmp.eq.f32.partialorder %v8277_v17, %v8373_v29 }
 0xcea   :  { %v2695_v60 = vsel %vm2694_vm9, %v2690_v2, inf  ;;  %v2681_v47 = vsel %vm2680_vm10, %v2676_v25, inf  ;;  %v2573_v2 = vcvt.f32.s32 %v8337_v46 }
 0xceb   :  { %2696 = vmin.xlane.f32.xlu1 %v2695_v60  ;;  %2682 = vmin.xlane.f32.xlu0 %v2681_v47  ;;  %v2616_v47 = vshll.u32 %v2615_v57, 16 }
 0xcec   :  { %v8381_v56 = vpop.xlane.xlu1 %2720  ;;  %v8383_v4 = vpop.xlane.xlu0 %2706 }
 0xced   :  { %vm2722_vm11 = vcmp.eq.f32.partialorder %v8291_v58, %v8381_v56  ;;  %vm2708_vm12 = vcmp.eq.f32.partialorder %v8293_v0, %v8383_v4 }
 0xcee   :  { %v2723_v27 = vsel %vm2722_vm11, %v2718_v36, inf  ;;  %v2709_v17 = vsel %vm2708_vm12, %v2704_v61, inf }
 0xcef   :  { %2724 = vmin.xlane.f32.xlu1 %v2723_v27  ;;  %2710 = vmin.xlane.f32.xlu0 %v2709_v17  ;;  %v2643_v17 = vcvt.f32.s32 %v8351_v19 }
 0xcf0   :  { %v8391_v39 = vpop.xlane.xlu1 %2748  ;;  %v8393_v41 = vpop.xlane.xlu0 %2734 }
 0xcf1   :  { %vm2750_vm13 = vcmp.eq.f32.partialorder %v8307_v31, %v8391_v39  ;;  %vm2736_vm14 = vcmp.eq.f32.partialorder %v8309_v43, %v8393_v41  ;;  %v2587_v43 = vcvt.f32.s32 %v8330_v18  ;;  %v2644_v19 = vshll.u32 %v2643_v17, 16 }
 0xcf2   :  { %v2751_v58 = vsel %vm2750_vm13, %v2746_v50, inf  ;;  %v2737_v0 = vsel %vm2736_vm14, %v2732_v30, inf }
 0xcf3   :  { %2752 = vmin.xlane.f32.xlu1 %v2751_v58  ;;  %2738 = vmin.xlane.f32.xlu0 %v2737_v0  ;;  %v2588_v7 = vshll.u32 %v2587_v43, 16  ;;  %v2671_v58 = vcvt.f32.s32 %v8361_v23  ;;  %v2699_v23 = vcvt.f32.s32 %v8371_v26 }
 0xcf4   :  { %v8399_v48 = vpop.xlane.xlu1 %2776  ;;  %v8401_v28 = vpop.xlane.xlu0 %2762 }
 0xcf5   :  { %vm2778_vm15 = vcmp.eq.f32.partialorder %v8321_v9, %v8399_v48  ;;  %vm2764_vm0 = vcmp.eq.f32.partialorder %v8323_v45, %v8401_v28  ;;  %v2601_v9 = vcvt.f32.s32 %v8345_v54  ;;  %v2574_v45 = vshll.u32 %v2573_v2, 16 }
 0xcf6   :  { %v2779_v31 = vsel %vm2778_vm15, %v2774_v33, inf  ;;  %v2765_v49 = vsel %vm2764_vm0, %v2760_v53, inf  ;;  %v2629_v54 = vcvt.f32.s32 %v8353_v40  ;;  %v2657_v40 = vcvt.f32.s32 %v8363_v59 }
 0xcf7   :  { %2780 = vmin.xlane.f32.xlu1 %v2779_v31  ;;  %2766 = vmin.xlane.f32.xlu0 %v2765_v49  ;;  %v2602_v46 = vshll.u32 %v2601_v9, 16  ;;  %v2672_v57 = vshll.u32 %v2671_v58, 16  ;;  %v2685_v59 = vcvt.f32.s32 %v8373_v29  ;;  %v2700_v26 = vshll.u32 %v2699_v23, 16 }
 0xcf8   :  { %v2630_v53 = vshll.u32 %v2629_v54, 16  ;;  %v2741_v54 = vcvt.f32.s32 %v8393_v41 }
 0xcf9   :  { %v2686_v29 = vshll.u32 %v2685_v59, 16 }
 0xcfa   :  { %v2742_v41 = vshll.u32 %v2741_v54, 16 }
 0xd60   :  { %v2585_v20 = vpop.xlane.xlu1 %2584 }
 0xd61   :  { %v2586_v25 = vcvt.f32.s32 %v2585_v20  ;;  %v2658_v20 = vshll.u32 %v2657_v40, 16 }
 0xd63   :  { %v2589_v60 = vadd.s32 %v2588_v7, %v2586_v25 }
 0xd64   :  { %v2613_v35 = vpop.xlane.xlu1 %2612  ;;  %v2571_v8 = vpop.xlane.xlu0 %2570 }
 0xd65   :  { %v2614_v36 = vcvt.f32.s32 %v2613_v35  ;;  %v2572_v61 = vcvt.f32.s32 %v2571_v8  ;;  %vm2787_vm1 = vcmp.eq.s32.totalorder %v6373_v38, %v2589_v60  ;;  %v2727_v8 = vcvt.f32.s32 %v8381_v56 }
 0xd66   :  { %v8413_v18 = vsel %vm2787_vm1, -inf, %v8109_v10 }
 0xd67   :  { %v2617_v22 = vadd.s32 %v2616_v47, %v2614_v36  ;;  %v2575_v27 = vadd.s32 %v2574_v45, %v2572_v61  ;;  %2820 = vmax.xlane.f32.xlu1 %v8413_v18  ;;  %v2713_v45 = vcvt.f32.s32 %v8383_v4  ;;  %v2728_v56 = vshll.u32 %v2727_v8, 16 }
 0xd68   :  { %v2599_v15 = vpop.xlane.xlu0 %2598 }
 0xd69   :  { %v2600_v52 = vcvt.f32.s32 %v2599_v15  ;;  %vm2789_vm2 = vcmp.eq.s32.totalorder %v6373_v38, %v2617_v22  ;;  %vm2786_vm3 = vcmp.eq.s32.totalorder %v6373_v38, %v2575_v27  ;;  %v2714_v4 = vshll.u32 %v2713_v45, 16 }
 0xd6a   :  { %v8421_v50 = vsel %vm2789_vm2, -inf, %v8117_v24  ;;  %v8424_v10 = vsel %vm2786_vm3, -inf, %v8120_v32  ;;  %v2755_v15 = vcvt.f32.s32 %v8391_v39 }
 0xd6b   :  { %v2603_v30 = vadd.s32 %v2602_v46, %v2600_v52  ;;  %2824 = vmax.xlane.f32.xlu1 %v8421_v50  ;;  %2818 = vmax.xlane.f32.xlu0 %v8424_v10 }
 0xd6c   :  { %v2641_v0 = vpop.xlane.xlu1 %2640  ;;  %v2627_v33 = vpop.xlane.xlu0 %2626  ;;  %v2756_v39 = vshll.u32 %v2755_v15, 16 }
 0xd6d   :  { %v2642_v31 = vcvt.f32.s32 %v2641_v0  ;;  %v2628_v49 = vcvt.f32.s32 %v2627_v33  ;;  %vm2788_vm4 = vcmp.eq.s32.totalorder %v6373_v38, %v2603_v30  ;;  %v2783_v33 = vcvt.f32.s32 %v8399_v48 }
 0xd6e   :  { %v8432_v24 = vsel %vm2788_vm4, -inf, %v8128_v37 }
 0xd6f   :  { %v2645_v32 = vadd.s32 %v2644_v19, %v2642_v31  ;;  %v2631_v43 = vadd.s32 %v2630_v53, %v2628_v49  ;;  %2822 = vmax.xlane.f32.xlu0 %v8432_v24  ;;  %v2769_v53 = vcvt.f32.s32 %v8401_v28  ;;  %v2784_v48 = vshll.u32 %v2783_v33, 16 }
 0xd70   :  { %v2669_v7 = vpop.xlane.xlu1 %2668  ;;  %v2655_v2 = vpop.xlane.xlu0 %2654 }
 0xd71   :  { %v2670_v25 = vcvt.f32.s32 %v2669_v7  ;;  %v2656_v60 = vcvt.f32.s32 %v2655_v2  ;;  %vm2791_vm5 = vcmp.eq.s32.totalorder %v6373_v38, %v2645_v32  ;;  %vm2790_vm6 = vcmp.eq.s32.totalorder %v6373_v38, %v2631_v43 }
 0xd72   :  { %v8440_v37 = vsel %vm2791_vm5, -inf, %v8136_v12  ;;  %v8443_v47 = vsel %vm2790_vm6, -inf, %v8139_v42  ;;  %v2770_v28 = vshll.u32 %v2769_v53, 16 }
 0xd73   :  { %v2673_v9 = vadd.s32 %v2672_v57, %v2670_v25  ;;  %v2659_v35 = vadd.s32 %v2658_v20, %v2656_v60  ;;  %2828 = vmax.xlane.f32.xlu1 %v8440_v37  ;;  %2826 = vmax.xlane.f32.xlu0 %v8443_v47 }
 0xd74   :  { %v2697_v36 = vpop.xlane.xlu1 %2696  ;;  %v2683_v61 = vpop.xlane.xlu0 %2682 }
 0xd75   :  { %v2698_v22 = vcvt.f32.s32 %v2697_v36  ;;  %v2684_v12 = vcvt.f32.s32 %v2683_v61  ;;  %vm2793_vm7 = vcmp.eq.s32.totalorder %v6373_v38, %v2673_v9  ;;  %vm2792_vm8 = vcmp.eq.s32.totalorder %v6373_v38, %v2659_v35 }
 0xd76   :  { %v8452_v42 = vsel %vm2793_vm7, -inf, %v8148_v13  ;;  %v8455_v27 = vsel %vm2792_vm8, -inf, %v8151_v11 }
 0xd77   :  { %v2701_v46 = vadd.s32 %v2700_v26, %v2698_v22  ;;  %v2687_v17 = vadd.s32 %v2686_v29, %v2684_v12  ;;  %2832 = vmax.xlane.f32.xlu1 %v8452_v42  ;;  %2830 = vmax.xlane.f32.xlu0 %v8455_v27 }
 0xd78   :  { %v2725_v52 = vpop.xlane.xlu1 %2724  ;;  %v2711_v30 = vpop.xlane.xlu0 %2710 }
 0xd79   :  { %v2726_v19 = vcvt.f32.s32 %v2725_v52  ;;  %v2712_v13 = vcvt.f32.s32 %v2711_v30  ;;  %vm2795_vm9 = vcmp.eq.s32.totalorder %v6373_v38, %v2701_v46  ;;  %vm2794_vm10 = vcmp.eq.s32.totalorder %v6373_v38, %v2687_v17 }
 0xd7a   :  { %v8464_v11 = vsel %vm2795_vm9, -inf, %v8160_v44  ;;  %v8467_v58 = vsel %vm2794_vm10, -inf, %v8163_v3 }
 0xd7b   :  { %v2729_v40 = vadd.s32 %v2728_v56, %v2726_v19  ;;  %v2715_v0 = vadd.s32 %v2714_v4, %v2712_v13  ;;  %2836 = vmax.xlane.f32.xlu1 %v8464_v11  ;;  %2834 = vmax.xlane.f32.xlu0 %v8467_v58 }
 0xd7c   :  { %v2753_v31 = vpop.xlane.xlu1 %2752  ;;  %v2739_v49 = vpop.xlane.xlu0 %2738 }
 0xd7d   :  { %v2754_v32 = vcvt.f32.s32 %v2753_v31  ;;  %v2740_v44 = vcvt.f32.s32 %v2739_v49  ;;  %vm2797_vm11 = vcmp.eq.s32.totalorder %v6373_v38, %v2729_v40  ;;  %vm2796_vm12 = vcmp.eq.s32.totalorder %v6373_v38, %v2715_v0 }
 0xd7e   :  { %v8476_v3 = vsel %vm2797_vm11, -inf, %v8172_v21  ;;  %v8479_v43 = vsel %vm2796_vm12, -inf, %v8175_v1 }
 0xd7f   :  { %v2757_v57 = vadd.s32 %v2756_v39, %v2754_v32  ;;  %v2743_v20 = vadd.s32 %v2742_v41, %v2740_v44  ;;  %2840 = vmax.xlane.f32.xlu1 %v8476_v3  ;;  %2838 = vmax.xlane.f32.xlu0 %v8479_v43 }
 0xd80   :  { %v2781_v23 = vpop.xlane.xlu1 %2780  ;;  %v2767_v59 = vpop.xlane.xlu0 %2766 }
 0xd81   :  { %v2782_v7 = vcvt.f32.s32 %v2781_v23  ;;  %v2768_v2 = vcvt.f32.s32 %v2767_v59  ;;  %vm2799_vm13 = vcmp.eq.s32.totalorder %v6373_v38, %v2757_v57  ;;  %vm2798_vm14 = vcmp.eq.s32.totalorder %v6373_v38, %v2743_v20 }
 0xd82   :  { %v8486_v21 = vsel %vm2799_vm13, -inf, %v8182_v5  ;;  %v8489_v1 = vsel %vm2798_vm14, -inf, %v8185_v51 }
 0xd83   :  { %v2785_v25 = vadd.s32 %v2784_v48, %v2782_v7  ;;  %v2771_v60 = vadd.s32 %v2770_v28, %v2768_v2  ;;  %2844 = vmax.xlane.f32.xlu1 %v8486_v21  ;;  %2842 = vmax.xlane.f32.xlu0 %v8489_v1 }
 0xd85   :  { %vm2801_vm15 = vcmp.eq.s32.totalorder %v6373_v38, %v2785_v25  ;;  %vm2800_vm0 = vcmp.eq.s32.totalorder %v6373_v38, %v2771_v60 }
 0xd86   :  { %v8496_v9 = vsel %vm2801_vm15, -inf, %v8192_v16  ;;  %v8499_v35 = vsel %vm2800_vm0, -inf, %v8195_v34 }
 0xd87   :  { %2848 = vmax.xlane.f32.xlu1 %v8496_v9  ;;  %2846 = vmax.xlane.f32.xlu0 %v8499_v35 }
 0xdf0   :  { %v2821_v5 = vpop.xlane.xlu1 %2820 }
 0xdf1   :  { %vm2851_vm1 = vcmp.eq.f32.partialorder %v8413_v18, %v2821_v5 }
 0xdf2   :  { %v8505_v51 = vsel %vm2851_vm1, %v6373_v38, 128 }
 0xdf3   :  { %v2897_v26 = vshra.s32 %v8505_v51, 16 }
 0xdf4   :  { %v2825_v29 = vpop.xlane.xlu1 %2824  ;;  %v2819_v8 = vpop.xlane.xlu0 %2818 }
 0xdf5   :  { %vm2853_vm2 = vcmp.eq.f32.partialorder %v8421_v50, %v2825_v29  ;;  %vm2850_vm3 = vcmp.eq.f32.partialorder %v8424_v10, %v2819_v8  ;;  %v8510_v16 = vcvt.s32.f32 %v2897_v26 }
 0xdf6   :  { %v8513_v34 = vsel %vm2853_vm2, %v6373_v38, 128  ;;  %v8516_v45 = vsel %vm2850_vm3, %v6373_v38, 128 }
 0xdf7   :  { %v2925_v36 = vshra.s32 %v8513_v34, 16  ;;  %v2883_v61 = vshra.s32 %v8516_v45, 16  ;;  %2900 = vmin.xlane.f32.xlu1 %v8510_v16 }
 0xdf8   :  { %v2823_v22 = vpop.xlane.xlu0 %2822 }
 0xdf9   :  { %vm2852_vm4 = vcmp.eq.f32.partialorder %v8432_v24, %v2823_v22  ;;  %v8522_v12 = vcvt.s32.f32 %v2925_v36  ;;  %v8524_v46 = vcvt.s32.f32 %v2883_v61 }
 0xdfa   :  { %v8527_v17 = vsel %vm2852_vm4, %v6373_v38, 128 }
 0xdfb   :  { %v2911_v56 = vshra.s32 %v8527_v17, 16  ;;  %2928 = vmin.xlane.f32.xlu1 %v8522_v12  ;;  %2886 = vmin.xlane.f32.xlu0 %v8524_v46 }
 0xdfc   :  { %v2829_v4 = vpop.xlane.xlu1 %2828  ;;  %v2827_v15 = vpop.xlane.xlu0 %2826 }
 0xdfd   :  { %vm2855_vm5 = vcmp.eq.f32.partialorder %v8440_v37, %v2829_v4  ;;  %vm2854_vm6 = vcmp.eq.f32.partialorder %v8443_v47, %v2827_v15  ;;  %v8534_v54 = vcvt.s32.f32 %v2911_v56 }
 0xdfe   :  { %v8537_v52 = vsel %vm2855_vm5, %v6373_v38, 128  ;;  %v8540_v30 = vsel %vm2854_vm6, %v6373_v38, 128 }
 0xdff   :  { %v2953_v19 = vshra.s32 %v8537_v52, 16  ;;  %v2939_v13 = vshra.s32 %v8540_v30, 16  ;;  %2914 = vmin.xlane.f32.xlu0 %v8534_v54 }
 0xe00   :  { %v2833_v40 = vpop.xlane.xlu1 %2832  ;;  %v2831_v0 = vpop.xlane.xlu0 %2830 }
 0xe01   :  { %vm2857_vm7 = vcmp.eq.f32.partialorder %v8452_v42, %v2833_v40  ;;  %vm2856_vm8 = vcmp.eq.f32.partialorder %v8455_v27, %v2831_v0  ;;  %v8547_v39 = vcvt.s32.f32 %v2953_v19  ;;  %v8549_v41 = vcvt.s32.f32 %v2939_v13 }
 0xe02   :  { %v8552_v33 = vsel %vm2857_vm7, %v6373_v38, 128  ;;  %v8555_v53 = vsel %vm2856_vm8, %v6373_v38, 128 }
 0xe03   :  { %v2981_v31 = vshra.s32 %v8552_v33, 16  ;;  %v2967_v49 = vshra.s32 %v8555_v53, 16  ;;  %2956 = vmin.xlane.f32.xlu1 %v8547_v39  ;;  %2942 = vmin.xlane.f32.xlu0 %v8549_v41 }
 0xe04   :  { %v2837_v32 = vpop.xlane.xlu1 %2836  ;;  %v2835_v44 = vpop.xlane.xlu0 %2834 }
 0xe05   :  { %vm2859_vm9 = vcmp.eq.f32.partialorder %v8464_v11, %v2837_v32  ;;  %vm2858_vm10 = vcmp.eq.f32.partialorder %v8467_v58, %v2835_v44  ;;  %v8563_v57 = vcvt.s32.f32 %v2981_v31  ;;  %v8565_v20 = vcvt.s32.f32 %v2967_v49 }
 0xe06   :  { %v8568_v48 = vsel %vm2859_vm9, %v6373_v38, 128  ;;  %v8571_v28 = vsel %vm2858_vm10, %v6373_v38, 128 }
 0xe07   :  { %v3009_v23 = vshra.s32 %v8568_v48, 16  ;;  %v2995_v59 = vshra.s32 %v8571_v28, 16  ;;  %2984 = vmin.xlane.f32.xlu1 %v8563_v57  ;;  %2970 = vmin.xlane.f32.xlu0 %v8565_v20 }
 0xe08   :  { %v2841_v7 = vpop.xlane.xlu1 %2840  ;;  %v2839_v2 = vpop.xlane.xlu0 %2838 }
 0xe09   :  { %vm2861_vm11 = vcmp.eq.f32.partialorder %v8476_v3, %v2841_v7  ;;  %vm2860_vm12 = vcmp.eq.f32.partialorder %v8479_v43, %v2839_v2  ;;  %v8579_v25 = vcvt.s32.f32 %v3009_v23  ;;  %v8581_v60 = vcvt.s32.f32 %v2995_v59 }
 0xe0a   :  { %v8584_v5 = vsel %vm2861_vm11, %v6373_v38, 128  ;;  %v8587_v26 = vsel %vm2860_vm12, %v6373_v38, 128 }
 0xe0b   :  { %v3037_v29 = vshra.s32 %v8584_v5, 16  ;;  %v3023_v8 = vshra.s32 %v8587_v26, 16  ;;  %3012 = vmin.xlane.f32.xlu1 %v8579_v25  ;;  %2998 = vmin.xlane.f32.xlu0 %v8581_v60 }
 0xe0c   :  { %v2845_v36 = vpop.xlane.xlu1 %2844  ;;  %v2843_v61 = vpop.xlane.xlu0 %2842 }
 0xe0d   :  { %vm2863_vm13 = vcmp.eq.f32.partialorder %v8486_v21, %v2845_v36  ;;  %vm2862_vm14 = vcmp.eq.f32.partialorder %v8489_v1, %v2843_v61  ;;  %v8595_v22 = vcvt.s32.f32 %v3037_v29  ;;  %v8597_v56 = vcvt.s32.f32 %v3023_v8 }
 0xe0e   :  { %v8600_v4 = vsel %vm2863_vm13, %v6373_v38, 128  ;;  %v8603_v15 = vsel %vm2862_vm14, %v6373_v38, 128  ;;  %v2896_v29 = vand.u32 65535, %v8505_v51  ;;  %v2924_v8 = vand.u32 65535, %v8513_v34 }
 0xe0f   :  { %v3065_v19 = vshra.s32 %v8600_v4, 16  ;;  %v3051_v13 = vshra.s32 %v8603_v15, 16  ;;  %3040 = vmin.xlane.f32.xlu1 %v8595_v22  ;;  %3026 = vmin.xlane.f32.xlu0 %v8597_v56  ;;  %v2882_v36 = vand.u32 65535, %v8516_v45 }
 0xe10   :  { %v2849_v40 = vpop.xlane.xlu1 %2848  ;;  %v2847_v0 = vpop.xlane.xlu0 %2846 }
 0xe11   :  { %vm2865_vm15 = vcmp.eq.f32.partialorder %v8496_v9, %v2849_v40  ;;  %vm2864_vm0 = vcmp.eq.f32.partialorder %v8499_v35, %v2847_v0  ;;  %v8611_v31 = vcvt.s32.f32 %v3065_v19  ;;  %v8613_v49 = vcvt.s32.f32 %v3051_v13 }
 0xe12   :  { %v8616_v32 = vsel %vm2865_vm15, %v6373_v38, 128  ;;  %v8619_v44 = vsel %vm2864_vm0, %v6373_v38, 128  ;;  %v2898_v19 = vcvt.s32.f32 %v2896_v29  ;;  %v2910_v40 = vand.u32 65535, %v8527_v17 }
 0xe13   :  { %v3093_v23 = vshra.s32 %v8616_v32, 16  ;;  %v3079_v59 = vshra.s32 %v8619_v44, 16  ;;  %3068 = vmin.xlane.f32.xlu1 %v8611_v31  ;;  %3054 = vmin.xlane.f32.xlu0 %v8613_v49  ;;  %v2884_v51 = vcvt.s32.f32 %v2882_v36  ;;  %v2938_v17 = vand.u32 65535, %v8540_v30 }
 0xe15   :  { %v8625_v7 = vcvt.s32.f32 %v3093_v23  ;;  %v8627_v2 = vcvt.s32.f32 %v3079_v59  ;;  %v2926_v59 = vcvt.s32.f32 %v2924_v8 }
 0xe17   :  { %3096 = vmin.xlane.f32.xlu1 %v8625_v7  ;;  %3082 = vmin.xlane.f32.xlu0 %v8627_v2 }
 0xe80   :  { %v8634_v61 = vpop.xlane.xlu1 %2900 }
 0xe81   :  { %vm2902_vm1 = vcmp.eq.f32.partialorder %v8510_v16, %v8634_v61  ;;  %v2952_v16 = vand.u32 65535, %v8537_v52  ;;  %v2940_v52 = vcvt.s32.f32 %v2938_v17 }
 0xe82   :  { %v2903_v13 = vsel %vm2902_vm1, %v2898_v19, inf  ;;  %v2912_v19 = vcvt.s32.f32 %v2910_v40 }
 0xe83   :  { %2904 = vmin.xlane.f32.xlu1 %v2903_v13 }
 0xe84   :  { %v8639_v0 = vpop.xlane.xlu1 %2928  ;;  %v8641_v23 = vpop.xlane.xlu0 %2886 }
 0xe85   :  { %vm2930_vm2 = vcmp.eq.f32.partialorder %v8522_v12, %v8639_v0  ;;  %vm2888_vm3 = vcmp.eq.f32.partialorder %v8524_v46, %v8641_v23  ;;  %v2980_v12 = vand.u32 65535, %v8552_v33  ;;  %v2966_v46 = vand.u32 65535, %v8555_v53 }
 0xe86   :  { %v2931_v34 = vsel %vm2930_vm2, %v2926_v59, inf  ;;  %v2889_v45 = vsel %vm2888_vm3, %v2884_v51, inf  ;;  %v2954_v59 = vcvt.s32.f32 %v2952_v16  ;;  %v3008_v33 = vand.u32 65535, %v8568_v48 }
 0xe87   :  { %2932 = vmin.xlane.f32.xlu1 %v2931_v34  ;;  %2890 = vmin.xlane.f32.xlu0 %v2889_v45  ;;  %v2994_v53 = vand.u32 65535, %v8571_v28  ;;  %v2982_v34 = vcvt.s32.f32 %v2980_v12  ;;  %v2968_v45 = vcvt.s32.f32 %v2966_v46  ;;  %v3036_v48 = vand.u32 65535, %v8584_v5 }
 0xe88   :  { %v8649_v29 = vpop.xlane.xlu0 %2914  ;;  %v3022_v28 = vand.u32 65535, %v8587_v26  ;;  %v3064_v5 = vand.u32 65535, %v8600_v4  ;;  %v3050_v26 = vand.u32 65535, %v8603_v15  ;;  %v3092_v4 = vand.u32 65535, %v8616_v32 }
 0xe89   :  { %vm2916_vm4 = vcmp.eq.f32.partialorder %v8534_v54, %v8649_v29  ;;  %v3078_v15 = vand.u32 65535, %v8619_v44 }
 0xe8a   :  { %v2917_v8 = vsel %vm2916_vm4, %v2912_v19, inf  ;;  %v3010_v19 = vcvt.s32.f32 %v3008_v33  ;;  %v3066_v33 = vcvt.s32.f32 %v3064_v5  ;;  %v3094_v44 = vcvt.s32.f32 %v3092_v4 }
 0xe8b   :  { %2918 = vmin.xlane.f32.xlu0 %v2917_v8  ;;  %v2996_v8 = vcvt.s32.f32 %v2994_v53  ;;  %v3052_v53 = vcvt.s32.f32 %v3050_v26 }
 0xe8c   :  { %v8655_v36 = vpop.xlane.xlu1 %2956  ;;  %v8657_v13 = vpop.xlane.xlu0 %2942 }
 0xe8d   :  { %vm2958_vm5 = vcmp.eq.f32.partialorder %v8547_v39, %v8655_v36  ;;  %vm2944_vm6 = vcmp.eq.f32.partialorder %v8549_v41, %v8657_v13 }
 0xe8e   :  { %v2959_v30 = vsel %vm2958_vm5, %v2954_v59, inf  ;;  %v2945_v54 = vsel %vm2944_vm6, %v2940_v52, inf  ;;  %v3038_v59 = vcvt.s32.f32 %v3036_v48  ;;  %v3024_v52 = vcvt.s32.f32 %v3022_v28 }
 0xe8f   :  { %2960 = vmin.xlane.f32.xlu1 %v2959_v30  ;;  %2946 = vmin.xlane.f32.xlu0 %v2945_v54 }
 0xe90   :  { %v8665_v40 = vpop.xlane.xlu1 %2984  ;;  %v8667_v51 = vpop.xlane.xlu0 %2970 }
 0xe91   :  { %vm2986_vm7 = vcmp.eq.f32.partialorder %v8563_v57, %v8665_v40  ;;  %vm2972_vm8 = vcmp.eq.f32.partialorder %v8565_v20, %v8667_v51 }
 0xe92   :  { %v2987_v39 = vsel %vm2986_vm7, %v2982_v34, inf  ;;  %v2973_v41 = vsel %vm2972_vm8, %v2968_v45, inf  ;;  %v3080_v45 = vcvt.s32.f32 %v3078_v15 }
 0xe93   :  { %2988 = vmin.xlane.f32.xlu1 %v2987_v39  ;;  %2974 = vmin.xlane.f32.xlu0 %v2973_v41  ;;  %v2935_v41 = vcvt.f32.s32 %v8639_v0 }
 0xe94   :  { %v8675_v16 = vpop.xlane.xlu1 %3012  ;;  %v8677_v17 = vpop.xlane.xlu0 %2998 }
 0xe95   :  { %vm3014_vm9 = vcmp.eq.f32.partialorder %v8579_v25, %v8675_v16  ;;  %vm3000_vm10 = vcmp.eq.f32.partialorder %v8581_v60, %v8677_v17 }
 0xe96   :  { %v3015_v57 = vsel %vm3014_vm9, %v3010_v19, inf  ;;  %v3001_v20 = vsel %vm3000_vm10, %v2996_v8, inf  ;;  %v2893_v19 = vcvt.f32.s32 %v8641_v23 }
 0xe97   :  { %3016 = vmin.xlane.f32.xlu1 %v3015_v57  ;;  %3002 = vmin.xlane.f32.xlu0 %v3001_v20  ;;  %v2936_v20 = vshll.u32 %v2935_v41, 16 }
 0xe98   :  { %v8685_v12 = vpop.xlane.xlu1 %3040  ;;  %v8687_v46 = vpop.xlane.xlu0 %3026 }
 0xe99   :  { %vm3042_vm11 = vcmp.eq.f32.partialorder %v8595_v22, %v8685_v12  ;;  %vm3028_vm12 = vcmp.eq.f32.partialorder %v8597_v56, %v8687_v46 }
 0xe9a   :  { %v3043_v25 = vsel %vm3042_vm11, %v3038_v59, inf  ;;  %v3029_v60 = vsel %vm3028_vm12, %v3024_v52, inf }
 0xe9b   :  { %3044 = vmin.xlane.f32.xlu1 %v3043_v25  ;;  %3030 = vmin.xlane.f32.xlu0 %v3029_v60  ;;  %v2963_v60 = vcvt.f32.s32 %v8655_v36 }
 0xe9c   :  { %v8695_v30 = vpop.xlane.xlu1 %3068  ;;  %v8697_v54 = vpop.xlane.xlu0 %3054 }
 0xe9d   :  { %vm3070_vm13 = vcmp.eq.f32.partialorder %v8611_v31, %v8695_v30  ;;  %vm3056_vm14 = vcmp.eq.f32.partialorder %v8613_v49, %v8697_v54  ;;  %v2907_v49 = vcvt.f32.s32 %v8634_v61  ;;  %v2964_v36 = vshll.u32 %v2963_v60, 16 }
 0xe9e   :  { %v3071_v22 = vsel %vm3070_vm13, %v3066_v33, inf  ;;  %v3057_v56 = vsel %vm3056_vm14, %v3052_v53, inf }
 0xe9f   :  { %3072 = vmin.xlane.f32.xlu1 %v3071_v22  ;;  %3058 = vmin.xlane.f32.xlu0 %v3057_v56  ;;  %v2908_v28 = vshll.u32 %v2907_v49, 16  ;;  %v2991_v22 = vcvt.f32.s32 %v8665_v40  ;;  %v3019_v40 = vcvt.f32.s32 %v8675_v16 }
 0xea0   :  { %v8703_v34 = vpop.xlane.xlu1 %3096  ;;  %v8705_v32 = vpop.xlane.xlu0 %3082 }
 0xea1   :  { %vm3098_vm15 = vcmp.eq.f32.partialorder %v8625_v7, %v8703_v34  ;;  %vm3084_vm0 = vcmp.eq.f32.partialorder %v8627_v2, %v8705_v32  ;;  %v2921_v7 = vcvt.f32.s32 %v8649_v29  ;;  %v2894_v2 = vshll.u32 %v2893_v19, 16 }
 0xea2   :  { %v3099_v31 = vsel %vm3098_vm15, %v3094_v44, inf  ;;  %v3085_v39 = vsel %vm3084_vm0, %v3080_v45, inf  ;;  %v2949_v29 = vcvt.f32.s32 %v8657_v13  ;;  %v2977_v13 = vcvt.f32.s32 %v8667_v51 }
 0xea3   :  { %3100 = vmin.xlane.f32.xlu1 %v3099_v31  ;;  %3086 = vmin.xlane.f32.xlu0 %v3085_v39  ;;  %v2922_v23 = vshll.u32 %v2921_v7, 16  ;;  %v2992_v41 = vshll.u32 %v2991_v22, 16  ;;  %v3005_v51 = vcvt.f32.s32 %v8677_v17  ;;  %v3020_v16 = vshll.u32 %v3019_v40, 16 }
 0xea4   :  { %v2950_v45 = vshll.u32 %v2949_v29, 16  ;;  %v3061_v29 = vcvt.f32.s32 %v8697_v54 }
 0xea5   :  { %v3006_v17 = vshll.u32 %v3005_v51, 16 }
 0xea6   :  { %v3062_v54 = vshll.u32 %v3061_v29, 16 }
 0xf0c   :  { %v2905_v48 = vpop.xlane.xlu1 %2904 }
 0xf0d   :  { %v2906_v8 = vcvt.f32.s32 %v2905_v48  ;;  %v2978_v48 = vshll.u32 %v2977_v13, 16 }
 0xf0f   :  { %v2909_v57 = vadd.s32 %v2908_v28, %v2906_v8 }
 0xf10   :  { %v2933_v5 = vpop.xlane.xlu1 %2932  ;;  %v2891_v26 = vpop.xlane.xlu0 %2890 }
 0xf11   :  { %v2934_v59 = vcvt.f32.s32 %v2933_v5  ;;  %v2892_v52 = vcvt.f32.s32 %v2891_v26  ;;  %vm3107_vm1 = vcmp.eq.s32.totalorder %v6373_v38, %v2909_v57  ;;  %v3047_v26 = vcvt.f32.s32 %v8685_v12 }
 0xf12   :  { %v8717_v61 = vsel %vm3107_vm1, -inf, %v8413_v18 }
 0xf13   :  { %v2937_v0 = vadd.s32 %v2936_v20, %v2934_v59  ;;  %v2895_v25 = vadd.s32 %v2894_v2, %v2892_v52  ;;  %3140 = vmax.xlane.f32.xlu1 %v8717_v61  ;;  %v3033_v2 = vcvt.f32.s32 %v8687_v46  ;;  %v3048_v12 = vshll.u32 %v3047_v26, 16 }
 0xf14   :  { %v2919_v4 = vpop.xlane.xlu0 %2918 }
 0xf15   :  { %v2920_v15 = vcvt.f32.s32 %v2919_v4  ;;  %vm3109_vm2 = vcmp.eq.s32.totalorder %v6373_v38, %v2937_v0  ;;  %vm3106_vm3 = vcmp.eq.s32.totalorder %v6373_v38, %v2895_v25  ;;  %v3034_v46 = vshll.u32 %v3033_v2, 16 }
 0xf16   :  { %v8725_v33 = vsel %vm3109_vm2, -inf, %v8421_v50  ;;  %v8728_v18 = vsel %vm3106_vm3, -inf, %v8424_v10  ;;  %v3075_v4 = vcvt.f32.s32 %v8695_v30 }
 0xf17   :  { %v2923_v53 = vadd.s32 %v2922_v23, %v2920_v15  ;;  %3144 = vmax.xlane.f32.xlu1 %v8725_v33  ;;  %3138 = vmax.xlane.f32.xlu0 %v8728_v18 }
 0xf18   :  { %v2961_v56 = vpop.xlane.xlu1 %2960  ;;  %v2947_v44 = vpop.xlane.xlu0 %2946  ;;  %v3076_v30 = vshll.u32 %v3075_v4, 16 }
 0xf19   :  { %v2962_v31 = vcvt.f32.s32 %v2961_v56  ;;  %v2948_v39 = vcvt.f32.s32 %v2947_v44  ;;  %vm3108_vm4 = vcmp.eq.s32.totalorder %v6373_v38, %v2923_v53  ;;  %v3103_v44 = vcvt.f32.s32 %v8703_v34 }
 0xf1a   :  { %v8736_v50 = vsel %vm3108_vm4, -inf, %v8432_v24 }
 0xf1b   :  { %v2965_v10 = vadd.s32 %v2964_v36, %v2962_v31  ;;  %v2951_v49 = vadd.s32 %v2950_v45, %v2948_v39  ;;  %3142 = vmax.xlane.f32.xlu0 %v8736_v50  ;;  %v3089_v45 = vcvt.f32.s32 %v8705_v32  ;;  %v3104_v34 = vshll.u32 %v3103_v44, 16 }
 0xf1c   :  { %v2989_v28 = vpop.xlane.xlu1 %2988  ;;  %v2975_v19 = vpop.xlane.xlu0 %2974 }
 0xf1d   :  { %v2990_v8 = vcvt.f32.s32 %v2989_v28  ;;  %v2976_v57 = vcvt.f32.s32 %v2975_v19  ;;  %vm3111_vm5 = vcmp.eq.s32.totalorder %v6373_v38, %v2965_v10  ;;  %vm3110_vm6 = vcmp.eq.s32.totalorder %v6373_v38, %v2951_v49 }
 0xf1e   :  { %v8744_v24 = vsel %vm3111_vm5, -inf, %v8440_v37  ;;  %v8747_v20 = vsel %vm3110_vm6, -inf, %v8443_v47  ;;  %v3090_v32 = vshll.u32 %v3089_v45, 16 }
 0xf1f   :  { %v2993_v7 = vadd.s32 %v2992_v41, %v2990_v8  ;;  %v2979_v5 = vadd.s32 %v2978_v48, %v2976_v57  ;;  %3148 = vmax.xlane.f32.xlu1 %v8744_v24  ;;  %3146 = vmax.xlane.f32.xlu0 %v8747_v20 }
 0xf20   :  { %v3017_v59 = vpop.xlane.xlu1 %3016  ;;  %v3003_v52 = vpop.xlane.xlu0 %3002 }
 0xf21   :  { %v3018_v0 = vcvt.f32.s32 %v3017_v59  ;;  %v3004_v37 = vcvt.f32.s32 %v3003_v52  ;;  %vm3113_vm7 = vcmp.eq.s32.totalorder %v6373_v38, %v2993_v7  ;;  %vm3112_vm8 = vcmp.eq.s32.totalorder %v6373_v38, %v2979_v5 }
 0xf22   :  { %v8756_v47 = vsel %vm3113_vm7, -inf, %v8452_v42  ;;  %v8759_v25 = vsel %vm3112_vm8, -inf, %v8455_v27 }
 0xf23   :  { %v3021_v23 = vadd.s32 %v3020_v16, %v3018_v0  ;;  %v3007_v60 = vadd.s32 %v3006_v17, %v3004_v37  ;;  %3152 = vmax.xlane.f32.xlu1 %v8756_v47  ;;  %3150 = vmax.xlane.f32.xlu0 %v8759_v25 }
 0xf24   :  { %v3045_v15 = vpop.xlane.xlu1 %3044  ;;  %v3031_v53 = vpop.xlane.xlu0 %3030 }
 0xf25   :  { %v3046_v36 = vcvt.f32.s32 %v3045_v15  ;;  %v3032_v42 = vcvt.f32.s32 %v3031_v53  ;;  %vm3115_vm9 = vcmp.eq.s32.totalorder %v6373_v38, %v3021_v23  ;;  %vm3114_vm10 = vcmp.eq.s32.totalorder %v6373_v38, %v3007_v60 }
 0xf26   :  { %v8768_v27 = vsel %vm3115_vm9, -inf, %v8464_v11  ;;  %v8771_v22 = vsel %vm3114_vm10, -inf, %v8467_v58 }
 0xf27   :  { %v3049_v13 = vadd.s32 %v3048_v12, %v3046_v36  ;;  %v3035_v56 = vadd.s32 %v3034_v46, %v3032_v42  ;;  %3156 = vmax.xlane.f32.xlu1 %v8768_v27  ;;  %3154 = vmax.xlane.f32.xlu0 %v8771_v22 }
 0xf28   :  { %v3073_v31 = vpop.xlane.xlu1 %3072  ;;  %v3059_v39 = vpop.xlane.xlu0 %3058 }
 0xf29   :  { %v3074_v10 = vcvt.f32.s32 %v3073_v31  ;;  %v3060_v11 = vcvt.f32.s32 %v3059_v39  ;;  %vm3117_vm11 = vcmp.eq.s32.totalorder %v6373_v38, %v3049_v13  ;;  %vm3116_vm12 = vcmp.eq.s32.totalorder %v6373_v38, %v3035_v56 }
 0xf2a   :  { %v8780_v58 = vsel %vm3117_vm11, -inf, %v8476_v3  ;;  %v8783_v49 = vsel %vm3116_vm12, -inf, %v8479_v43 }
 0xf2b   :  { %v3077_v41 = vadd.s32 %v3076_v30, %v3074_v10  ;;  %v3063_v48 = vadd.s32 %v3062_v54, %v3060_v11  ;;  %3160 = vmax.xlane.f32.xlu1 %v8780_v58  ;;  %3158 = vmax.xlane.f32.xlu0 %v8783_v49 }
 0xf2c   :  { %v3101_v40 = vpop.xlane.xlu1 %3100  ;;  %v3087_v51 = vpop.xlane.xlu0 %3086 }
 0xf2d   :  { %v3102_v28 = vcvt.f32.s32 %v3101_v40  ;;  %v3088_v19 = vcvt.f32.s32 %v3087_v51  ;;  %vm3119_vm13 = vcmp.eq.s32.totalorder %v6373_v38, %v3077_v41  ;;  %vm3118_vm14 = vcmp.eq.s32.totalorder %v6373_v38, %v3063_v48 }
 0xf2e   :  { %v8790_v3 = vsel %vm3119_vm13, -inf, %v8486_v21  ;;  %v8793_v43 = vsel %vm3118_vm14, -inf, %v8489_v1 }
 0xf2f   :  { %v3105_v8 = vadd.s32 %v3104_v34, %v3102_v28  ;;  %v3091_v57 = vadd.s32 %v3090_v32, %v3088_v19  ;;  %3164 = vmax.xlane.f32.xlu1 %v8790_v3  ;;  %3162 = vmax.xlane.f32.xlu0 %v8793_v43 }
 0xf31   :  { %vm3121_vm15 = vcmp.eq.s32.totalorder %v6373_v38, %v3105_v8  ;;  %vm3120_vm0 = vcmp.eq.s32.totalorder %v6373_v38, %v3091_v57 }
 0xf32   :  { %v8800_v7 = vsel %vm3121_vm15, -inf, %v8496_v9  ;;  %v8803_v5 = vsel %vm3120_vm0, -inf, %v8499_v35 }
 0xf33   :  { %3168 = vmax.xlane.f32.xlu1 %v8800_v7  ;;  %3166 = vmax.xlane.f32.xlu0 %v8803_v5 }
 0xf9c   :  { %v3141_v21 = vpop.xlane.xlu1 %3140 }
 0xf9d   :  { %vm3171_vm1 = vcmp.eq.f32.partialorder %v8717_v61, %v3141_v21 }
 0xf9e   :  { %v8809_v1 = vsel %vm3171_vm1, %v6373_v38, 128 }
 0xf9f   :  { %v3217_v16 = vshra.s32 %v8809_v1, 16 }
 0xfa0   :  { %v3145_v17 = vpop.xlane.xlu1 %3144  ;;  %v3139_v26 = vpop.xlane.xlu0 %3138 }
 0xfa1   :  { %vm3173_vm2 = vcmp.eq.f32.partialorder %v8725_v33, %v3145_v17  ;;  %vm3170_vm3 = vcmp.eq.f32.partialorder %v8728_v18, %v3139_v26  ;;  %v8814_v9 = vcvt.s32.f32 %v3217_v16 }
 0xfa2   :  { %v8817_v35 = vsel %vm3173_vm2, %v6373_v38, 128  ;;  %v8820_v2 = vsel %vm3170_vm3, %v6373_v38, 128 }
 0xfa3   :  { %v3245_v59 = vshra.s32 %v8817_v35, 16  ;;  %v3203_v52 = vshra.s32 %v8820_v2, 16  ;;  %3220 = vmin.xlane.f32.xlu1 %v8814_v9 }
 0xfa4   :  { %v3143_v0 = vpop.xlane.xlu0 %3142 }
 0xfa5   :  { %vm3172_vm4 = vcmp.eq.f32.partialorder %v8736_v50, %v3143_v0  ;;  %v8826_v37 = vcvt.s32.f32 %v3245_v59  ;;  %v8828_v23 = vcvt.s32.f32 %v3203_v52 }
 0xfa6   :  { %v8831_v60 = vsel %vm3172_vm4, %v6373_v38, 128 }
 0xfa7   :  { %v3231_v12 = vshra.s32 %v8831_v60, 16  ;;  %3248 = vmin.xlane.f32.xlu1 %v8826_v37  ;;  %3206 = vmin.xlane.f32.xlu0 %v8828_v23 }
 0xfa8   :  { %v3149_v46 = vpop.xlane.xlu1 %3148  ;;  %v3147_v4 = vpop.xlane.xlu0 %3146 }
 0xfa9   :  { %vm3175_vm5 = vcmp.eq.f32.partialorder %v8744_v24, %v3149_v46  ;;  %vm3174_vm6 = vcmp.eq.f32.partialorder %v8747_v20, %v3147_v4  ;;  %v8838_v29 = vcvt.s32.f32 %v3231_v12 }
 0xfaa   :  { %v8841_v15 = vsel %vm3175_vm5, %v6373_v38, 128  ;;  %v8844_v53 = vsel %vm3174_vm6, %v6373_v38, 128 }
 0xfab   :  { %v3273_v36 = vshra.s32 %v8841_v15, 16  ;;  %v3259_v42 = vshra.s32 %v8844_v53, 16  ;;  %3234 = vmin.xlane.f32.xlu0 %v8838_v29 }
 0xfac   :  { %v3153_v13 = vpop.xlane.xlu1 %3152  ;;  %v3151_v56 = vpop.xlane.xlu0 %3150 }
 0xfad   :  { %vm3177_vm7 = vcmp.eq.f32.partialorder %v8756_v47, %v3153_v13  ;;  %vm3176_vm8 = vcmp.eq.f32.partialorder %v8759_v25, %v3151_v56  ;;  %v8851_v30 = vcvt.s32.f32 %v3273_v36  ;;  %v8853_v54 = vcvt.s32.f32 %v3259_v42 }
 0xfae   :  { %v8856_v44 = vsel %vm3177_vm7, %v6373_v38, 128  ;;  %v8859_v45 = vsel %vm3176_vm8, %v6373_v38, 128 }
 0xfaf   :  { %v3301_v31 = vshra.s32 %v8856_v44, 16  ;;  %v3287_v39 = vshra.s32 %v8859_v45, 16  ;;  %3276 = vmin.xlane.f32.xlu1 %v8851_v30  ;;  %3262 = vmin.xlane.f32.xlu0 %v8853_v54 }
 0xfb0   :  { %v3157_v10 = vpop.xlane.xlu1 %3156  ;;  %v3155_v11 = vpop.xlane.xlu0 %3154 }
 0xfb1   :  { %vm3179_vm9 = vcmp.eq.f32.partialorder %v8768_v27, %v3157_v10  ;;  %vm3178_vm10 = vcmp.eq.f32.partialorder %v8771_v22, %v3155_v11  ;;  %v8867_v41 = vcvt.s32.f32 %v3301_v31  ;;  %v8869_v48 = vcvt.s32.f32 %v3287_v39 }
 0xfb2   :  { %v8872_v34 = vsel %vm3179_vm9, %v6373_v38, 128  ;;  %v8875_v32 = vsel %vm3178_vm10, %v6373_v38, 128 }
 0xfb3   :  { %v3329_v40 = vshra.s32 %v8872_v34, 16  ;;  %v3315_v51 = vshra.s32 %v8875_v32, 16  ;;  %3304 = vmin.xlane.f32.xlu1 %v8867_v41  ;;  %3290 = vmin.xlane.f32.xlu0 %v8869_v48 }
 0xfb4   :  { %v3161_v28 = vpop.xlane.xlu1 %3160  ;;  %v3159_v19 = vpop.xlane.xlu0 %3158 }
 0xfb5   :  { %vm3181_vm11 = vcmp.eq.f32.partialorder %v8780_v58, %v3161_v28  ;;  %vm3180_vm12 = vcmp.eq.f32.partialorder %v8783_v49, %v3159_v19  ;;  %v8883_v8 = vcvt.s32.f32 %v3329_v40  ;;  %v8885_v57 = vcvt.s32.f32 %v3315_v51 }
 0xfb6   :  { %v8888_v21 = vsel %vm3181_vm11, %v6373_v38, 128  ;;  %v8891_v16 = vsel %vm3180_vm12, %v6373_v38, 128 }
 0xfb7   :  { %v3357_v17 = vshra.s32 %v8888_v21, 16  ;;  %v3343_v26 = vshra.s32 %v8891_v16, 16  ;;  %3332 = vmin.xlane.f32.xlu1 %v8883_v8  ;;  %3318 = vmin.xlane.f32.xlu0 %v8885_v57 }
 0xfb8   :  { %v3165_v59 = vpop.xlane.xlu1 %3164  ;;  %v3163_v52 = vpop.xlane.xlu0 %3162 }
 0xfb9   :  { %vm3183_vm13 = vcmp.eq.f32.partialorder %v8790_v3, %v3165_v59  ;;  %vm3182_vm14 = vcmp.eq.f32.partialorder %v8793_v43, %v3163_v52  ;;  %v8899_v0 = vcvt.s32.f32 %v3357_v17  ;;  %v8901_v12 = vcvt.s32.f32 %v3343_v26 }
 0xfba   :  { %v8904_v46 = vsel %vm3183_vm13, %v6373_v38, 128  ;;  %v8907_v4 = vsel %vm3182_vm14, %v6373_v38, 128  ;;  %v3216_v17 = vand.u32 65535, %v8809_v1  ;;  %v3244_v26 = vand.u32 65535, %v8817_v35 }
 0xfbb   :  { %v3385_v36 = vshra.s32 %v8904_v46, 16  ;;  %v3371_v42 = vshra.s32 %v8907_v4, 16  ;;  %3360 = vmin.xlane.f32.xlu1 %v8899_v0  ;;  %3346 = vmin.xlane.f32.xlu0 %v8901_v12  ;;  %v3202_v59 = vand.u32 65535, %v8820_v2 }
 0xfbc   :  { %v3169_v13 = vpop.xlane.xlu1 %3168  ;;  %v3167_v56 = vpop.xlane.xlu0 %3166 }
 0xfbd   :  { %vm3185_vm15 = vcmp.eq.f32.partialorder %v8800_v7, %v3169_v13  ;;  %vm3184_vm0 = vcmp.eq.f32.partialorder %v8803_v5, %v3167_v56  ;;  %v8915_v31 = vcvt.s32.f32 %v3385_v36  ;;  %v8917_v39 = vcvt.s32.f32 %v3371_v42 }
 0xfbe   :  { %v8920_v10 = vsel %vm3185_vm15, %v6373_v38, 128  ;;  %v8923_v11 = vsel %vm3184_vm0, %v6373_v38, 128  ;;  %v3218_v36 = vcvt.s32.f32 %v3216_v17  ;;  %v3230_v13 = vand.u32 65535, %v8831_v60 }
 0xfbf   :  { %v3413_v40 = vshra.s32 %v8920_v10, 16  ;;  %v3399_v51 = vshra.s32 %v8923_v11, 16  ;;  %3388 = vmin.xlane.f32.xlu1 %v8915_v31  ;;  %3374 = vmin.xlane.f32.xlu0 %v8917_v39  ;;  %v3204_v1 = vcvt.s32.f32 %v3202_v59  ;;  %v3258_v60 = vand.u32 65535, %v8844_v53 }
 0xfc1   :  { %v8929_v28 = vcvt.s32.f32 %v3413_v40  ;;  %v8931_v19 = vcvt.s32.f32 %v3399_v51  ;;  %v3246_v51 = vcvt.s32.f32 %v3244_v26 }
 0xfc3   :  { %3416 = vmin.xlane.f32.xlu1 %v8929_v28  ;;  %3402 = vmin.xlane.f32.xlu0 %v8931_v19 }
0x102c   :  { %v8938_v52 = vpop.xlane.xlu1 %3220 }
0x102d   :  { %vm3222_vm1 = vcmp.eq.f32.partialorder %v8814_v9, %v8938_v52  ;;  %v3272_v9 = vand.u32 65535, %v8841_v15  ;;  %v3260_v15 = vcvt.s32.f32 %v3258_v60 }
0x102e   :  { %v3223_v42 = vsel %vm3222_vm1, %v3218_v36, inf  ;;  %v3232_v36 = vcvt.s32.f32 %v3230_v13 }
0x102f   :  { %3224 = vmin.xlane.f32.xlu1 %v3223_v42 }
0x1030   :  { %v8943_v56 = vpop.xlane.xlu1 %3248  ;;  %v8945_v40 = vpop.xlane.xlu0 %3206 }
0x1031   :  { %vm3250_vm2 = vcmp.eq.f32.partialorder %v8826_v37, %v8943_v56  ;;  %vm3208_vm3 = vcmp.eq.f32.partialorder %v8828_v23, %v8945_v40  ;;  %v3300_v37 = vand.u32 65535, %v8856_v44  ;;  %v3286_v23 = vand.u32 65535, %v8859_v45 }
0x1032   :  { %v3251_v35 = vsel %vm3250_vm2, %v3246_v51, inf  ;;  %v3209_v2 = vsel %vm3208_vm3, %v3204_v1, inf  ;;  %v3274_v51 = vcvt.s32.f32 %v3272_v9  ;;  %v3328_v44 = vand.u32 65535, %v8872_v34 }
0x1033   :  { %3252 = vmin.xlane.f32.xlu1 %v3251_v35  ;;  %3210 = vmin.xlane.f32.xlu0 %v3209_v2  ;;  %v3314_v45 = vand.u32 65535, %v8875_v32  ;;  %v3302_v35 = vcvt.s32.f32 %v3300_v37  ;;  %v3288_v2 = vcvt.s32.f32 %v3286_v23  ;;  %v3356_v34 = vand.u32 65535, %v8888_v21 }
0x1034   :  { %v8953_v17 = vpop.xlane.xlu0 %3234  ;;  %v3342_v32 = vand.u32 65535, %v8891_v16  ;;  %v3384_v21 = vand.u32 65535, %v8904_v46  ;;  %v3370_v16 = vand.u32 65535, %v8907_v4  ;;  %v3412_v46 = vand.u32 65535, %v8920_v10 }
0x1035   :  { %vm3236_vm4 = vcmp.eq.f32.partialorder %v8838_v29, %v8953_v17  ;;  %v3398_v4 = vand.u32 65535, %v8923_v11 }
0x1036   :  { %v3237_v26 = vsel %vm3236_vm4, %v3232_v36, inf  ;;  %v3330_v36 = vcvt.s32.f32 %v3328_v44  ;;  %v3386_v44 = vcvt.s32.f32 %v3384_v21  ;;  %v3414_v11 = vcvt.s32.f32 %v3412_v46 }
0x1037   :  { %3238 = vmin.xlane.f32.xlu0 %v3237_v26  ;;  %v3316_v26 = vcvt.s32.f32 %v3314_v45  ;;  %v3372_v45 = vcvt.s32.f32 %v3370_v16 }
0x1038   :  { %v8959_v59 = vpop.xlane.xlu1 %3276  ;;  %v8961_v42 = vpop.xlane.xlu0 %3262 }
0x1039   :  { %vm3278_vm5 = vcmp.eq.f32.partialorder %v8851_v30, %v8959_v59  ;;  %vm3264_vm6 = vcmp.eq.f32.partialorder %v8853_v54, %v8961_v42 }
0x103a   :  { %v3279_v53 = vsel %vm3278_vm5, %v3274_v51, inf  ;;  %v3265_v29 = vsel %vm3264_vm6, %v3260_v15, inf  ;;  %v3358_v51 = vcvt.s32.f32 %v3356_v34  ;;  %v3344_v15 = vcvt.s32.f32 %v3342_v32 }
0x103b   :  { %3280 = vmin.xlane.f32.xlu1 %v3279_v53  ;;  %3266 = vmin.xlane.f32.xlu0 %v3265_v29 }
0x103c   :  { %v8969_v13 = vpop.xlane.xlu1 %3304  ;;  %v8971_v1 = vpop.xlane.xlu0 %3290 }
0x103d   :  { %vm3306_vm7 = vcmp.eq.f32.partialorder %v8867_v41, %v8969_v13  ;;  %vm3292_vm8 = vcmp.eq.f32.partialorder %v8869_v48, %v8971_v1 }
0x103e   :  { %v3307_v30 = vsel %vm3306_vm7, %v3302_v35, inf  ;;  %v3293_v54 = vsel %vm3292_vm8, %v3288_v2, inf  ;;  %v3400_v2 = vcvt.s32.f32 %v3398_v4 }
0x103f   :  { %3308 = vmin.xlane.f32.xlu1 %v3307_v30  ;;  %3294 = vmin.xlane.f32.xlu0 %v3293_v54  ;;  %v3255_v54 = vcvt.f32.s32 %v8943_v56 }
0x1040   :  { %v8979_v9 = vpop.xlane.xlu1 %3332  ;;  %v8981_v60 = vpop.xlane.xlu0 %3318 }
0x1041   :  { %vm3334_vm9 = vcmp.eq.f32.partialorder %v8883_v8, %v8979_v9  ;;  %vm3320_vm10 = vcmp.eq.f32.partialorder %v8885_v57, %v8981_v60 }
0x1042   :  { %v3335_v41 = vsel %vm3334_vm9, %v3330_v36, inf  ;;  %v3321_v48 = vsel %vm3320_vm10, %v3316_v26, inf  ;;  %v3213_v36 = vcvt.f32.s32 %v8945_v40 }
0x1043   :  { %3336 = vmin.xlane.f32.xlu1 %v3335_v41  ;;  %3322 = vmin.xlane.f32.xlu0 %v3321_v48  ;;  %v3256_v48 = vshll.u32 %v3255_v54, 16 }
0x1044   :  { %v8989_v37 = vpop.xlane.xlu1 %3360  ;;  %v8991_v23 = vpop.xlane.xlu0 %3346 }
0x1045   :  { %vm3362_vm11 = vcmp.eq.f32.partialorder %v8899_v0, %v8989_v37  ;;  %vm3348_vm12 = vcmp.eq.f32.partialorder %v8901_v12, %v8991_v23 }
0x1046   :  { %v3363_v8 = vsel %vm3362_vm11, %v3358_v51, inf  ;;  %v3349_v57 = vsel %vm3348_vm12, %v3344_v15, inf }
0x1047   :  { %3364 = vmin.xlane.f32.xlu1 %v3363_v8  ;;  %3350 = vmin.xlane.f32.xlu0 %v3349_v57  ;;  %v3283_v57 = vcvt.f32.s32 %v8959_v59 }
0x1048   :  { %v8999_v53 = vpop.xlane.xlu1 %3388  ;;  %v9001_v29 = vpop.xlane.xlu0 %3374 }
0x1049   :  { %vm3390_vm13 = vcmp.eq.f32.partialorder %v8915_v31, %v8999_v53  ;;  %vm3376_vm14 = vcmp.eq.f32.partialorder %v8917_v39, %v9001_v29  ;;  %v3227_v39 = vcvt.f32.s32 %v8938_v52  ;;  %v3284_v59 = vshll.u32 %v3283_v57, 16 }
0x104a   :  { %v3391_v0 = vsel %vm3390_vm13, %v3386_v44, inf  ;;  %v3377_v12 = vsel %vm3376_vm14, %v3372_v45, inf }
0x104b   :  { %3392 = vmin.xlane.f32.xlu1 %v3391_v0  ;;  %3378 = vmin.xlane.f32.xlu0 %v3377_v12  ;;  %v3228_v32 = vshll.u32 %v3227_v39, 16  ;;  %v3311_v0 = vcvt.f32.s32 %v8969_v13  ;;  %v3339_v13 = vcvt.f32.s32 %v8979_v9 }
0x104c   :  { %v9007_v35 = vpop.xlane.xlu1 %3416  ;;  %v9009_v10 = vpop.xlane.xlu0 %3402 }
0x104d   :  { %vm3418_vm15 = vcmp.eq.f32.partialorder %v8929_v28, %v9007_v35  ;;  %vm3404_vm0 = vcmp.eq.f32.partialorder %v8931_v19, %v9009_v10  ;;  %v3241_v28 = vcvt.f32.s32 %v8953_v17  ;;  %v3214_v19 = vshll.u32 %v3213_v36, 16 }
0x104e   :  { %v3419_v31 = vsel %vm3418_vm15, %v3414_v11, inf  ;;  %v3405_v30 = vsel %vm3404_vm0, %v3400_v2, inf  ;;  %v3269_v17 = vcvt.f32.s32 %v8961_v42  ;;  %v3297_v42 = vcvt.f32.s32 %v8971_v1 }
0x104f   :  { %3420 = vmin.xlane.f32.xlu1 %v3419_v31  ;;  %3406 = vmin.xlane.f32.xlu0 %v3405_v30  ;;  %v3242_v40 = vshll.u32 %v3241_v28, 16  ;;  %v3312_v54 = vshll.u32 %v3311_v0, 16  ;;  %v3325_v1 = vcvt.f32.s32 %v8981_v60  ;;  %v3340_v9 = vshll.u32 %v3339_v13, 16 }
0x1050   :  { %v3270_v2 = vshll.u32 %v3269_v17, 16  ;;  %v3381_v17 = vcvt.f32.s32 %v9001_v29 }
0x1051   :  { %v3326_v60 = vshll.u32 %v3325_v1, 16 }
0x1052   :  { %v3382_v29 = vshll.u32 %v3381_v17, 16 }
0x10b8   :  { %v3225_v34 = vpop.xlane.xlu1 %3224 }
0x10b9   :  { %v3226_v26 = vcvt.f32.s32 %v3225_v34  ;;  %v3298_v34 = vshll.u32 %v3297_v42, 16 }
0x10bb   :  { %v3229_v41 = vadd.s32 %v3228_v32, %v3226_v26 }
0x10bc   :  { %v3253_v21 = vpop.xlane.xlu1 %3252  ;;  %v3211_v16 = vpop.xlane.xlu0 %3210 }
0x10bd   :  { %v3254_v51 = vcvt.f32.s32 %v3253_v21  ;;  %v3212_v15 = vcvt.f32.s32 %v3211_v16  ;;  %vm3427_vm1 = vcmp.eq.s32.totalorder %v6373_v38, %v3229_v41  ;;  %v3367_v16 = vcvt.f32.s32 %v8989_v37 }
0x10be   :  { %v9021_v52 = vsel %vm3427_vm1, -inf, %v8717_v61 }
0x10bf   :  { %v3257_v56 = vadd.s32 %v3256_v48, %v3254_v51  ;;  %v3215_v8 = vadd.s32 %v3214_v19, %v3212_v15  ;;  %3460 = vmax.xlane.f32.xlu1 %v9021_v52  ;;  %v3353_v19 = vcvt.f32.s32 %v8991_v23  ;;  %v3368_v37 = vshll.u32 %v3367_v16, 16 }
0x10c0   :  { %v3239_v46 = vpop.xlane.xlu0 %3238 }
0x10c1   :  { %v3240_v4 = vcvt.f32.s32 %v3239_v46  ;;  %vm3429_vm2 = vcmp.eq.s32.totalorder %v6373_v38, %v3257_v56  ;;  %vm3426_vm3 = vcmp.eq.s32.totalorder %v6373_v38, %v3215_v8  ;;  %v3354_v23 = vshll.u32 %v3353_v19, 16 }
0x10c2   :  { %v9029_v44 = vsel %vm3429_vm2, -inf, %v8725_v33  ;;  %v9032_v61 = vsel %vm3426_vm3, -inf, %v8728_v18  ;;  %v3395_v46 = vcvt.f32.s32 %v8999_v53 }
0x10c3   :  { %v3243_v45 = vadd.s32 %v3242_v40, %v3240_v4  ;;  %3464 = vmax.xlane.f32.xlu1 %v9029_v44  ;;  %3458 = vmax.xlane.f32.xlu0 %v9032_v61 }
0x10c4   :  { %v3281_v12 = vpop.xlane.xlu1 %3280  ;;  %v3267_v11 = vpop.xlane.xlu0 %3266  ;;  %v3396_v53 = vshll.u32 %v3395_v46, 16 }
0x10c5   :  { %v3282_v31 = vcvt.f32.s32 %v3281_v12  ;;  %v3268_v30 = vcvt.f32.s32 %v3267_v11  ;;  %vm3428_vm4 = vcmp.eq.s32.totalorder %v6373_v38, %v3243_v45  ;;  %v3423_v11 = vcvt.f32.s32 %v9007_v35 }
0x10c6   :  { %v9040_v33 = vsel %vm3428_vm4, -inf, %v8736_v50 }
0x10c7   :  { %v3285_v18 = vadd.s32 %v3284_v59, %v3282_v31  ;;  %v3271_v39 = vadd.s32 %v3270_v2, %v3268_v30  ;;  %3462 = vmax.xlane.f32.xlu0 %v9040_v33  ;;  %v3409_v2 = vcvt.f32.s32 %v9009_v10  ;;  %v3424_v35 = vshll.u32 %v3423_v11, 16 }
0x10c8   :  { %v3309_v32 = vpop.xlane.xlu1 %3308  ;;  %v3295_v36 = vpop.xlane.xlu0 %3294 }
0x10c9   :  { %v3310_v26 = vcvt.f32.s32 %v3309_v32  ;;  %v3296_v41 = vcvt.f32.s32 %v3295_v36  ;;  %vm3431_vm5 = vcmp.eq.s32.totalorder %v6373_v38, %v3285_v18  ;;  %vm3430_vm6 = vcmp.eq.s32.totalorder %v6373_v38, %v3271_v39 }
0x10ca   :  { %v9048_v50 = vsel %vm3431_vm5, -inf, %v8744_v24  ;;  %v9051_v48 = vsel %vm3430_vm6, -inf, %v8747_v20  ;;  %v3410_v10 = vshll.u32 %v3409_v2, 16 }
0x10cb   :  { %v3313_v28 = vadd.s32 %v3312_v54, %v3310_v26  ;;  %v3299_v21 = vadd.s32 %v3298_v34, %v3296_v41  ;;  %3468 = vmax.xlane.f32.xlu1 %v9048_v50  ;;  %3466 = vmax.xlane.f32.xlu0 %v9051_v48 }
0x10cc   :  { %v3337_v51 = vpop.xlane.xlu1 %3336  ;;  %v3323_v15 = vpop.xlane.xlu0 %3322 }
0x10cd   :  { %v3338_v56 = vcvt.f32.s32 %v3337_v51  ;;  %v3324_v24 = vcvt.f32.s32 %v3323_v15  ;;  %vm3433_vm7 = vcmp.eq.s32.totalorder %v6373_v38, %v3313_v28  ;;  %vm3432_vm8 = vcmp.eq.s32.totalorder %v6373_v38, %v3299_v21 }
0x10ce   :  { %v9060_v20 = vsel %vm3433_vm7, -inf, %v8756_v47  ;;  %v9063_v8 = vsel %vm3432_vm8, -inf, %v8759_v25 }
0x10cf   :  { %v3341_v40 = vadd.s32 %v3340_v9, %v3338_v56  ;;  %v3327_v57 = vadd.s32 %v3326_v60, %v3324_v24  ;;  %3472 = vmax.xlane.f32.xlu1 %v9060_v20  ;;  %3470 = vmax.xlane.f32.xlu0 %v9063_v8 }
0x10d0   :  { %v3365_v4 = vpop.xlane.xlu1 %3364  ;;  %v3351_v45 = vpop.xlane.xlu0 %3350 }
0x10d1   :  { %v3366_v59 = vcvt.f32.s32 %v3365_v4  ;;  %v3352_v47 = vcvt.f32.s32 %v3351_v45  ;;  %vm3435_vm9 = vcmp.eq.s32.totalorder %v6373_v38, %v3341_v40  ;;  %vm3434_vm10 = vcmp.eq.s32.totalorder %v6373_v38, %v3327_v57 }
0x10d2   :  { %v9072_v25 = vsel %vm3435_vm9, -inf, %v8768_v27  ;;  %v9075_v0 = vsel %vm3434_vm10, -inf, %v8771_v22 }
0x10d3   :  { %v3369_v42 = vadd.s32 %v3368_v37, %v3366_v59  ;;  %v3355_v12 = vadd.s32 %v3354_v23, %v3352_v47  ;;  %3476 = vmax.xlane.f32.xlu1 %v9072_v25  ;;  %3474 = vmax.xlane.f32.xlu0 %v9075_v0 }
0x10d4   :  { %v3393_v31 = vpop.xlane.xlu1 %3392  ;;  %v3379_v30 = vpop.xlane.xlu0 %3378 }
0x10d5   :  { %v3394_v18 = vcvt.f32.s32 %v3393_v31  ;;  %v3380_v27 = vcvt.f32.s32 %v3379_v30  ;;  %vm3437_vm11 = vcmp.eq.s32.totalorder %v6373_v38, %v3369_v42  ;;  %vm3436_vm12 = vcmp.eq.s32.totalorder %v6373_v38, %v3355_v12 }
0x10d6   :  { %v9084_v22 = vsel %vm3437_vm11, -inf, %v8780_v58  ;;  %v9087_v39 = vsel %vm3436_vm12, -inf, %v8783_v49 }
0x10d7   :  { %v3397_v54 = vadd.s32 %v3396_v53, %v3394_v18  ;;  %v3383_v34 = vadd.s32 %v3382_v29, %v3380_v27  ;;  %3480 = vmax.xlane.f32.xlu1 %v9084_v22  ;;  %3478 = vmax.xlane.f32.xlu0 %v9087_v39 }
0x10d8   :  { %v3421_v13 = vpop.xlane.xlu1 %3420  ;;  %v3407_v1 = vpop.xlane.xlu0 %3406 }
0x10d9   :  { %v3422_v32 = vcvt.f32.s32 %v3421_v13  ;;  %v3408_v36 = vcvt.f32.s32 %v3407_v1  ;;  %vm3439_vm13 = vcmp.eq.s32.totalorder %v6373_v38, %v3397_v54  ;;  %vm3438_vm14 = vcmp.eq.s32.totalorder %v6373_v38, %v3383_v34 }
0x10da   :  { %v9094_v58 = vsel %vm3439_vm13, -inf, %v8790_v3  ;;  %v9097_v49 = vsel %vm3438_vm14, -inf, %v8793_v43 }
0x10db   :  { %v3425_v26 = vadd.s32 %v3424_v35, %v3422_v32  ;;  %v3411_v41 = vadd.s32 %v3410_v10, %v3408_v36  ;;  %3484 = vmax.xlane.f32.xlu1 %v9094_v58  ;;  %3482 = vmax.xlane.f32.xlu0 %v9097_v49 }
0x10dd   :  { %vm3441_vm15 = vcmp.eq.s32.totalorder %v6373_v38, %v3425_v26  ;;  %vm3440_vm0 = vcmp.eq.s32.totalorder %v6373_v38, %v3411_v41 }
0x10de   :  { %v9104_v28 = vsel %vm3441_vm15, -inf, %v8800_v7  ;;  %v9107_v21 = vsel %vm3440_vm0, -inf, %v8803_v5 }
0x10df   :  { %3488 = vmax.xlane.f32.xlu1 %v9104_v28  ;;  %3486 = vmax.xlane.f32.xlu0 %v9107_v21 }
0x1148   :  { %v3461_v3 = vpop.xlane.xlu1 %3460 }
0x1149   :  { %vm3491_vm1 = vcmp.eq.f32.partialorder %v9021_v52, %v3461_v3 }
0x114a   :  { %v9113_v43 = vsel %vm3491_vm1, %v6373_v38, 128 }
0x114b   :  { %v3537_v9 = vshra.s32 %v9113_v43, 16 }
0x114c   :  { %v3465_v60 = vpop.xlane.xlu1 %3464  ;;  %v3459_v16 = vpop.xlane.xlu0 %3458 }
0x114d   :  { %vm3493_vm2 = vcmp.eq.f32.partialorder %v9029_v44, %v3465_v60  ;;  %vm3490_vm3 = vcmp.eq.f32.partialorder %v9032_v61, %v3459_v16  ;;  %v9118_v7 = vcvt.s32.f32 %v3537_v9 }
0x114e   :  { %v9121_v5 = vsel %vm3493_vm2, %v6373_v38, 128  ;;  %v9124_v19 = vsel %vm3490_vm3, %v6373_v38, 128 }
0x114f   :  { %v3565_v51 = vshra.s32 %v9121_v5, 16  ;;  %v3523_v15 = vshra.s32 %v9124_v19, 16  ;;  %3540 = vmin.xlane.f32.xlu1 %v9118_v7 }
0x1150   :  { %v3463_v56 = vpop.xlane.xlu0 %3462 }
0x1151   :  { %vm3492_vm4 = vcmp.eq.f32.partialorder %v9040_v33, %v3463_v56  ;;  %v9130_v24 = vcvt.s32.f32 %v3565_v51  ;;  %v9132_v40 = vcvt.s32.f32 %v3523_v15 }
0x1152   :  { %v9135_v57 = vsel %vm3492_vm4, %v6373_v38, 128 }
0x1153   :  { %v3551_v37 = vshra.s32 %v9135_v57, 16  ;;  %3568 = vmin.xlane.f32.xlu1 %v9130_v24  ;;  %3526 = vmin.xlane.f32.xlu0 %v9132_v40 }
0x1154   :  { %v3469_v23 = vpop.xlane.xlu1 %3468  ;;  %v3467_v46 = vpop.xlane.xlu0 %3466 }
0x1155   :  { %vm3495_vm5 = vcmp.eq.f32.partialorder %v9048_v50, %v3469_v23  ;;  %vm3494_vm6 = vcmp.eq.f32.partialorder %v9051_v48, %v3467_v46  ;;  %v9142_v17 = vcvt.s32.f32 %v3551_v37 }
0x1156   :  { %v9145_v4 = vsel %vm3495_vm5, %v6373_v38, 128  ;;  %v9148_v45 = vsel %vm3494_vm6, %v6373_v38, 128 }
0x1157   :  { %v3593_v59 = vshra.s32 %v9145_v4, 16  ;;  %v3579_v47 = vshra.s32 %v9148_v45, 16  ;;  %3554 = vmin.xlane.f32.xlu0 %v9142_v17 }
0x1158   :  { %v3473_v42 = vpop.xlane.xlu1 %3472  ;;  %v3471_v12 = vpop.xlane.xlu0 %3470 }
0x1159   :  { %vm3497_vm7 = vcmp.eq.f32.partialorder %v9060_v20, %v3473_v42  ;;  %vm3496_vm8 = vcmp.eq.f32.partialorder %v9063_v8, %v3471_v12  ;;  %v9155_v53 = vcvt.s32.f32 %v3593_v59  ;;  %v9157_v29 = vcvt.s32.f32 %v3579_v47 }
0x115a   :  { %v9160_v11 = vsel %vm3497_vm7, %v6373_v38, 128  ;;  %v9163_v2 = vsel %vm3496_vm8, %v6373_v38, 128 }
0x115b   :  { %v3621_v31 = vshra.s32 %v9160_v11, 16  ;;  %v3607_v30 = vshra.s32 %v9163_v2, 16  ;;  %3596 = vmin.xlane.f32.xlu1 %v9155_v53  ;;  %3582 = vmin.xlane.f32.xlu0 %v9157_v29 }
0x115c   :  { %v3477_v18 = vpop.xlane.xlu1 %3476  ;;  %v3475_v27 = vpop.xlane.xlu0 %3474 }
0x115d   :  { %vm3499_vm9 = vcmp.eq.f32.partialorder %v9072_v25, %v3477_v18  ;;  %vm3498_vm10 = vcmp.eq.f32.partialorder %v9075_v0, %v3475_v27  ;;  %v9171_v54 = vcvt.s32.f32 %v3621_v31  ;;  %v9173_v34 = vcvt.s32.f32 %v3607_v30 }
0x115e   :  { %v9176_v35 = vsel %vm3499_vm9, %v6373_v38, 128  ;;  %v9179_v10 = vsel %vm3498_vm10, %v6373_v38, 128 }
0x115f   :  { %v3649_v13 = vshra.s32 %v9176_v35, 16  ;;  %v3635_v1 = vshra.s32 %v9179_v10, 16  ;;  %3624 = vmin.xlane.f32.xlu1 %v9171_v54  ;;  %3610 = vmin.xlane.f32.xlu0 %v9173_v34 }
0x1160   :  { %v3481_v32 = vpop.xlane.xlu1 %3480  ;;  %v3479_v36 = vpop.xlane.xlu0 %3478 }
0x1161   :  { %vm3501_vm11 = vcmp.eq.f32.partialorder %v9084_v22, %v3481_v32  ;;  %vm3500_vm12 = vcmp.eq.f32.partialorder %v9087_v39, %v3479_v36  ;;  %v9187_v26 = vcvt.s32.f32 %v3649_v13  ;;  %v9189_v41 = vcvt.s32.f32 %v3635_v1 }
0x1162   :  { %v9192_v3 = vsel %vm3501_vm11, %v6373_v38, 128  ;;  %v9195_v9 = vsel %vm3500_vm12, %v6373_v38, 128 }
0x1163   :  { %v3677_v60 = vshra.s32 %v9192_v3, 16  ;;  %v3663_v16 = vshra.s32 %v9195_v9, 16  ;;  %3652 = vmin.xlane.f32.xlu1 %v9187_v26  ;;  %3638 = vmin.xlane.f32.xlu0 %v9189_v41 }
0x1164   :  { %v3485_v51 = vpop.xlane.xlu1 %3484  ;;  %v3483_v15 = vpop.xlane.xlu0 %3482 }
0x1165   :  { %vm3503_vm13 = vcmp.eq.f32.partialorder %v9094_v58, %v3485_v51  ;;  %vm3502_vm14 = vcmp.eq.f32.partialorder %v9097_v49, %v3483_v15  ;;  %v9203_v56 = vcvt.s32.f32 %v3677_v60  ;;  %v9205_v37 = vcvt.s32.f32 %v3663_v16 }
0x1166   :  { %v9208_v23 = vsel %vm3503_vm13, %v6373_v38, 128  ;;  %v9211_v46 = vsel %vm3502_vm14, %v6373_v38, 128  ;;  %v3536_v60 = vand.u32 65535, %v9113_v43  ;;  %v3564_v16 = vand.u32 65535, %v9121_v5 }
0x1167   :  { %v3705_v59 = vshra.s32 %v9208_v23, 16  ;;  %v3691_v47 = vshra.s32 %v9211_v46, 16  ;;  %3680 = vmin.xlane.f32.xlu1 %v9203_v56  ;;  %3666 = vmin.xlane.f32.xlu0 %v9205_v37  ;;  %v3522_v51 = vand.u32 65535, %v9124_v19 }
0x1168   :  { %v3489_v42 = vpop.xlane.xlu1 %3488  ;;  %v3487_v12 = vpop.xlane.xlu0 %3486 }
0x1169   :  { %vm3505_vm15 = vcmp.eq.f32.partialorder %v9104_v28, %v3489_v42  ;;  %vm3504_vm0 = vcmp.eq.f32.partialorder %v9107_v21, %v3487_v12  ;;  %v9219_v31 = vcvt.s32.f32 %v3705_v59  ;;  %v9221_v30 = vcvt.s32.f32 %v3691_v47 }
0x116a   :  { %v9224_v18 = vsel %vm3505_vm15, %v6373_v38, 128  ;;  %v9227_v27 = vsel %vm3504_vm0, %v6373_v38, 128  ;;  %v3538_v59 = vcvt.s32.f32 %v3536_v60  ;;  %v3550_v42 = vand.u32 65535, %v9135_v57 }
0x116b   :  { %v3733_v13 = vshra.s32 %v9224_v18, 16  ;;  %v3719_v1 = vshra.s32 %v9227_v27, 16  ;;  %3708 = vmin.xlane.f32.xlu1 %v9219_v31  ;;  %3694 = vmin.xlane.f32.xlu0 %v9221_v30  ;;  %v3524_v43 = vcvt.s32.f32 %v3522_v51  ;;  %v3578_v57 = vand.u32 65535, %v9148_v45 }
0x116d   :  { %v9233_v32 = vcvt.s32.f32 %v3733_v13  ;;  %v9235_v36 = vcvt.s32.f32 %v3719_v1  ;;  %v3566_v1 = vcvt.s32.f32 %v3564_v16 }
0x116f   :  { %3736 = vmin.xlane.f32.xlu1 %v9233_v32  ;;  %3722 = vmin.xlane.f32.xlu0 %v9235_v36 }
0x11d8   :  { %v9242_v15 = vpop.xlane.xlu1 %3540 }
0x11d9   :  { %vm3542_vm1 = vcmp.eq.f32.partialorder %v9118_v7, %v9242_v15  ;;  %v3592_v7 = vand.u32 65535, %v9145_v4  ;;  %v3580_v4 = vcvt.s32.f32 %v3578_v57 }
0x11da   :  { %v3543_v47 = vsel %vm3542_vm1, %v3538_v59, inf  ;;  %v3552_v59 = vcvt.s32.f32 %v3550_v42 }
0x11db   :  { %3544 = vmin.xlane.f32.xlu1 %v3543_v47 }
0x11dc   :  { %v9247_v12 = vpop.xlane.xlu1 %3568  ;;  %v9249_v13 = vpop.xlane.xlu0 %3526 }
0x11dd   :  { %vm3570_vm2 = vcmp.eq.f32.partialorder %v9130_v24, %v9247_v12  ;;  %vm3528_vm3 = vcmp.eq.f32.partialorder %v9132_v40, %v9249_v13  ;;  %v3620_v24 = vand.u32 65535, %v9160_v11  ;;  %v3606_v40 = vand.u32 65535, %v9163_v2 }
0x11de   :  { %v3571_v5 = vsel %vm3570_vm2, %v3566_v1, inf  ;;  %v3529_v19 = vsel %vm3528_vm3, %v3524_v43, inf  ;;  %v3594_v1 = vcvt.s32.f32 %v3592_v7  ;;  %v3648_v11 = vand.u32 65535, %v9176_v35 }
0x11df   :  { %3572 = vmin.xlane.f32.xlu1 %v3571_v5  ;;  %3530 = vmin.xlane.f32.xlu0 %v3529_v19  ;;  %v3634_v2 = vand.u32 65535, %v9179_v10  ;;  %v3622_v5 = vcvt.s32.f32 %v3620_v24  ;;  %v3608_v19 = vcvt.s32.f32 %v3606_v40  ;;  %v3676_v35 = vand.u32 65535, %v9192_v3 }
0x11e0   :  { %v9257_v60 = vpop.xlane.xlu0 %3554  ;;  %v3662_v10 = vand.u32 65535, %v9195_v9  ;;  %v3704_v3 = vand.u32 65535, %v9208_v23  ;;  %v3690_v9 = vand.u32 65535, %v9211_v46  ;;  %v3732_v23 = vand.u32 65535, %v9224_v18 }
0x11e1   :  { %vm3556_vm4 = vcmp.eq.f32.partialorder %v9142_v17, %v9257_v60  ;;  %v3718_v46 = vand.u32 65535, %v9227_v27 }
0x11e2   :  { %v3557_v16 = vsel %vm3556_vm4, %v3552_v59, inf  ;;  %v3650_v59 = vcvt.s32.f32 %v3648_v11  ;;  %v3706_v11 = vcvt.s32.f32 %v3704_v3  ;;  %v3734_v27 = vcvt.s32.f32 %v3732_v23 }
0x11e3   :  { %3558 = vmin.xlane.f32.xlu0 %v3557_v16  ;;  %v3636_v16 = vcvt.s32.f32 %v3634_v2  ;;  %v3692_v2 = vcvt.s32.f32 %v3690_v9 }
0x11e4   :  { %v9263_v51 = vpop.xlane.xlu1 %3596  ;;  %v9265_v47 = vpop.xlane.xlu0 %3582 }
0x11e5   :  { %vm3598_vm5 = vcmp.eq.f32.partialorder %v9155_v53, %v9263_v51  ;;  %vm3584_vm6 = vcmp.eq.f32.partialorder %v9157_v29, %v9265_v47 }
0x11e6   :  { %v3599_v45 = vsel %vm3598_vm5, %v3594_v1, inf  ;;  %v3585_v17 = vsel %vm3584_vm6, %v3580_v4, inf  ;;  %v3678_v1 = vcvt.s32.f32 %v3676_v35  ;;  %v3664_v4 = vcvt.s32.f32 %v3662_v10 }
0x11e7   :  { %3600 = vmin.xlane.f32.xlu1 %v3599_v45  ;;  %3586 = vmin.xlane.f32.xlu0 %v3585_v17 }
0x11e8   :  { %v9273_v42 = vpop.xlane.xlu1 %3624  ;;  %v9275_v43 = vpop.xlane.xlu0 %3610 }
0x11e9   :  { %vm3626_vm7 = vcmp.eq.f32.partialorder %v9171_v54, %v9273_v42  ;;  %vm3612_vm8 = vcmp.eq.f32.partialorder %v9173_v34, %v9275_v43 }
0x11ea   :  { %v3627_v53 = vsel %vm3626_vm7, %v3622_v5, inf  ;;  %v3613_v29 = vsel %vm3612_vm8, %v3608_v19, inf  ;;  %v3720_v19 = vcvt.s32.f32 %v3718_v46 }
0x11eb   :  { %3628 = vmin.xlane.f32.xlu1 %v3627_v53  ;;  %3614 = vmin.xlane.f32.xlu0 %v3613_v29  ;;  %v3575_v29 = vcvt.f32.s32 %v9247_v12 }
0x11ec   :  { %v9283_v7 = vpop.xlane.xlu1 %3652  ;;  %v9285_v57 = vpop.xlane.xlu0 %3638 }
0x11ed   :  { %vm3654_vm9 = vcmp.eq.f32.partialorder %v9187_v26, %v9283_v7  ;;  %vm3640_vm10 = vcmp.eq.f32.partialorder %v9189_v41, %v9285_v57 }
0x11ee   :  { %v3655_v54 = vsel %vm3654_vm9, %v3650_v59, inf  ;;  %v3641_v34 = vsel %vm3640_vm10, %v3636_v16, inf  ;;  %v3533_v59 = vcvt.f32.s32 %v9249_v13 }
0x11ef   :  { %3656 = vmin.xlane.f32.xlu1 %v3655_v54  ;;  %3642 = vmin.xlane.f32.xlu0 %v3641_v34  ;;  %v3576_v34 = vshll.u32 %v3575_v29, 16 }
0x11f0   :  { %v9293_v24 = vpop.xlane.xlu1 %3680  ;;  %v9295_v40 = vpop.xlane.xlu0 %3666 }
0x11f1   :  { %vm3682_vm11 = vcmp.eq.f32.partialorder %v9203_v56, %v9293_v24  ;;  %vm3668_vm12 = vcmp.eq.f32.partialorder %v9205_v37, %v9295_v40 }
0x11f2   :  { %v3683_v26 = vsel %vm3682_vm11, %v3678_v1, inf  ;;  %v3669_v41 = vsel %vm3668_vm12, %v3664_v4, inf }
0x11f3   :  { %3684 = vmin.xlane.f32.xlu1 %v3683_v26  ;;  %3670 = vmin.xlane.f32.xlu0 %v3669_v41  ;;  %v3603_v41 = vcvt.f32.s32 %v9263_v51 }
0x11f4   :  { %v9303_v45 = vpop.xlane.xlu1 %3708  ;;  %v9305_v17 = vpop.xlane.xlu0 %3694 }
0x11f5   :  { %vm3710_vm13 = vcmp.eq.f32.partialorder %v9219_v31, %v9303_v45  ;;  %vm3696_vm14 = vcmp.eq.f32.partialorder %v9221_v30, %v9305_v17  ;;  %v3547_v30 = vcvt.f32.s32 %v9242_v15  ;;  %v3604_v51 = vshll.u32 %v3603_v41, 16 }
0x11f6   :  { %v3711_v56 = vsel %vm3710_vm13, %v3706_v11, inf  ;;  %v3697_v37 = vsel %vm3696_vm14, %v3692_v2, inf }
0x11f7   :  { %3712 = vmin.xlane.f32.xlu1 %v3711_v56  ;;  %3698 = vmin.xlane.f32.xlu0 %v3697_v37  ;;  %v3548_v10 = vshll.u32 %v3547_v30, 16  ;;  %v3631_v56 = vcvt.f32.s32 %v9273_v42  ;;  %v3659_v42 = vcvt.f32.s32 %v9283_v7 }
0x11f8   :  { %v9311_v5 = vpop.xlane.xlu1 %3736  ;;  %v9313_v18 = vpop.xlane.xlu0 %3722 }
0x11f9   :  { %vm3738_vm15 = vcmp.eq.f32.partialorder %v9233_v32, %v9311_v5  ;;  %vm3724_vm0 = vcmp.eq.f32.partialorder %v9235_v36, %v9313_v18  ;;  %v3561_v32 = vcvt.f32.s32 %v9257_v60  ;;  %v3534_v36 = vshll.u32 %v3533_v59, 16 }
0x11fa   :  { %v3739_v31 = vsel %vm3738_vm15, %v3734_v27, inf  ;;  %v3725_v53 = vsel %vm3724_vm0, %v3720_v19, inf  ;;  %v3589_v60 = vcvt.f32.s32 %v9265_v47  ;;  %v3617_v47 = vcvt.f32.s32 %v9275_v43 }
0x11fb   :  { %3740 = vmin.xlane.f32.xlu1 %v3739_v31  ;;  %3726 = vmin.xlane.f32.xlu0 %v3725_v53  ;;  %v3562_v13 = vshll.u32 %v3561_v32, 16  ;;  %v3632_v29 = vshll.u32 %v3631_v56, 16  ;;  %v3645_v43 = vcvt.f32.s32 %v9285_v57  ;;  %v3660_v7 = vshll.u32 %v3659_v42, 16 }
0x11fc   :  { %v3590_v19 = vshll.u32 %v3589_v60, 16  ;;  %v3701_v60 = vcvt.f32.s32 %v9305_v17 }
0x11fd   :  { %v3646_v57 = vshll.u32 %v3645_v43, 16 }
0x11fe   :  { %v3702_v17 = vshll.u32 %v3701_v60, 16 }
0x1264   :  { %v3545_v35 = vpop.xlane.xlu1 %3544 }
0x1265   :  { %v3546_v16 = vcvt.f32.s32 %v3545_v35  ;;  %v3618_v35 = vshll.u32 %v3617_v47, 16 }
0x1267   :  { %v3549_v54 = vadd.s32 %v3548_v10, %v3546_v16 }
0x1268   :  { %v3573_v3 = vpop.xlane.xlu1 %3572  ;;  %v3531_v9 = vpop.xlane.xlu0 %3530 }
0x1269   :  { %v3574_v1 = vcvt.f32.s32 %v3573_v3  ;;  %v3532_v4 = vcvt.f32.s32 %v3531_v9  ;;  %vm3747_vm1 = vcmp.eq.s32.totalorder %v6373_v38, %v3549_v54  ;;  %v3687_v9 = vcvt.f32.s32 %v9293_v24 }
0x126a   :  { %v9325_v15 = vsel %vm3747_vm1, -inf, %v9021_v52 }
0x126b   :  { %v3577_v12 = vadd.s32 %v3576_v34, %v3574_v1  ;;  %v3535_v26 = vadd.s32 %v3534_v36, %v3532_v4  ;;  %3780 = vmax.xlane.f32.xlu1 %v9325_v15  ;;  %v3673_v36 = vcvt.f32.s32 %v9295_v40  ;;  %v3688_v24 = vshll.u32 %v3687_v9, 16 }
0x126c   :  { %v3559_v23 = vpop.xlane.xlu0 %3558 }
0x126d   :  { %v3560_v46 = vcvt.f32.s32 %v3559_v23  ;;  %vm3749_vm2 = vcmp.eq.s32.totalorder %v6373_v38, %v3577_v12  ;;  %vm3746_vm3 = vcmp.eq.s32.totalorder %v6373_v38, %v3535_v26  ;;  %v3674_v40 = vshll.u32 %v3673_v36, 16 }
0x126e   :  { %v9333_v11 = vsel %vm3749_vm2, -inf, %v9029_v44  ;;  %v9336_v52 = vsel %vm3746_vm3, -inf, %v9032_v61  ;;  %v3715_v23 = vcvt.f32.s32 %v9303_v45 }
0x126f   :  { %v3563_v2 = vadd.s32 %v3562_v13, %v3560_v46  ;;  %3784 = vmax.xlane.f32.xlu1 %v9333_v11  ;;  %3778 = vmax.xlane.f32.xlu0 %v9336_v52 }
0x1270   :  { %v3601_v37 = vpop.xlane.xlu1 %3600  ;;  %v3587_v27 = vpop.xlane.xlu0 %3586  ;;  %v3716_v45 = vshll.u32 %v3715_v23, 16 }
0x1271   :  { %v3602_v31 = vcvt.f32.s32 %v3601_v37  ;;  %v3588_v53 = vcvt.f32.s32 %v3587_v27  ;;  %vm3748_vm4 = vcmp.eq.s32.totalorder %v6373_v38, %v3563_v2  ;;  %v3743_v27 = vcvt.f32.s32 %v9311_v5 }
0x1272   :  { %v9344_v44 = vsel %vm3748_vm4, -inf, %v9040_v33 }
0x1273   :  { %v3605_v61 = vadd.s32 %v3604_v51, %v3602_v31  ;;  %v3591_v30 = vadd.s32 %v3590_v19, %v3588_v53  ;;  %3782 = vmax.xlane.f32.xlu0 %v9344_v44  ;;  %v3729_v19 = vcvt.f32.s32 %v9313_v18  ;;  %v3744_v5 = vshll.u32 %v3743_v27, 16 }
0x1274   :  { %v3629_v10 = vpop.xlane.xlu1 %3628  ;;  %v3615_v59 = vpop.xlane.xlu0 %3614 }
0x1275   :  { %v3630_v16 = vcvt.f32.s32 %v3629_v10  ;;  %v3616_v54 = vcvt.f32.s32 %v3615_v59  ;;  %vm3751_vm5 = vcmp.eq.s32.totalorder %v6373_v38, %v3605_v61  ;;  %vm3750_vm6 = vcmp.eq.s32.totalorder %v6373_v38, %v3591_v30 }
0x1276   :  { %v9352_v33 = vsel %vm3751_vm5, -inf, %v9048_v50  ;;  %v9355_v34 = vsel %vm3750_vm6, -inf, %v9051_v48  ;;  %v3730_v18 = vshll.u32 %v3729_v19, 16 }
0x1277   :  { %v3633_v32 = vadd.s32 %v3632_v29, %v3630_v16  ;;  %v3619_v3 = vadd.s32 %v3618_v35, %v3616_v54  ;;  %3788 = vmax.xlane.f32.xlu1 %v9352_v33  ;;  %3786 = vmax.xlane.f32.xlu0 %v9355_v34 }
0x1278   :  { %v3657_v1 = vpop.xlane.xlu1 %3656  ;;  %v3643_v4 = vpop.xlane.xlu0 %3642 }
0x1279   :  { %v3658_v12 = vcvt.f32.s32 %v3657_v1  ;;  %v3644_v50 = vcvt.f32.s32 %v3643_v4  ;;  %vm3753_vm7 = vcmp.eq.s32.totalorder %v6373_v38, %v3633_v32  ;;  %vm3752_vm8 = vcmp.eq.s32.totalorder %v6373_v38, %v3619_v3 }
0x127a   :  { %v9364_v48 = vsel %vm3753_vm7, -inf, %v9060_v20  ;;  %v9367_v26 = vsel %vm3752_vm8, -inf, %v9063_v8 }
0x127b   :  { %v3661_v13 = vadd.s32 %v3660_v7, %v3658_v12  ;;  %v3647_v41 = vadd.s32 %v3646_v57, %v3644_v50  ;;  %3792 = vmax.xlane.f32.xlu1 %v9364_v48  ;;  %3790 = vmax.xlane.f32.xlu0 %v9367_v26 }
0x127c   :  { %v3685_v46 = vpop.xlane.xlu1 %3684  ;;  %v3671_v2 = vpop.xlane.xlu0 %3670 }
0x127d   :  { %v3686_v51 = vcvt.f32.s32 %v3685_v46  ;;  %v3672_v20 = vcvt.f32.s32 %v3671_v2  ;;  %vm3755_vm9 = vcmp.eq.s32.totalorder %v6373_v38, %v3661_v13  ;;  %vm3754_vm10 = vcmp.eq.s32.totalorder %v6373_v38, %v3647_v41 }
0x127e   :  { %v9376_v8 = vsel %vm3755_vm9, -inf, %v9072_v25  ;;  %v9379_v56 = vsel %vm3754_vm10, -inf, %v9075_v0 }
0x127f   :  { %v3689_v47 = vadd.s32 %v3688_v24, %v3686_v51  ;;  %v3675_v37 = vadd.s32 %v3674_v40, %v3672_v20  ;;  %3796 = vmax.xlane.f32.xlu1 %v9376_v8  ;;  %3794 = vmax.xlane.f32.xlu0 %v9379_v56 }
0x1280   :  { %v3713_v31 = vpop.xlane.xlu1 %3712  ;;  %v3699_v53 = vpop.xlane.xlu0 %3698 }
0x1281   :  { %v3714_v61 = vcvt.f32.s32 %v3713_v31  ;;  %v3700_v25 = vcvt.f32.s32 %v3699_v53  ;;  %vm3757_vm11 = vcmp.eq.s32.totalorder %v6373_v38, %v3689_v47  ;;  %vm3756_vm12 = vcmp.eq.s32.totalorder %v6373_v38, %v3675_v37 }
0x1282   :  { %v9388_v0 = vsel %vm3757_vm11, -inf, %v9084_v22  ;;  %v9391_v30 = vsel %vm3756_vm12, -inf, %v9087_v39 }
0x1283   :  { %v3717_v29 = vadd.s32 %v3716_v45, %v3714_v61  ;;  %v3703_v35 = vadd.s32 %v3702_v17, %v3700_v25  ;;  %3800 = vmax.xlane.f32.xlu1 %v9388_v0  ;;  %3798 = vmax.xlane.f32.xlu0 %v9391_v30 }
0x1284   :  { %v3741_v42 = vpop.xlane.xlu1 %3740  ;;  %v3727_v43 = vpop.xlane.xlu0 %3726 }
0x1285   :  { %v3742_v10 = vcvt.f32.s32 %v3741_v42  ;;  %v3728_v59 = vcvt.f32.s32 %v3727_v43  ;;  %vm3759_vm13 = vcmp.eq.s32.totalorder %v6373_v38, %v3717_v29  ;;  %vm3758_vm14 = vcmp.eq.s32.totalorder %v6373_v38, %v3703_v35 }
0x1286   :  { %v9398_v22 = vsel %vm3759_vm13, -inf, %v9094_v58  ;;  %v9401_v39 = vsel %vm3758_vm14, -inf, %v9097_v49 }
0x1287   :  { %v3745_v16 = vadd.s32 %v3744_v5, %v3742_v10  ;;  %v3731_v54 = vadd.s32 %v3730_v18, %v3728_v59  ;;  %3804 = vmax.xlane.f32.xlu1 %v9398_v22  ;;  %3802 = vmax.xlane.f32.xlu0 %v9401_v39 }
0x1289   :  { %vm3761_vm15 = vcmp.eq.s32.totalorder %v6373_v38, %v3745_v16  ;;  %vm3760_vm0 = vcmp.eq.s32.totalorder %v6373_v38, %v3731_v54 }
0x128a   :  { %v9408_v32 = vsel %vm3761_vm15, -inf, %v9104_v28  ;;  %v9411_v3 = vsel %vm3760_vm0, -inf, %v9107_v21 }
0x128b   :  { %3808 = vmax.xlane.f32.xlu1 %v9408_v32  ;;  %3806 = vmax.xlane.f32.xlu0 %v9411_v3 }
0x12f4   :  { %v3781_v58 = vpop.xlane.xlu1 %3780 }
0x12f5   :  { %vm3811_vm1 = vcmp.eq.f32.partialorder %v9325_v15, %v3781_v58 }
0x12f6   :  { %v9417_v49 = vsel %vm3811_vm1, %v6373_v38, 128 }
0x12f7   :  { %v3857_v7 = vshra.s32 %v9417_v49, 16 }
0x12f8   :  { %v3785_v57 = vpop.xlane.xlu1 %3784  ;;  %v3779_v9 = vpop.xlane.xlu0 %3778 }
0x12f9   :  { %vm3813_vm2 = vcmp.eq.f32.partialorder %v9333_v11, %v3785_v57  ;;  %vm3810_vm3 = vcmp.eq.f32.partialorder %v9336_v52, %v3779_v9  ;;  %v9422_v28 = vcvt.s32.f32 %v3857_v7 }
0x12fa   :  { %v9425_v21 = vsel %vm3813_vm2, %v6373_v38, 128  ;;  %v9428_v36 = vsel %vm3810_vm3, %v6373_v38, 128 }
0x12fb   :  { %v3885_v1 = vshra.s32 %v9425_v21, 16  ;;  %v3843_v4 = vshra.s32 %v9428_v36, 16  ;;  %3860 = vmin.xlane.f32.xlu1 %v9422_v28 }
0x12fc   :  { %v3783_v12 = vpop.xlane.xlu0 %3782 }
0x12fd   :  { %vm3812_vm4 = vcmp.eq.f32.partialorder %v9344_v44, %v3783_v12  ;;  %v9434_v50 = vcvt.s32.f32 %v3885_v1  ;;  %v9436_v13 = vcvt.s32.f32 %v3843_v4 }
0x12fe   :  { %v9439_v41 = vsel %vm3812_vm4, %v6373_v38, 128 }
0x12ff   :  { %v3871_v24 = vshra.s32 %v9439_v41, 16  ;;  %3888 = vmin.xlane.f32.xlu1 %v9434_v50  ;;  %3846 = vmin.xlane.f32.xlu0 %v9436_v13 }
0x1300   :  { %v3789_v40 = vpop.xlane.xlu1 %3788  ;;  %v3787_v23 = vpop.xlane.xlu0 %3786 }
0x1301   :  { %vm3815_vm5 = vcmp.eq.f32.partialorder %v9352_v33, %v3789_v40  ;;  %vm3814_vm6 = vcmp.eq.f32.partialorder %v9355_v34, %v3787_v23  ;;  %v9446_v60 = vcvt.s32.f32 %v3871_v24 }
0x1302   :  { %v9449_v46 = vsel %vm3815_vm5, %v6373_v38, 128  ;;  %v9452_v2 = vsel %vm3814_vm6, %v6373_v38, 128 }
0x1303   :  { %v3913_v51 = vshra.s32 %v9449_v46, 16  ;;  %v3899_v20 = vshra.s32 %v9452_v2, 16  ;;  %3874 = vmin.xlane.f32.xlu0 %v9446_v60 }
0x1304   :  { %v3793_v47 = vpop.xlane.xlu1 %3792  ;;  %v3791_v37 = vpop.xlane.xlu0 %3790 }
0x1305   :  { %vm3817_vm7 = vcmp.eq.f32.partialorder %v9364_v48, %v3793_v47  ;;  %vm3816_vm8 = vcmp.eq.f32.partialorder %v9367_v26, %v3791_v37  ;;  %v9459_v45 = vcvt.s32.f32 %v3913_v51  ;;  %v9461_v17 = vcvt.s32.f32 %v3899_v20 }
0x1306   :  { %v9464_v27 = vsel %vm3817_vm7, %v6373_v38, 128  ;;  %v9467_v19 = vsel %vm3816_vm8, %v6373_v38, 128 }
0x1307   :  { %v3941_v31 = vshra.s32 %v9464_v27, 16  ;;  %v3927_v53 = vshra.s32 %v9467_v19, 16  ;;  %3916 = vmin.xlane.f32.xlu1 %v9459_v45  ;;  %3902 = vmin.xlane.f32.xlu0 %v9461_v17 }
0x1308   :  { %v3797_v61 = vpop.xlane.xlu1 %3796  ;;  %v3795_v25 = vpop.xlane.xlu0 %3794 }
0x1309   :  { %vm3819_vm9 = vcmp.eq.f32.partialorder %v9376_v8, %v3797_v61  ;;  %vm3818_vm10 = vcmp.eq.f32.partialorder %v9379_v56, %v3795_v25  ;;  %v9475_v29 = vcvt.s32.f32 %v3941_v31  ;;  %v9477_v35 = vcvt.s32.f32 %v3927_v53 }
0x130a   :  { %v9480_v5 = vsel %vm3819_vm9, %v6373_v38, 128  ;;  %v9483_v18 = vsel %vm3818_vm10, %v6373_v38, 128 }
0x130b   :  { %v3969_v42 = vshra.s32 %v9480_v5, 16  ;;  %v3955_v43 = vshra.s32 %v9483_v18, 16  ;;  %3944 = vmin.xlane.f32.xlu1 %v9475_v29  ;;  %3930 = vmin.xlane.f32.xlu0 %v9477_v35 }
0x130c   :  { %v3801_v10 = vpop.xlane.xlu1 %3800  ;;  %v3799_v59 = vpop.xlane.xlu0 %3798 }
0x130d   :  { %vm3821_vm11 = vcmp.eq.f32.partialorder %v9388_v0, %v3801_v10  ;;  %vm3820_vm12 = vcmp.eq.f32.partialorder %v9391_v30, %v3799_v59  ;;  %v9491_v16 = vcvt.s32.f32 %v3969_v42  ;;  %v9493_v54 = vcvt.s32.f32 %v3955_v43 }
0x130e   :  { %v9496_v58 = vsel %vm3821_vm11, %v6373_v38, 128  ;;  %v9499_v7 = vsel %vm3820_vm12, %v6373_v38, 128 }
0x130f   :  { %v3997_v57 = vshra.s32 %v9496_v58, 16  ;;  %v3983_v9 = vshra.s32 %v9499_v7, 16  ;;  %3972 = vmin.xlane.f32.xlu1 %v9491_v16  ;;  %3958 = vmin.xlane.f32.xlu0 %v9493_v54 }
0x1310   :  { %v3805_v1 = vpop.xlane.xlu1 %3804  ;;  %v3803_v4 = vpop.xlane.xlu0 %3802 }
0x1311   :  { %vm3823_vm13 = vcmp.eq.f32.partialorder %v9398_v22, %v3805_v1  ;;  %vm3822_vm14 = vcmp.eq.f32.partialorder %v9401_v39, %v3803_v4  ;;  %v9507_v12 = vcvt.s32.f32 %v3997_v57  ;;  %v9509_v24 = vcvt.s32.f32 %v3983_v9 }
0x1312   :  { %v9512_v40 = vsel %vm3823_vm13, %v6373_v38, 128  ;;  %v9515_v23 = vsel %vm3822_vm14, %v6373_v38, 128  ;;  %v3856_v57 = vand.u32 65535, %v9417_v49  ;;  %v3884_v9 = vand.u32 65535, %v9425_v21 }
0x1313   :  { %v4025_v51 = vshra.s32 %v9512_v40, 16  ;;  %v4011_v20 = vshra.s32 %v9515_v23, 16  ;;  %4000 = vmin.xlane.f32.xlu1 %v9507_v12  ;;  %3986 = vmin.xlane.f32.xlu0 %v9509_v24  ;;  %v3842_v1 = vand.u32 65535, %v9428_v36 }
0x1314   :  { %v3809_v47 = vpop.xlane.xlu1 %3808  ;;  %v3807_v37 = vpop.xlane.xlu0 %3806 }
0x1315   :  { %vm3825_vm15 = vcmp.eq.f32.partialorder %v9408_v32, %v3809_v47  ;;  %vm3824_vm0 = vcmp.eq.f32.partialorder %v9411_v3, %v3807_v37  ;;  %v9523_v31 = vcvt.s32.f32 %v4025_v51  ;;  %v9525_v53 = vcvt.s32.f32 %v4011_v20 }
0x1316   :  { %v9528_v61 = vsel %vm3825_vm15, %v6373_v38, 128  ;;  %v9531_v25 = vsel %vm3824_vm0, %v6373_v38, 128  ;;  %v3858_v51 = vcvt.s32.f32 %v3856_v57  ;;  %v3870_v47 = vand.u32 65535, %v9439_v41 }
0x1317   :  { %v4053_v42 = vshra.s32 %v9528_v61, 16  ;;  %v4039_v43 = vshra.s32 %v9531_v25, 16  ;;  %4028 = vmin.xlane.f32.xlu1 %v9523_v31  ;;  %4014 = vmin.xlane.f32.xlu0 %v9525_v53  ;;  %v3844_v49 = vcvt.s32.f32 %v3842_v1  ;;  %v3898_v41 = vand.u32 65535, %v9452_v2 }
0x1319   :  { %v9537_v10 = vcvt.s32.f32 %v4053_v42  ;;  %v9539_v59 = vcvt.s32.f32 %v4039_v43  ;;  %v3886_v43 = vcvt.s32.f32 %v3884_v9 }
0x131b   :  { %4056 = vmin.xlane.f32.xlu1 %v9537_v10  ;;  %4042 = vmin.xlane.f32.xlu0 %v9539_v59 }
0x1384   :  { %v9546_v4 = vpop.xlane.xlu1 %3860 }
0x1385   :  { %vm3862_vm1 = vcmp.eq.f32.partialorder %v9422_v28, %v9546_v4  ;;  %v3912_v28 = vand.u32 65535, %v9449_v46  ;;  %v3900_v46 = vcvt.s32.f32 %v3898_v41 }
0x1386   :  { %v3863_v20 = vsel %vm3862_vm1, %v3858_v51, inf  ;;  %v3872_v51 = vcvt.s32.f32 %v3870_v47 }
0x1387   :  { %3864 = vmin.xlane.f32.xlu1 %v3863_v20 }
0x1388   :  { %v9551_v37 = vpop.xlane.xlu1 %3888  ;;  %v9553_v42 = vpop.xlane.xlu0 %3846 }
0x1389   :  { %vm3890_vm2 = vcmp.eq.f32.partialorder %v9434_v50, %v9551_v37  ;;  %vm3848_vm3 = vcmp.eq.f32.partialorder %v9436_v13, %v9553_v42  ;;  %v3940_v50 = vand.u32 65535, %v9464_v27  ;;  %v3926_v13 = vand.u32 65535, %v9467_v19 }
0x138a   :  { %v3891_v21 = vsel %vm3890_vm2, %v3886_v43, inf  ;;  %v3849_v36 = vsel %vm3848_vm3, %v3844_v49, inf  ;;  %v3914_v43 = vcvt.s32.f32 %v3912_v28  ;;  %v3968_v27 = vand.u32 65535, %v9480_v5 }
0x138b   :  { %3892 = vmin.xlane.f32.xlu1 %v3891_v21  ;;  %3850 = vmin.xlane.f32.xlu0 %v3849_v36  ;;  %v3954_v19 = vand.u32 65535, %v9483_v18  ;;  %v3942_v21 = vcvt.s32.f32 %v3940_v50  ;;  %v3928_v36 = vcvt.s32.f32 %v3926_v13  ;;  %v3996_v5 = vand.u32 65535, %v9496_v58 }
0x138c   :  { %v9561_v57 = vpop.xlane.xlu0 %3874  ;;  %v3982_v18 = vand.u32 65535, %v9499_v7  ;;  %v4024_v58 = vand.u32 65535, %v9512_v40  ;;  %v4010_v7 = vand.u32 65535, %v9515_v23  ;;  %v4052_v40 = vand.u32 65535, %v9528_v61 }
0x138d   :  { %vm3876_vm4 = vcmp.eq.f32.partialorder %v9446_v60, %v9561_v57  ;;  %v4038_v23 = vand.u32 65535, %v9531_v25 }
0x138e   :  { %v3877_v9 = vsel %vm3876_vm4, %v3872_v51, inf  ;;  %v3970_v51 = vcvt.s32.f32 %v3968_v27  ;;  %v4026_v27 = vcvt.s32.f32 %v4024_v58  ;;  %v4054_v25 = vcvt.s32.f32 %v4052_v40 }
0x138f   :  { %3878 = vmin.xlane.f32.xlu0 %v3877_v9  ;;  %v3956_v9 = vcvt.s32.f32 %v3954_v19  ;;  %v4012_v19 = vcvt.s32.f32 %v4010_v7 }
0x1390   :  { %v9567_v1 = vpop.xlane.xlu1 %3916  ;;  %v9569_v20 = vpop.xlane.xlu0 %3902 }
0x1391   :  { %vm3918_vm5 = vcmp.eq.f32.partialorder %v9459_v45, %v9567_v1  ;;  %vm3904_vm6 = vcmp.eq.f32.partialorder %v9461_v17, %v9569_v20 }
0x1392   :  { %v3919_v2 = vsel %vm3918_vm5, %v3914_v43, inf  ;;  %v3905_v60 = vsel %vm3904_vm6, %v3900_v46, inf  ;;  %v3998_v43 = vcvt.s32.f32 %v3996_v5  ;;  %v3984_v46 = vcvt.s32.f32 %v3982_v18 }
0x1393   :  { %3920 = vmin.xlane.f32.xlu1 %v3919_v2  ;;  %3906 = vmin.xlane.f32.xlu0 %v3905_v60 }
0x1394   :  { %v9577_v47 = vpop.xlane.xlu1 %3944  ;;  %v9579_v49 = vpop.xlane.xlu0 %3930 }
0x1395   :  { %vm3946_vm7 = vcmp.eq.f32.partialorder %v9475_v29, %v9577_v47  ;;  %vm3932_vm8 = vcmp.eq.f32.partialorder %v9477_v35, %v9579_v49 }
0x1396   :  { %v3947_v45 = vsel %vm3946_vm7, %v3942_v21, inf  ;;  %v3933_v17 = vsel %vm3932_vm8, %v3928_v36, inf  ;;  %v4040_v36 = vcvt.s32.f32 %v4038_v23 }
0x1397   :  { %3948 = vmin.xlane.f32.xlu1 %v3947_v45  ;;  %3934 = vmin.xlane.f32.xlu0 %v3933_v17  ;;  %v3895_v17 = vcvt.f32.s32 %v9551_v37 }
0x1398   :  { %v9587_v28 = vpop.xlane.xlu1 %3972  ;;  %v9589_v41 = vpop.xlane.xlu0 %3958 }
0x1399   :  { %vm3974_vm9 = vcmp.eq.f32.partialorder %v9491_v16, %v9587_v28  ;;  %vm3960_vm10 = vcmp.eq.f32.partialorder %v9493_v54, %v9589_v41 }
0x139a   :  { %v3975_v29 = vsel %vm3974_vm9, %v3970_v51, inf  ;;  %v3961_v35 = vsel %vm3960_vm10, %v3956_v9, inf  ;;  %v3853_v51 = vcvt.f32.s32 %v9553_v42 }
0x139b   :  { %3976 = vmin.xlane.f32.xlu1 %v3975_v29  ;;  %3962 = vmin.xlane.f32.xlu0 %v3961_v35  ;;  %v3896_v35 = vshll.u32 %v3895_v17, 16 }
0x139c   :  { %v9597_v50 = vpop.xlane.xlu1 %4000  ;;  %v9599_v13 = vpop.xlane.xlu0 %3986 }
0x139d   :  { %vm4002_vm11 = vcmp.eq.f32.partialorder %v9507_v12, %v9597_v50  ;;  %vm3988_vm12 = vcmp.eq.f32.partialorder %v9509_v24, %v9599_v13 }
0x139e   :  { %v4003_v16 = vsel %vm4002_vm11, %v3998_v43, inf  ;;  %v3989_v54 = vsel %vm3988_vm12, %v3984_v46, inf }
0x139f   :  { %4004 = vmin.xlane.f32.xlu1 %v4003_v16  ;;  %3990 = vmin.xlane.f32.xlu0 %v3989_v54  ;;  %v3923_v54 = vcvt.f32.s32 %v9567_v1 }
0x13a0   :  { %v9607_v2 = vpop.xlane.xlu1 %4028  ;;  %v9609_v60 = vpop.xlane.xlu0 %4014 }
0x13a1   :  { %vm4030_vm13 = vcmp.eq.f32.partialorder %v9523_v31, %v9607_v2  ;;  %vm4016_vm14 = vcmp.eq.f32.partialorder %v9525_v53, %v9609_v60  ;;  %v3867_v53 = vcvt.f32.s32 %v9546_v4  ;;  %v3924_v1 = vshll.u32 %v3923_v54, 16 }
0x13a2   :  { %v4031_v12 = vsel %vm4030_vm13, %v4026_v27, inf  ;;  %v4017_v24 = vsel %vm4016_vm14, %v4012_v19, inf }
0x13a3   :  { %4032 = vmin.xlane.f32.xlu1 %v4031_v12  ;;  %4018 = vmin.xlane.f32.xlu0 %v4017_v24  ;;  %v3868_v18 = vshll.u32 %v3867_v53, 16  ;;  %v3951_v12 = vcvt.f32.s32 %v9577_v47  ;;  %v3979_v47 = vcvt.f32.s32 %v9587_v28 }
0x13a4   :  { %v9615_v21 = vpop.xlane.xlu1 %4056  ;;  %v9617_v61 = vpop.xlane.xlu0 %4042 }
0x13a5   :  { %vm4058_vm15 = vcmp.eq.f32.partialorder %v9537_v10, %v9615_v21  ;;  %vm4044_vm0 = vcmp.eq.f32.partialorder %v9539_v59, %v9617_v61  ;;  %v3881_v10 = vcvt.f32.s32 %v9561_v57  ;;  %v3854_v59 = vshll.u32 %v3853_v51, 16 }
0x13a6   :  { %v4059_v31 = vsel %vm4058_vm15, %v4054_v25, inf  ;;  %v4045_v45 = vsel %vm4044_vm0, %v4040_v36, inf  ;;  %v3909_v57 = vcvt.f32.s32 %v9569_v20  ;;  %v3937_v20 = vcvt.f32.s32 %v9579_v49 }
0x13a7   :  { %4060 = vmin.xlane.f32.xlu1 %v4059_v31  ;;  %4046 = vmin.xlane.f32.xlu0 %v4045_v45  ;;  %v3882_v42 = vshll.u32 %v3881_v10, 16  ;;  %v3952_v17 = vshll.u32 %v3951_v12, 16  ;;  %v3965_v49 = vcvt.f32.s32 %v9589_v41  ;;  %v3980_v28 = vshll.u32 %v3979_v47, 16 }
0x13a8   :  { %v3910_v36 = vshll.u32 %v3909_v57, 16  ;;  %v4021_v57 = vcvt.f32.s32 %v9609_v60 }
0x13a9   :  { %v3966_v41 = vshll.u32 %v3965_v49, 16 }
0x13aa   :  { %v4022_v60 = vshll.u32 %v4021_v57, 16 }
0x1410   :  { %v3865_v5 = vpop.xlane.xlu1 %3864 }
0x1411   :  { %v3866_v9 = vcvt.f32.s32 %v3865_v5  ;;  %v3938_v5 = vshll.u32 %v3937_v20, 16 }
0x1413   :  { %v3869_v29 = vadd.s32 %v3868_v18, %v3866_v9 }
0x1414   :  { %v3893_v58 = vpop.xlane.xlu1 %3892  ;;  %v3851_v7 = vpop.xlane.xlu0 %3850 }
0x1415   :  { %v3894_v43 = vcvt.f32.s32 %v3893_v58  ;;  %v3852_v46 = vcvt.f32.s32 %v3851_v7  ;;  %vm4067_vm1 = vcmp.eq.s32.totalorder %v6373_v38, %v3869_v29  ;;  %v4007_v7 = vcvt.f32.s32 %v9597_v50 }
0x1416   :  { %v9629_v4 = vsel %vm4067_vm1, -inf, %v9325_v15 }
0x1417   :  { %v3897_v37 = vadd.s32 %v3896_v35, %v3894_v43  ;;  %v3855_v16 = vadd.s32 %v3854_v59, %v3852_v46  ;;  %4100 = vmax.xlane.f32.xlu1 %v9629_v4  ;;  %v3993_v59 = vcvt.f32.s32 %v9599_v13  ;;  %v4008_v50 = vshll.u32 %v4007_v7, 16 }
0x1418   :  { %v3879_v40 = vpop.xlane.xlu0 %3878 }
0x1419   :  { %v3880_v23 = vcvt.f32.s32 %v3879_v40  ;;  %vm4069_vm2 = vcmp.eq.s32.totalorder %v6373_v38, %v3897_v37  ;;  %vm4066_vm3 = vcmp.eq.s32.totalorder %v6373_v38, %v3855_v16  ;;  %v3994_v13 = vshll.u32 %v3993_v59, 16 }
0x141a   :  { %v9637_v27 = vsel %vm4069_vm2, -inf, %v9333_v11  ;;  %v9640_v15 = vsel %vm4066_vm3, -inf, %v9336_v52  ;;  %v4035_v40 = vcvt.f32.s32 %v9607_v2 }
0x141b   :  { %v3883_v19 = vadd.s32 %v3882_v42, %v3880_v23  ;;  %4104 = vmax.xlane.f32.xlu1 %v9637_v27  ;;  %4098 = vmax.xlane.f32.xlu0 %v9640_v15 }
0x141c   :  { %v3921_v24 = vpop.xlane.xlu1 %3920  ;;  %v3907_v25 = vpop.xlane.xlu0 %3906  ;;  %v4036_v2 = vshll.u32 %v4035_v40, 16 }
0x141d   :  { %v3922_v31 = vcvt.f32.s32 %v3921_v24  ;;  %v3908_v45 = vcvt.f32.s32 %v3907_v25  ;;  %vm4068_vm4 = vcmp.eq.s32.totalorder %v6373_v38, %v3883_v19  ;;  %v4063_v25 = vcvt.f32.s32 %v9615_v21 }
0x141e   :  { %v9648_v11 = vsel %vm4068_vm4, -inf, %v9344_v44 }
0x141f   :  { %v3925_v52 = vadd.s32 %v3924_v1, %v3922_v31  ;;  %v3911_v53 = vadd.s32 %v3910_v36, %v3908_v45  ;;  %4102 = vmax.xlane.f32.xlu0 %v9648_v11  ;;  %v4049_v36 = vcvt.f32.s32 %v9617_v61  ;;  %v4064_v21 = vshll.u32 %v4063_v25, 16 }
0x1420   :  { %v3949_v18 = vpop.xlane.xlu1 %3948  ;;  %v3935_v51 = vpop.xlane.xlu0 %3934 }
0x1421   :  { %v3950_v9 = vcvt.f32.s32 %v3949_v18  ;;  %v3936_v29 = vcvt.f32.s32 %v3935_v51  ;;  %vm4071_vm5 = vcmp.eq.s32.totalorder %v6373_v38, %v3925_v52  ;;  %vm4070_vm6 = vcmp.eq.s32.totalorder %v6373_v38, %v3911_v53 }
0x1422   :  { %v9656_v44 = vsel %vm4071_vm5, -inf, %v9352_v33  ;;  %v9659_v35 = vsel %vm4070_vm6, -inf, %v9355_v34  ;;  %v4050_v61 = vshll.u32 %v4049_v36, 16 }
0x1423   :  { %v3953_v10 = vadd.s32 %v3952_v17, %v3950_v9  ;;  %v3939_v58 = vadd.s32 %v3938_v5, %v3936_v29  ;;  %4108 = vmax.xlane.f32.xlu1 %v9656_v44  ;;  %4106 = vmax.xlane.f32.xlu0 %v9659_v35 }
0x1424   :  { %v3977_v43 = vpop.xlane.xlu1 %3976  ;;  %v3963_v46 = vpop.xlane.xlu0 %3962 }
0x1425   :  { %v3978_v37 = vcvt.f32.s32 %v3977_v43  ;;  %v3964_v33 = vcvt.f32.s32 %v3963_v46  ;;  %vm4073_vm7 = vcmp.eq.s32.totalorder %v6373_v38, %v3953_v10  ;;  %vm4072_vm8 = vcmp.eq.s32.totalorder %v6373_v38, %v3939_v58 }
0x1426   :  { %v9668_v34 = vsel %vm4073_vm7, -inf, %v9364_v48  ;;  %v9671_v16 = vsel %vm4072_vm8, -inf, %v9367_v26 }
0x1427   :  { %v3981_v42 = vadd.s32 %v3980_v28, %v3978_v37  ;;  %v3967_v54 = vadd.s32 %v3966_v41, %v3964_v33  ;;  %4112 = vmax.xlane.f32.xlu1 %v9668_v34  ;;  %4110 = vmax.xlane.f32.xlu0 %v9671_v16 }
0x1428   :  { %v4005_v23 = vpop.xlane.xlu1 %4004  ;;  %v3991_v19 = vpop.xlane.xlu0 %3990 }
0x1429   :  { %v4006_v1 = vcvt.f32.s32 %v4005_v23  ;;  %v3992_v48 = vcvt.f32.s32 %v3991_v19  ;;  %vm4075_vm9 = vcmp.eq.s32.totalorder %v6373_v38, %v3981_v42  ;;  %vm4074_vm10 = vcmp.eq.s32.totalorder %v6373_v38, %v3967_v54 }
0x142a   :  { %v9680_v26 = vsel %vm4075_vm9, -inf, %v9376_v8  ;;  %v9683_v12 = vsel %vm4074_vm10, -inf, %v9379_v56 }
0x142b   :  { %v4009_v20 = vadd.s32 %v4008_v50, %v4006_v1  ;;  %v3995_v24 = vadd.s32 %v3994_v13, %v3992_v48  ;;  %4116 = vmax.xlane.f32.xlu1 %v9680_v26  ;;  %4114 = vmax.xlane.f32.xlu0 %v9683_v12 }
0x142c   :  { %v4033_v31 = vpop.xlane.xlu1 %4032  ;;  %v4019_v45 = vpop.xlane.xlu0 %4018 }
0x142d   :  { %v4034_v52 = vcvt.f32.s32 %v4033_v31  ;;  %v4020_v8 = vcvt.f32.s32 %v4019_v45  ;;  %vm4077_vm11 = vcmp.eq.s32.totalorder %v6373_v38, %v4009_v20  ;;  %vm4076_vm12 = vcmp.eq.s32.totalorder %v6373_v38, %v3995_v24 }
0x142e   :  { %v9692_v56 = vsel %vm4077_vm11, -inf, %v9388_v0  ;;  %v9695_v53 = vsel %vm4076_vm12, -inf, %v9391_v30 }
0x142f   :  { %v4037_v17 = vadd.s32 %v4036_v2, %v4034_v52  ;;  %v4023_v5 = vadd.s32 %v4022_v60, %v4020_v8  ;;  %4120 = vmax.xlane.f32.xlu1 %v9692_v56  ;;  %4118 = vmax.xlane.f32.xlu0 %v9695_v53 }
0x1430   :  { %v4061_v47 = vpop.xlane.xlu1 %4060  ;;  %v4047_v49 = vpop.xlane.xlu0 %4046 }
0x1431   :  { %v4062_v18 = vcvt.f32.s32 %v4061_v47  ;;  %v4048_v51 = vcvt.f32.s32 %v4047_v49  ;;  %vm4079_vm13 = vcmp.eq.s32.totalorder %v6373_v38, %v4037_v17  ;;  %vm4078_vm14 = vcmp.eq.s32.totalorder %v6373_v38, %v4023_v5 }
0x1432   :  { %v9702_v0 = vsel %vm4079_vm13, -inf, %v9398_v22  ;;  %v9705_v30 = vsel %vm4078_vm14, -inf, %v9401_v39 }
0x1433   :  { %v4065_v9 = vadd.s32 %v4064_v21, %v4062_v18  ;;  %v4051_v29 = vadd.s32 %v4050_v61, %v4048_v51  ;;  %4124 = vmax.xlane.f32.xlu1 %v9702_v0  ;;  %4122 = vmax.xlane.f32.xlu0 %v9705_v30 }
0x1435   :  { %vm4081_vm15 = vcmp.eq.s32.totalorder %v6373_v38, %v4065_v9  ;;  %vm4080_vm0 = vcmp.eq.s32.totalorder %v6373_v38, %v4051_v29 }
0x1436   :  { %v9712_v10 = vsel %vm4081_vm15, -inf, %v9408_v32  ;;  %v9715_v58 = vsel %vm4080_vm0, -inf, %v9411_v3 }
0x1437   :  { %4128 = vmax.xlane.f32.xlu1 %v9712_v10  ;;  %4126 = vmax.xlane.f32.xlu0 %v9715_v58 }
0x14a0   :  { %v4101_v22 = vpop.xlane.xlu1 %4100 }
0x14a1   :  { %vm4131_vm1 = vcmp.eq.f32.partialorder %v9629_v4, %v4101_v22 }
0x14a2   :  { %v9721_v39 = vsel %vm4131_vm1, %v6373_v38, 128 }
0x14a3   :  { %v4177_v28 = vshra.s32 %v9721_v39, 16 }
0x14a4   :  { %v4105_v41 = vpop.xlane.xlu1 %4104  ;;  %v4099_v7 = vpop.xlane.xlu0 %4098 }
0x14a5   :  { %vm4133_vm2 = vcmp.eq.f32.partialorder %v9637_v27, %v4105_v41  ;;  %vm4130_vm3 = vcmp.eq.f32.partialorder %v9640_v15, %v4099_v7  ;;  %v9726_v32 = vcvt.s32.f32 %v4177_v28 }
0x14a6   :  { %v9729_v3 = vsel %vm4133_vm2, %v6373_v38, 128  ;;  %v9732_v59 = vsel %vm4130_vm3, %v6373_v38, 128 }
0x14a7   :  { %v4205_v43 = vshra.s32 %v9729_v3, 16  ;;  %v4163_v46 = vshra.s32 %v9732_v59, 16  ;;  %4180 = vmin.xlane.f32.xlu1 %v9726_v32 }
0x14a8   :  { %v4103_v37 = vpop.xlane.xlu0 %4102 }
0x14a9   :  { %vm4132_vm4 = vcmp.eq.f32.partialorder %v9648_v11, %v4103_v37  ;;  %v9738_v33 = vcvt.s32.f32 %v4205_v43  ;;  %v9740_v42 = vcvt.s32.f32 %v4163_v46 }
0x14aa   :  { %v9743_v54 = vsel %vm4132_vm4, %v6373_v38, 128 }
0x14ab   :  { %v4191_v50 = vshra.s32 %v9743_v54, 16  ;;  %4208 = vmin.xlane.f32.xlu1 %v9738_v33  ;;  %4166 = vmin.xlane.f32.xlu0 %v9740_v42 }
0x14ac   :  { %v4109_v13 = vpop.xlane.xlu1 %4108  ;;  %v4107_v40 = vpop.xlane.xlu0 %4106 }
0x14ad   :  { %vm4135_vm5 = vcmp.eq.f32.partialorder %v9656_v44, %v4109_v13  ;;  %vm4134_vm6 = vcmp.eq.f32.partialorder %v9659_v35, %v4107_v40  ;;  %v9750_v57 = vcvt.s32.f32 %v4191_v50 }
0x14ae   :  { %v9753_v23 = vsel %vm4135_vm5, %v6373_v38, 128  ;;  %v9756_v19 = vsel %vm4134_vm6, %v6373_v38, 128 }
0x14af   :  { %v4233_v1 = vshra.s32 %v9753_v23, 16  ;;  %v4219_v48 = vshra.s32 %v9756_v19, 16  ;;  %4194 = vmin.xlane.f32.xlu0 %v9750_v57 }
0x14b0   :  { %v4113_v20 = vpop.xlane.xlu1 %4112  ;;  %v4111_v24 = vpop.xlane.xlu0 %4110 }
0x14b1   :  { %vm4137_vm7 = vcmp.eq.f32.partialorder %v9668_v34, %v4113_v20  ;;  %vm4136_vm8 = vcmp.eq.f32.partialorder %v9671_v16, %v4111_v24  ;;  %v9763_v2 = vcvt.s32.f32 %v4233_v1  ;;  %v9765_v60 = vcvt.s32.f32 %v4219_v48 }
0x14b2   :  { %v9768_v25 = vsel %vm4137_vm7, %v6373_v38, 128  ;;  %v9771_v36 = vsel %vm4136_vm8, %v6373_v38, 128 }
0x14b3   :  { %v4261_v31 = vshra.s32 %v9768_v25, 16  ;;  %v4247_v45 = vshra.s32 %v9771_v36, 16  ;;  %4236 = vmin.xlane.f32.xlu1 %v9763_v2  ;;  %4222 = vmin.xlane.f32.xlu0 %v9765_v60 }
0x14b4   :  { %v4117_v52 = vpop.xlane.xlu1 %4116  ;;  %v4115_v8 = vpop.xlane.xlu0 %4114 }
0x14b5   :  { %vm4139_vm9 = vcmp.eq.f32.partialorder %v9680_v26, %v4117_v52  ;;  %vm4138_vm10 = vcmp.eq.f32.partialorder %v9683_v12, %v4115_v8  ;;  %v9779_v17 = vcvt.s32.f32 %v4261_v31  ;;  %v9781_v5 = vcvt.s32.f32 %v4247_v45 }
0x14b6   :  { %v9784_v21 = vsel %vm4139_vm9, %v6373_v38, 128  ;;  %v9787_v61 = vsel %vm4138_vm10, %v6373_v38, 128 }
0x14b7   :  { %v4289_v47 = vshra.s32 %v9784_v21, 16  ;;  %v4275_v49 = vshra.s32 %v9787_v61, 16  ;;  %4264 = vmin.xlane.f32.xlu1 %v9779_v17  ;;  %4250 = vmin.xlane.f32.xlu0 %v9781_v5 }
0x14b8   :  { %v4121_v18 = vpop.xlane.xlu1 %4120  ;;  %v4119_v51 = vpop.xlane.xlu0 %4118 }
0x14b9   :  { %vm4141_vm11 = vcmp.eq.f32.partialorder %v9692_v56, %v4121_v18  ;;  %vm4140_vm12 = vcmp.eq.f32.partialorder %v9695_v53, %v4119_v51  ;;  %v9795_v9 = vcvt.s32.f32 %v4289_v47  ;;  %v9797_v29 = vcvt.s32.f32 %v4275_v49 }
0x14ba   :  { %v9800_v22 = vsel %vm4141_vm11, %v6373_v38, 128  ;;  %v9803_v28 = vsel %vm4140_vm12, %v6373_v38, 128 }
0x14bb   :  { %v4317_v41 = vshra.s32 %v9800_v22, 16  ;;  %v4303_v7 = vshra.s32 %v9803_v28, 16  ;;  %4292 = vmin.xlane.f32.xlu1 %v9795_v9  ;;  %4278 = vmin.xlane.f32.xlu0 %v9797_v29 }
0x14bc   :  { %v4125_v43 = vpop.xlane.xlu1 %4124  ;;  %v4123_v46 = vpop.xlane.xlu0 %4122 }
0x14bd   :  { %vm4143_vm13 = vcmp.eq.f32.partialorder %v9702_v0, %v4125_v43  ;;  %vm4142_vm14 = vcmp.eq.f32.partialorder %v9705_v30, %v4123_v46  ;;  %v9811_v37 = vcvt.s32.f32 %v4317_v41  ;;  %v9813_v50 = vcvt.s32.f32 %v4303_v7 }
0x14be   :  { %v9816_v13 = vsel %vm4143_vm13, %v6373_v38, 128  ;;  %v9819_v40 = vsel %vm4142_vm14, %v6373_v38, 128  ;;  %v4176_v41 = vand.u32 65535, %v9721_v39  ;;  %v4204_v7 = vand.u32 65535, %v9729_v3 }
0x14bf   :  { %v4345_v1 = vshra.s32 %v9816_v13, 16  ;;  %v4331_v48 = vshra.s32 %v9819_v40, 16  ;;  %4320 = vmin.xlane.f32.xlu1 %v9811_v37  ;;  %4306 = vmin.xlane.f32.xlu0 %v9813_v50  ;;  %v4162_v43 = vand.u32 65535, %v9732_v59 }
0x14c0   :  { %v4129_v20 = vpop.xlane.xlu1 %4128  ;;  %v4127_v24 = vpop.xlane.xlu0 %4126 }
0x14c1   :  { %vm4145_vm15 = vcmp.eq.f32.partialorder %v9712_v10, %v4129_v20  ;;  %vm4144_vm0 = vcmp.eq.f32.partialorder %v9715_v58, %v4127_v24  ;;  %v9827_v31 = vcvt.s32.f32 %v4345_v1  ;;  %v9829_v45 = vcvt.s32.f32 %v4331_v48 }
0x14c2   :  { %v9832_v52 = vsel %vm4145_vm15, %v6373_v38, 128  ;;  %v9835_v8 = vsel %vm4144_vm0, %v6373_v38, 128  ;;  %v4178_v1 = vcvt.s32.f32 %v4176_v41  ;;  %v4190_v20 = vand.u32 65535, %v9743_v54 }
0x14c3   :  { %v4373_v47 = vshra.s32 %v9832_v52, 16  ;;  %v4359_v49 = vshra.s32 %v9835_v8, 16  ;;  %4348 = vmin.xlane.f32.xlu1 %v9827_v31  ;;  %4334 = vmin.xlane.f32.xlu0 %v9829_v45  ;;  %v4164_v39 = vcvt.s32.f32 %v4162_v43  ;;  %v4218_v54 = vand.u32 65535, %v9756_v19 }
0x14c5   :  { %v9841_v18 = vcvt.s32.f32 %v4373_v47  ;;  %v9843_v51 = vcvt.s32.f32 %v4359_v49  ;;  %v4206_v49 = vcvt.s32.f32 %v4204_v7 }
0x14c7   :  { %4376 = vmin.xlane.f32.xlu1 %v9841_v18  ;;  %4362 = vmin.xlane.f32.xlu0 %v9843_v51 }
0x1530   :  { %v9850_v46 = vpop.xlane.xlu1 %4180 }
0x1531   :  { %vm4182_vm1 = vcmp.eq.f32.partialorder %v9726_v32, %v9850_v46  ;;  %v4232_v32 = vand.u32 65535, %v9753_v23  ;;  %v4220_v23 = vcvt.s32.f32 %v4218_v54 }
0x1532   :  { %v4183_v48 = vsel %vm4182_vm1, %v4178_v1, inf  ;;  %v4192_v1 = vcvt.s32.f32 %v4190_v20 }
0x1533   :  { %4184 = vmin.xlane.f32.xlu1 %v4183_v48 }
0x1534   :  { %v9855_v24 = vpop.xlane.xlu1 %4208  ;;  %v9857_v47 = vpop.xlane.xlu0 %4166 }
0x1535   :  { %vm4210_vm2 = vcmp.eq.f32.partialorder %v9738_v33, %v9855_v24  ;;  %vm4168_vm3 = vcmp.eq.f32.partialorder %v9740_v42, %v9857_v47  ;;  %v4260_v33 = vand.u32 65535, %v9768_v25  ;;  %v4246_v42 = vand.u32 65535, %v9771_v36 }
0x1536   :  { %v4211_v3 = vsel %vm4210_vm2, %v4206_v49, inf  ;;  %v4169_v59 = vsel %vm4168_vm3, %v4164_v39, inf  ;;  %v4234_v49 = vcvt.s32.f32 %v4232_v32  ;;  %v4288_v25 = vand.u32 65535, %v9784_v21 }
0x1537   :  { %4212 = vmin.xlane.f32.xlu1 %v4211_v3  ;;  %4170 = vmin.xlane.f32.xlu0 %v4169_v59  ;;  %v4274_v36 = vand.u32 65535, %v9787_v61  ;;  %v4262_v3 = vcvt.s32.f32 %v4260_v33  ;;  %v4248_v59 = vcvt.s32.f32 %v4246_v42  ;;  %v4316_v21 = vand.u32 65535, %v9800_v22 }
0x1538   :  { %v9865_v41 = vpop.xlane.xlu0 %4194  ;;  %v4302_v61 = vand.u32 65535, %v9803_v28  ;;  %v4344_v22 = vand.u32 65535, %v9816_v13  ;;  %v4330_v28 = vand.u32 65535, %v9819_v40  ;;  %v4372_v13 = vand.u32 65535, %v9832_v52 }
0x1539   :  { %vm4196_vm4 = vcmp.eq.f32.partialorder %v9750_v57, %v9865_v41  ;;  %v4358_v40 = vand.u32 65535, %v9835_v8 }
0x153a   :  { %v4197_v7 = vsel %vm4196_vm4, %v4192_v1, inf  ;;  %v4290_v1 = vcvt.s32.f32 %v4288_v25  ;;  %v4346_v25 = vcvt.s32.f32 %v4344_v22  ;;  %v4374_v8 = vcvt.s32.f32 %v4372_v13 }
0x153b   :  { %4198 = vmin.xlane.f32.xlu0 %v4197_v7  ;;  %v4276_v7 = vcvt.s32.f32 %v4274_v36  ;;  %v4332_v36 = vcvt.s32.f32 %v4330_v28 }
0x153c   :  { %v9871_v43 = vpop.xlane.xlu1 %4236  ;;  %v9873_v48 = vpop.xlane.xlu0 %4222 }
0x153d   :  { %vm4238_vm5 = vcmp.eq.f32.partialorder %v9763_v2, %v9871_v43  ;;  %vm4224_vm6 = vcmp.eq.f32.partialorder %v9765_v60, %v9873_v48 }
0x153e   :  { %v4239_v19 = vsel %vm4238_vm5, %v4234_v49, inf  ;;  %v4225_v57 = vsel %vm4224_vm6, %v4220_v23, inf  ;;  %v4318_v49 = vcvt.s32.f32 %v4316_v21  ;;  %v4304_v23 = vcvt.s32.f32 %v4302_v61 }
0x153f   :  { %4240 = vmin.xlane.f32.xlu1 %v4239_v19  ;;  %4226 = vmin.xlane.f32.xlu0 %v4225_v57 }
0x1540   :  { %v9881_v20 = vpop.xlane.xlu1 %4264  ;;  %v9883_v39 = vpop.xlane.xlu0 %4250 }
0x1541   :  { %vm4266_vm7 = vcmp.eq.f32.partialorder %v9779_v17, %v9881_v20  ;;  %vm4252_vm8 = vcmp.eq.f32.partialorder %v9781_v5, %v9883_v39 }
0x1542   :  { %v4267_v2 = vsel %vm4266_vm7, %v4262_v3, inf  ;;  %v4253_v60 = vsel %vm4252_vm8, %v4248_v59, inf  ;;  %v4360_v59 = vcvt.s32.f32 %v4358_v40 }
0x1543   :  { %4268 = vmin.xlane.f32.xlu1 %v4267_v2  ;;  %4254 = vmin.xlane.f32.xlu0 %v4253_v60  ;;  %v4215_v60 = vcvt.f32.s32 %v9855_v24 }
0x1544   :  { %v9891_v32 = vpop.xlane.xlu1 %4292  ;;  %v9893_v54 = vpop.xlane.xlu0 %4278 }
0x1545   :  { %vm4294_vm9 = vcmp.eq.f32.partialorder %v9795_v9, %v9891_v32  ;;  %vm4280_vm10 = vcmp.eq.f32.partialorder %v9797_v29, %v9893_v54 }
0x1546   :  { %v4295_v17 = vsel %vm4294_vm9, %v4290_v1, inf  ;;  %v4281_v5 = vsel %vm4280_vm10, %v4276_v7, inf  ;;  %v4173_v1 = vcvt.f32.s32 %v9857_v47 }
0x1547   :  { %4296 = vmin.xlane.f32.xlu1 %v4295_v17  ;;  %4282 = vmin.xlane.f32.xlu0 %v4281_v5  ;;  %v4216_v5 = vshll.u32 %v4215_v60, 16 }
0x1548   :  { %v9901_v33 = vpop.xlane.xlu1 %4320  ;;  %v9903_v42 = vpop.xlane.xlu0 %4306 }
0x1549   :  { %vm4322_vm11 = vcmp.eq.f32.partialorder %v9811_v37, %v9901_v33  ;;  %vm4308_vm12 = vcmp.eq.f32.partialorder %v9813_v50, %v9903_v42 }
0x154a   :  { %v4323_v9 = vsel %vm4322_vm11, %v4318_v49, inf  ;;  %v4309_v29 = vsel %vm4308_vm12, %v4304_v23, inf }
0x154b   :  { %4324 = vmin.xlane.f32.xlu1 %v4323_v9  ;;  %4310 = vmin.xlane.f32.xlu0 %v4309_v29  ;;  %v4243_v29 = vcvt.f32.s32 %v9871_v43 }
0x154c   :  { %v9911_v19 = vpop.xlane.xlu1 %4348  ;;  %v9913_v57 = vpop.xlane.xlu0 %4334 }
0x154d   :  { %vm4350_vm13 = vcmp.eq.f32.partialorder %v9827_v31, %v9911_v19  ;;  %vm4336_vm14 = vcmp.eq.f32.partialorder %v9829_v45, %v9913_v57  ;;  %v4187_v45 = vcvt.f32.s32 %v9850_v46  ;;  %v4244_v43 = vshll.u32 %v4243_v29, 16 }
0x154e   :  { %v4351_v37 = vsel %vm4350_vm13, %v4346_v25, inf  ;;  %v4337_v50 = vsel %vm4336_vm14, %v4332_v36, inf }
0x154f   :  { %4352 = vmin.xlane.f32.xlu1 %v4351_v37  ;;  %4338 = vmin.xlane.f32.xlu0 %v4337_v50  ;;  %v4188_v61 = vshll.u32 %v4187_v45, 16  ;;  %v4271_v37 = vcvt.f32.s32 %v9881_v20  ;;  %v4299_v20 = vcvt.f32.s32 %v9891_v32 }
0x1550   :  { %v9919_v3 = vpop.xlane.xlu1 %4376  ;;  %v9921_v52 = vpop.xlane.xlu0 %4362 }
0x1551   :  { %vm4378_vm15 = vcmp.eq.f32.partialorder %v9841_v18, %v9919_v3  ;;  %vm4364_vm0 = vcmp.eq.f32.partialorder %v9843_v51, %v9921_v52  ;;  %v4201_v18 = vcvt.f32.s32 %v9865_v41  ;;  %v4174_v51 = vshll.u32 %v4173_v1, 16 }
0x1552   :  { %v4379_v31 = vsel %vm4378_vm15, %v4374_v8, inf  ;;  %v4365_v2 = vsel %vm4364_vm0, %v4360_v59, inf  ;;  %v4229_v41 = vcvt.f32.s32 %v9873_v48  ;;  %v4257_v48 = vcvt.f32.s32 %v9883_v39 }
0x1553   :  { %4380 = vmin.xlane.f32.xlu1 %v4379_v31  ;;  %4366 = vmin.xlane.f32.xlu0 %v4365_v2  ;;  %v4202_v47 = vshll.u32 %v4201_v18, 16  ;;  %v4272_v60 = vshll.u32 %v4271_v37, 16  ;;  %v4285_v39 = vcvt.f32.s32 %v9893_v54  ;;  %v4300_v32 = vshll.u32 %v4299_v20, 16 }
0x1554   :  { %v4230_v59 = vshll.u32 %v4229_v41, 16  ;;  %v4341_v41 = vcvt.f32.s32 %v9913_v57 }
0x1555   :  { %v4286_v54 = vshll.u32 %v4285_v39, 16 }
0x1556   :  { %v4342_v57 = vshll.u32 %v4341_v41, 16 }
0x15bc   :  { %v4185_v21 = vpop.xlane.xlu1 %4184 }
0x15bd   :  { %v4186_v7 = vcvt.f32.s32 %v4185_v21  ;;  %v4258_v21 = vshll.u32 %v4257_v48, 16 }
0x15bf   :  { %v4189_v17 = vadd.s32 %v4188_v61, %v4186_v7 }
0x15c0   :  { %v4213_v22 = vpop.xlane.xlu1 %4212  ;;  %v4171_v28 = vpop.xlane.xlu0 %4170 }
0x15c1   :  { %v4214_v49 = vcvt.f32.s32 %v4213_v22  ;;  %v4172_v23 = vcvt.f32.s32 %v4171_v28  ;;  %vm4387_vm1 = vcmp.eq.s32.totalorder %v6373_v38, %v4189_v17  ;;  %v4327_v28 = vcvt.f32.s32 %v9901_v33 }
0x15c2   :  { %v9933_v46 = vsel %vm4387_vm1, -inf, %v9629_v4 }
0x15c3   :  { %v4217_v24 = vadd.s32 %v4216_v5, %v4214_v49  ;;  %v4175_v9 = vadd.s32 %v4174_v51, %v4172_v23  ;;  %4420 = vmax.xlane.f32.xlu1 %v9933_v46  ;;  %v4313_v51 = vcvt.f32.s32 %v9903_v42  ;;  %v4328_v33 = vshll.u32 %v4327_v28, 16 }
0x15c4   :  { %v4199_v13 = vpop.xlane.xlu0 %4198 }
0x15c5   :  { %v4200_v40 = vcvt.f32.s32 %v4199_v13  ;;  %vm4389_vm2 = vcmp.eq.s32.totalorder %v6373_v38, %v4217_v24  ;;  %vm4386_vm3 = vcmp.eq.s32.totalorder %v6373_v38, %v4175_v9  ;;  %v4314_v42 = vshll.u32 %v4313_v51, 16 }
0x15c6   :  { %v9941_v25 = vsel %vm4389_vm2, -inf, %v9637_v27  ;;  %v9944_v4 = vsel %vm4386_vm3, -inf, %v9640_v15  ;;  %v4355_v13 = vcvt.f32.s32 %v9911_v19 }
0x15c7   :  { %v4203_v36 = vadd.s32 %v4202_v47, %v4200_v40  ;;  %4424 = vmax.xlane.f32.xlu1 %v9941_v25  ;;  %4418 = vmax.xlane.f32.xlu0 %v9944_v4 }
0x15c8   :  { %v4241_v50 = vpop.xlane.xlu1 %4240  ;;  %v4227_v8 = vpop.xlane.xlu0 %4226  ;;  %v4356_v19 = vshll.u32 %v4355_v13, 16 }
0x15c9   :  { %v4242_v31 = vcvt.f32.s32 %v4241_v50  ;;  %v4228_v2 = vcvt.f32.s32 %v4227_v8  ;;  %vm4388_vm4 = vcmp.eq.s32.totalorder %v6373_v38, %v4203_v36  ;;  %v4383_v8 = vcvt.f32.s32 %v9919_v3 }
0x15ca   :  { %v9952_v27 = vsel %vm4388_vm4, -inf, %v9648_v11 }
0x15cb   :  { %v4245_v15 = vadd.s32 %v4244_v43, %v4242_v31  ;;  %v4231_v45 = vadd.s32 %v4230_v59, %v4228_v2  ;;  %4422 = vmax.xlane.f32.xlu0 %v9952_v27  ;;  %v4369_v59 = vcvt.f32.s32 %v9921_v52  ;;  %v4384_v3 = vshll.u32 %v4383_v8, 16 }
0x15cc   :  { %v4269_v61 = vpop.xlane.xlu1 %4268  ;;  %v4255_v1 = vpop.xlane.xlu0 %4254 }
0x15cd   :  { %v4270_v7 = vcvt.f32.s32 %v4269_v61  ;;  %v4256_v17 = vcvt.f32.s32 %v4255_v1  ;;  %vm4391_vm5 = vcmp.eq.s32.totalorder %v6373_v38, %v4245_v15  ;;  %vm4390_vm6 = vcmp.eq.s32.totalorder %v6373_v38, %v4231_v45 }
0x15ce   :  { %v9960_v11 = vsel %vm4391_vm5, -inf, %v9656_v44  ;;  %v9963_v5 = vsel %vm4390_vm6, -inf, %v9659_v35  ;;  %v4370_v52 = vshll.u32 %v4369_v59, 16 }
0x15cf   :  { %v4273_v18 = vadd.s32 %v4272_v60, %v4270_v7  ;;  %v4259_v22 = vadd.s32 %v4258_v21, %v4256_v17  ;;  %4428 = vmax.xlane.f32.xlu1 %v9960_v11  ;;  %4426 = vmax.xlane.f32.xlu0 %v9963_v5 }
0x15d0   :  { %v4297_v49 = vpop.xlane.xlu1 %4296  ;;  %v4283_v23 = vpop.xlane.xlu0 %4282 }
0x15d1   :  { %v4298_v24 = vcvt.f32.s32 %v4297_v49  ;;  %v4284_v44 = vcvt.f32.s32 %v4283_v23  ;;  %vm4393_vm7 = vcmp.eq.s32.totalorder %v6373_v38, %v4273_v18  ;;  %vm4392_vm8 = vcmp.eq.s32.totalorder %v6373_v38, %v4259_v22 }
0x15d2   :  { %v9972_v35 = vsel %vm4393_vm7, -inf, %v9668_v34  ;;  %v9975_v9 = vsel %vm4392_vm8, -inf, %v9671_v16 }
0x15d3   :  { %v4301_v47 = vadd.s32 %v4300_v32, %v4298_v24  ;;  %v4287_v29 = vadd.s32 %v4286_v54, %v4284_v44  ;;  %4432 = vmax.xlane.f32.xlu1 %v9972_v35  ;;  %4430 = vmax.xlane.f32.xlu0 %v9975_v9 }
0x15d4   :  { %v4325_v40 = vpop.xlane.xlu1 %4324  ;;  %v4311_v36 = vpop.xlane.xlu0 %4310 }
0x15d5   :  { %v4326_v43 = vcvt.f32.s32 %v4325_v40  ;;  %v4312_v34 = vcvt.f32.s32 %v4311_v36  ;;  %vm4395_vm9 = vcmp.eq.s32.totalorder %v6373_v38, %v4301_v47  ;;  %vm4394_vm10 = vcmp.eq.s32.totalorder %v6373_v38, %v4287_v29 }
0x15d6   :  { %v9984_v16 = vsel %vm4395_vm9, -inf, %v9680_v26  ;;  %v9987_v37 = vsel %vm4394_vm10, -inf, %v9683_v12 }
0x15d7   :  { %v4329_v48 = vadd.s32 %v4328_v33, %v4326_v43  ;;  %v4315_v50 = vadd.s32 %v4314_v42, %v4312_v34  ;;  %4436 = vmax.xlane.f32.xlu1 %v9984_v16  ;;  %4434 = vmax.xlane.f32.xlu0 %v9987_v37 }
0x15d8   :  { %v4353_v31 = vpop.xlane.xlu1 %4352  ;;  %v4339_v2 = vpop.xlane.xlu0 %4338 }
0x15d9   :  { %v4354_v15 = vcvt.f32.s32 %v4353_v31  ;;  %v4340_v26 = vcvt.f32.s32 %v4339_v2  ;;  %vm4397_vm11 = vcmp.eq.s32.totalorder %v6373_v38, %v4329_v48  ;;  %vm4396_vm12 = vcmp.eq.s32.totalorder %v6373_v38, %v4315_v50 }
0x15da   :  { %v9996_v12 = vsel %vm4397_vm11, -inf, %v9692_v56  ;;  %v9999_v45 = vsel %vm4396_vm12, -inf, %v9695_v53 }
0x15db   :  { %v4357_v60 = vadd.s32 %v4356_v19, %v4354_v15  ;;  %v4343_v21 = vadd.s32 %v4342_v57, %v4340_v26  ;;  %4440 = vmax.xlane.f32.xlu1 %v9996_v12  ;;  %4438 = vmax.xlane.f32.xlu0 %v9999_v45 }
0x15dc   :  { %v4381_v20 = vpop.xlane.xlu1 %4380  ;;  %v4367_v39 = vpop.xlane.xlu0 %4366 }
0x15dd   :  { %v4382_v61 = vcvt.f32.s32 %v4381_v20  ;;  %v4368_v1 = vcvt.f32.s32 %v4367_v39  ;;  %vm4399_vm13 = vcmp.eq.s32.totalorder %v6373_v38, %v4357_v60  ;;  %vm4398_vm14 = vcmp.eq.s32.totalorder %v6373_v38, %v4343_v21 }
0x15de   :  { %v10006_v56 = vsel %vm4399_vm13, -inf, %v9702_v0  ;;  %v10009_v53 = vsel %vm4398_vm14, -inf, %v9705_v30 }
0x15df   :  { %v4385_v7 = vadd.s32 %v4384_v3, %v4382_v61  ;;  %v4371_v17 = vadd.s32 %v4370_v52, %v4368_v1  ;;  %4444 = vmax.xlane.f32.xlu1 %v10006_v56  ;;  %4442 = vmax.xlane.f32.xlu0 %v10009_v53 }
0x15e1   :  { %vm4401_vm15 = vcmp.eq.s32.totalorder %v6373_v38, %v4385_v7  ;;  %vm4400_vm0 = vcmp.eq.s32.totalorder %v6373_v38, %v4371_v17 }
0x15e2   :  { %v10016_v18 = vsel %vm4401_vm15, -inf, %v9712_v10  ;;  %v10019_v22 = vsel %vm4400_vm0, -inf, %v9715_v58 }
0x15e3   :  { %4448 = vmax.xlane.f32.xlu1 %v10016_v18  ;;  %4446 = vmax.xlane.f32.xlu0 %v10019_v22 }
0x164c   :  { %v4421_v0 = vpop.xlane.xlu1 %4420 }
0x164d   :  { %vm4451_vm1 = vcmp.eq.f32.partialorder %v9933_v46, %v4421_v0 }
0x164e   :  { %v10025_v30 = vsel %vm4451_vm1, %v6373_v38, 128 }
0x164f   :  { %v4497_v32 = vshra.s32 %v10025_v30, 16 }
0x1650   :  { %v4425_v54 = vpop.xlane.xlu1 %4424  ;;  %v4419_v28 = vpop.xlane.xlu0 %4418 }
0x1651   :  { %vm4453_vm2 = vcmp.eq.f32.partialorder %v9941_v25, %v4425_v54  ;;  %vm4450_vm3 = vcmp.eq.f32.partialorder %v9944_v4, %v4419_v28  ;;  %v10030_v10 = vcvt.s32.f32 %v4497_v32 }
0x1652   :  { %v10033_v58 = vsel %vm4453_vm2, %v6373_v38, 128  ;;  %v10036_v51 = vsel %vm4450_vm3, %v6373_v38, 128 }
0x1653   :  { %v4525_v49 = vshra.s32 %v10033_v58, 16  ;;  %v4483_v23 = vshra.s32 %v10036_v51, 16  ;;  %4500 = vmin.xlane.f32.xlu1 %v10030_v10 }
0x1654   :  { %v4423_v24 = vpop.xlane.xlu0 %4422 }
0x1655   :  { %vm4452_vm4 = vcmp.eq.f32.partialorder %v9952_v27, %v4423_v24  ;;  %v10042_v44 = vcvt.s32.f32 %v4525_v49  ;;  %v10044_v47 = vcvt.s32.f32 %v4483_v23 }
0x1656   :  { %v10047_v29 = vsel %vm4452_vm4, %v6373_v38, 128 }
0x1657   :  { %v4511_v33 = vshra.s32 %v10047_v29, 16  ;;  %4528 = vmin.xlane.f32.xlu1 %v10042_v44  ;;  %4486 = vmin.xlane.f32.xlu0 %v10044_v47 }
0x1658   :  { %v4429_v42 = vpop.xlane.xlu1 %4428  ;;  %v4427_v13 = vpop.xlane.xlu0 %4426 }
0x1659   :  { %vm4455_vm5 = vcmp.eq.f32.partialorder %v9960_v11, %v4429_v42  ;;  %vm4454_vm6 = vcmp.eq.f32.partialorder %v9963_v5, %v4427_v13  ;;  %v10054_v41 = vcvt.s32.f32 %v4511_v33 }
0x165a   :  { %v10057_v40 = vsel %vm4455_vm5, %v6373_v38, 128  ;;  %v10060_v36 = vsel %vm4454_vm6, %v6373_v38, 128 }
0x165b   :  { %v4553_v43 = vshra.s32 %v10057_v40, 16  ;;  %v4539_v34 = vshra.s32 %v10060_v36, 16  ;;  %4514 = vmin.xlane.f32.xlu0 %v10054_v41 }
0x165c   :  { %v4433_v48 = vpop.xlane.xlu1 %4432  ;;  %v4431_v50 = vpop.xlane.xlu0 %4430 }
0x165d   :  { %vm4457_vm7 = vcmp.eq.f32.partialorder %v9972_v35, %v4433_v48  ;;  %vm4456_vm8 = vcmp.eq.f32.partialorder %v9975_v9, %v4431_v50  ;;  %v10067_v19 = vcvt.s32.f32 %v4553_v43  ;;  %v10069_v57 = vcvt.s32.f32 %v4539_v34 }
0x165e   :  { %v10072_v8 = vsel %vm4457_vm7, %v6373_v38, 128  ;;  %v10075_v59 = vsel %vm4456_vm8, %v6373_v38, 128 }
0x165f   :  { %v4581_v31 = vshra.s32 %v10072_v8, 16  ;;  %v4567_v2 = vshra.s32 %v10075_v59, 16  ;;  %4556 = vmin.xlane.f32.xlu1 %v10067_v19  ;;  %4542 = vmin.xlane.f32.xlu0 %v10069_v57 }
0x1660   :  { %v4437_v15 = vpop.xlane.xlu1 %4436  ;;  %v4435_v26 = vpop.xlane.xlu0 %4434 }
0x1661   :  { %vm4459_vm9 = vcmp.eq.f32.partialorder %v9984_v16, %v4437_v15  ;;  %vm4458_vm10 = vcmp.eq.f32.partialorder %v9987_v37, %v4435_v26  ;;  %v10083_v60 = vcvt.s32.f32 %v4581_v31  ;;  %v10085_v21 = vcvt.s32.f32 %v4567_v2 }
0x1662   :  { %v10088_v3 = vsel %vm4459_vm9, %v6373_v38, 128  ;;  %v10091_v52 = vsel %vm4458_vm10, %v6373_v38, 128 }
0x1663   :  { %v4609_v20 = vshra.s32 %v10088_v3, 16  ;;  %v4595_v39 = vshra.s32 %v10091_v52, 16  ;;  %4584 = vmin.xlane.f32.xlu1 %v10083_v60  ;;  %4570 = vmin.xlane.f32.xlu0 %v10085_v21 }
0x1664   :  { %v4441_v61 = vpop.xlane.xlu1 %4440  ;;  %v4439_v1 = vpop.xlane.xlu0 %4438 }
0x1665   :  { %vm4461_vm11 = vcmp.eq.f32.partialorder %v9996_v12, %v4441_v61  ;;  %vm4460_vm12 = vcmp.eq.f32.partialorder %v9999_v45, %v4439_v1  ;;  %v10099_v7 = vcvt.s32.f32 %v4609_v20  ;;  %v10101_v17 = vcvt.s32.f32 %v4595_v39 }
0x1666   :  { %v10104_v0 = vsel %vm4461_vm11, %v6373_v38, 128  ;;  %v10107_v32 = vsel %vm4460_vm12, %v6373_v38, 128 }
0x1667   :  { %v4637_v54 = vshra.s32 %v10104_v0, 16  ;;  %v4623_v28 = vshra.s32 %v10107_v32, 16  ;;  %4612 = vmin.xlane.f32.xlu1 %v10099_v7  ;;  %4598 = vmin.xlane.f32.xlu0 %v10101_v17 }
0x1668   :  { %v4445_v49 = vpop.xlane.xlu1 %4444  ;;  %v4443_v23 = vpop.xlane.xlu0 %4442 }
0x1669   :  { %vm4463_vm13 = vcmp.eq.f32.partialorder %v10006_v56, %v4445_v49  ;;  %vm4462_vm14 = vcmp.eq.f32.partialorder %v10009_v53, %v4443_v23  ;;  %v10115_v24 = vcvt.s32.f32 %v4637_v54  ;;  %v10117_v33 = vcvt.s32.f32 %v4623_v28 }
0x166a   :  { %v10120_v42 = vsel %vm4463_vm13, %v6373_v38, 128  ;;  %v10123_v13 = vsel %vm4462_vm14, %v6373_v38, 128  ;;  %v4496_v54 = vand.u32 65535, %v10025_v30  ;;  %v4524_v28 = vand.u32 65535, %v10033_v58 }
0x166b   :  { %v4665_v43 = vshra.s32 %v10120_v42, 16  ;;  %v4651_v34 = vshra.s32 %v10123_v13, 16  ;;  %4640 = vmin.xlane.f32.xlu1 %v10115_v24  ;;  %4626 = vmin.xlane.f32.xlu0 %v10117_v33  ;;  %v4482_v49 = vand.u32 65535, %v10036_v51 }
0x166c   :  { %v4449_v48 = vpop.xlane.xlu1 %4448  ;;  %v4447_v50 = vpop.xlane.xlu0 %4446 }
0x166d   :  { %vm4465_vm15 = vcmp.eq.f32.partialorder %v10016_v18, %v4449_v48  ;;  %vm4464_vm0 = vcmp.eq.f32.partialorder %v10019_v22, %v4447_v50  ;;  %v10131_v31 = vcvt.s32.f32 %v4665_v43  ;;  %v10133_v2 = vcvt.s32.f32 %v4651_v34 }
0x166e   :  { %v10136_v15 = vsel %vm4465_vm15, %v6373_v38, 128  ;;  %v10139_v26 = vsel %vm4464_vm0, %v6373_v38, 128  ;;  %v4498_v43 = vcvt.s32.f32 %v4496_v54  ;;  %v4510_v48 = vand.u32 65535, %v10047_v29 }
0x166f   :  { %v4693_v20 = vshra.s32 %v10136_v15, 16  ;;  %v4679_v39 = vshra.s32 %v10139_v26, 16  ;;  %4668 = vmin.xlane.f32.xlu1 %v10131_v31  ;;  %4654 = vmin.xlane.f32.xlu0 %v10133_v2  ;;  %v4484_v30 = vcvt.s32.f32 %v4482_v49  ;;  %v4538_v29 = vand.u32 65535, %v10060_v36 }
0x1671   :  { %v10145_v61 = vcvt.s32.f32 %v4693_v20  ;;  %v10147_v1 = vcvt.s32.f32 %v4679_v39  ;;  %v4526_v39 = vcvt.s32.f32 %v4524_v28 }
0x1673   :  { %4696 = vmin.xlane.f32.xlu1 %v10145_v61  ;;  %4682 = vmin.xlane.f32.xlu0 %v10147_v1 }
0x16dc   :  { %v10154_v23 = vpop.xlane.xlu1 %4500 }
0x16dd   :  { %vm4502_vm1 = vcmp.eq.f32.partialorder %v10030_v10, %v10154_v23  ;;  %v4552_v10 = vand.u32 65535, %v10057_v40  ;;  %v4540_v40 = vcvt.s32.f32 %v4538_v29 }
0x16de   :  { %v4503_v34 = vsel %vm4502_vm1, %v4498_v43, inf  ;;  %v4512_v43 = vcvt.s32.f32 %v4510_v48 }
0x16df   :  { %4504 = vmin.xlane.f32.xlu1 %v4503_v34 }
0x16e0   :  { %v10159_v50 = vpop.xlane.xlu1 %4528  ;;  %v10161_v20 = vpop.xlane.xlu0 %4486 }
0x16e1   :  { %vm4530_vm2 = vcmp.eq.f32.partialorder %v10042_v44, %v10159_v50  ;;  %vm4488_vm3 = vcmp.eq.f32.partialorder %v10044_v47, %v10161_v20  ;;  %v4580_v44 = vand.u32 65535, %v10072_v8  ;;  %v4566_v47 = vand.u32 65535, %v10075_v59 }
0x16e2   :  { %v4531_v58 = vsel %vm4530_vm2, %v4526_v39, inf  ;;  %v4489_v51 = vsel %vm4488_vm3, %v4484_v30, inf  ;;  %v4554_v39 = vcvt.s32.f32 %v4552_v10  ;;  %v4608_v8 = vand.u32 65535, %v10088_v3 }
0x16e3   :  { %4532 = vmin.xlane.f32.xlu1 %v4531_v58  ;;  %4490 = vmin.xlane.f32.xlu0 %v4489_v51  ;;  %v4594_v59 = vand.u32 65535, %v10091_v52  ;;  %v4582_v58 = vcvt.s32.f32 %v4580_v44  ;;  %v4568_v51 = vcvt.s32.f32 %v4566_v47  ;;  %v4636_v3 = vand.u32 65535, %v10104_v0 }
0x16e4   :  { %v10169_v54 = vpop.xlane.xlu0 %4514  ;;  %v4622_v52 = vand.u32 65535, %v10107_v32  ;;  %v4664_v0 = vand.u32 65535, %v10120_v42  ;;  %v4650_v32 = vand.u32 65535, %v10123_v13  ;;  %v4692_v42 = vand.u32 65535, %v10136_v15 }
0x16e5   :  { %vm4516_vm4 = vcmp.eq.f32.partialorder %v10054_v41, %v10169_v54  ;;  %v4678_v13 = vand.u32 65535, %v10139_v26 }
0x16e6   :  { %v4517_v28 = vsel %vm4516_vm4, %v4512_v43, inf  ;;  %v4610_v43 = vcvt.s32.f32 %v4608_v8  ;;  %v4666_v8 = vcvt.s32.f32 %v4664_v0  ;;  %v4694_v26 = vcvt.s32.f32 %v4692_v42 }
0x16e7   :  { %4518 = vmin.xlane.f32.xlu0 %v4517_v28  ;;  %v4596_v28 = vcvt.s32.f32 %v4594_v59  ;;  %v4652_v59 = vcvt.s32.f32 %v4650_v32 }
0x16e8   :  { %v10175_v49 = vpop.xlane.xlu1 %4556  ;;  %v10177_v34 = vpop.xlane.xlu0 %4542 }
0x16e9   :  { %vm4558_vm5 = vcmp.eq.f32.partialorder %v10067_v19, %v10175_v49  ;;  %vm4544_vm6 = vcmp.eq.f32.partialorder %v10069_v57, %v10177_v34 }
0x16ea   :  { %v4559_v36 = vsel %vm4558_vm5, %v4554_v39, inf  ;;  %v4545_v41 = vsel %vm4544_vm6, %v4540_v40, inf  ;;  %v4638_v39 = vcvt.s32.f32 %v4636_v3  ;;  %v4624_v40 = vcvt.s32.f32 %v4622_v52 }
0x16eb   :  { %4560 = vmin.xlane.f32.xlu1 %v4559_v36  ;;  %4546 = vmin.xlane.f32.xlu0 %v4545_v41 }
0x16ec   :  { %v10185_v48 = vpop.xlane.xlu1 %4584  ;;  %v10187_v30 = vpop.xlane.xlu0 %4570 }
0x16ed   :  { %vm4586_vm7 = vcmp.eq.f32.partialorder %v10083_v60, %v10185_v48  ;;  %vm4572_vm8 = vcmp.eq.f32.partialorder %v10085_v21, %v10187_v30 }
0x16ee   :  { %v4587_v19 = vsel %vm4586_vm7, %v4582_v58, inf  ;;  %v4573_v57 = vsel %vm4572_vm8, %v4568_v51, inf  ;;  %v4680_v51 = vcvt.s32.f32 %v4678_v13 }
0x16ef   :  { %4588 = vmin.xlane.f32.xlu1 %v4587_v19  ;;  %4574 = vmin.xlane.f32.xlu0 %v4573_v57  ;;  %v4535_v57 = vcvt.f32.s32 %v10159_v50 }
0x16f0   :  { %v10195_v10 = vpop.xlane.xlu1 %4612  ;;  %v10197_v29 = vpop.xlane.xlu0 %4598 }
0x16f1   :  { %vm4614_vm9 = vcmp.eq.f32.partialorder %v10099_v7, %v10195_v10  ;;  %vm4600_vm10 = vcmp.eq.f32.partialorder %v10101_v17, %v10197_v29 }
0x16f2   :  { %v4615_v60 = vsel %vm4614_vm9, %v4610_v43, inf  ;;  %v4601_v21 = vsel %vm4600_vm10, %v4596_v28, inf  ;;  %v4493_v43 = vcvt.f32.s32 %v10161_v20 }
0x16f3   :  { %4616 = vmin.xlane.f32.xlu1 %v4615_v60  ;;  %4602 = vmin.xlane.f32.xlu0 %v4601_v21  ;;  %v4536_v21 = vshll.u32 %v4535_v57, 16 }
0x16f4   :  { %v10205_v44 = vpop.xlane.xlu1 %4640  ;;  %v10207_v47 = vpop.xlane.xlu0 %4626 }
0x16f5   :  { %vm4642_vm11 = vcmp.eq.f32.partialorder %v10115_v24, %v10205_v44  ;;  %vm4628_vm12 = vcmp.eq.f32.partialorder %v10117_v33, %v10207_v47 }
0x16f6   :  { %v4643_v7 = vsel %vm4642_vm11, %v4638_v39, inf  ;;  %v4629_v17 = vsel %vm4628_vm12, %v4624_v40, inf }
0x16f7   :  { %4644 = vmin.xlane.f32.xlu1 %v4643_v7  ;;  %4630 = vmin.xlane.f32.xlu0 %v4629_v17  ;;  %v4563_v17 = vcvt.f32.s32 %v10175_v49 }
0x16f8   :  { %v10215_v36 = vpop.xlane.xlu1 %4668  ;;  %v10217_v41 = vpop.xlane.xlu0 %4654 }
0x16f9   :  { %vm4670_vm13 = vcmp.eq.f32.partialorder %v10131_v31, %v10215_v36  ;;  %vm4656_vm14 = vcmp.eq.f32.partialorder %v10133_v2, %v10217_v41  ;;  %v4507_v2 = vcvt.f32.s32 %v10154_v23  ;;  %v4564_v49 = vshll.u32 %v4563_v17, 16 }
0x16fa   :  { %v4671_v24 = vsel %vm4670_vm13, %v4666_v8, inf  ;;  %v4657_v33 = vsel %vm4656_vm14, %v4652_v59, inf }
0x16fb   :  { %4672 = vmin.xlane.f32.xlu1 %v4671_v24  ;;  %4658 = vmin.xlane.f32.xlu0 %v4657_v33  ;;  %v4508_v52 = vshll.u32 %v4507_v2, 16  ;;  %v4591_v24 = vcvt.f32.s32 %v10185_v48  ;;  %v4619_v48 = vcvt.f32.s32 %v10195_v10 }
0x16fc   :  { %v10223_v58 = vpop.xlane.xlu1 %4696  ;;  %v10225_v15 = vpop.xlane.xlu0 %4682 }
0x16fd   :  { %vm4698_vm15 = vcmp.eq.f32.partialorder %v10145_v61, %v10223_v58  ;;  %vm4684_vm0 = vcmp.eq.f32.partialorder %v10147_v1, %v10225_v15  ;;  %v4521_v61 = vcvt.f32.s32 %v10169_v54  ;;  %v4494_v1 = vshll.u32 %v4493_v43, 16 }
0x16fe   :  { %v4699_v31 = vsel %vm4698_vm15, %v4694_v26, inf  ;;  %v4685_v19 = vsel %vm4684_vm0, %v4680_v51, inf  ;;  %v4549_v54 = vcvt.f32.s32 %v10177_v34  ;;  %v4577_v34 = vcvt.f32.s32 %v10187_v30 }
0x16ff   :  { %4700 = vmin.xlane.f32.xlu1 %v4699_v31  ;;  %4686 = vmin.xlane.f32.xlu0 %v4685_v19  ;;  %v4522_v20 = vshll.u32 %v4521_v61, 16  ;;  %v4592_v57 = vshll.u32 %v4591_v24, 16  ;;  %v4605_v30 = vcvt.f32.s32 %v10197_v29  ;;  %v4620_v10 = vshll.u32 %v4619_v48, 16 }
0x1700   :  { %v4550_v51 = vshll.u32 %v4549_v54, 16  ;;  %v4661_v54 = vcvt.f32.s32 %v10217_v41 }
0x1701   :  { %v4606_v29 = vshll.u32 %v4605_v30, 16 }
0x1702   :  { %v4662_v41 = vshll.u32 %v4661_v54, 16 }
0x1768   :  { %v4505_v3 = vpop.xlane.xlu1 %4504 }
0x1769   :  { %v4506_v28 = vcvt.f32.s32 %v4505_v3  ;;  %v4578_v3 = vshll.u32 %v4577_v34, 16 }
0x176b   :  { %v4509_v60 = vadd.s32 %v4508_v52, %v4506_v28 }
0x176c   :  { %v4533_v0 = vpop.xlane.xlu1 %4532  ;;  %v4491_v32 = vpop.xlane.xlu0 %4490 }
0x176d   :  { %v4534_v39 = vcvt.f32.s32 %v4533_v0  ;;  %v4492_v40 = vcvt.f32.s32 %v4491_v32  ;;  %vm4707_vm1 = vcmp.eq.s32.totalorder %v6373_v38, %v4509_v60  ;;  %v4647_v32 = vcvt.f32.s32 %v10205_v44 }
0x176e   :  { %v10237_v23 = vsel %vm4707_vm1, -inf, %v9933_v46 }
0x176f   :  { %v4537_v50 = vadd.s32 %v4536_v21, %v4534_v39  ;;  %v4495_v7 = vadd.s32 %v4494_v1, %v4492_v40  ;;  %4740 = vmax.xlane.f32.xlu1 %v10237_v23  ;;  %v4633_v1 = vcvt.f32.s32 %v10207_v47  ;;  %v4648_v44 = vshll.u32 %v4647_v32, 16 }
0x1770   :  { %v4519_v42 = vpop.xlane.xlu0 %4518 }
0x1771   :  { %v4520_v13 = vcvt.f32.s32 %v4519_v42  ;;  %vm4709_vm2 = vcmp.eq.s32.totalorder %v6373_v38, %v4537_v50  ;;  %vm4706_vm3 = vcmp.eq.s32.totalorder %v6373_v38, %v4495_v7  ;;  %v4634_v47 = vshll.u32 %v4633_v1, 16 }
0x1772   :  { %v10245_v8 = vsel %vm4709_vm2, -inf, %v9941_v25  ;;  %v10248_v46 = vsel %vm4706_vm3, -inf, %v9944_v4  ;;  %v4675_v42 = vcvt.f32.s32 %v10215_v36 }
0x1773   :  { %v4523_v59 = vadd.s32 %v4522_v20, %v4520_v13  ;;  %4744 = vmax.xlane.f32.xlu1 %v10245_v8  ;;  %4738 = vmax.xlane.f32.xlu0 %v10248_v46 }
0x1774   :  { %v4561_v33 = vpop.xlane.xlu1 %4560  ;;  %v4547_v26 = vpop.xlane.xlu0 %4546  ;;  %v4676_v36 = vshll.u32 %v4675_v42, 16 }
0x1775   :  { %v4562_v31 = vcvt.f32.s32 %v4561_v33  ;;  %v4548_v19 = vcvt.f32.s32 %v4547_v26  ;;  %vm4708_vm4 = vcmp.eq.s32.totalorder %v6373_v38, %v4523_v59  ;;  %v4703_v26 = vcvt.f32.s32 %v10223_v58 }
0x1776   :  { %v10256_v25 = vsel %vm4708_vm4, -inf, %v9952_v27 }
0x1777   :  { %v4565_v4 = vadd.s32 %v4564_v49, %v4562_v31  ;;  %v4551_v2 = vadd.s32 %v4550_v51, %v4548_v19  ;;  %4742 = vmax.xlane.f32.xlu0 %v10256_v25  ;;  %v4689_v51 = vcvt.f32.s32 %v10225_v15  ;;  %v4704_v58 = vshll.u32 %v4703_v26, 16 }
0x1778   :  { %v4589_v52 = vpop.xlane.xlu1 %4588  ;;  %v4575_v43 = vpop.xlane.xlu0 %4574 }
0x1779   :  { %v4590_v28 = vcvt.f32.s32 %v4589_v52  ;;  %v4576_v60 = vcvt.f32.s32 %v4575_v43  ;;  %vm4711_vm5 = vcmp.eq.s32.totalorder %v6373_v38, %v4565_v4  ;;  %vm4710_vm6 = vcmp.eq.s32.totalorder %v6373_v38, %v4551_v2 }
0x177a   :  { %v10264_v27 = vsel %vm4711_vm5, -inf, %v9960_v11  ;;  %v10267_v21 = vsel %vm4710_vm6, -inf, %v9963_v5  ;;  %v4690_v15 = vshll.u32 %v4689_v51, 16 }
0x177b   :  { %v4593_v61 = vadd.s32 %v4592_v57, %v4590_v28  ;;  %v4579_v0 = vadd.s32 %v4578_v3, %v4576_v60  ;;  %4748 = vmax.xlane.f32.xlu1 %v10264_v27  ;;  %4746 = vmax.xlane.f32.xlu0 %v10267_v21 }
0x177c   :  { %v4617_v39 = vpop.xlane.xlu1 %4616  ;;  %v4603_v40 = vpop.xlane.xlu0 %4602 }
0x177d   :  { %v4618_v50 = vcvt.f32.s32 %v4617_v39  ;;  %v4604_v11 = vcvt.f32.s32 %v4603_v40  ;;  %vm4713_vm7 = vcmp.eq.s32.totalorder %v6373_v38, %v4593_v61  ;;  %vm4712_vm8 = vcmp.eq.s32.totalorder %v6373_v38, %v4579_v0 }
0x177e   :  { %v10276_v5 = vsel %vm4713_vm7, -inf, %v9972_v35  ;;  %v10279_v7 = vsel %vm4712_vm8, -inf, %v9975_v9 }
0x177f   :  { %v4621_v20 = vadd.s32 %v4620_v10, %v4618_v50  ;;  %v4607_v17 = vadd.s32 %v4606_v29, %v4604_v11  ;;  %4752 = vmax.xlane.f32.xlu1 %v10276_v5  ;;  %4750 = vmax.xlane.f32.xlu0 %v10279_v7 }
0x1780   :  { %v4645_v13 = vpop.xlane.xlu1 %4644  ;;  %v4631_v59 = vpop.xlane.xlu0 %4630 }
0x1781   :  { %v4646_v49 = vcvt.f32.s32 %v4645_v13  ;;  %v4632_v35 = vcvt.f32.s32 %v4631_v59  ;;  %vm4715_vm9 = vcmp.eq.s32.totalorder %v6373_v38, %v4621_v20  ;;  %vm4714_vm10 = vcmp.eq.s32.totalorder %v6373_v38, %v4607_v17 }
0x1782   :  { %v10288_v9 = vsel %vm4715_vm9, -inf, %v9984_v16  ;;  %v10291_v24 = vsel %vm4714_vm10, -inf, %v9987_v37 }
0x1783   :  { %v4649_v34 = vadd.s32 %v4648_v44, %v4646_v49  ;;  %v4635_v33 = vadd.s32 %v4634_v47, %v4632_v35  ;;  %4756 = vmax.xlane.f32.xlu1 %v10288_v9  ;;  %4754 = vmax.xlane.f32.xlu0 %v10291_v24 }
0x1784   :  { %v4673_v31 = vpop.xlane.xlu1 %4672  ;;  %v4659_v19 = vpop.xlane.xlu0 %4658 }
0x1785   :  { %v4674_v4 = vcvt.f32.s32 %v4673_v31  ;;  %v4660_v16 = vcvt.f32.s32 %v4659_v19  ;;  %vm4717_vm11 = vcmp.eq.s32.totalorder %v6373_v38, %v4649_v34  ;;  %vm4716_vm12 = vcmp.eq.s32.totalorder %v6373_v38, %v4635_v33 }
0x1786   :  { %v10300_v37 = vsel %vm4717_vm11, -inf, %v9996_v12  ;;  %v10303_v2 = vsel %vm4716_vm12, -inf, %v9999_v45 }
0x1787   :  { %v4677_v57 = vadd.s32 %v4676_v36, %v4674_v4  ;;  %v4663_v3 = vadd.s32 %v4662_v41, %v4660_v16  ;;  %4760 = vmax.xlane.f32.xlu1 %v10300_v37  ;;  %4758 = vmax.xlane.f32.xlu0 %v10303_v2 }
0x1788   :  { %v4701_v48 = vpop.xlane.xlu1 %4700  ;;  %v4687_v30 = vpop.xlane.xlu0 %4686 }
0x1789   :  { %v4702_v52 = vcvt.f32.s32 %v4701_v48  ;;  %v4688_v43 = vcvt.f32.s32 %v4687_v30  ;;  %vm4719_vm13 = vcmp.eq.s32.totalorder %v6373_v38, %v4677_v57  ;;  %vm4718_vm14 = vcmp.eq.s32.totalorder %v6373_v38, %v4663_v3 }
0x178a   :  { %v10310_v12 = vsel %vm4719_vm13, -inf, %v10006_v56  ;;  %v10313_v45 = vsel %vm4718_vm14, -inf, %v10009_v53 }
0x178b   :  { %v4705_v28 = vadd.s32 %v4704_v58, %v4702_v52  ;;  %v4691_v60 = vadd.s32 %v4690_v15, %v4688_v43  ;;  %4764 = vmax.xlane.f32.xlu1 %v10310_v12  ;;  %4762 = vmax.xlane.f32.xlu0 %v10313_v45 }
0x178d   :  { %vm4721_vm15 = vcmp.eq.s32.totalorder %v6373_v38, %v4705_v28  ;;  %vm4720_vm0 = vcmp.eq.s32.totalorder %v6373_v38, %v4691_v60 }
0x178e   :  { %v10320_v61 = vsel %vm4721_vm15, -inf, %v10016_v18  ;;  %v10323_v0 = vsel %vm4720_vm0, -inf, %v10019_v22 }
0x178f   :  { %4768 = vmax.xlane.f32.xlu1 %v10320_v61  ;;  %4766 = vmax.xlane.f32.xlu0 %v10323_v0 }
0x17f8   :  { %v4741_v56 = vpop.xlane.xlu1 %4740 }
0x17f9   :  { %vm4771_vm1 = vcmp.eq.f32.partialorder %v10237_v23, %v4741_v56 }
0x17fa   :  { %v10329_v53 = vsel %vm4771_vm1, %v6373_v38, 128 }
0x17fb   :  { %v4817_v10 = vshra.s32 %v10329_v53, 16 }
0x17fc   :  { %v4745_v29 = vpop.xlane.xlu1 %4744  ;;  %v4739_v32 = vpop.xlane.xlu0 %4738 }
0x17fd   :  { %vm4773_vm2 = vcmp.eq.f32.partialorder %v10245_v8, %v4745_v29  ;;  %vm4770_vm3 = vcmp.eq.f32.partialorder %v10248_v46, %v4739_v32  ;;  %v10334_v18 = vcvt.s32.f32 %v4817_v10 }
0x17fe   :  { %v10337_v22 = vsel %vm4773_vm2, %v6373_v38, 128  ;;  %v10340_v1 = vsel %vm4770_vm3, %v6373_v38, 128 }
0x17ff   :  { %v4845_v39 = vshra.s32 %v10337_v22, 16  ;;  %v4803_v40 = vshra.s32 %v10340_v1, 16  ;;  %4820 = vmin.xlane.f32.xlu1 %v10334_v18 }
0x1800   :  { %v4743_v50 = vpop.xlane.xlu0 %4742 }
0x1801   :  { %vm4772_vm4 = vcmp.eq.f32.partialorder %v10256_v25, %v4743_v50  ;;  %v10346_v11 = vcvt.s32.f32 %v4845_v39  ;;  %v10348_v20 = vcvt.s32.f32 %v4803_v40 }
0x1802   :  { %v10351_v17 = vsel %vm4772_vm4, %v6373_v38, 128 }
0x1803   :  { %v4831_v44 = vshra.s32 %v10351_v17, 16  ;;  %4848 = vmin.xlane.f32.xlu1 %v10346_v11  ;;  %4806 = vmin.xlane.f32.xlu0 %v10348_v20 }
0x1804   :  { %v4749_v47 = vpop.xlane.xlu1 %4748  ;;  %v4747_v42 = vpop.xlane.xlu0 %4746 }
0x1805   :  { %vm4775_vm5 = vcmp.eq.f32.partialorder %v10264_v27, %v4749_v47  ;;  %vm4774_vm6 = vcmp.eq.f32.partialorder %v10267_v21, %v4747_v42  ;;  %v10358_v54 = vcvt.s32.f32 %v4831_v44 }
0x1806   :  { %v10361_v13 = vsel %vm4775_vm5, %v6373_v38, 128  ;;  %v10364_v59 = vsel %vm4774_vm6, %v6373_v38, 128 }
0x1807   :  { %v4873_v49 = vshra.s32 %v10361_v13, 16  ;;  %v4859_v35 = vshra.s32 %v10364_v59, 16  ;;  %4834 = vmin.xlane.f32.xlu0 %v10358_v54 }
0x1808   :  { %v4753_v34 = vpop.xlane.xlu1 %4752  ;;  %v4751_v33 = vpop.xlane.xlu0 %4750 }
0x1809   :  { %vm4777_vm7 = vcmp.eq.f32.partialorder %v10276_v5, %v4753_v34  ;;  %vm4776_vm8 = vcmp.eq.f32.partialorder %v10279_v7, %v4751_v33  ;;  %v10371_v36 = vcvt.s32.f32 %v4873_v49  ;;  %v10373_v41 = vcvt.s32.f32 %v4859_v35 }
0x180a   :  { %v10376_v26 = vsel %vm4777_vm7, %v6373_v38, 128  ;;  %v10379_v51 = vsel %vm4776_vm8, %v6373_v38, 128 }
0x180b   :  { %v4901_v31 = vshra.s32 %v10376_v26, 16  ;;  %v4887_v19 = vshra.s32 %v10379_v51, 16  ;;  %4876 = vmin.xlane.f32.xlu1 %v10371_v36  ;;  %4862 = vmin.xlane.f32.xlu0 %v10373_v41 }
0x180c   :  { %v4757_v4 = vpop.xlane.xlu1 %4756  ;;  %v4755_v16 = vpop.xlane.xlu0 %4754 }
0x180d   :  { %vm4779_vm9 = vcmp.eq.f32.partialorder %v10288_v9, %v4757_v4  ;;  %vm4778_vm10 = vcmp.eq.f32.partialorder %v10291_v24, %v4755_v16  ;;  %v10387_v57 = vcvt.s32.f32 %v4901_v31  ;;  %v10389_v3 = vcvt.s32.f32 %v4887_v19 }
0x180e   :  { %v10392_v58 = vsel %vm4779_vm9, %v6373_v38, 128  ;;  %v10395_v15 = vsel %vm4778_vm10, %v6373_v38, 128 }
0x180f   :  { %v4929_v48 = vshra.s32 %v10392_v58, 16  ;;  %v4915_v30 = vshra.s32 %v10395_v15, 16  ;;  %4904 = vmin.xlane.f32.xlu1 %v10387_v57  ;;  %4890 = vmin.xlane.f32.xlu0 %v10389_v3 }
0x1810   :  { %v4761_v52 = vpop.xlane.xlu1 %4760  ;;  %v4759_v43 = vpop.xlane.xlu0 %4758 }
0x1811   :  { %vm4781_vm11 = vcmp.eq.f32.partialorder %v10300_v37, %v4761_v52  ;;  %vm4780_vm12 = vcmp.eq.f32.partialorder %v10303_v2, %v4759_v43  ;;  %v10403_v28 = vcvt.s32.f32 %v4929_v48  ;;  %v10405_v60 = vcvt.s32.f32 %v4915_v30 }
0x1812   :  { %v10408_v56 = vsel %vm4781_vm11, %v6373_v38, 128  ;;  %v10411_v10 = vsel %vm4780_vm12, %v6373_v38, 128 }
0x1813   :  { %v4957_v29 = vshra.s32 %v10408_v56, 16  ;;  %v4943_v32 = vshra.s32 %v10411_v10, 16  ;;  %4932 = vmin.xlane.f32.xlu1 %v10403_v28  ;;  %4918 = vmin.xlane.f32.xlu0 %v10405_v60 }
0x1814   :  { %v4765_v39 = vpop.xlane.xlu1 %4764  ;;  %v4763_v40 = vpop.xlane.xlu0 %4762 }
0x1815   :  { %vm4783_vm13 = vcmp.eq.f32.partialorder %v10310_v12, %v4765_v39  ;;  %vm4782_vm14 = vcmp.eq.f32.partialorder %v10313_v45, %v4763_v40  ;;  %v10419_v50 = vcvt.s32.f32 %v4957_v29  ;;  %v10421_v44 = vcvt.s32.f32 %v4943_v32 }
0x1816   :  { %v10424_v47 = vsel %vm4783_vm13, %v6373_v38, 128  ;;  %v10427_v42 = vsel %vm4782_vm14, %v6373_v38, 128  ;;  %v4816_v29 = vand.u32 65535, %v10329_v53  ;;  %v4844_v32 = vand.u32 65535, %v10337_v22 }
0x1817   :  { %v4985_v49 = vshra.s32 %v10424_v47, 16  ;;  %v4971_v35 = vshra.s32 %v10427_v42, 16  ;;  %4960 = vmin.xlane.f32.xlu1 %v10419_v50  ;;  %4946 = vmin.xlane.f32.xlu0 %v10421_v44  ;;  %v4802_v39 = vand.u32 65535, %v10340_v1 }
0x1818   :  { %v4769_v34 = vpop.xlane.xlu1 %4768  ;;  %v4767_v33 = vpop.xlane.xlu0 %4766 }
0x1819   :  { %vm4785_vm15 = vcmp.eq.f32.partialorder %v10320_v61, %v4769_v34  ;;  %vm4784_vm0 = vcmp.eq.f32.partialorder %v10323_v0, %v4767_v33  ;;  %v10435_v31 = vcvt.s32.f32 %v4985_v49  ;;  %v10437_v19 = vcvt.s32.f32 %v4971_v35 }
0x181a   :  { %v10440_v4 = vsel %vm4785_vm15, %v6373_v38, 128  ;;  %v10443_v16 = vsel %vm4784_vm0, %v6373_v38, 128  ;;  %v4818_v49 = vcvt.s32.f32 %v4816_v29  ;;  %v4830_v34 = vand.u32 65535, %v10351_v17 }
0x181b   :  { %v5013_v48 = vshra.s32 %v10440_v4, 16  ;;  %v4999_v30 = vshra.s32 %v10443_v16, 16  ;;  %4988 = vmin.xlane.f32.xlu1 %v10435_v31  ;;  %4974 = vmin.xlane.f32.xlu0 %v10437_v19  ;;  %v4804_v53 = vcvt.s32.f32 %v4802_v39  ;;  %v4858_v17 = vand.u32 65535, %v10364_v59 }
0x181d   :  { %v10449_v52 = vcvt.s32.f32 %v5013_v48  ;;  %v10451_v43 = vcvt.s32.f32 %v4999_v30  ;;  %v4846_v30 = vcvt.s32.f32 %v4844_v32 }
0x181f   :  { %5016 = vmin.xlane.f32.xlu1 %v10449_v52  ;;  %5002 = vmin.xlane.f32.xlu0 %v10451_v43 }
0x1888   :  { %v10458_v40 = vpop.xlane.xlu1 %4820 }
0x1889   :  { %vm4822_vm1 = vcmp.eq.f32.partialorder %v10334_v18, %v10458_v40  ;;  %v4872_v18 = vand.u32 65535, %v10361_v13  ;;  %v4860_v13 = vcvt.s32.f32 %v4858_v17 }
0x188a   :  { %v4823_v35 = vsel %vm4822_vm1, %v4818_v49, inf  ;;  %v4832_v49 = vcvt.s32.f32 %v4830_v34 }
0x188b   :  { %4824 = vmin.xlane.f32.xlu1 %v4823_v35 }
0x188c   :  { %v10463_v33 = vpop.xlane.xlu1 %4848  ;;  %v10465_v48 = vpop.xlane.xlu0 %4806 }
0x188d   :  { %vm4850_vm2 = vcmp.eq.f32.partialorder %v10346_v11, %v10463_v33  ;;  %vm4808_vm3 = vcmp.eq.f32.partialorder %v10348_v20, %v10465_v48  ;;  %v4900_v11 = vand.u32 65535, %v10376_v26  ;;  %v4886_v20 = vand.u32 65535, %v10379_v51 }
0x188e   :  { %v4851_v22 = vsel %vm4850_vm2, %v4846_v30, inf  ;;  %v4809_v1 = vsel %vm4808_vm3, %v4804_v53, inf  ;;  %v4874_v30 = vcvt.s32.f32 %v4872_v18  ;;  %v4928_v26 = vand.u32 65535, %v10392_v58 }
0x188f   :  { %4852 = vmin.xlane.f32.xlu1 %v4851_v22  ;;  %4810 = vmin.xlane.f32.xlu0 %v4809_v1  ;;  %v4914_v51 = vand.u32 65535, %v10395_v15  ;;  %v4902_v22 = vcvt.s32.f32 %v4900_v11  ;;  %v4888_v1 = vcvt.s32.f32 %v4886_v20  ;;  %v4956_v58 = vand.u32 65535, %v10408_v56 }
0x1890   :  { %v10473_v29 = vpop.xlane.xlu0 %4834  ;;  %v4942_v15 = vand.u32 65535, %v10411_v10  ;;  %v4984_v56 = vand.u32 65535, %v10424_v47  ;;  %v4970_v10 = vand.u32 65535, %v10427_v42  ;;  %v5012_v47 = vand.u32 65535, %v10440_v4 }
0x1891   :  { %vm4836_vm4 = vcmp.eq.f32.partialorder %v10358_v54, %v10473_v29  ;;  %v4998_v42 = vand.u32 65535, %v10443_v16 }
0x1892   :  { %v4837_v32 = vsel %vm4836_vm4, %v4832_v49, inf  ;;  %v4930_v49 = vcvt.s32.f32 %v4928_v26  ;;  %v4986_v26 = vcvt.s32.f32 %v4984_v56  ;;  %v5014_v16 = vcvt.s32.f32 %v5012_v47 }
0x1893   :  { %4838 = vmin.xlane.f32.xlu0 %v4837_v32  ;;  %v4916_v32 = vcvt.s32.f32 %v4914_v51  ;;  %v4972_v51 = vcvt.s32.f32 %v4970_v10 }
0x1894   :  { %v10479_v39 = vpop.xlane.xlu1 %4876  ;;  %v10481_v35 = vpop.xlane.xlu0 %4862 }
0x1895   :  { %vm4878_vm5 = vcmp.eq.f32.partialorder %v10371_v36, %v10479_v39  ;;  %vm4864_vm6 = vcmp.eq.f32.partialorder %v10373_v41, %v10481_v35 }
0x1896   :  { %v4879_v59 = vsel %vm4878_vm5, %v4874_v30, inf  ;;  %v4865_v54 = vsel %vm4864_vm6, %v4860_v13, inf  ;;  %v4958_v30 = vcvt.s32.f32 %v4956_v58  ;;  %v4944_v13 = vcvt.s32.f32 %v4942_v15 }
0x1897   :  { %4880 = vmin.xlane.f32.xlu1 %v4879_v59  ;;  %4866 = vmin.xlane.f32.xlu0 %v4865_v54 }
0x1898   :  { %v10489_v34 = vpop.xlane.xlu1 %4904  ;;  %v10491_v53 = vpop.xlane.xlu0 %4890 }
0x1899   :  { %vm4906_vm7 = vcmp.eq.f32.partialorder %v10387_v57, %v10489_v34  ;;  %vm4892_vm8 = vcmp.eq.f32.partialorder %v10389_v3, %v10491_v53 }
0x189a   :  { %v4907_v36 = vsel %vm4906_vm7, %v4902_v22, inf  ;;  %v4893_v41 = vsel %vm4892_vm8, %v4888_v1, inf  ;;  %v5000_v1 = vcvt.s32.f32 %v4998_v42 }
0x189b   :  { %4908 = vmin.xlane.f32.xlu1 %v4907_v36  ;;  %4894 = vmin.xlane.f32.xlu0 %v4893_v41  ;;  %v4855_v41 = vcvt.f32.s32 %v10463_v33 }
0x189c   :  { %v10499_v18 = vpop.xlane.xlu1 %4932  ;;  %v10501_v17 = vpop.xlane.xlu0 %4918 }
0x189d   :  { %vm4934_vm9 = vcmp.eq.f32.partialorder %v10403_v28, %v10499_v18  ;;  %vm4920_vm10 = vcmp.eq.f32.partialorder %v10405_v60, %v10501_v17 }
0x189e   :  { %v4935_v57 = vsel %vm4934_vm9, %v4930_v49, inf  ;;  %v4921_v3 = vsel %vm4920_vm10, %v4916_v32, inf  ;;  %v4813_v49 = vcvt.f32.s32 %v10465_v48 }
0x189f   :  { %4936 = vmin.xlane.f32.xlu1 %v4935_v57  ;;  %4922 = vmin.xlane.f32.xlu0 %v4921_v3  ;;  %v4856_v3 = vshll.u32 %v4855_v41, 16 }
0x18a0   :  { %v10509_v11 = vpop.xlane.xlu1 %4960  ;;  %v10511_v20 = vpop.xlane.xlu0 %4946 }
0x18a1   :  { %vm4962_vm11 = vcmp.eq.f32.partialorder %v10419_v50, %v10509_v11  ;;  %vm4948_vm12 = vcmp.eq.f32.partialorder %v10421_v44, %v10511_v20 }
0x18a2   :  { %v4963_v28 = vsel %vm4962_vm11, %v4958_v30, inf  ;;  %v4949_v60 = vsel %vm4948_vm12, %v4944_v13, inf }
0x18a3   :  { %4964 = vmin.xlane.f32.xlu1 %v4963_v28  ;;  %4950 = vmin.xlane.f32.xlu0 %v4949_v60  ;;  %v4883_v60 = vcvt.f32.s32 %v10479_v39 }
0x18a4   :  { %v10519_v59 = vpop.xlane.xlu1 %4988  ;;  %v10521_v54 = vpop.xlane.xlu0 %4974 }
0x18a5   :  { %vm4990_vm13 = vcmp.eq.f32.partialorder %v10435_v31, %v10519_v59  ;;  %vm4976_vm14 = vcmp.eq.f32.partialorder %v10437_v19, %v10521_v54  ;;  %v4827_v19 = vcvt.f32.s32 %v10458_v40  ;;  %v4884_v39 = vshll.u32 %v4883_v60, 16 }
0x18a6   :  { %v4991_v50 = vsel %vm4990_vm13, %v4986_v26, inf  ;;  %v4977_v44 = vsel %vm4976_vm14, %v4972_v51, inf }
0x18a7   :  { %4992 = vmin.xlane.f32.xlu1 %v4991_v50  ;;  %4978 = vmin.xlane.f32.xlu0 %v4977_v44  ;;  %v4828_v15 = vshll.u32 %v4827_v19, 16  ;;  %v4911_v50 = vcvt.f32.s32 %v10489_v34  ;;  %v4939_v34 = vcvt.f32.s32 %v10499_v18 }
0x18a8   :  { %v10527_v22 = vpop.xlane.xlu1 %5016  ;;  %v10529_v4 = vpop.xlane.xlu0 %5002 }
0x18a9   :  { %vm5018_vm15 = vcmp.eq.f32.partialorder %v10449_v52, %v10527_v22  ;;  %vm5004_vm0 = vcmp.eq.f32.partialorder %v10451_v43, %v10529_v4  ;;  %v4841_v52 = vcvt.f32.s32 %v10473_v29  ;;  %v4814_v43 = vshll.u32 %v4813_v49, 16 }
0x18aa   :  { %v5019_v31 = vsel %vm5018_vm15, %v5014_v16, inf  ;;  %v5005_v36 = vsel %vm5004_vm0, %v5000_v1, inf  ;;  %v4869_v29 = vcvt.f32.s32 %v10481_v35  ;;  %v4897_v35 = vcvt.f32.s32 %v10491_v53 }
0x18ab   :  { %5020 = vmin.xlane.f32.xlu1 %v5019_v31  ;;  %5006 = vmin.xlane.f32.xlu0 %v5005_v36  ;;  %v4842_v48 = vshll.u32 %v4841_v52, 16  ;;  %v4912_v41 = vshll.u32 %v4911_v50, 16  ;;  %v4925_v53 = vcvt.f32.s32 %v10501_v17  ;;  %v4940_v18 = vshll.u32 %v4939_v34, 16 }
0x18ac   :  { %v4870_v1 = vshll.u32 %v4869_v29, 16  ;;  %v4981_v29 = vcvt.f32.s32 %v10521_v54 }
0x18ad   :  { %v4926_v17 = vshll.u32 %v4925_v53, 16 }
0x18ae   :  { %v4982_v54 = vshll.u32 %v4981_v29, 16 }
0x1914   :  { %v4825_v58 = vpop.xlane.xlu1 %4824 }
0x1915   :  { %v4826_v32 = vcvt.f32.s32 %v4825_v58  ;;  %v4898_v58 = vshll.u32 %v4897_v35, 16 }
0x1917   :  { %v4829_v57 = vadd.s32 %v4828_v15, %v4826_v32 }
0x1918   :  { %v4853_v56 = vpop.xlane.xlu1 %4852  ;;  %v4811_v10 = vpop.xlane.xlu0 %4810 }
0x1919   :  { %v4854_v30 = vcvt.f32.s32 %v4853_v56  ;;  %v4812_v13 = vcvt.f32.s32 %v4811_v10  ;;  %vm5027_vm1 = vcmp.eq.s32.totalorder %v6373_v38, %v4829_v57  ;;  %v4967_v10 = vcvt.f32.s32 %v10509_v11 }
0x191a   :  { %v10541_v40 = vsel %vm5027_vm1, -inf, %v10237_v23 }
0x191b   :  { %v4857_v33 = vadd.s32 %v4856_v3, %v4854_v30  ;;  %v4815_v28 = vadd.s32 %v4814_v43, %v4812_v13  ;;  %5060 = vmax.xlane.f32.xlu1 %v10541_v40  ;;  %v4953_v43 = vcvt.f32.s32 %v10511_v20  ;;  %v4968_v11 = vshll.u32 %v4967_v10, 16 }
0x191c   :  { %v4839_v47 = vpop.xlane.xlu0 %4838 }
0x191d   :  { %v4840_v42 = vcvt.f32.s32 %v4839_v47  ;;  %vm5029_vm2 = vcmp.eq.s32.totalorder %v6373_v38, %v4857_v33  ;;  %vm5026_vm3 = vcmp.eq.s32.totalorder %v6373_v38, %v4815_v28  ;;  %v4954_v20 = vshll.u32 %v4953_v43, 16 }
0x191e   :  { %v10549_v26 = vsel %vm5029_vm2, -inf, %v10245_v8  ;;  %v10552_v23 = vsel %vm5026_vm3, -inf, %v10248_v46  ;;  %v4995_v47 = vcvt.f32.s32 %v10519_v59 }
0x191f   :  { %v4843_v51 = vadd.s32 %v4842_v48, %v4840_v42  ;;  %5064 = vmax.xlane.f32.xlu1 %v10549_v26  ;;  %5058 = vmax.xlane.f32.xlu0 %v10552_v23 }
0x1920   :  { %v4881_v44 = vpop.xlane.xlu1 %4880  ;;  %v4867_v16 = vpop.xlane.xlu0 %4866  ;;  %v4996_v59 = vshll.u32 %v4995_v47, 16 }
0x1921   :  { %v4882_v31 = vcvt.f32.s32 %v4881_v44  ;;  %v4868_v36 = vcvt.f32.s32 %v4867_v16  ;;  %vm5028_vm4 = vcmp.eq.s32.totalorder %v6373_v38, %v4843_v51  ;;  %v5023_v16 = vcvt.f32.s32 %v10527_v22 }
0x1922   :  { %v10560_v8 = vsel %vm5028_vm4, -inf, %v10256_v25 }
0x1923   :  { %v4885_v46 = vadd.s32 %v4884_v39, %v4882_v31  ;;  %v4871_v19 = vadd.s32 %v4870_v1, %v4868_v36  ;;  %5062 = vmax.xlane.f32.xlu0 %v10560_v8  ;;  %v5009_v1 = vcvt.f32.s32 %v10529_v4  ;;  %v5024_v22 = vshll.u32 %v5023_v16, 16 }
0x1924   :  { %v4909_v15 = vpop.xlane.xlu1 %4908  ;;  %v4895_v49 = vpop.xlane.xlu0 %4894 }
0x1925   :  { %v4910_v32 = vcvt.f32.s32 %v4909_v15  ;;  %v4896_v57 = vcvt.f32.s32 %v4895_v49  ;;  %vm5031_vm5 = vcmp.eq.s32.totalorder %v6373_v38, %v4885_v46  ;;  %vm5030_vm6 = vcmp.eq.s32.totalorder %v6373_v38, %v4871_v19 }
0x1926   :  { %v10568_v25 = vsel %vm5031_vm5, -inf, %v10264_v27  ;;  %v10571_v3 = vsel %vm5030_vm6, -inf, %v10267_v21  ;;  %v5010_v4 = vshll.u32 %v5009_v1, 16 }
0x1927   :  { %v4913_v52 = vadd.s32 %v4912_v41, %v4910_v32  ;;  %v4899_v56 = vadd.s32 %v4898_v58, %v4896_v57  ;;  %5068 = vmax.xlane.f32.xlu1 %v10568_v25  ;;  %5066 = vmax.xlane.f32.xlu0 %v10571_v3 }
0x1928   :  { %v4937_v30 = vpop.xlane.xlu1 %4936  ;;  %v4923_v13 = vpop.xlane.xlu0 %4922 }
0x1929   :  { %v4938_v33 = vcvt.f32.s32 %v4937_v30  ;;  %v4924_v27 = vcvt.f32.s32 %v4923_v13  ;;  %vm5033_vm7 = vcmp.eq.s32.totalorder %v6373_v38, %v4913_v52  ;;  %vm5032_vm8 = vcmp.eq.s32.totalorder %v6373_v38, %v4899_v56 }
0x192a   :  { %v10580_v21 = vsel %vm5033_vm7, -inf, %v10276_v5  ;;  %v10583_v28 = vsel %vm5032_vm8, -inf, %v10279_v7 }
0x192b   :  { %v4941_v48 = vadd.s32 %v4940_v18, %v4938_v33  ;;  %v4927_v60 = vadd.s32 %v4926_v17, %v4924_v27  ;;  %5072 = vmax.xlane.f32.xlu1 %v10580_v21  ;;  %5070 = vmax.xlane.f32.xlu0 %v10583_v28 }
0x192c   :  { %v4965_v42 = vpop.xlane.xlu1 %4964  ;;  %v4951_v51 = vpop.xlane.xlu0 %4950 }
0x192d   :  { %v4966_v39 = vcvt.f32.s32 %v4965_v42  ;;  %v4952_v5 = vcvt.f32.s32 %v4951_v51  ;;  %vm5035_vm9 = vcmp.eq.s32.totalorder %v6373_v38, %v4941_v48  ;;  %vm5034_vm10 = vcmp.eq.s32.totalorder %v6373_v38, %v4927_v60 }
0x192e   :  { %v10592_v7 = vsel %vm5035_vm9, -inf, %v10288_v9  ;;  %v10595_v50 = vsel %vm5034_vm10, -inf, %v10291_v24 }
0x192f   :  { %v4969_v35 = vadd.s32 %v4968_v11, %v4966_v39  ;;  %v4955_v44 = vadd.s32 %v4954_v20, %v4952_v5  ;;  %5076 = vmax.xlane.f32.xlu1 %v10592_v7  ;;  %5074 = vmax.xlane.f32.xlu0 %v10595_v50 }
0x1930   :  { %v4993_v31 = vpop.xlane.xlu1 %4992  ;;  %v4979_v36 = vpop.xlane.xlu0 %4978 }
0x1931   :  { %v4994_v46 = vcvt.f32.s32 %v4993_v31  ;;  %v4980_v9 = vcvt.f32.s32 %v4979_v36  ;;  %vm5037_vm11 = vcmp.eq.s32.totalorder %v6373_v38, %v4969_v35  ;;  %vm5036_vm12 = vcmp.eq.s32.totalorder %v6373_v38, %v4955_v44 }
0x1932   :  { %v10604_v24 = vsel %vm5037_vm11, -inf, %v10300_v37  ;;  %v10607_v19 = vsel %vm5036_vm12, -inf, %v10303_v2 }
0x1933   :  { %v4997_v41 = vadd.s32 %v4996_v59, %v4994_v46  ;;  %v4983_v58 = vadd.s32 %v4982_v54, %v4980_v9  ;;  %5080 = vmax.xlane.f32.xlu1 %v10604_v24  ;;  %5078 = vmax.xlane.f32.xlu0 %v10607_v19 }
0x1934   :  { %v5021_v34 = vpop.xlane.xlu1 %5020  ;;  %v5007_v53 = vpop.xlane.xlu0 %5006 }
0x1935   :  { %v5022_v15 = vcvt.f32.s32 %v5021_v34  ;;  %v5008_v49 = vcvt.f32.s32 %v5007_v53  ;;  %vm5039_vm13 = vcmp.eq.s32.totalorder %v6373_v38, %v4997_v41  ;;  %vm5038_vm14 = vcmp.eq.s32.totalorder %v6373_v38, %v4983_v58 }
0x1936   :  { %v10614_v37 = vsel %vm5039_vm13, -inf, %v10310_v12  ;;  %v10617_v2 = vsel %vm5038_vm14, -inf, %v10313_v45 }
0x1937   :  { %v5025_v32 = vadd.s32 %v5024_v22, %v5022_v15  ;;  %v5011_v57 = vadd.s32 %v5010_v4, %v5008_v49  ;;  %5084 = vmax.xlane.f32.xlu1 %v10614_v37  ;;  %5082 = vmax.xlane.f32.xlu0 %v10617_v2 }
0x1939   :  { %vm5041_vm15 = vcmp.eq.s32.totalorder %v6373_v38, %v5025_v32  ;;  %vm5040_vm0 = vcmp.eq.s32.totalorder %v6373_v38, %v5011_v57 }
0x193a   :  { %v10624_v52 = vsel %vm5041_vm15, -inf, %v10320_v61  ;;  %v10627_v56 = vsel %vm5040_vm0, -inf, %v10323_v0 }
0x193b   :  { %5088 = vmax.xlane.f32.xlu1 %v10624_v52  ;;  %5086 = vmax.xlane.f32.xlu0 %v10627_v56 }
0x19a4   :  { %v5061_v12 = vpop.xlane.xlu1 %5060 }
0x19a5   :  { %vm5091_vm1 = vcmp.eq.f32.partialorder %v10541_v40, %v5061_v12 }
0x19a6   :  { %v10633_v45 = vsel %vm5091_vm1, %v6373_v38, 128 }
0x19a7   :  { %v5137_v18 = vshra.s32 %v10633_v45, 16 }
0x19a8   :  { %v5065_v17 = vpop.xlane.xlu1 %5064  ;;  %v5059_v10 = vpop.xlane.xlu0 %5058 }
0x19a9   :  { %v10636_v43 = vcvt.s32.f32 %v5137_v18  ;;  %vm5093_vm2 = vcmp.eq.f32.partialorder %v10549_v26, %v5065_v17  ;;  %vm5090_vm3 = vcmp.eq.f32.partialorder %v10552_v23, %v5059_v10 }
0x19aa   :  { %v10641_v61 = vsel %vm5093_vm2, %v6373_v38, 128  ;;  %v10644_v0 = vsel %vm5090_vm3, %v6373_v38, 128 }
0x19ab   :  { %v5165_v30 = vshra.s32 %v10641_v61, 16  ;;  %v5123_v13 = vshra.s32 %v10644_v0, 16  ;;  %5140 = vmin.xlane.f32.xlu1 %v10636_v43 }
0x19ac   :  { %v5063_v33 = vpop.xlane.xlu0 %5062 }
0x19ad   :  { %v10649_v27 = vcvt.s32.f32 %v5165_v30  ;;  %v10651_v48 = vcvt.s32.f32 %v5123_v13  ;;  %vm5092_vm4 = vcmp.eq.f32.partialorder %v10560_v8, %v5063_v33 }
0x19ae   :  { %v10655_v60 = vsel %vm5092_vm4, %v6373_v38, 128 }
0x19af   :  { %5168 = vmin.xlane.f32.xlu1 %v10649_v27  ;;  %5126 = vmin.xlane.f32.xlu0 %v10651_v48  ;;  %v5151_v11 = vshra.s32 %v10655_v60, 16 }
0x19b0   :  { %v5069_v20 = vpop.xlane.xlu1 %5068  ;;  %v5067_v47 = vpop.xlane.xlu0 %5066 }
0x19b1   :  { %vm5095_vm5 = vcmp.eq.f32.partialorder %v10568_v25, %v5069_v20  ;;  %vm5094_vm6 = vcmp.eq.f32.partialorder %v10571_v3, %v5067_v47  ;;  %v10662_v29 = vcvt.s32.f32 %v5151_v11 }
0x19b2   :  { %v10665_v42 = vsel %vm5095_vm5, %v6373_v38, 128  ;;  %v10668_v51 = vsel %vm5094_vm6, %v6373_v38, 128 }
0x19b3   :  { %v5193_v39 = vshra.s32 %v10665_v42, 16  ;;  %v5179_v5 = vshra.s32 %v10668_v51, 16  ;;  %5154 = vmin.xlane.f32.xlu0 %v10662_v29 }
0x19b4   :  { %v5073_v35 = vpop.xlane.xlu1 %5072  ;;  %v5071_v44 = vpop.xlane.xlu0 %5070 }
0x19b5   :  { %v10673_v59 = vcvt.s32.f32 %v5193_v39  ;;  %v10675_v54 = vcvt.s32.f32 %v5179_v5  ;;  %vm5097_vm7 = vcmp.eq.f32.partialorder %v10580_v21, %v5073_v35  ;;  %vm5096_vm8 = vcmp.eq.f32.partialorder %v10583_v28, %v5071_v44 }
0x19b6   :  { %v10680_v16 = vsel %vm5097_vm7, %v6373_v38, 128  ;;  %v10683_v1 = vsel %vm5096_vm8, %v6373_v38, 128 }
0x19b7   :  { %5196 = vmin.xlane.f32.xlu1 %v10673_v59  ;;  %v5221_v31 = vshra.s32 %v10680_v16, 16  ;;  %v5207_v36 = vshra.s32 %v10683_v1, 16  ;;  %5182 = vmin.xlane.f32.xlu0 %v10675_v54 }
0x19b8   :  { %v5077_v46 = vpop.xlane.xlu1 %5076  ;;  %v5075_v9 = vpop.xlane.xlu0 %5074 }
0x19b9   :  { %vm5099_vm9 = vcmp.eq.f32.partialorder %v10592_v7, %v5077_v46  ;;  %vm5098_vm10 = vcmp.eq.f32.partialorder %v10595_v50, %v5075_v9  ;;  %v10691_v41 = vcvt.s32.f32 %v5221_v31  ;;  %v10693_v58 = vcvt.s32.f32 %v5207_v36 }
0x19ba   :  { %v10696_v22 = vsel %vm5099_vm9, %v6373_v38, 128  ;;  %v10699_v4 = vsel %vm5098_vm10, %v6373_v38, 128 }
0x19bb   :  { %v5249_v34 = vshra.s32 %v10696_v22, 16  ;;  %v5235_v53 = vshra.s32 %v10699_v4, 16  ;;  %5224 = vmin.xlane.f32.xlu1 %v10691_v41  ;;  %5210 = vmin.xlane.f32.xlu0 %v10693_v58 }
0x19bc   :  { %v5081_v15 = vpop.xlane.xlu1 %5080  ;;  %v5079_v49 = vpop.xlane.xlu0 %5078 }
0x19bd   :  { %vm5101_vm11 = vcmp.eq.f32.partialorder %v10604_v24, %v5081_v15  ;;  %vm5100_vm12 = vcmp.eq.f32.partialorder %v10607_v19, %v5079_v49  ;;  %v10707_v32 = vcvt.s32.f32 %v5249_v34  ;;  %v10709_v57 = vcvt.s32.f32 %v5235_v53 }
0x19be   :  { %v10712_v12 = vsel %vm5101_vm11, %v6373_v38, 128  ;;  %v10715_v18 = vsel %vm5100_vm12, %v6373_v38, 128 }
0x19bf   :  { %v5277_v17 = vshra.s32 %v10712_v12, 16  ;;  %v5263_v10 = vshra.s32 %v10715_v18, 16  ;;  %5252 = vmin.xlane.f32.xlu1 %v10707_v32  ;;  %5238 = vmin.xlane.f32.xlu0 %v10709_v57 }
0x19c0   :  { %v5085_v30 = vpop.xlane.xlu1 %5084  ;;  %v5083_v13 = vpop.xlane.xlu0 %5082 }
0x19c1   :  { %vm5103_vm13 = vcmp.eq.f32.partialorder %v10614_v37, %v5085_v30  ;;  %vm5102_vm14 = vcmp.eq.f32.partialorder %v10617_v2, %v5083_v13  ;;  %v10723_v33 = vcvt.s32.f32 %v5277_v17  ;;  %v10725_v11 = vcvt.s32.f32 %v5263_v10 }
0x19c2   :  { %v10728_v20 = vsel %vm5103_vm13, %v6373_v38, 128  ;;  %v10731_v47 = vsel %vm5102_vm14, %v6373_v38, 128  ;;  %v5136_v17 = vand.u32 65535, %v10633_v45  ;;  %v5164_v30 = vand.u32 65535, %v10641_v61 }
0x19c3   :  { %v5305_v39 = vshra.s32 %v10728_v20, 16  ;;  %v5291_v5 = vshra.s32 %v10731_v47, 16  ;;  %5280 = vmin.xlane.f32.xlu1 %v10723_v33  ;;  %5266 = vmin.xlane.f32.xlu0 %v10725_v11  ;;  %v5122_v13 = vand.u32 65535, %v10644_v0  ;;  %v5150_v45 = vand.u32 65535, %v10655_v60 }
0x19c4   :  { %v5089_v35 = vpop.xlane.xlu1 %5088  ;;  %v5087_v44 = vpop.xlane.xlu0 %5086  ;;  %v5138_v10 = vcvt.s32.f32 %v5136_v17 }
0x19c5   :  { %vm5105_vm15 = vcmp.eq.f32.partialorder %v10624_v52, %v5089_v35  ;;  %vm5104_vm0 = vcmp.eq.f32.partialorder %v10627_v56, %v5087_v44  ;;  %v10739_v31 = vcvt.s32.f32 %v5305_v39  ;;  %v10741_v36 = vcvt.s32.f32 %v5291_v5 }
0x19c6   :  { %v10744_v46 = vsel %vm5105_vm15, %v6373_v38, 128  ;;  %v10747_v9 = vsel %vm5104_vm0, %v6373_v38, 128  ;;  %v5166_v35 = vcvt.s32.f32 %v5164_v30  ;;  %v5124_v44 = vcvt.s32.f32 %v5122_v13 }
0x19c7   :  { %v5333_v34 = vshra.s32 %v10744_v46, 16  ;;  %v5319_v53 = vshra.s32 %v10747_v9, 16  ;;  %5308 = vmin.xlane.f32.xlu1 %v10739_v31  ;;  %5294 = vmin.xlane.f32.xlu0 %v10741_v36  ;;  %v5152_v17 = vcvt.s32.f32 %v5150_v45 }
0x19c9   :  { %v10753_v15 = vcvt.s32.f32 %v5333_v34  ;;  %v10755_v49 = vcvt.s32.f32 %v5319_v53 }
0x19cb   :  { %5336 = vmin.xlane.f32.xlu1 %v10753_v15  ;;  %5322 = vmin.xlane.f32.xlu0 %v10755_v49 }
0x1a34   :  { %v10762_v39 = vpop.xlane.xlu1 %5140 }
0x1a35   :  { %vm5142_vm1 = vcmp.eq.f32.partialorder %v10636_v43, %v10762_v39  ;;  %v5192_v43 = vand.u32 65535, %v10665_v42 }
0x1a36   :  { %v5143_v5 = vsel %vm5142_vm1, %v5138_v10, inf  ;;  %v5178_v10 = vand.u32 65535, %v10668_v51 }
0x1a37   :  { %5144 = vmin.xlane.f32.xlu1 %v5143_v5  ;;  %v5194_v13 = vcvt.s32.f32 %v5192_v43  ;;  %v5220_v5 = vand.u32 65535, %v10680_v16  ;;  %v5234_v16 = vand.u32 65535, %v10699_v4  ;;  %v5262_v4 = vand.u32 65535, %v10715_v18 }
0x1a38   :  { %v10766_v34 = vpop.xlane.xlu1 %5168  ;;  %v10768_v53 = vpop.xlane.xlu0 %5126  ;;  %v5290_v18 = vand.u32 65535, %v10731_v47  ;;  %v5318_v47 = vand.u32 65535, %v10747_v9 }
0x1a39   :  { %vm5170_vm2 = vcmp.eq.f32.partialorder %v10649_v27, %v10766_v34  ;;  %vm5128_vm3 = vcmp.eq.f32.partialorder %v10651_v48, %v10768_v53  ;;  %v5180_v48 = vcvt.s32.f32 %v5178_v10 }
0x1a3a   :  { %v5171_v61 = vsel %vm5170_vm2, %v5166_v35, inf  ;;  %v5129_v0 = vsel %vm5128_vm3, %v5124_v44, inf  ;;  %v5206_v35 = vand.u32 65535, %v10683_v1  ;;  %v5222_v44 = vcvt.s32.f32 %v5220_v5 }
0x1a3b   :  { %5172 = vmin.xlane.f32.xlu1 %v5171_v61  ;;  %5130 = vmin.xlane.f32.xlu0 %v5129_v0  ;;  %v5248_v61 = vand.u32 65535, %v10696_v22  ;;  %v5276_v22 = vand.u32 65535, %v10712_v12  ;;  %v5304_v12 = vand.u32 65535, %v10728_v20  ;;  %v5332_v20 = vand.u32 65535, %v10744_v46 }
0x1a3c   :  { %v10777_v30 = vpop.xlane.xlu0 %5154  ;;  %v5208_v45 = vcvt.s32.f32 %v5206_v35 }
0x1a3d   :  { %vm5156_vm4 = vcmp.eq.f32.partialorder %v10662_v29, %v10777_v30  ;;  %v5250_v43 = vcvt.s32.f32 %v5248_v61  ;;  %v5334_v61 = vcvt.s32.f32 %v5332_v20 }
0x1a3e   :  { %v5157_v60 = vsel %vm5156_vm4, %v5152_v17, inf  ;;  %v5236_v17 = vcvt.s32.f32 %v5234_v16  ;;  %v5320_v16 = vcvt.s32.f32 %v5318_v47 }
0x1a3f   :  { %5158 = vmin.xlane.f32.xlu0 %v5157_v60 }
0x1a40   :  { %v10781_v27 = vpop.xlane.xlu1 %5196  ;;  %v10787_v42 = vpop.xlane.xlu0 %5182 }
0x1a41   :  { %vm5198_vm5 = vcmp.eq.f32.partialorder %v10673_v59, %v10781_v27  ;;  %vm5184_vm6 = vcmp.eq.f32.partialorder %v10675_v54, %v10787_v42 }
0x1a42   :  { %v5199_v51 = vsel %vm5198_vm5, %v5194_v13, inf  ;;  %v5185_v29 = vsel %vm5184_vm6, %v5180_v48, inf  ;;  %v5278_v13 = vcvt.s32.f32 %v5276_v22  ;;  %v5264_v48 = vcvt.s32.f32 %v5262_v4 }
0x1a43   :  { %5200 = vmin.xlane.f32.xlu1 %v5199_v51  ;;  %5186 = vmin.xlane.f32.xlu0 %v5185_v29  ;;  %v5306_v51 = vcvt.s32.f32 %v5304_v12  ;;  %v5292_v29 = vcvt.s32.f32 %v5290_v18 }
0x1a44   :  { %v10793_v0 = vpop.xlane.xlu1 %5224  ;;  %v10795_v1 = vpop.xlane.xlu0 %5210 }
0x1a45   :  { %vm5226_vm7 = vcmp.eq.f32.partialorder %v10691_v41, %v10793_v0  ;;  %vm5212_vm8 = vcmp.eq.f32.partialorder %v10693_v58, %v10795_v1 }
0x1a46   :  { %v5227_v59 = vsel %vm5226_vm7, %v5222_v44, inf  ;;  %v5213_v54 = vsel %vm5212_vm8, %v5208_v45, inf }
0x1a47   :  { %5228 = vmin.xlane.f32.xlu1 %v5227_v59  ;;  %5214 = vmin.xlane.f32.xlu0 %v5213_v54  ;;  %v5175_v54 = vcvt.f32.s32 %v10766_v34 }
0x1a48   :  { %v10803_v10 = vpop.xlane.xlu1 %5252  ;;  %v10805_v60 = vpop.xlane.xlu0 %5238 }
0x1a49   :  { %vm5254_vm9 = vcmp.eq.f32.partialorder %v10707_v32, %v10803_v10  ;;  %vm5240_vm10 = vcmp.eq.f32.partialorder %v10709_v57, %v10805_v60 }
0x1a4a   :  { %v5255_v41 = vsel %vm5254_vm9, %v5250_v43, inf  ;;  %v5241_v58 = vsel %vm5240_vm10, %v5236_v17, inf  ;;  %v5133_v43 = vcvt.f32.s32 %v10768_v53 }
0x1a4b   :  { %5256 = vmin.xlane.f32.xlu1 %v5255_v41  ;;  %5242 = vmin.xlane.f32.xlu0 %v5241_v58  ;;  %v5176_v58 = vshll.u32 %v5175_v54, 16 }
0x1a4c   :  { %v10813_v5 = vpop.xlane.xlu1 %5280  ;;  %v10815_v35 = vpop.xlane.xlu0 %5266 }
0x1a4d   :  { %vm5282_vm11 = vcmp.eq.f32.partialorder %v10723_v33, %v10813_v5  ;;  %vm5268_vm12 = vcmp.eq.f32.partialorder %v10725_v11, %v10815_v35 }
0x1a4e   :  { %v5283_v32 = vsel %vm5282_vm11, %v5278_v13, inf  ;;  %v5269_v57 = vsel %vm5268_vm12, %v5264_v48, inf  ;;  %v5134_v13 = vshll.u32 %v5133_v43, 16  ;;  %v5259_v43 = vcvt.f32.s32 %v10803_v10 }
0x1a4f   :  { %5284 = vmin.xlane.f32.xlu1 %v5283_v32  ;;  %5270 = vmin.xlane.f32.xlu0 %v5269_v57  ;;  %v5203_v57 = vcvt.f32.s32 %v10781_v27  ;;  %v5231_v27 = vcvt.f32.s32 %v10793_v0 }
0x1a50   :  { %v10823_v44 = vpop.xlane.xlu1 %5308  ;;  %v10825_v45 = vpop.xlane.xlu0 %5294 }
0x1a51   :  { %vm5310_vm13 = vcmp.eq.f32.partialorder %v10739_v31, %v10823_v44  ;;  %vm5296_vm14 = vcmp.eq.f32.partialorder %v10741_v36, %v10825_v45  ;;  %v5147_v36 = vcvt.f32.s32 %v10762_v39 }
0x1a52   :  { %v5311_v33 = vsel %vm5310_vm13, %v5306_v51, inf  ;;  %v5297_v11 = vsel %vm5296_vm14, %v5292_v29, inf }
0x1a53   :  { %5312 = vmin.xlane.f32.xlu1 %v5311_v33  ;;  %5298 = vmin.xlane.f32.xlu0 %v5297_v11  ;;  %v5148_v22 = vshll.u32 %v5147_v36, 16  ;;  %v5204_v11 = vshll.u32 %v5203_v57, 16  ;;  %v5232_v36 = vshll.u32 %v5231_v27, 16 }
0x1a54   :  { %v10831_v59 = vpop.xlane.xlu1 %5336  ;;  %v10833_v46 = vpop.xlane.xlu0 %5322 }
0x1a55   :  { %vm5338_vm15 = vcmp.eq.f32.partialorder %v10753_v15, %v10831_v59  ;;  %vm5324_vm0 = vcmp.eq.f32.partialorder %v10755_v49, %v10833_v46  ;;  %v5161_v49 = vcvt.f32.s32 %v10777_v30  ;;  %v5189_v30 = vcvt.f32.s32 %v10787_v42 }
0x1a56   :  { %v5339_v31 = vsel %vm5338_vm15, %v5334_v61, inf  ;;  %v5325_v9 = vsel %vm5324_vm0, %v5320_v16, inf  ;;  %v5217_v61 = vcvt.f32.s32 %v10795_v1 }
0x1a57   :  { %5340 = vmin.xlane.f32.xlu1 %v5339_v31  ;;  %5326 = vmin.xlane.f32.xlu0 %v5325_v9  ;;  %v5162_v53 = vshll.u32 %v5161_v49, 16  ;;  %v5190_v31 = vshll.u32 %v5189_v30, 16  ;;  %v5273_v49 = vcvt.f32.s32 %v10815_v35  ;;  %v5301_v30 = vcvt.f32.s32 %v10825_v45 }
0x1a58   :  { %v5218_v0 = vshll.u32 %v5217_v61, 16 }
0x1a59   :  { %v5274_v35 = vshll.u32 %v5273_v49, 16  ;;  %v5302_v45 = vshll.u32 %v5301_v30, 16 }
0x1ac0   :  { %v5145_v17 = vpop.xlane.xlu1 %5144 }
0x1ac1   :  { %v5146_v4 = vcvt.f32.s32 %v5145_v17  ;;  %v5245_v17 = vcvt.f32.s32 %v10805_v60  ;;  %v5260_v60 = vshll.u32 %v5259_v43, 16 }
0x1ac3   :  { %v5149_v41 = vadd.s32 %v5148_v22, %v5146_v4 }
0x1ac4   :  { %v5173_v15 = vpop.xlane.xlu1 %5172  ;;  %v5131_v48 = vpop.xlane.xlu0 %5130 }
0x1ac5   :  { %v5174_v12 = vcvt.f32.s32 %v5173_v15  ;;  %v5132_v18 = vcvt.f32.s32 %v5131_v48  ;;  %vm5347_vm1 = vcmp.eq.s32.totalorder %v6373_v38, %v5149_v41  ;;  %v5246_v15 = vshll.u32 %v5245_v17, 16 }
0x1ac6   :  { %v10845_v39 = vsel %vm5347_vm1, -inf, %v10541_v40  ;;  %v5287_v48 = vcvt.f32.s32 %v10813_v5 }
0x1ac7   :  { %v5177_v34 = vadd.s32 %v5176_v58, %v5174_v12  ;;  %v5135_v32 = vadd.s32 %v5134_v13, %v5132_v18  ;;  %5380 = vmax.xlane.f32.xlu1 %v10845_v39 }
0x1ac8   :  { %v5159_v51 = vpop.xlane.xlu0 %5158  ;;  %v5288_v5 = vshll.u32 %v5287_v48, 16 }
0x1ac9   :  { %vm5349_vm2 = vcmp.eq.s32.totalorder %v6373_v38, %v5177_v34  ;;  %vm5346_vm3 = vcmp.eq.s32.totalorder %v6373_v38, %v5135_v32  ;;  %v5160_v29 = vcvt.f32.s32 %v5159_v51  ;;  %v5315_v51 = vcvt.f32.s32 %v10823_v44 }
0x1aca   :  { %v10853_v20 = vsel %vm5349_vm2, -inf, %v10549_v26  ;;  %v10856_v40 = vsel %vm5346_vm3, -inf, %v10552_v23 }
0x1acb   :  { %5384 = vmax.xlane.f32.xlu1 %v10853_v20  ;;  %5378 = vmax.xlane.f32.xlu0 %v10856_v40  ;;  %v5163_v47 = vadd.s32 %v5162_v53, %v5160_v29  ;;  %v5316_v44 = vshll.u32 %v5315_v51, 16 }
0x1acc   :  { %v5201_v33 = vpop.xlane.xlu1 %5200  ;;  %v5187_v42 = vpop.xlane.xlu0 %5186 }
0x1acd   :  { %v5202_v16 = vcvt.f32.s32 %v5201_v33  ;;  %v5188_v9 = vcvt.f32.s32 %v5187_v42  ;;  %vm5348_vm4 = vcmp.eq.s32.totalorder %v6373_v38, %v5163_v47  ;;  %v5329_v42 = vcvt.f32.s32 %v10833_v46 }
0x1ace   :  { %v10864_v23 = vsel %vm5348_vm4, -inf, %v10560_v8 }
0x1acf   :  { %v5205_v26 = vadd.s32 %v5204_v11, %v5202_v16  ;;  %v5191_v54 = vadd.s32 %v5190_v31, %v5188_v9  ;;  %5382 = vmax.xlane.f32.xlu0 %v10864_v23  ;;  %v5343_v16 = vcvt.f32.s32 %v10831_v59  ;;  %v5330_v46 = vshll.u32 %v5329_v42, 16 }
0x1ad0   :  { %v5229_v1 = vpop.xlane.xlu1 %5228  ;;  %v5215_v22 = vpop.xlane.xlu0 %5214 }
0x1ad1   :  { %vm5351_vm5 = vcmp.eq.s32.totalorder %v6373_v38, %v5205_v26  ;;  %v5230_v4 = vcvt.f32.s32 %v5229_v1  ;;  %v5216_v41 = vcvt.f32.s32 %v5215_v22  ;;  %vm5350_vm6 = vcmp.eq.s32.totalorder %v6373_v38, %v5191_v54 }
0x1ad2   :  { %v10871_v58 = vsel %vm5351_vm5, -inf, %v10568_v25  ;;  %v10876_v8 = vsel %vm5350_vm6, -inf, %v10571_v3  ;;  %v5344_v59 = vshll.u32 %v5343_v16, 16 }
0x1ad3   :  { %5388 = vmax.xlane.f32.xlu1 %v10871_v58  ;;  %v5233_v13 = vadd.s32 %v5232_v36, %v5230_v4  ;;  %v5219_v10 = vadd.s32 %v5218_v0, %v5216_v41  ;;  %5386 = vmax.xlane.f32.xlu0 %v10876_v8 }
0x1ad4   :  { %v5257_v12 = vpop.xlane.xlu1 %5256  ;;  %v5243_v25 = vpop.xlane.xlu0 %5242 }
0x1ad5   :  { %v5258_v18 = vcvt.f32.s32 %v5257_v12  ;;  %v5244_v34 = vcvt.f32.s32 %v5243_v25  ;;  %vm5353_vm7 = vcmp.eq.s32.totalorder %v6373_v38, %v5233_v13  ;;  %vm5352_vm8 = vcmp.eq.s32.totalorder %v6373_v38, %v5219_v10 }
0x1ad6   :  { %v10884_v3 = vsel %vm5353_vm7, -inf, %v10580_v21  ;;  %v10887_v32 = vsel %vm5352_vm8, -inf, %v10583_v28 }
0x1ad7   :  { %v5261_v53 = vadd.s32 %v5260_v60, %v5258_v18  ;;  %v5247_v57 = vadd.s32 %v5246_v15, %v5244_v34  ;;  %5392 = vmax.xlane.f32.xlu1 %v10884_v3  ;;  %5390 = vmax.xlane.f32.xlu0 %v10887_v32 }
0x1ad8   :  { %v5285_v29 = vpop.xlane.xlu1 %5284  ;;  %v5271_v27 = vpop.xlane.xlu0 %5270 }
0x1ad9   :  { %v5286_v47 = vcvt.f32.s32 %v5285_v29  ;;  %v5272_v21 = vcvt.f32.s32 %v5271_v27  ;;  %vm5355_vm9 = vcmp.eq.s32.totalorder %v6373_v38, %v5261_v53  ;;  %vm5354_vm10 = vcmp.eq.s32.totalorder %v6373_v38, %v5247_v57 }
0x1ada   :  { %v10896_v28 = vsel %vm5355_vm9, -inf, %v10592_v7  ;;  %v10899_v33 = vsel %vm5354_vm10, -inf, %v10595_v50 }
0x1adb   :  { %v5289_v11 = vadd.s32 %v5288_v5, %v5286_v47  ;;  %v5275_v61 = vadd.s32 %v5274_v35, %v5272_v21  ;;  %5396 = vmax.xlane.f32.xlu1 %v10896_v28  ;;  %5394 = vmax.xlane.f32.xlu0 %v10899_v33 }
0x1adc   :  { %v5313_v31 = vpop.xlane.xlu1 %5312  ;;  %v5299_v9 = vpop.xlane.xlu0 %5298 }
0x1add   :  { %v5314_v26 = vcvt.f32.s32 %v5313_v31  ;;  %v5300_v7 = vcvt.f32.s32 %v5299_v9  ;;  %vm5357_vm11 = vcmp.eq.s32.totalorder %v6373_v38, %v5289_v11  ;;  %vm5356_vm12 = vcmp.eq.s32.totalorder %v6373_v38, %v5275_v61 }
0x1ade   :  { %v10908_v50 = vsel %vm5357_vm11, -inf, %v10604_v24  ;;  %v10911_v36 = vsel %vm5356_vm12, -inf, %v10607_v19 }
0x1adf   :  { %v5317_v54 = vadd.s32 %v5316_v44, %v5314_v26  ;;  %v5303_v0 = vadd.s32 %v5302_v45, %v5300_v7  ;;  %5400 = vmax.xlane.f32.xlu1 %v10908_v50  ;;  %5398 = vmax.xlane.f32.xlu0 %v10911_v36 }
0x1ae0   :  { %v5341_v43 = vpop.xlane.xlu1 %5340  ;;  %v5327_v17 = vpop.xlane.xlu0 %5326 }
0x1ae1   :  { %v5342_v1 = vcvt.f32.s32 %v5341_v43  ;;  %v5328_v22 = vcvt.f32.s32 %v5327_v17  ;;  %vm5359_vm13 = vcmp.eq.s32.totalorder %v6373_v38, %v5317_v54  ;;  %vm5358_vm14 = vcmp.eq.s32.totalorder %v6373_v38, %v5303_v0 }
0x1ae2   :  { %v10918_v24 = vsel %vm5359_vm13, -inf, %v10614_v37  ;;  %v10921_v19 = vsel %vm5358_vm14, -inf, %v10617_v2 }
0x1ae3   :  { %v5345_v4 = vadd.s32 %v5344_v59, %v5342_v1  ;;  %v5331_v41 = vadd.s32 %v5330_v46, %v5328_v22  ;;  %5404 = vmax.xlane.f32.xlu1 %v10918_v24  ;;  %5402 = vmax.xlane.f32.xlu0 %v10921_v19 }
0x1ae5   :  { %vm5361_vm15 = vcmp.eq.s32.totalorder %v6373_v38, %v5345_v4  ;;  %vm5360_vm0 = vcmp.eq.s32.totalorder %v6373_v38, %v5331_v41 }
0x1ae6   :  { %v10928_v13 = vsel %vm5361_vm15, -inf, %v10624_v52  ;;  %v10931_v10 = vsel %vm5360_vm0, -inf, %v10627_v56 }
0x1ae7   :  { %5408 = vmax.xlane.f32.xlu1 %v10928_v13  ;;  %5406 = vmax.xlane.f32.xlu0 %v10931_v10 }
0x1b50   :  { %v5381_v37 = vpop.xlane.xlu1 %5380 }
0x1b51   :  { %vm5411_vm1 = vcmp.eq.f32.partialorder %v10845_v39, %v5381_v37 }
0x1b52   :  { %v10937_v2 = vsel %vm5411_vm1, %v6373_v38, 128 }
0x1b53   :  { %v5457_v60 = vshra.s32 %v10937_v2, 16 }
0x1b54   :  { %v5385_v15 = vpop.xlane.xlu1 %5384  ;;  %v5379_v48 = vpop.xlane.xlu0 %5378 }
0x1b55   :  { %v10940_v49 = vcvt.s32.f32 %v5457_v60  ;;  %vm5413_vm2 = vcmp.eq.f32.partialorder %v10853_v20, %v5385_v15  ;;  %vm5410_vm3 = vcmp.eq.f32.partialorder %v10856_v40, %v5379_v48 }
0x1b56   :  { %v10945_v52 = vsel %vm5413_vm2, %v6373_v38, 128  ;;  %v10948_v56 = vsel %vm5410_vm3, %v6373_v38, 128 }
0x1b57   :  { %v5485_v12 = vshra.s32 %v10945_v52, 16  ;;  %v5443_v25 = vshra.s32 %v10948_v56, 16  ;;  %5460 = vmin.xlane.f32.xlu1 %v10940_v49 }
0x1b58   :  { %v5383_v53 = vpop.xlane.xlu0 %5382 }
0x1b59   :  { %v10953_v18 = vcvt.s32.f32 %v5485_v12  ;;  %v10955_v34 = vcvt.s32.f32 %v5443_v25  ;;  %vm5412_vm4 = vcmp.eq.f32.partialorder %v10864_v23, %v5383_v53 }
0x1b5a   :  { %v10959_v57 = vsel %vm5412_vm4, %v6373_v38, 128 }
0x1b5b   :  { %5488 = vmin.xlane.f32.xlu1 %v10953_v18  ;;  %5446 = vmin.xlane.f32.xlu0 %v10955_v34  ;;  %v5471_v5 = vshra.s32 %v10959_v57, 16 }
0x1b5c   :  { %v5389_v35 = vpop.xlane.xlu1 %5388  ;;  %v5387_v51 = vpop.xlane.xlu0 %5386 }
0x1b5d   :  { %vm5415_vm5 = vcmp.eq.f32.partialorder %v10871_v58, %v5389_v35  ;;  %v10965_v30 = vcvt.s32.f32 %v5471_v5  ;;  %vm5414_vm6 = vcmp.eq.f32.partialorder %v10876_v8, %v5387_v51 }
0x1b5e   :  { %v10968_v29 = vsel %vm5415_vm5, %v6373_v38, 128  ;;  %v10973_v47 = vsel %vm5414_vm6, %v6373_v38, 128 }
0x1b5f   :  { %v5513_v27 = vshra.s32 %v10968_v29, 16  ;;  %v5499_v21 = vshra.s32 %v10973_v47, 16  ;;  %5474 = vmin.xlane.f32.xlu0 %v10965_v30 }
0x1b60   :  { %v5393_v61 = vpop.xlane.xlu1 %5392  ;;  %v5391_v44 = vpop.xlane.xlu0 %5390 }
0x1b61   :  { %v10977_v11 = vcvt.s32.f32 %v5513_v27  ;;  %v10979_v45 = vcvt.s32.f32 %v5499_v21  ;;  %vm5417_vm7 = vcmp.eq.f32.partialorder %v10884_v3, %v5393_v61  ;;  %vm5416_vm8 = vcmp.eq.f32.partialorder %v10887_v32, %v5391_v44 }
0x1b62   :  { %v10984_v16 = vsel %vm5417_vm7, %v6373_v38, 128  ;;  %v10987_v42 = vsel %vm5416_vm8, %v6373_v38, 128 }
0x1b63   :  { %5516 = vmin.xlane.f32.xlu1 %v10977_v11  ;;  %v5541_v31 = vshra.s32 %v10984_v16, 16  ;;  %v5527_v9 = vshra.s32 %v10987_v42, 16  ;;  %5502 = vmin.xlane.f32.xlu0 %v10979_v45 }
0x1b64   :  { %v5397_v26 = vpop.xlane.xlu1 %5396  ;;  %v5395_v7 = vpop.xlane.xlu0 %5394 }
0x1b65   :  { %v10993_v54 = vcvt.s32.f32 %v5541_v31  ;;  %v10995_v0 = vcvt.s32.f32 %v5527_v9  ;;  %vm5419_vm9 = vcmp.eq.f32.partialorder %v10896_v28, %v5397_v26  ;;  %vm5418_vm10 = vcmp.eq.f32.partialorder %v10899_v33, %v5395_v7 }
0x1b66   :  { %v11000_v59 = vsel %vm5419_vm9, %v6373_v38, 128  ;;  %v11003_v46 = vsel %vm5418_vm10, %v6373_v38, 128 }
0x1b67   :  { %5544 = vmin.xlane.f32.xlu1 %v10993_v54  ;;  %5530 = vmin.xlane.f32.xlu0 %v10995_v0  ;;  %v5569_v43 = vshra.s32 %v11000_v59, 16  ;;  %v5555_v17 = vshra.s32 %v11003_v46, 16 }
0x1b68   :  { %v5401_v1 = vpop.xlane.xlu1 %5400  ;;  %v5399_v22 = vpop.xlane.xlu0 %5398 }
0x1b69   :  { %vm5421_vm11 = vcmp.eq.f32.partialorder %v10908_v50, %v5401_v1  ;;  %vm5420_vm12 = vcmp.eq.f32.partialorder %v10911_v36, %v5399_v22  ;;  %v11011_v4 = vcvt.s32.f32 %v5569_v43  ;;  %v11013_v41 = vcvt.s32.f32 %v5555_v17 }
0x1b6a   :  { %v11016_v37 = vsel %vm5421_vm11, %v6373_v38, 128  ;;  %v11019_v60 = vsel %vm5420_vm12, %v6373_v38, 128 }
0x1b6b   :  { %v5597_v15 = vshra.s32 %v11016_v37, 16  ;;  %v5583_v48 = vshra.s32 %v11019_v60, 16  ;;  %5572 = vmin.xlane.f32.xlu1 %v11011_v4  ;;  %5558 = vmin.xlane.f32.xlu0 %v11013_v41 }
0x1b6c   :  { %v5405_v12 = vpop.xlane.xlu1 %5404  ;;  %v5403_v25 = vpop.xlane.xlu0 %5402 }
0x1b6d   :  { %vm5423_vm13 = vcmp.eq.f32.partialorder %v10918_v24, %v5405_v12  ;;  %vm5422_vm14 = vcmp.eq.f32.partialorder %v10921_v19, %v5403_v25  ;;  %v11027_v53 = vcvt.s32.f32 %v5597_v15  ;;  %v11029_v5 = vcvt.s32.f32 %v5583_v48 }
0x1b6e   :  { %v11032_v35 = vsel %vm5423_vm13, %v6373_v38, 128  ;;  %v11035_v51 = vsel %vm5422_vm14, %v6373_v38, 128  ;;  %v5456_v15 = vand.u32 65535, %v10937_v2  ;;  %v5484_v12 = vand.u32 65535, %v10945_v52 }
0x1b6f   :  { %v5625_v27 = vshra.s32 %v11032_v35, 16  ;;  %v5611_v21 = vshra.s32 %v11035_v51, 16  ;;  %5600 = vmin.xlane.f32.xlu1 %v11027_v53  ;;  %5586 = vmin.xlane.f32.xlu0 %v11029_v5  ;;  %v5442_v25 = vand.u32 65535, %v10948_v56  ;;  %v5470_v2 = vand.u32 65535, %v10959_v57 }
0x1b70   :  { %v5409_v61 = vpop.xlane.xlu1 %5408  ;;  %v5407_v44 = vpop.xlane.xlu0 %5406  ;;  %v5458_v48 = vcvt.s32.f32 %v5456_v15 }
0x1b71   :  { %vm5425_vm15 = vcmp.eq.f32.partialorder %v10928_v13, %v5409_v61  ;;  %vm5424_vm0 = vcmp.eq.f32.partialorder %v10931_v10, %v5407_v44  ;;  %v11043_v31 = vcvt.s32.f32 %v5625_v27  ;;  %v11045_v9 = vcvt.s32.f32 %v5611_v21 }
0x1b72   :  { %v11048_v26 = vsel %vm5425_vm15, %v6373_v38, 128  ;;  %v11051_v7 = vsel %vm5424_vm0, %v6373_v38, 128  ;;  %v5486_v61 = vcvt.s32.f32 %v5484_v12  ;;  %v5444_v44 = vcvt.s32.f32 %v5442_v25 }
0x1b73   :  { %v5653_v43 = vshra.s32 %v11048_v26, 16  ;;  %v5639_v17 = vshra.s32 %v11051_v7, 16  ;;  %5628 = vmin.xlane.f32.xlu1 %v11043_v31  ;;  %5614 = vmin.xlane.f32.xlu0 %v11045_v9  ;;  %v5472_v15 = vcvt.s32.f32 %v5470_v2 }
0x1b75   :  { %v11057_v1 = vcvt.s32.f32 %v5653_v43  ;;  %v11059_v22 = vcvt.s32.f32 %v5639_v17 }
0x1b77   :  { %5656 = vmin.xlane.f32.xlu1 %v11057_v1  ;;  %5642 = vmin.xlane.f32.xlu0 %v11059_v22 }
0x1be0   :  { %v11066_v27 = vpop.xlane.xlu1 %5460 }
0x1be1   :  { %vm5462_vm1 = vcmp.eq.f32.partialorder %v10940_v49, %v11066_v27  ;;  %v5512_v49 = vand.u32 65535, %v10968_v29 }
0x1be2   :  { %v5463_v21 = vsel %vm5462_vm1, %v5458_v48, inf  ;;  %v5498_v48 = vand.u32 65535, %v10973_v47 }
0x1be3   :  { %5464 = vmin.xlane.f32.xlu1 %v5463_v21  ;;  %v5514_v25 = vcvt.s32.f32 %v5512_v49  ;;  %v5540_v21 = vand.u32 65535, %v10984_v16  ;;  %v5568_v16 = vand.u32 65535, %v11000_v59 }
0x1be4   :  { %v11070_v43 = vpop.xlane.xlu1 %5488  ;;  %v11072_v17 = vpop.xlane.xlu0 %5446 }
0x1be5   :  { %vm5490_vm2 = vcmp.eq.f32.partialorder %v10953_v18, %v11070_v43  ;;  %vm5448_vm3 = vcmp.eq.f32.partialorder %v10955_v34, %v11072_v17  ;;  %v5500_v34 = vcvt.s32.f32 %v5498_v48  ;;  %v5570_v49 = vcvt.s32.f32 %v5568_v16 }
0x1be6   :  { %v5491_v52 = vsel %vm5490_vm2, %v5486_v61, inf  ;;  %v5449_v56 = vsel %vm5448_vm3, %v5444_v44, inf  ;;  %v5526_v61 = vand.u32 65535, %v10987_v42  ;;  %v5542_v44 = vcvt.s32.f32 %v5540_v21 }
0x1be7   :  { %5492 = vmin.xlane.f32.xlu1 %v5491_v52  ;;  %5450 = vmin.xlane.f32.xlu0 %v5449_v56  ;;  %v5554_v42 = vand.u32 65535, %v11003_v46  ;;  %v5596_v48 = vand.u32 65535, %v11016_v37  ;;  %v5624_v37 = vand.u32 65535, %v11032_v35  ;;  %v5652_v35 = vand.u32 65535, %v11048_v26 }
0x1be8   :  { %v11081_v12 = vpop.xlane.xlu0 %5474  ;;  %v5528_v2 = vcvt.s32.f32 %v5526_v61 }
0x1be9   :  { %vm5476_vm4 = vcmp.eq.f32.partialorder %v10965_v30, %v11081_v12  ;;  %v5598_v46 = vcvt.s32.f32 %v5596_v48  ;;  %v5654_v16 = vcvt.s32.f32 %v5652_v35 }
0x1bea   :  { %v5477_v57 = vsel %vm5476_vm4, %v5472_v15, inf  ;;  %v5556_v15 = vcvt.s32.f32 %v5554_v42 }
0x1beb   :  { %5478 = vmin.xlane.f32.xlu0 %v5477_v57  ;;  %v5582_v57 = vand.u32 65535, %v11019_v60  ;;  %v5610_v60 = vand.u32 65535, %v11035_v51  ;;  %v5638_v51 = vand.u32 65535, %v11051_v7 }
0x1bec   :  { %v11085_v18 = vpop.xlane.xlu1 %5516  ;;  %v11091_v29 = vpop.xlane.xlu0 %5502 }
0x1bed   :  { %vm5518_vm5 = vcmp.eq.f32.partialorder %v10977_v11, %v11085_v18  ;;  %vm5504_vm6 = vcmp.eq.f32.partialorder %v10979_v45, %v11091_v29  ;;  %v5640_v42 = vcvt.s32.f32 %v5638_v51 }
0x1bee   :  { %v5519_v47 = vsel %vm5518_vm5, %v5514_v25, inf  ;;  %v5505_v30 = vsel %vm5504_vm6, %v5500_v34, inf  ;;  %v5584_v34 = vcvt.s32.f32 %v5582_v57 }
0x1bef   :  { %5520 = vmin.xlane.f32.xlu1 %v5519_v47  ;;  %5506 = vmin.xlane.f32.xlu0 %v5505_v30  ;;  %v5626_v47 = vcvt.s32.f32 %v5624_v37  ;;  %v5612_v30 = vcvt.s32.f32 %v5610_v60 }
0x1bf0   :  { %v11095_v52 = vpop.xlane.xlu1 %5544  ;;  %v11097_v56 = vpop.xlane.xlu0 %5530 }
0x1bf1   :  { %vm5546_vm7 = vcmp.eq.f32.partialorder %v10993_v54, %v11095_v52  ;;  %vm5532_vm8 = vcmp.eq.f32.partialorder %v10995_v0, %v11097_v56 }
0x1bf2   :  { %v5547_v11 = vsel %vm5546_vm7, %v5542_v44, inf  ;;  %v5533_v45 = vsel %vm5532_vm8, %v5528_v2, inf }
0x1bf3   :  { %5548 = vmin.xlane.f32.xlu1 %v5547_v11  ;;  %5534 = vmin.xlane.f32.xlu0 %v5533_v45  ;;  %v5495_v45 = vcvt.f32.s32 %v11070_v43 }
0x1bf4   :  { %v11107_v25 = vpop.xlane.xlu1 %5572  ;;  %v11109_v59 = vpop.xlane.xlu0 %5558 }
0x1bf5   :  { %vm5574_vm9 = vcmp.eq.f32.partialorder %v11011_v4, %v11107_v25  ;;  %vm5560_vm10 = vcmp.eq.f32.partialorder %v11013_v41, %v11109_v59 }
0x1bf6   :  { %v5575_v54 = vsel %vm5574_vm9, %v5570_v49, inf  ;;  %v5561_v0 = vsel %vm5560_vm10, %v5556_v15, inf  ;;  %v5453_v49 = vcvt.f32.s32 %v11072_v17 }
0x1bf7   :  { %5576 = vmin.xlane.f32.xlu1 %v5575_v54  ;;  %5562 = vmin.xlane.f32.xlu0 %v5561_v0  ;;  %v5496_v0 = vshll.u32 %v5495_v45, 16 }
0x1bf8   :  { %v11117_v21 = vpop.xlane.xlu1 %5600  ;;  %v11119_v61 = vpop.xlane.xlu0 %5586 }
0x1bf9   :  { %vm5602_vm11 = vcmp.eq.f32.partialorder %v11027_v53, %v11117_v21  ;;  %vm5588_vm12 = vcmp.eq.f32.partialorder %v11029_v5, %v11119_v61 }
0x1bfa   :  { %v5603_v4 = vsel %vm5602_vm11, %v5598_v46, inf  ;;  %v5589_v41 = vsel %vm5588_vm12, %v5584_v34, inf  ;;  %v5454_v46 = vshll.u32 %v5453_v49, 16  ;;  %v5565_v49 = vcvt.f32.s32 %v11109_v59 }
0x1bfb   :  { %5604 = vmin.xlane.f32.xlu1 %v5603_v4  ;;  %5590 = vmin.xlane.f32.xlu0 %v5589_v41 }
0x1bfc   :  { %v11127_v44 = vpop.xlane.xlu1 %5628  ;;  %v11129_v2 = vpop.xlane.xlu0 %5614 }
0x1bfd   :  { %vm5630_vm13 = vcmp.eq.f32.partialorder %v11043_v31, %v11127_v44  ;;  %vm5616_vm14 = vcmp.eq.f32.partialorder %v11045_v9, %v11129_v2  ;;  %v5467_v9 = vcvt.f32.s32 %v11066_v27 }
0x1bfe   :  { %v5631_v53 = vsel %vm5630_vm13, %v5626_v47, inf  ;;  %v5617_v5 = vsel %vm5616_vm14, %v5612_v30, inf  ;;  %v5523_v47 = vcvt.f32.s32 %v11085_v18  ;;  %v5509_v30 = vcvt.f32.s32 %v11091_v29 }
0x1bff   :  { %5632 = vmin.xlane.f32.xlu1 %v5631_v53  ;;  %5618 = vmin.xlane.f32.xlu0 %v5617_v5  ;;  %v5468_v48 = vshll.u32 %v5467_v9, 16  ;;  %v5551_v53 = vcvt.f32.s32 %v11095_v52 }
0x1c00   :  { %v11135_v11 = vpop.xlane.xlu1 %5656  ;;  %v11137_v26 = vpop.xlane.xlu0 %5642 }
0x1c01   :  { %vm5658_vm15 = vcmp.eq.f32.partialorder %v11057_v1, %v11135_v11  ;;  %vm5644_vm0 = vcmp.eq.f32.partialorder %v11059_v22, %v11137_v26  ;;  %v5481_v22 = vcvt.f32.s32 %v11081_v12  ;;  %v5552_v45 = vshll.u32 %v5551_v53, 16 }
0x1c02   :  { %v5659_v31 = vsel %vm5658_vm15, %v5654_v16, inf  ;;  %v5645_v7 = vsel %vm5644_vm0, %v5640_v42, inf }
0x1c03   :  { %5660 = vmin.xlane.f32.xlu1 %v5659_v31  ;;  %5646 = vmin.xlane.f32.xlu0 %v5645_v7  ;;  %v5482_v41 = vshll.u32 %v5481_v22, 16  ;;  %v5524_v31 = vshll.u32 %v5523_v47, 16  ;;  %v5510_v7 = vshll.u32 %v5509_v30, 16  ;;  %v11237_v22 = vld [vmem:[#allocation5_spill] sm:$0xff]  ;;  %v5621_v47 = vcvt.f32.s32 %v11129_v2 }
0x1c6c   :  { %v5465_v15 = vpop.xlane.xlu1 %5464 }
0x1c6d   :  { %v5466_v57 = vcvt.f32.s32 %v5465_v15 }
0x1c6f   :  { %v5469_v54 = vadd.s32 %v5468_v48, %v5466_v57 }
0x1c70   :  { %v5493_v1 = vpop.xlane.xlu1 %5492  ;;  %v5451_v34 = vpop.xlane.xlu0 %5450 }
0x1c71   :  { %vm5667_vm1 = vcmp.eq.s32.totalorder %v6373_v38, %v5469_v54  ;;  %v5494_v37 = vcvt.f32.s32 %v5493_v1  ;;  %v5452_v60 = vcvt.f32.s32 %v5451_v34  ;;  %v5566_v34 = vshll.u32 %v5565_v49, 16 }
0x1c72   :  { %v5683_v27 = vsel %vm5667_vm1, -inf, %v10845_v39 }
0x1c73   :  { %vm5699_vm2 = vcmp.eq.f32.partialorder %v5683_v27, -inf  ;;  %v5497_v43 = vadd.s32 %v5496_v0, %v5494_v37  ;;  %v5455_v4 = vadd.s32 %v5454_v46, %v5452_v60  ;;  %v5607_v60 = vcvt.f32.s32 %v11117_v21  ;;  %v11238_v21 = vld [vmem:[#allocation7_spill] sm:$0xff] }
0x1c74   :  { %v5715_v17 = vsel %vm5699_vm2, %v6325_v55, 0.0  ;;  %v5479_v12 = vpop.xlane.xlu0 %5478  ;;  %v5537_v55 = vcvt.f32.s32 %v11097_v56 }
0x1c75   :  { %5731 = vst [vmem:[#allocation2 + $0x8] sm:$0xff] %v5715_v17  ;;  %vm5669_vm3 = vcmp.eq.s32.totalorder %v6373_v38, %v5497_v43  ;;  %vm5666_vm4 = vcmp.eq.s32.totalorder %v6373_v38, %v5455_v4  ;;  %v5480_v51 = vcvt.f32.s32 %v5479_v12  ;;  %v11239_v12 = vld [vmem:[#allocation6_spill] sm:$0xff] }
0x1c76   :  { %v5685_v35 = vsel %vm5669_vm3, -inf, %v10853_v20  ;;  %v5682_v39 = vsel %vm5666_vm4, -inf, %v10856_v40  ;;  %v5538_v56 = vshll.u32 %v5537_v55, 16 }
0x1c77   :  { %vm5701_vm5 = vcmp.eq.f32.partialorder %v5685_v35, -inf  ;;  %vm5698_vm6 = vcmp.eq.f32.partialorder %v5682_v39, -inf  ;;  %v5483_v16 = vadd.s32 %v5482_v41, %v5480_v51  ;;  %v5635_v41 = vcvt.f32.s32 %v11127_v44 }
0x1c78   :  { %v5717_v18 = vsel %vm5701_vm5, %v6330_v63, 0.0  ;;  %v5714_v5 = vsel %vm5698_vm6, %v6328_v62, 0.0  ;;  %v5521_v42 = vpop.xlane.xlu1 %5520  ;;  %v5507_v20 = vpop.xlane.xlu0 %5506  ;;  %v5579_v62 = vcvt.f32.s32 %v11107_v25  ;;  %v5608_v51 = vshll.u32 %v5607_v60, 16 }
0x1c79   :  { %5733 = vst [vmem:[#allocation2 + $0x18] sm:$0xff] %v5717_v18  ;;  %5730 = vst [vmem:[#allocation2] sm:$0xff] %v5714_v5  ;;  %v5522_v29 = vcvt.f32.s32 %v5521_v42  ;;  %vm5668_vm7 = vcmp.eq.s32.totalorder %v6373_v38, %v5483_v16  ;;  %v5508_v40 = vcvt.f32.s32 %v5507_v20  ;;  %v5636_v55 = vshll.u32 %v5635_v41, 16 }
0x1c7a   :  { %v5684_v52 = vsel %vm5668_vm7, -inf, %v10864_v23  ;;  %v5622_v18 = vshll.u32 %v5621_v47, 16  ;;  %v5649_v20 = vcvt.f32.s32 %v11137_v26 }
0x1c7b   :  { %v5525_v9 = vadd.s32 %v5524_v31, %v5522_v29  ;;  %vm5700_vm8 = vcmp.eq.f32.partialorder %v5684_v52, -inf  ;;  %v5511_v63 = vadd.s32 %v5510_v7, %v5508_v40  ;;  %v5663_v29 = vcvt.f32.s32 %v11135_v11  ;;  %v11240_v7 = vld [vmem:[#allocation9_spill] sm:$0xff]  ;;  %v11241_v52 = vld [vmem:[#allocation8_spill] sm:$0xff] }
0x1c7c   :  { %v5716_v15 = vsel %vm5700_vm8, %v6334_v6, 0.0  ;;  %v5549_v48 = vpop.xlane.xlu1 %5548  ;;  %v5535_v57 = vpop.xlane.xlu0 %5534  ;;  %v5580_v6 = vshll.u32 %v5579_v62, 16 }
0x1c7d   :  { %vm5671_vm9 = vcmp.eq.s32.totalorder %v6373_v38, %v5525_v9  ;;  %5732 = vst [vmem:[#allocation2 + $0x10] sm:$0xff] %v5716_v15  ;;  %vm5670_vm10 = vcmp.eq.s32.totalorder %v6373_v38, %v5511_v63  ;;  %v5550_v23 = vcvt.f32.s32 %v5549_v48  ;;  %v5536_v0 = vcvt.f32.s32 %v5535_v57  ;;  %v11242_v48 = vld [vmem:[#allocation11_spill] sm:$0xff] }
0x1c7e   :  { %v5687_v54 = vsel %vm5671_vm9, -inf, %v10871_v58  ;;  %v5686_v46 = vsel %vm5670_vm10, -inf, %v10876_v8  ;;  %v5593_v58 = vcvt.f32.s32 %v11119_v61  ;;  %v5664_v49 = vshll.u32 %v5663_v29, 16 }
0x1c7f   :  { %vm5703_vm11 = vcmp.eq.f32.partialorder %v5687_v54, -inf  ;;  %vm5702_vm12 = vcmp.eq.f32.partialorder %v5686_v46, -inf  ;;  %v5553_v59 = vadd.s32 %v5552_v45, %v5550_v23  ;;  %v5539_v1 = vadd.s32 %v5538_v56, %v5536_v0  ;;  %v11243_v54 = vld [vmem:[#allocation10_spill] sm:$0xff] }
0x1c80   :  { %v5719_v25 = vsel %vm5703_vm11, %v6339_v14, 0.0  ;;  %v5718_v37 = vsel %vm5702_vm12, %v11237_v22, 0.0  ;;  %v5577_v8 = vpop.xlane.xlu1 %5576  ;;  %v5563_v27 = vpop.xlane.xlu0 %5562  ;;  %v5594_v53 = vshll.u32 %v5593_v58, 16  ;;  %v5650_v15 = vshll.u32 %v5649_v20, 16  ;;  %v11246_v58 = vld [vmem:[#allocation15_spill] sm:$0xff] }
0x1c81   :  { %5735 = vst [vmem:[#allocation2 + $0x28] sm:$0xff] %v5719_v25  ;;  %5734 = vst [vmem:[#allocation2 + $0x20] sm:$0xff] %v5718_v37  ;;  %vm5673_vm13 = vcmp.eq.s32.totalorder %v6373_v38, %v5553_v59  ;;  %vm5672_vm14 = vcmp.eq.s32.totalorder %v6373_v38, %v5539_v1  ;;  %v5578_v4 = vcvt.f32.s32 %v5577_v8  ;;  %v5564_v17 = vcvt.f32.s32 %v5563_v27  ;;  %v11245_v37 = vld [vmem:[#allocation12_spill] sm:$0xff]  ;;  %v11247_v27 = vld [vmem:[#allocation14_spill] sm:$0xff] }
0x1c82   :  { %v5689_v14 = vsel %vm5673_vm13, -inf, %v10884_v3  ;;  %v5688_v43 = vsel %vm5672_vm14, -inf, %v10887_v32 }
0x1c83   :  { %vm5705_vm15 = vcmp.eq.f32.partialorder %v5689_v14, -inf  ;;  %vm5704_vm0 = vcmp.eq.f32.partialorder %v5688_v43, -inf  ;;  %v5581_v35 = vadd.s32 %v5580_v6, %v5578_v4  ;;  %v5567_v39 = vadd.s32 %v5566_v34, %v5564_v17  ;;  %v11244_v34 = vld [vmem:[#allocation13_spill] sm:$0xff] }
0x1c84   :  { %v5721_v61 = vsel %vm5705_vm15, %v11238_v21, 0.0  ;;  %v5720_v30 = vsel %vm5704_vm0, %v11239_v12, 0.0  ;;  %v5605_v3 = vpop.xlane.xlu1 %5604  ;;  %v5591_v32 = vpop.xlane.xlu0 %5590 }
0x1c85   :  { %5737 = vst [vmem:[#allocation2 + $0x38] sm:$0xff] %v5721_v61  ;;  %5736 = vst [vmem:[#allocation2 + $0x30] sm:$0xff] %v5720_v30  ;;  %vm5675_vm1 = vcmp.eq.s32.totalorder %v6373_v38, %v5581_v35  ;;  %vm5674_vm2 = vcmp.eq.s32.totalorder %v6373_v38, %v5567_v39  ;;  %v5606_v44 = vcvt.f32.s32 %v5605_v3  ;;  %v5592_v2 = vcvt.f32.s32 %v5591_v32 }
0x1c86   :  { %v5691_v5 = vsel %vm5675_vm1, -inf, %v10896_v28  ;;  %v5690_v16 = vsel %vm5674_vm2, -inf, %v10899_v33 }
0x1c87   :  { %vm5707_vm3 = vcmp.eq.f32.partialorder %v5691_v5, -inf  ;;  %vm5706_vm4 = vcmp.eq.f32.partialorder %v5690_v16, -inf  ;;  %v5609_v42 = vadd.s32 %v5608_v51, %v5606_v44  ;;  %v5595_v31 = vadd.s32 %v5594_v53, %v5592_v2 }
0x1c88   :  { %v5723_v40 = vsel %vm5707_vm3, %v11240_v7, 0.0  ;;  %v5722_v9 = vsel %vm5706_vm4, %v11241_v52, 0.0  ;;  %v5633_v45 = vpop.xlane.xlu1 %5632  ;;  %v5619_v56 = vpop.xlane.xlu0 %5618 }
0x1c89   :  { %5739 = vst [vmem:[#allocation2 + $0x48] sm:$0xff] %v5723_v40  ;;  %5738 = vst [vmem:[#allocation2 + $0x40] sm:$0xff] %v5722_v9  ;;  %vm5677_vm5 = vcmp.eq.s32.totalorder %v6373_v38, %v5609_v42  ;;  %vm5676_vm6 = vcmp.eq.s32.totalorder %v6373_v38, %v5595_v31  ;;  %v5634_v28 = vcvt.f32.s32 %v5633_v45  ;;  %v5620_v33 = vcvt.f32.s32 %v5619_v56 }
0x1c8a   :  { %v5693_v63 = vsel %vm5677_vm5, -inf, %v10908_v50  ;;  %v5692_v11 = vsel %vm5676_vm6, -inf, %v10911_v36 }
0x1c8b   :  { %vm5709_vm7 = vcmp.eq.f32.partialorder %v5693_v63, -inf  ;;  %vm5708_vm8 = vcmp.eq.f32.partialorder %v5692_v11, -inf  ;;  %v5637_v26 = vadd.s32 %v5636_v55, %v5634_v28  ;;  %v5623_v62 = vadd.s32 %v5622_v18, %v5620_v33 }
0x1c8c   :  { %v5725_v57 = vsel %vm5709_vm7, %v11242_v48, 0.0  ;;  %v5724_v23 = vsel %vm5708_vm8, %v11243_v54, 0.0  ;;  %v5661_v0 = vpop.xlane.xlu1 %5660  ;;  %v5647_v46 = vpop.xlane.xlu0 %5646 }
0x1c8d   :  { %5741 = vst [vmem:[#allocation2 + $0x58] sm:$0xff] %v5725_v57  ;;  %5740 = vst [vmem:[#allocation2 + $0x50] sm:$0xff] %v5724_v23  ;;  %vm5679_vm9 = vcmp.eq.s32.totalorder %v6373_v38, %v5637_v26  ;;  %vm5678_vm10 = vcmp.eq.s32.totalorder %v6373_v38, %v5623_v62  ;;  %v5662_v50 = vcvt.f32.s32 %v5661_v0  ;;  %v5648_v36 = vcvt.f32.s32 %v5647_v46 }
0x1c8e   :  { %v5695_v25 = vsel %vm5679_vm9, -inf, %v10918_v24  ;;  %v5694_v59 = vsel %vm5678_vm10, -inf, %v10921_v19 }
0x1c8f   :  { %vm5711_vm11 = vcmp.eq.f32.partialorder %v5695_v25, -inf  ;;  %vm5710_vm12 = vcmp.eq.f32.partialorder %v5694_v59, -inf  ;;  %v5665_v1 = vadd.s32 %v5664_v49, %v5662_v50  ;;  %v5651_v6 = vadd.s32 %v5650_v15, %v5648_v36 }
0x1c90   :  { %v5727_v22 = vsel %vm5711_vm11, %v11244_v34, 0.0  ;;  %v5726_v60 = vsel %vm5710_vm12, %v11245_v37, 0.0 }
0x1c91   :  { %5743 = vst [vmem:[#allocation2 + $0x68] sm:$0xff] %v5727_v22  ;;  %5742 = vst [vmem:[#allocation2 + $0x60] sm:$0xff] %v5726_v60  ;;  %vm5681_vm13 = vcmp.eq.s32.totalorder %v6373_v38, %v5665_v1  ;;  %vm5680_vm14 = vcmp.eq.s32.totalorder %v6373_v38, %v5651_v6 }
0x1c92   :  { %v5697_v24 = vsel %vm5681_vm13, -inf, %v10928_v13  ;;  %v5696_v19 = vsel %vm5680_vm14, -inf, %v10931_v10 }
0x1c93   :  { %vm5713_vm15 = vcmp.eq.f32.partialorder %v5697_v24, -inf  ;;  %vm5712_vm0 = vcmp.eq.f32.partialorder %v5696_v19, -inf }
0x1c94   :  { %v5729_v8 = vsel %vm5713_vm15, %v11246_v58, 0.0  ;;  %v5728_v14 = vsel %vm5712_vm0, %v11247_v27, 0.0 }
0x1c95   :  { %5745 = vst [vmem:[#allocation2 + $0x78] sm:$0xff] %v5729_v8  ;;  %5744 = vst [vmem:[#allocation2 + $0x70] sm:$0xff] %v5728_v14 }
0x1c96   :  { %6061 = shalt.err (!%p6058_p4)
}
0x1c97   :  { %s6073_s8 = smov 128   ;;  %s6074_s9 = smov 8  }
0x1c98   :  { %5757 = dma.vmem_to_hbm [thread:$0]  %s5752_s3, 2048, %s11214_s4, [#allocation3], %s6073_s8, %s6073_s8, %s6074_s9  }
0x1c99   :  { %6070 = dma.done.wait [#allocation3], 2048  }
0x1c9a   :  { %6071 = vsyncadd [#allocation3], 4294965248 }
0x1c9b   :  { %5761 = vsyncpa [#allocation3], 1 }

</bundles_post_ra>
